<compile_context>
chip_gen: v6e
topology: v6e:2x2x1
jax: 0.10.0
libtpu: 0.0.40
codegen_flags: <defaults>
</compile_context>

<pallas_src>
import functools
import numpy as np

import jax
import jax.numpy as jnp
from jax.experimental import pallas as pl
from jax.experimental.pallas import tpu as pltpu

# ----------------------------- configuration --------------------------------
BATCH = 2
SEQ = 8              # BERT token sequence length
HIDDEN = 32          # args['hidden_size'] (768 in the real model)
NUM_LABELS = 3
CLS_PAD = 128        # lane-dense padded width for the classifier output

VOCAB = 50
MAX_POS = 64
BERT_HEADS = 4
BERT_HEAD_DIM = HIDDEN // BERT_HEADS
BERT_FFN = 64

SLF_HEADS = 8        # MultiHeadAttention(8, hidden, 64, 64)
SLF_DK = 64
SLF_DV = 64

FS = 16              # GAT input feature size
GAT_HEADS = 8        # GATv2Conv(num_heads=8)
GAT_OUT = HIDDEN     # out_feats (768 == hidden in the real model)
N_NODES = 6

SEQ_CAT = SEQ + GAT_HEADS   # length after concatenating the GAT embeddings


# ------------------------------ fused Pallas kernel ---------------------------
def _fused_kernel(
    # inputs
    x_emb_ref, mask_ref,
    feats_ref, adj_ref,
    gw_src_ref, gb_src_ref, gw_dst_ref, gb_dst_ref,
    gattn_ref, gres_w_ref, gbias_ref,
    eln_g_ref, eln_b_ref,
    wqkv_ref, bqkv_ref, wo_ref, bo_ref, ln1_g_ref, ln1_b_ref,
    w1_ref, b1_ref, w2_ref, b2_ref, ln2_g_ref, ln2_b_ref,
    pos_ref, blg_ref, blb_ref,
    swqkv_ref, sfc_ref, sln_g_ref, sln_b_ref,
    cls_w_ref, cls_b_ref,
    # output
    out_ref,
    # scratch
    embs,
    *, ids, batch, seq):
  f32 = jnp.float32
  bf = jnp.bfloat16

  def ln(x, g, b, eps):
    mu = jnp.mean(x, axis=-1, keepdims=True)
    var = jnp.mean(jnp.square(x - mu), axis=-1, keepdims=True)
    return (x - mu) * jax.lax.rsqrt(var + eps) * g + b

  def mm(a, b):
    # MXU matmul: bf16 operands, f32 accumulation.
    return jnp.dot(a.astype(bf), b.astype(bf), preferred_element_type=f32)

  def mm_nt(a, b):
    # a [M, D] @ b [N, D]^T without an explicit transpose.
    return jax.lax.dot_general(a.astype(bf), b.astype(bf),
                               (((1,), (1,)), ((), ())),
                               preferred_element_type=f32)

  def softmax_rows(s):
    s = s - jnp.max(s, axis=-1, keepdims=True)
    p = jnp.exp(s)
    return p * pl.reciprocal(jnp.sum(p, axis=-1, keepdims=True), approx=True)

  # ----------------- Stage 1: GATv2 over the dense graph ---------------------
  feats = feats_ref[...]                                   # [N, FS]
  adj_pos = adj_ref[...] > 0.0                             # [N, N] (adj[dst, src])
  feat_src = mm(feats, gw_src_ref[...]) + gb_src_ref[...]  # [N, HG*F]
  feat_dst = mm(feats, gw_dst_ref[...]) + gb_dst_ref[...]  # [N, HG*F]
  res = mm(feats, gres_w_ref[...])                         # residual projection
  gbias = gbias_ref[...]                                   # [1, HG*F]

  for h in range(GAT_HEADS):
    c0, c1 = h * GAT_OUT, (h + 1) * GAT_OUT
    el = feat_src[:, c0:c1]                                # [N, F] source messages
    er = feat_dst[:, c0:c1]                                # [N, F]
    a = gattn_ref[h:h + 1, :]                              # [1, F]
    m = er[:, None, :] + el[None, :, :]                    # [dst, src, F]
    m = jnp.where(m > 0.0, m, 0.2 * m)                     # LeakyReLU(0.2)
    # TODO(synk): at F=768 (real model) move this VPU reduce onto the MXU
    # ((N*N, F) @ a^T); negligible at F=32.
    e = jnp.sum(m * a[None, :, :], axis=-1)                # [dst, src]
    e = jnp.where(adj_pos, e, -1e30)
    p = jnp.exp(e - jnp.max(e, axis=-1, keepdims=True))
    p = p * adj_pos.astype(f32)
    denom = jnp.maximum(jnp.sum(p, axis=-1, keepdims=True), 1e-9)
    alpha = p * pl.reciprocal(denom, approx=True)
    out_h = mm(alpha, el)                                  # [N, F]
    # index_select (static ids) -> write the GAT "tokens" straight into the
    # concatenated-sequence scratch.
    for b, node in enumerate(ids):
      row = (out_h[node:node + 1, :]
             + res[node:node + 1, c0:c1]
             + gbias[:, c0:c1])                            # [1, F]
      embs[b, seq + h:seq + h + 1, :] = row

  # ----------------- Stage 2..5: per-batch BERT + concat + slf-attn + head ----
  scale_b = 1.0 / float(np.sqrt(BERT_HEAD_DIM))
  scale_s = 1.0 / float(np.sqrt(SLF_DK))
  wo = wo_ref[...]
  sfc = sfc_ref[...]

  for b in range(batch):
    # ---- BERT embedding LayerNorm ----
    x = ln(x_emb_ref[b], eln_g_ref[...], eln_b_ref[...], 1e-12)      # [S, H]
    key_bias = (1.0 - mask_ref[b:b + 1, :]) * (-1e9)                 # [1, S]

    # ---- BERT self-attention (fused QKV projection) ----
    qkv = mm(x, wqkv_ref[...]) + bqkv_ref[...]                       # [S, 3H]
    acc = jnp.zeros((seq, HIDDEN), f32)
    for h in range(BERT_HEADS):
      q = qkv[:, h * BERT_HEAD_DIM:(h + 1) * BERT_HEAD_DIM]
      k = qkv[:, HIDDEN + h * BERT_HEAD_DIM:HIDDEN + (h + 1) * BERT_HEAD_DIM]
      v = qkv[:, 2 * HIDDEN + h * BERT_HEAD_DIM:
              2 * HIDDEN + (h + 1) * BERT_HEAD_DIM]
      s = mm_nt(q, k) * scale_b + key_bias                           # [S, S]
      pah = softmax_rows(s)
      ctx = mm(pah, v)                                               # [S, Dh]
      # output projection folded per head: sum_h ctx_h @ Wo_h
      acc = acc + mm(ctx, wo[h * BERT_HEAD_DIM:(h + 1) * BERT_HEAD_DIM, :])
    x = ln(x + acc + bo_ref[...], ln1_g_ref[...], ln1_b_ref[...], 1e-12)

    # ---- BERT FFN ----
    ff = jax.nn.gelu(mm(x, w1_ref[...]) + b1_ref[...])
    ff = mm(ff, w2_ref[...]) + b2_ref[...]
    x = ln(x + ff, ln2_g_ref[...], ln2_b_ref[...], 1e-12)
    embs[b, 0:seq, :] = x                                            # BERT tokens

    # ---- concat (via scratch) + positional encoding + LayerNorm(1e-6) ----
    cat = ln(embs[b] + pos_ref[...], blg_ref[...], blb_ref[...], 1e-6)   # [Sc, H]

    # ---- slf MultiHeadAttention(8, hidden, 64, 64): residual + post-LN ----
    qkv_s = mm(cat, swqkv_ref[...])                                  # [Sc, 1536]
    ko = SLF_HEADS * SLF_DK
    vo = 2 * SLF_HEADS * SLF_DK
    acc_s = jnp.zeros((SEQ_CAT, HIDDEN), f32)
    for h in range(SLF_HEADS):
      q = qkv_s[:, h * SLF_DK:(h + 1) * SLF_DK]
      k = qkv_s[:, ko + h * SLF_DK:ko + (h + 1) * SLF_DK]
      v = qkv_s[:, vo + h * SLF_DV:vo + (h + 1) * SLF_DV]
      s = mm_nt(q, k) * scale_s                                      # [Sc, Sc]
      pah = softmax_rows(s)
      ctx = mm(pah, v)                                               # [Sc, Dv]
      acc_s = acc_s + mm(ctx, sfc[h * SLF_DV:(h + 1) * SLF_DV, :])
    y = ln(acc_s + cat, sln_g_ref[...], sln_b_ref[...], 1e-6)        # [Sc, H]

    # ---- sum over sequence -> (dropout=eval) -> relu -> classifier ----
    hsum = jnp.maximum(jnp.sum(y, axis=0, keepdims=True), 0.0)       # [1, H]
    out_ref[b:b + 1, :] = mm(hsum, cls_w_ref[...]) + cls_b_ref[...]  # [1, 128]


# ------------------------------ parameter init --------------------------------
def _xavier(key, fan_in, fan_out):
  # nn.init.xavier_normal_ with gain = calculate_gain('sigmoid') == 1.0
  std = float(np.sqrt(2.0 / (fan_in + fan_out)))
  return std * jax.random.normal(key, (fan_in, fan_out), jnp.float32)


def sinusoid_table(n_position, d_hid):
  pos = np.arange(n_position)[:, None].astype(np.float64)
  i = np.arange(d_hid)[None, :]
  angle = pos / np.power(10000.0, 2 * (i // 2) / d_hid)
  table = np.zeros((n_position, d_hid), np.float32)
  table[:, 0::2] = np.sin(angle[:, 0::2])
  table[:, 1::2] = np.cos(angle[:, 1::2])
  return jnp.asarray(table)


def init_params(key):
  keys = iter(jax.random.split(key, 64))
  nk = lambda: next(keys)
  p = {}
  # GATv2Conv(fs, 768->HIDDEN, heads=8, residual=True)
  p["gat"] = dict(
      fc_src_w=_xavier(nk(), FS, GAT_HEADS * GAT_OUT),
      fc_src_b=jnp.zeros((GAT_HEADS * GAT_OUT,), jnp.float32),
      fc_dst_w=_xavier(nk(), FS, GAT_HEADS * GAT_OUT),
      fc_dst_b=jnp.zeros((GAT_HEADS * GAT_OUT,), jnp.float32),
      attn=_xavier(nk(), GAT_HEADS, GAT_OUT),
      res_w=_xavier(nk(), FS, GAT_HEADS * GAT_OUT),  # residual proj (no bias)
      bias=jnp.zeros((GAT_HEADS * GAT_OUT,), jnp.float32),
  )
  # mini BERT (1 layer)
  layer = dict(
      wq=_xavier(nk(), HIDDEN, HIDDEN), bq=jnp.zeros((HIDDEN,), jnp.float32),
      wk=_xavier(nk(), HIDDEN, HIDDEN), bk=jnp.zeros((HIDDEN,), jnp.float32),
      wv=_xavier(nk(), HIDDEN, HIDDEN), bv=jnp.zeros((HIDDEN,), jnp.float32),
      wo=_xavier(nk(), HIDDEN, HIDDEN), bo=jnp.zeros((HIDDEN,), jnp.float32),
      ln1_g=jnp.ones((HIDDEN,), jnp.float32), ln1_b=jnp.zeros((HIDDEN,), jnp.float32),
      w1=_xavier(nk(), HIDDEN, BERT_FFN), b1=jnp.zeros((BERT_FFN,), jnp.float32),
      w2=_xavier(nk(), BERT_FFN, HIDDEN), b2=jnp.zeros((HIDDEN,), jnp.float32),
      ln2_g=jnp.ones((HIDDEN,), jnp.float32), ln2_b=jnp.zeros((HIDDEN,), jnp.float32),
  )
  p["bert"] = dict(
      word_emb=0.02 * jax.random.normal(nk(), (VOCAB, HIDDEN), jnp.float32),
      pos_emb=0.02 * jax.random.normal(nk(), (MAX_POS, HIDDEN), jnp.float32),
      type_emb=0.02 * jax.random.normal(nk(), (2, HIDDEN), jnp.float32),
      emb_ln_g=jnp.ones((HIDDEN,), jnp.float32),
      emb_ln_b=jnp.zeros((HIDDEN,), jnp.float32),
      layers=[layer],
  )
  # MultiHeadAttention(8, hidden, 64, 64)
  p["slf_attn"] = dict(
      w_qs=_xavier(nk(), HIDDEN, SLF_HEADS * SLF_DK),
      w_ks=_xavier(nk(), HIDDEN, SLF_HEADS * SLF_DK),
      w_vs=_xavier(nk(), HIDDEN, SLF_HEADS * SLF_DV),
      fc=_xavier(nk(), SLF_HEADS * SLF_DV, HIDDEN),
      ln_g=jnp.ones((HIDDEN,), jnp.float32),
      ln_b=jnp.zeros((HIDDEN,), jnp.float32),
  )
  p["bl_ln_g"] = jnp.ones((HIDDEN,), jnp.float32)
  p["bl_ln_b"] = jnp.zeros((HIDDEN,), jnp.float32)
  p["cls_w"] = _xavier(nk(), HIDDEN, NUM_LABELS)
  p["cls_b"] = jnp.zeros((NUM_LABELS,), jnp.float32)
  p["pos_table"] = sinusoid_table(112, HIDDEN)   # PositionalEncoding(n_position=112)
  return p


# ------------------------------- forward wrapper ------------------------------
def jointv2_forward(params, inputs, lens, mask, labels, adj, features, url):
  del lens, labels   # not used in forward (matches reference)
  p = params
  pb = p["bert"]
  lyr = pb["layers"][0]
  ps = p["slf_attn"]
  g = p["gat"]
  B, S = inputs.shape

  # TODO(synk): embedding gather kept in plain JAX (data-dependent gather is not
  # the hot path); everything downstream is fused into a single Pallas kernel.
  x_emb = (jnp.take(pb["word_emb"], inputs, axis=0)
           + pb["pos_emb"][:S][None, :, :]
           + pb["type_emb"][0][None, None, :]).astype(jnp.float32)

  Sc = S + GAT_HEADS
  n = Sc - 7                                   # self.position(size(1) - 7)
  # TODO(synk): PositionalEncoding reference impl not provided; the length-(Sc-7)
  # sinusoid table is zero-padded to the concatenated length before the add.
  pos = jnp.zeros((Sc, HIDDEN), jnp.float32).at[:n].set(p["pos_table"][:n])

  # fused QKV weights (lane-dense: 3H and 8*(64+64+64)=1536 wide)
  wqkv = jnp.concatenate([lyr["wq"], lyr["wk"], lyr["wv"]], axis=1)
  bqkv = jnp.concatenate([lyr["bq"], lyr["bk"], lyr["bv"]], axis=0).reshape(1, 3 * HIDDEN)
  swqkv = jnp.concatenate([ps["w_qs"], ps["w_ks"], ps["w_vs"]], axis=1)

  # lane-dense padded classifier weights (output written as [B, 128], sliced below)
  cls_w_pad = jnp.zeros((HIDDEN, CLS_PAD), jnp.float32).at[:, :NUM_LABELS].set(p["cls_w"])
  cls_b_pad = jnp.zeros((1, CLS_PAD), jnp.float32).at[0, :NUM_LABELS].set(p["cls_b"])

  ids = tuple(int(i) - 1 for i in url)          # static index_select ids

  args = (
      x_emb, mask.astype(jnp.float32),
      features.astype(jnp.float32), adj.astype(jnp.float32),
      g["fc_src_w"], g["fc_src_b"].reshape(1, -1),
      g["fc_dst_w"], g["fc_dst_b"].reshape(1, -1),
      g["attn"], g["res_w"], g["bias"].reshape(1, -1),
      pb["emb_ln_g"].reshape(1, -1), pb["emb_ln_b"].reshape(1, -1),
      wqkv, bqkv, lyr["wo"], lyr["bo"].reshape(1, -1),
      lyr["ln1_g"].reshape(1, -1), lyr["ln1_b"].reshape(1, -1),
      lyr["w1"], lyr["b1"].reshape(1, -1),
      lyr["w2"], lyr["b2"].reshape(1, -1),
      lyr["ln2_g"].reshape(1, -1), lyr["ln2_b"].reshape(1, -1),
      pos, p["bl_ln_g"].reshape(1, -1), p["bl_ln_b"].reshape(1, -1),
      swqkv, ps["fc"], ps["ln_g"].reshape(1, -1), ps["ln_b"].reshape(1, -1),
      cls_w_pad, cls_b_pad,
  )

  out = pl.pallas_call(
      functools.partial(_fused_kernel, ids=ids, batch=B, seq=S),
      out_shape=jax.ShapeDtypeStruct((B, CLS_PAD), jnp.float32),
      scratch_shapes=[pltpu.VMEM((B, Sc, HIDDEN), jnp.float32)],
  )(*args)
  return out[:, :NUM_LABELS]


# ------------------------------------ main ------------------------------------
if __name__ == "__main__":
  key = jax.random.PRNGKey(0)
  pkey, ikey, fkey = jax.random.split(key, 3)
  params = init_params(pkey)

  inputs = jax.random.randint(ikey, (BATCH, SEQ), 0, VOCAB, dtype=jnp.int32)
  mask = jnp.array([[1.0] * SEQ,
                    [1.0] * (SEQ - 2) + [0.0] * 2], dtype=jnp.float32)
  lens = jnp.array([SEQ, SEQ - 2], dtype=jnp.int32)       # unused in forward
  labels = jnp.zeros((BATCH,), dtype=jnp.int32)           # unused in forward
  features = jax.random.normal(fkey, (N_NODES, FS), dtype=jnp.float32)

  # small directed graph with self-loops; adj[dst, src] = 1 (replaces DGL graph)
  adj_np = np.eye(N_NODES, dtype=np.float32)
  src = [0, 1, 2, 3, 4, 5, 0, 2]
  dst = [1, 2, 3, 4, 5, 0, 3, 5]
  adj_np[dst, src] = 1.0
  adj = jnp.asarray(adj_np)

  url = [3, 5]                                            # 1-indexed node ids

  logits = jointv2_forward(params, inputs, lens, mask, labels, adj, features, url)
  logits = jax.block_until_ready(logits)
  assert logits.shape == (BATCH, NUM_LABELS) and logits.dtype == jnp.float32
  assert bool(jnp.all(jnp.isfinite(logits)))
  print("KERNEL_OK")
</pallas_src>

<mosaic_0001>
module attributes {stable_mosaic.version = 11 : i64} {
  func.func @_fused_kernel(%arg0: memref<2x8x32xf32, #tpu.memory_space<vmem>>, %arg1: memref<2x8xf32, #tpu.memory_space<vmem>>, %arg2: memref<6x16xf32, #tpu.memory_space<vmem>>, %arg3: memref<6x6xf32, #tpu.memory_space<vmem>>, %arg4: memref<16x256xf32, #tpu.memory_space<vmem>>, %arg5: memref<1x256xf32, #tpu.memory_space<vmem>>, %arg6: memref<16x256xf32, #tpu.memory_space<vmem>>, %arg7: memref<1x256xf32, #tpu.memory_space<vmem>>, %arg8: memref<8x32xf32, #tpu.memory_space<vmem>>, %arg9: memref<16x256xf32, #tpu.memory_space<vmem>>, %arg10: memref<1x256xf32, #tpu.memory_space<vmem>>, %arg11: memref<1x32xf32, #tpu.memory_space<vmem>>, %arg12: memref<1x32xf32, #tpu.memory_space<vmem>>, %arg13: memref<32x96xf32, #tpu.memory_space<vmem>>, %arg14: memref<1x96xf32, #tpu.memory_space<vmem>>, %arg15: memref<32x32xf32, #tpu.memory_space<vmem>>, %arg16: memref<1x32xf32, #tpu.memory_space<vmem>>, %arg17: memref<1x32xf32, #tpu.memory_space<vmem>>, %arg18: memref<1x32xf32, #tpu.memory_space<vmem>>, %arg19: memref<32x64xf32, #tpu.memory_space<vmem>>, %arg20: memref<1x64xf32, #tpu.memory_space<vmem>>, %arg21: memref<64x32xf32, #tpu.memory_space<vmem>>, %arg22: memref<1x32xf32, #tpu.memory_space<vmem>>, %arg23: memref<1x32xf32, #tpu.memory_space<vmem>>, %arg24: memref<1x32xf32, #tpu.memory_space<vmem>>, %arg25: memref<16x32xf32, #tpu.memory_space<vmem>>, %arg26: memref<1x32xf32, #tpu.memory_space<vmem>>, %arg27: memref<1x32xf32, #tpu.memory_space<vmem>>, %arg28: memref<32x1536xf32, #tpu.memory_space<vmem>>, %arg29: memref<512x32xf32, #tpu.memory_space<vmem>>, %arg30: memref<1x32xf32, #tpu.memory_space<vmem>>, %arg31: memref<1x32xf32, #tpu.memory_space<vmem>>, %arg32: memref<32x128xf32, #tpu.memory_space<vmem>>, %arg33: memref<1x128xf32, #tpu.memory_space<vmem>>, %arg34: memref<2x128xf32, #tpu.memory_space<vmem>>, %arg35: memref<2x16x32xf32, #tpu.memory_space<vmem>>) attributes {dimension_semantics = [], scalar_prefetch = 0 : i64, scratch_operands = 1 : i64, tpu.core_type = #tpu.core_type<tc>} {
    %c0 = arith.constant 0 : index
    %c0_0 = arith.constant 0 : index
    %0 = vector.load %arg2[%c0, %c0_0] : memref<6x16xf32, #tpu.memory_space<vmem>>, vector<6x16xf32>
    %c0_1 = arith.constant 0 : index
    %c0_2 = arith.constant 0 : index
    %1 = vector.load %arg3[%c0_1, %c0_2] : memref<6x6xf32, #tpu.memory_space<vmem>>, vector<6x6xf32>
    %cst = arith.constant 0.000000e+00 : f32
    %2 = vector.broadcast %cst : f32 to vector<6x6xf32>
    %3 = arith.cmpf ogt, %1, %2 : vector<6x6xf32>
    %c0_3 = arith.constant 0 : index
    %c0_4 = arith.constant 0 : index
    %4 = vector.load %arg4[%c0_3, %c0_4] : memref<16x256xf32, #tpu.memory_space<vmem>>, vector<16x256xf32>
    %5 = arith.truncf %0 : vector<6x16xf32> to vector<6x16xbf16>
    %6 = arith.truncf %4 : vector<16x256xf32> to vector<16x256xbf16>
    %cst_5 = arith.constant dense<0.000000e+00> : vector<6x256xf32>
    %7 = tpu.matmul %5, %6, %cst_5 {dimension_numbers = #tpu.dot_dimension_numbers<[1], [0], [0], [1], [0, 0, 1, 1], [], []>} : vector<6x16xbf16>, vector<16x256xbf16>, vector<6x256xf32> -> vector<6x256xf32>
    %c0_6 = arith.constant 0 : index
    %c0_7 = arith.constant 0 : index
    %8 = vector.load %arg5[%c0_6, %c0_7] : memref<1x256xf32, #tpu.memory_space<vmem>>, vector<1x256xf32>
    %9 = vector.broadcast %8 : vector<1x256xf32> to vector<6x256xf32>
    %10 = arith.addf %7, %9 : vector<6x256xf32>
    %c0_8 = arith.constant 0 : index
    %c0_9 = arith.constant 0 : index
    %11 = vector.load %arg6[%c0_8, %c0_9] : memref<16x256xf32, #tpu.memory_space<vmem>>, vector<16x256xf32>
    %12 = arith.truncf %0 : vector<6x16xf32> to vector<6x16xbf16>
    %13 = arith.truncf %11 : vector<16x256xf32> to vector<16x256xbf16>
    %cst_10 = arith.constant dense<0.000000e+00> : vector<6x256xf32>
    %14 = tpu.matmul %12, %13, %cst_10 {dimension_numbers = #tpu.dot_dimension_numbers<[1], [0], [0], [1], [0, 0, 1, 1], [], []>} : vector<6x16xbf16>, vector<16x256xbf16>, vector<6x256xf32> -> vector<6x256xf32>
    %c0_11 = arith.constant 0 : index
    %c0_12 = arith.constant 0 : index
    %15 = vector.load %arg7[%c0_11, %c0_12] : memref<1x256xf32, #tpu.memory_space<vmem>>, vector<1x256xf32>
    %16 = vector.broadcast %15 : vector<1x256xf32> to vector<6x256xf32>
    %17 = arith.addf %14, %16 : vector<6x256xf32>
    %c0_13 = arith.constant 0 : index
    %c0_14 = arith.constant 0 : index
    %18 = vector.load %arg9[%c0_13, %c0_14] : memref<16x256xf32, #tpu.memory_space<vmem>>, vector<16x256xf32>
    %19 = arith.truncf %0 : vector<6x16xf32> to vector<6x16xbf16>
    %20 = arith.truncf %18 : vector<16x256xf32> to vector<16x256xbf16>
    %cst_15 = arith.constant dense<0.000000e+00> : vector<6x256xf32>
    %21 = tpu.matmul %19, %20, %cst_15 {dimension_numbers = #tpu.dot_dimension_numbers<[1], [0], [0], [1], [0, 0, 1, 1], [], []>} : vector<6x16xbf16>, vector<16x256xbf16>, vector<6x256xf32> -> vector<6x256xf32>
    %c0_16 = arith.constant 0 : index
    %c0_17 = arith.constant 0 : index
    %22 = vector.load %arg10[%c0_16, %c0_17] : memref<1x256xf32, #tpu.memory_space<vmem>>, vector<1x256xf32>
    %23 = vector.extract_strided_slice %10 {offsets = [0, 0], sizes = [6, 32], strides = [1, 1]} : vector<6x256xf32> to vector<6x32xf32>
    %24 = vector.extract_strided_slice %17 {offsets = [0, 0], sizes = [6, 32], strides = [1, 1]} : vector<6x256xf32> to vector<6x32xf32>
    %c0_18 = arith.constant 0 : index
    %c0_19 = arith.constant 0 : index
    %25 = vector.load %arg8[%c0_18, %c0_19] : memref<8x32xf32, #tpu.memory_space<vmem>>, vector<1x32xf32>
    %26 = vector.shape_cast %24 : vector<6x32xf32> to vector<6x1x32xf32>
    %27 = vector.shape_cast %23 : vector<6x32xf32> to vector<1x6x32xf32>
    %28 = vector.broadcast %26 : vector<6x1x32xf32> to vector<6x6x32xf32>
    %29 = vector.broadcast %27 : vector<1x6x32xf32> to vector<6x6x32xf32>
    %30 = arith.addf %28, %29 : vector<6x6x32xf32>
    %cst_20 = arith.constant 0.000000e+00 : f32
    %31 = vector.broadcast %cst_20 : f32 to vector<6x6x32xf32>
    %32 = arith.cmpf ogt, %30, %31 : vector<6x6x32xf32>
    %cst_21 = arith.constant 2.000000e-01 : f32
    %33 = vector.broadcast %cst_21 : f32 to vector<6x6x32xf32>
    %34 = arith.mulf %33, %30 : vector<6x6x32xf32>
    %35 = arith.select %32, %30, %34 : vector<6x6x32xi1>, vector<6x6x32xf32>
    %36 = vector.shape_cast %25 : vector<1x32xf32> to vector<1x1x32xf32>
    %37 = vector.broadcast %36 : vector<1x1x32xf32> to vector<6x6x32xf32>
    %38 = arith.mulf %35, %37 : vector<6x6x32xf32>
    %cst_22 = arith.constant dense<0.000000e+00> : vector<6x6xf32>
    %39 = vector.multi_reduction <add>, %38, %cst_22 [2] : vector<6x6x32xf32> to vector<6x6xf32>
    %cst_23 = arith.constant -1.000000e+30 : f32
    %40 = vector.broadcast %cst_23 : f32 to vector<6x6xf32>
    %41 = arith.select %3, %39, %40 : vector<6x6xi1>, vector<6x6xf32>
    %cst_24 = arith.constant dense<0xFF800000> : vector<6xf32>
    %42 = vector.multi_reduction <maximumf>, %41, %cst_24 [1] : vector<6x6xf32> to vector<6xf32>
    %43 = vector.shape_cast %42 : vector<6xf32> to vector<6x1xf32>
    %44 = vector.broadcast %43 : vector<6x1xf32> to vector<6x6xf32>
    %45 = arith.subf %41, %44 : vector<6x6xf32>
    %46 = math.exp %45 : vector<6x6xf32>
    %47 = arith.extui %3 : vector<6x6xi1> to vector<6x6xi32>
    %48 = arith.sitofp %47 : vector<6x6xi32> to vector<6x6xf32>
    %49 = arith.mulf %46, %48 : vector<6x6xf32>
    %cst_25 = arith.constant dense<0.000000e+00> : vector<6xf32>
    %50 = vector.multi_reduction <add>, %49, %cst_25 [1] : vector<6x6xf32> to vector<6xf32>
    %51 = vector.shape_cast %50 : vector<6xf32> to vector<6x1xf32>
    %cst_26 = arith.constant 9.99999971E-10 : f32
    %52 = vector.broadcast %cst_26 : f32 to vector<6x1xf32>
    %53 = arith.maximumf %51, %52 : vector<6x1xf32>
    %54 = tpu.reciprocal %53 {approx = true} : vector<6x1xf32> -> vector<6x1xf32>
    %55 = vector.broadcast %54 : vector<6x1xf32> to vector<6x6xf32>
    %56 = arith.mulf %49, %55 : vector<6x6xf32>
    %57 = arith.truncf %56 : vector<6x6xf32> to vector<6x6xbf16>
    %58 = arith.truncf %23 : vector<6x32xf32> to vector<6x32xbf16>
    %cst_27 = arith.constant dense<0.000000e+00> : vector<6x32xf32>
    %59 = tpu.matmul %57, %58, %cst_27 {dimension_numbers = #tpu.dot_dimension_numbers<[1], [0], [0], [1], [0, 0, 1, 1], [], []>} : vector<6x6xbf16>, vector<6x32xbf16>, vector<6x32xf32> -> vector<6x32xf32>
    %60 = vector.extract_strided_slice %59 {offsets = [2, 0], sizes = [1, 32], strides = [1, 1]} : vector<6x32xf32> to vector<1x32xf32>
    %61 = vector.extract_strided_slice %21 {offsets = [2, 0], sizes = [1, 32], strides = [1, 1]} : vector<6x256xf32> to vector<1x32xf32>
    %62 = arith.addf %60, %61 : vector<1x32xf32>
    %63 = vector.extract_strided_slice %22 {offsets = [0, 0], sizes = [1, 32], strides = [1, 1]} : vector<1x256xf32> to vector<1x32xf32>
    %64 = arith.addf %62, %63 : vector<1x32xf32>
    %c0_28 = arith.constant 0 : index
    %c8 = arith.constant 8 : index
    %c0_29 = arith.constant 0 : index
    %65 = vector.load %arg35[%c0_28, %c8, %c0_29] : memref<2x16x32xf32, #tpu.memory_space<vmem>>, vector<1x1x32xf32>
    %66 = vector.shape_cast %65 : vector<1x1x32xf32> to vector<1x32xf32>
    %67 = vector.shape_cast %64 : vector<1x32xf32> to vector<1x1x32xf32>
    tpu.vector_store %arg35[%c0_28, %c8, %c0_29], %67 {strides = array<i32>} : memref<2x16x32xf32, #tpu.memory_space<vmem>>, vector<1x1x32xf32>,
    %68 = vector.extract_strided_slice %59 {offsets = [4, 0], sizes = [1, 32], strides = [1, 1]} : vector<6x32xf32> to vector<1x32xf32>
    %69 = vector.extract_strided_slice %21 {offsets = [4, 0], sizes = [1, 32], strides = [1, 1]} : vector<6x256xf32> to vector<1x32xf32>
    %70 = arith.addf %68, %69 : vector<1x32xf32>
    %71 = vector.extract_strided_slice %22 {offsets = [0, 0], sizes = [1, 32], strides = [1, 1]} : vector<1x256xf32> to vector<1x32xf32>
    %72 = arith.addf %70, %71 : vector<1x32xf32>
    %c1 = arith.constant 1 : index
    %c8_30 = arith.constant 8 : index
    %c0_31 = arith.constant 0 : index
    %73 = vector.load %arg35[%c1, %c8_30, %c0_31] : memref<2x16x32xf32, #tpu.memory_space<vmem>>, vector<1x1x32xf32>
    %74 = vector.shape_cast %73 : vector<1x1x32xf32> to vector<1x32xf32>
    %75 = vector.shape_cast %72 : vector<1x32xf32> to vector<1x1x32xf32>
    tpu.vector_store %arg35[%c1, %c8_30, %c0_31], %75 {strides = array<i32>} : memref<2x16x32xf32, #tpu.memory_space<vmem>>, vector<1x1x32xf32>,
    %76 = vector.extract_strided_slice %10 {offsets = [0, 32], sizes = [6, 32], strides = [1, 1]} : vector<6x256xf32> to vector<6x32xf32>
    %77 = vector.extract_strided_slice %17 {offsets = [0, 32], sizes = [6, 32], strides = [1, 1]} : vector<6x256xf32> to vector<6x32xf32>
    %c1_32 = arith.constant 1 : index
    %c0_33 = arith.constant 0 : index
    %78 = vector.load %arg8[%c1_32, %c0_33] : memref<8x32xf32, #tpu.memory_space<vmem>>, vector<1x32xf32>
    %79 = vector.shape_cast %77 : vector<6x32xf32> to vector<6x1x32xf32>
    %80 = vector.shape_cast %76 : vector<6x32xf32> to vector<1x6x32xf32>
    %81 = vector.broadcast %79 : vector<6x1x32xf32> to vector<6x6x32xf32>
    %82 = vector.broadcast %80 : vector<1x6x32xf32> to vector<6x6x32xf32>
    %83 = arith.addf %81, %82 : vector<6x6x32xf32>
    %cst_34 = arith.constant 0.000000e+00 : f32
    %84 = vector.broadcast %cst_34 : f32 to vector<6x6x32xf32>
    %85 = arith.cmpf ogt, %83, %84 : vector<6x6x32xf32>
    %cst_35 = arith.constant 2.000000e-01 : f32
    %86 = vector.broadcast %cst_35 : f32 to vector<6x6x32xf32>
    %87 = arith.mulf %86, %83 : vector<6x6x32xf32>
    %88 = arith.select %85, %83, %87 : vector<6x6x32xi1>, vector<6x6x32xf32>
    %89 = vector.shape_cast %78 : vector<1x32xf32> to vector<1x1x32xf32>
    %90 = vector.broadcast %89 : vector<1x1x32xf32> to vector<6x6x32xf32>
    %91 = arith.mulf %88, %90 : vector<6x6x32xf32>
    %cst_36 = arith.constant dense<0.000000e+00> : vector<6x6xf32>
    %92 = vector.multi_reduction <add>, %91, %cst_36 [2] : vector<6x6x32xf32> to vector<6x6xf32>
    %cst_37 = arith.constant -1.000000e+30 : f32
    %93 = vector.broadcast %cst_37 : f32 to vector<6x6xf32>
    %94 = arith.select %3, %92, %93 : vector<6x6xi1>, vector<6x6xf32>
    %cst_38 = arith.constant dense<0xFF800000> : vector<6xf32>
    %95 = vector.multi_reduction <maximumf>, %94, %cst_38 [1] : vector<6x6xf32> to vector<6xf32>
    %96 = vector.shape_cast %95 : vector<6xf32> to vector<6x1xf32>
    %97 = vector.broadcast %96 : vector<6x1xf32> to vector<6x6xf32>
    %98 = arith.subf %94, %97 : vector<6x6xf32>
    %99 = math.exp %98 : vector<6x6xf32>
    %100 = arith.extui %3 : vector<6x6xi1> to vector<6x6xi32>
    %101 = arith.sitofp %100 : vector<6x6xi32> to vector<6x6xf32>
    %102 = arith.mulf %99, %101 : vector<6x6xf32>
    %cst_39 = arith.constant dense<0.000000e+00> : vector<6xf32>
    %103 = vector.multi_reduction <add>, %102, %cst_39 [1] : vector<6x6xf32> to vector<6xf32>
    %104 = vector.shape_cast %103 : vector<6xf32> to vector<6x1xf32>
    %cst_40 = arith.constant 9.99999971E-10 : f32
    %105 = vector.broadcast %cst_40 : f32 to vector<6x1xf32>
    %106 = arith.maximumf %104, %105 : vector<6x1xf32>
    %107 = tpu.reciprocal %106 {approx = true} : vector<6x1xf32> -> vector<6x1xf32>
    %108 = vector.broadcast %107 : vector<6x1xf32> to vector<6x6xf32>
    %109 = arith.mulf %102, %108 : vector<6x6xf32>
    %110 = arith.truncf %109 : vector<6x6xf32> to vector<6x6xbf16>
    %111 = arith.truncf %76 : vector<6x32xf32> to vector<6x32xbf16>
    %cst_41 = arith.constant dense<0.000000e+00> : vector<6x32xf32>
    %112 = tpu.matmul %110, %111, %cst_41 {dimension_numbers = #tpu.dot_dimension_numbers<[1], [0], [0], [1], [0, 0, 1, 1], [], []>} : vector<6x6xbf16>, vector<6x32xbf16>, vector<6x32xf32> -> vector<6x32xf32>
    %113 = vector.extract_strided_slice %112 {offsets = [2, 0], sizes = [1, 32], strides = [1, 1]} : vector<6x32xf32> to vector<1x32xf32>
    %114 = vector.extract_strided_slice %21 {offsets = [2, 32], sizes = [1, 32], strides = [1, 1]} : vector<6x256xf32> to vector<1x32xf32>
    %115 = arith.addf %113, %114 : vector<1x32xf32>
    %116 = vector.extract_strided_slice %22 {offsets = [0, 32], sizes = [1, 32], strides = [1, 1]} : vector<1x256xf32> to vector<1x32xf32>
    %117 = arith.addf %115, %116 : vector<1x32xf32>
    %c0_42 = arith.constant 0 : index
    %c9 = arith.constant 9 : index
    %c0_43 = arith.constant 0 : index
    %118 = vector.load %arg35[%c0_42, %c9, %c0_43] : memref<2x16x32xf32, #tpu.memory_space<vmem>>, vector<1x1x32xf32>
    %119 = vector.shape_cast %118 : vector<1x1x32xf32> to vector<1x32xf32>
    %120 = vector.shape_cast %117 : vector<1x32xf32> to vector<1x1x32xf32>
    tpu.vector_store %arg35[%c0_42, %c9, %c0_43], %120 {strides = array<i32>} : memref<2x16x32xf32, #tpu.memory_space<vmem>>, vector<1x1x32xf32>,
    %121 = vector.extract_strided_slice %112 {offsets = [4, 0], sizes = [1, 32], strides = [1, 1]} : vector<6x32xf32> to vector<1x32xf32>
    %122 = vector.extract_strided_slice %21 {offsets = [4, 32], sizes = [1, 32], strides = [1, 1]} : vector<6x256xf32> to vector<1x32xf32>
    %123 = arith.addf %121, %122 : vector<1x32xf32>
    %124 = vector.extract_strided_slice %22 {offsets = [0, 32], sizes = [1, 32], strides = [1, 1]} : vector<1x256xf32> to vector<1x32xf32>
    %125 = arith.addf %123, %124 : vector<1x32xf32>
    %c1_44 = arith.constant 1 : index
    %c9_45 = arith.constant 9 : index
    %c0_46 = arith.constant 0 : index
    %126 = vector.load %arg35[%c1_44, %c9_45, %c0_46] : memref<2x16x32xf32, #tpu.memory_space<vmem>>, vector<1x1x32xf32>
    %127 = vector.shape_cast %126 : vector<1x1x32xf32> to vector<1x32xf32>
    %128 = vector.shape_cast %125 : vector<1x32xf32> to vector<1x1x32xf32>
    tpu.vector_store %arg35[%c1_44, %c9_45, %c0_46], %128 {strides = array<i32>} : memref<2x16x32xf32, #tpu.memory_space<vmem>>, vector<1x1x32xf32>,
    %129 = vector.extract_strided_slice %10 {offsets = [0, 64], sizes = [6, 32], strides = [1, 1]} : vector<6x256xf32> to vector<6x32xf32>
    %130 = vector.extract_strided_slice %17 {offsets = [0, 64], sizes = [6, 32], strides = [1, 1]} : vector<6x256xf32> to vector<6x32xf32>
    %c2 = arith.constant 2 : index
    %c0_47 = arith.constant 0 : index
    %131 = vector.load %arg8[%c2, %c0_47] : memref<8x32xf32, #tpu.memory_space<vmem>>, vector<1x32xf32>
    %132 = vector.shape_cast %130 : vector<6x32xf32> to vector<6x1x32xf32>
    %133 = vector.shape_cast %129 : vector<6x32xf32> to vector<1x6x32xf32>
    %134 = vector.broadcast %132 : vector<6x1x32xf32> to vector<6x6x32xf32>
    %135 = vector.broadcast %133 : vector<1x6x32xf32> to vector<6x6x32xf32>
    %136 = arith.addf %134, %135 : vector<6x6x32xf32>
    %cst_48 = arith.constant 0.000000e+00 : f32
    %137 = vector.broadcast %cst_48 : f32 to vector<6x6x32xf32>
    %138 = arith.cmpf ogt, %136, %137 : vector<6x6x32xf32>
    %cst_49 = arith.constant 2.000000e-01 : f32
    %139 = vector.broadcast %cst_49 : f32 to vector<6x6x32xf32>
    %140 = arith.mulf %139, %136 : vector<6x6x32xf32>
    %141 = arith.select %138, %136, %140 : vector<6x6x32xi1>, vector<6x6x32xf32>
    %142 = vector.shape_cast %131 : vector<1x32xf32> to vector<1x1x32xf32>
    %143 = vector.broadcast %142 : vector<1x1x32xf32> to vector<6x6x32xf32>
    %144 = arith.mulf %141, %143 : vector<6x6x32xf32>
    %cst_50 = arith.constant dense<0.000000e+00> : vector<6x6xf32>
    %145 = vector.multi_reduction <add>, %144, %cst_50 [2] : vector<6x6x32xf32> to vector<6x6xf32>
    %cst_51 = arith.constant -1.000000e+30 : f32
    %146 = vector.broadcast %cst_51 : f32 to vector<6x6xf32>
    %147 = arith.select %3, %145, %146 : vector<6x6xi1>, vector<6x6xf32>
    %cst_52 = arith.constant dense<0xFF800000> : vector<6xf32>
    %148 = vector.multi_reduction <maximumf>, %147, %cst_52 [1] : vector<6x6xf32> to vector<6xf32>
    %149 = vector.shape_cast %148 : vector<6xf32> to vector<6x1xf32>
    %150 = vector.broadcast %149 : vector<6x1xf32> to vector<6x6xf32>
    %151 = arith.subf %147, %150 : vector<6x6xf32>
    %152 = math.exp %151 : vector<6x6xf32>
    %153 = arith.extui %3 : vector<6x6xi1> to vector<6x6xi32>
    %154 = arith.sitofp %153 : vector<6x6xi32> to vector<6x6xf32>
    %155 = arith.mulf %152, %154 : vector<6x6xf32>
    %cst_53 = arith.constant dense<0.000000e+00> : vector<6xf32>
    %156 = vector.multi_reduction <add>, %155, %cst_53 [1] : vector<6x6xf32> to vector<6xf32>
    %157 = vector.shape_cast %156 : vector<6xf32> to vector<6x1xf32>
    %cst_54 = arith.constant 9.99999971E-10 : f32
    %158 = vector.broadcast %cst_54 : f32 to vector<6x1xf32>
    %159 = arith.maximumf %157, %158 : vector<6x1xf32>
    %160 = tpu.reciprocal %159 {approx = true} : vector<6x1xf32> -> vector<6x1xf32>
    %161 = vector.broadcast %160 : vector<6x1xf32> to vector<6x6xf32>
    %162 = arith.mulf %155, %161 : vector<6x6xf32>
    %163 = arith.truncf %162 : vector<6x6xf32> to vector<6x6xbf16>
    %164 = arith.truncf %129 : vector<6x32xf32> to vector<6x32xbf16>
    %cst_55 = arith.constant dense<0.000000e+00> : vector<6x32xf32>
    %165 = tpu.matmul %163, %164, %cst_55 {dimension_numbers = #tpu.dot_dimension_numbers<[1], [0], [0], [1], [0, 0, 1, 1], [], []>} : vector<6x6xbf16>, vector<6x32xbf16>, vector<6x32xf32> -> vector<6x32xf32>
    %166 = vector.extract_strided_slice %165 {offsets = [2, 0], sizes = [1, 32], strides = [1, 1]} : vector<6x32xf32> to vector<1x32xf32>
    %167 = vector.extract_strided_slice %21 {offsets = [2, 64], sizes = [1, 32], strides = [1, 1]} : vector<6x256xf32> to vector<1x32xf32>
    %168 = arith.addf %166, %167 : vector<1x32xf32>
    %169 = vector.extract_strided_slice %22 {offsets = [0, 64], sizes = [1, 32], strides = [1, 1]} : vector<1x256xf32> to vector<1x32xf32>
    %170 = arith.addf %168, %169 : vector<1x32xf32>
    %c0_56 = arith.constant 0 : index
    %c10 = arith.constant 10 : index
    %c0_57 = arith.constant 0 : index
    %171 = vector.load %arg35[%c0_56, %c10, %c0_57] : memref<2x16x32xf32, #tpu.memory_space<vmem>>, vector<1x1x32xf32>
    %172 = vector.shape_cast %171 : vector<1x1x32xf32> to vector<1x32xf32>
    %173 = vector.shape_cast %170 : vector<1x32xf32> to vector<1x1x32xf32>
    tpu.vector_store %arg35[%c0_56, %c10, %c0_57], %173 {strides = array<i32>} : memref<2x16x32xf32, #tpu.memory_space<vmem>>, vector<1x1x32xf32>,
    %174 = vector.extract_strided_slice %165 {offsets = [4, 0], sizes = [1, 32], strides = [1, 1]} : vector<6x32xf32> to vector<1x32xf32>
    %175 = vector.extract_strided_slice %21 {offsets = [4, 64], sizes = [1, 32], strides = [1, 1]} : vector<6x256xf32> to vector<1x32xf32>
    %176 = arith.addf %174, %175 : vector<1x32xf32>
    %177 = vector.extract_strided_slice %22 {offsets = [0, 64], sizes = [1, 32], strides = [1, 1]} : vector<1x256xf32> to vector<1x32xf32>
    %178 = arith.addf %176, %177 : vector<1x32xf32>
    %c1_58 = arith.constant 1 : index
    %c10_59 = arith.constant 10 : index
    %c0_60 = arith.constant 0 : index
    %179 = vector.load %arg35[%c1_58, %c10_59, %c0_60] : memref<2x16x32xf32, #tpu.memory_space<vmem>>, vector<1x1x32xf32>
    %180 = vector.shape_cast %179 : vector<1x1x32xf32> to vector<1x32xf32>
    %181 = vector.shape_cast %178 : vector<1x32xf32> to vector<1x1x32xf32>
    tpu.vector_store %arg35[%c1_58, %c10_59, %c0_60], %181 {strides = array<i32>} : memref<2x16x32xf32, #tpu.memory_space<vmem>>, vector<1x1x32xf32>,
    %182 = vector.extract_strided_slice %10 {offsets = [0, 96], sizes = [6, 32], strides = [1, 1]} : vector<6x256xf32> to vector<6x32xf32>
    %183 = vector.extract_strided_slice %17 {offsets = [0, 96], sizes = [6, 32], strides = [1, 1]} : vector<6x256xf32> to vector<6x32xf32>
    %c3 = arith.constant 3 : index
    %c0_61 = arith.constant 0 : index
    %184 = vector.load %arg8[%c3, %c0_61] : memref<8x32xf32, #tpu.memory_space<vmem>>, vector<1x32xf32>
    %185 = vector.shape_cast %183 : vector<6x32xf32> to vector<6x1x32xf32>
    %186 = vector.shape_cast %182 : vector<6x32xf32> to vector<1x6x32xf32>
    %187 = vector.broadcast %185 : vector<6x1x32xf32> to vector<6x6x32xf32>
    %188 = vector.broadcast %186 : vector<1x6x32xf32> to vector<6x6x32xf32>
    %189 = arith.addf %187, %188 : vector<6x6x32xf32>
    %cst_62 = arith.constant 0.000000e+00 : f32
    %190 = vector.broadcast %cst_62 : f32 to vector<6x6x32xf32>
    %191 = arith.cmpf ogt, %189, %190 : vector<6x6x32xf32>
    %cst_63 = arith.constant 2.000000e-01 : f32
    %192 = vector.broadcast %cst_63 : f32 to vector<6x6x32xf32>
    %193 = arith.mulf %192, %189 : vector<6x6x32xf32>
    %194 = arith.select %191, %189, %193 : vector<6x6x32xi1>, vector<6x6x32xf32>
    %195 = vector.shape_cast %184 : vector<1x32xf32> to vector<1x1x32xf32>
    %196 = vector.broadcast %195 : vector<1x1x32xf32> to vector<6x6x32xf32>
    %197 = arith.mulf %194, %196 : vector<6x6x32xf32>
    %cst_64 = arith.constant dense<0.000000e+00> : vector<6x6xf32>
    %198 = vector.multi_reduction <add>, %197, %cst_64 [2] : vector<6x6x32xf32> to vector<6x6xf32>
    %cst_65 = arith.constant -1.000000e+30 : f32
    %199 = vector.broadcast %cst_65 : f32 to vector<6x6xf32>
    %200 = arith.select %3, %198, %199 : vector<6x6xi1>, vector<6x6xf32>
    %cst_66 = arith.constant dense<0xFF800000> : vector<6xf32>
    %201 = vector.multi_reduction <maximumf>, %200, %cst_66 [1] : vector<6x6xf32> to vector<6xf32>
    %202 = vector.shape_cast %201 : vector<6xf32> to vector<6x1xf32>
    %203 = vector.broadcast %202 : vector<6x1xf32> to vector<6x6xf32>
    %204 = arith.subf %200, %203 : vector<6x6xf32>
    %205 = math.exp %204 : vector<6x6xf32>
    %206 = arith.extui %3 : vector<6x6xi1> to vector<6x6xi32>
    %207 = arith.sitofp %206 : vector<6x6xi32> to vector<6x6xf32>
    %208 = arith.mulf %205, %207 : vector<6x6xf32>
    %cst_67 = arith.constant dense<0.000000e+00> : vector<6xf32>
    %209 = vector.multi_reduction <add>, %208, %cst_67 [1] : vector<6x6xf32> to vector<6xf32>
    %210 = vector.shape_cast %209 : vector<6xf32> to vector<6x1xf32>
    %cst_68 = arith.constant 9.99999971E-10 : f32
    %211 = vector.broadcast %cst_68 : f32 to vector<6x1xf32>
    %212 = arith.maximumf %210, %211 : vector<6x1xf32>
    %213 = tpu.reciprocal %212 {approx = true} : vector<6x1xf32> -> vector<6x1xf32>
    %214 = vector.broadcast %213 : vector<6x1xf32> to vector<6x6xf32>
    %215 = arith.mulf %208, %214 : vector<6x6xf32>
    %216 = arith.truncf %215 : vector<6x6xf32> to vector<6x6xbf16>
    %217 = arith.truncf %182 : vector<6x32xf32> to vector<6x32xbf16>
    %cst_69 = arith.constant dense<0.000000e+00> : vector<6x32xf32>
    %218 = tpu.matmul %216, %217, %cst_69 {dimension_numbers = #tpu.dot_dimension_numbers<[1], [0], [0], [1], [0, 0, 1, 1], [], []>} : vector<6x6xbf16>, vector<6x32xbf16>, vector<6x32xf32> -> vector<6x32xf32>
    %219 = vector.extract_strided_slice %218 {offsets = [2, 0], sizes = [1, 32], strides = [1, 1]} : vector<6x32xf32> to vector<1x32xf32>
    %220 = vector.extract_strided_slice %21 {offsets = [2, 96], sizes = [1, 32], strides = [1, 1]} : vector<6x256xf32> to vector<1x32xf32>
    %221 = arith.addf %219, %220 : vector<1x32xf32>
    %222 = vector.extract_strided_slice %22 {offsets = [0, 96], sizes = [1, 32], strides = [1, 1]} : vector<1x256xf32> to vector<1x32xf32>
    %223 = arith.addf %221, %222 : vector<1x32xf32>
    %c0_70 = arith.constant 0 : index
    %c11 = arith.constant 11 : index
    %c0_71 = arith.constant 0 : index
    %224 = vector.load %arg35[%c0_70, %c11, %c0_71] : memref<2x16x32xf32, #tpu.memory_space<vmem>>, vector<1x1x32xf32>
    %225 = vector.shape_cast %224 : vector<1x1x32xf32> to vector<1x32xf32>
    %226 = vector.shape_cast %223 : vector<1x32xf32> to vector<1x1x32xf32>
    tpu.vector_store %arg35[%c0_70, %c11, %c0_71], %226 {strides = array<i32>} : memref<2x16x32xf32, #tpu.memory_space<vmem>>, vector<1x1x32xf32>,
    %227 = vector.extract_strided_slice %218 {offsets = [4, 0], sizes = [1, 32], strides = [1, 1]} : vector<6x32xf32> to vector<1x32xf32>
    %228 = vector.extract_strided_slice %21 {offsets = [4, 96], sizes = [1, 32], strides = [1, 1]} : vector<6x256xf32> to vector<1x32xf32>
    %229 = arith.addf %227, %228 : vector<1x32xf32>
    %230 = vector.extract_strided_slice %22 {offsets = [0, 96], sizes = [1, 32], strides = [1, 1]} : vector<1x256xf32> to vector<1x32xf32>
    %231 = arith.addf %229, %230 : vector<1x32xf32>
    %c1_72 = arith.constant 1 : index
    %c11_73 = arith.constant 11 : index
    %c0_74 = arith.constant 0 : index
    %232 = vector.load %arg35[%c1_72, %c11_73, %c0_74] : memref<2x16x32xf32, #tpu.memory_space<vmem>>, vector<1x1x32xf32>
    %233 = vector.shape_cast %232 : vector<1x1x32xf32> to vector<1x32xf32>
    %234 = vector.shape_cast %231 : vector<1x32xf32> to vector<1x1x32xf32>
    tpu.vector_store %arg35[%c1_72, %c11_73, %c0_74], %234 {strides = array<i32>} : memref<2x16x32xf32, #tpu.memory_space<vmem>>, vector<1x1x32xf32>,
    %235 = vector.extract_strided_slice %10 {offsets = [0, 128], sizes = [6, 32], strides = [1, 1]} : vector<6x256xf32> to vector<6x32xf32>
    %236 = vector.extract_strided_slice %17 {offsets = [0, 128], sizes = [6, 32], strides = [1, 1]} : vector<6x256xf32> to vector<6x32xf32>
    %c4 = arith.constant 4 : index
    %c0_75 = arith.constant 0 : index
    %237 = vector.load %arg8[%c4, %c0_75] : memref<8x32xf32, #tpu.memory_space<vmem>>, vector<1x32xf32>
    %238 = vector.shape_cast %236 : vector<6x32xf32> to vector<6x1x32xf32>
    %239 = vector.shape_cast %235 : vector<6x32xf32> to vector<1x6x32xf32>
    %240 = vector.broadcast %238 : vector<6x1x32xf32> to vector<6x6x32xf32>
    %241 = vector.broadcast %239 : vector<1x6x32xf32> to vector<6x6x32xf32>
    %242 = arith.addf %240, %241 : vector<6x6x32xf32>
    %cst_76 = arith.constant 0.000000e+00 : f32
    %243 = vector.broadcast %cst_76 : f32 to vector<6x6x32xf32>
    %244 = arith.cmpf ogt, %242, %243 : vector<6x6x32xf32>
    %cst_77 = arith.constant 2.000000e-01 : f32
    %245 = vector.broadcast %cst_77 : f32 to vector<6x6x32xf32>
    %246 = arith.mulf %245, %242 : vector<6x6x32xf32>
    %247 = arith.select %244, %242, %246 : vector<6x6x32xi1>, vector<6x6x32xf32>
    %248 = vector.shape_cast %237 : vector<1x32xf32> to vector<1x1x32xf32>
    %249 = vector.broadcast %248 : vector<1x1x32xf32> to vector<6x6x32xf32>
    %250 = arith.mulf %247, %249 : vector<6x6x32xf32>
    %cst_78 = arith.constant dense<0.000000e+00> : vector<6x6xf32>
    %251 = vector.multi_reduction <add>, %250, %cst_78 [2] : vector<6x6x32xf32> to vector<6x6xf32>
    %cst_79 = arith.constant -1.000000e+30 : f32
    %252 = vector.broadcast %cst_79 : f32 to vector<6x6xf32>
    %253 = arith.select %3, %251, %252 : vector<6x6xi1>, vector<6x6xf32>
    %cst_80 = arith.constant dense<0xFF800000> : vector<6xf32>
    %254 = vector.multi_reduction <maximumf>, %253, %cst_80 [1] : vector<6x6xf32> to vector<6xf32>
    %255 = vector.shape_cast %254 : vector<6xf32> to vector<6x1xf32>
    %256 = vector.broadcast %255 : vector<6x1xf32> to vector<6x6xf32>
    %257 = arith.subf %253, %256 : vector<6x6xf32>
    %258 = math.exp %257 : vector<6x6xf32>
    %259 = arith.extui %3 : vector<6x6xi1> to vector<6x6xi32>
    %260 = arith.sitofp %259 : vector<6x6xi32> to vector<6x6xf32>
    %261 = arith.mulf %258, %260 : vector<6x6xf32>
    %cst_81 = arith.constant dense<0.000000e+00> : vector<6xf32>
    %262 = vector.multi_reduction <add>, %261, %cst_81 [1] : vector<6x6xf32> to vector<6xf32>
    %263 = vector.shape_cast %262 : vector<6xf32> to vector<6x1xf32>
    %cst_82 = arith.constant 9.99999971E-10 : f32
    %264 = vector.broadcast %cst_82 : f32 to vector<6x1xf32>
    %265 = arith.maximumf %263, %264 : vector<6x1xf32>
    %266 = tpu.reciprocal %265 {approx = true} : vector<6x1xf32> -> vector<6x1xf32>
    %267 = vector.broadcast %266 : vector<6x1xf32> to vector<6x6xf32>
    %268 = arith.mulf %261, %267 : vector<6x6xf32>
    %269 = arith.truncf %268 : vector<6x6xf32> to vector<6x6xbf16>
    %270 = arith.truncf %235 : vector<6x32xf32> to vector<6x32xbf16>
    %cst_83 = arith.constant dense<0.000000e+00> : vector<6x32xf32>
    %271 = tpu.matmul %269, %270, %cst_83 {dimension_numbers = #tpu.dot_dimension_numbers<[1], [0], [0], [1], [0, 0, 1, 1], [], []>} : vector<6x6xbf16>, vector<6x32xbf16>, vector<6x32xf32> -> vector<6x32xf32>
    %272 = vector.extract_strided_slice %271 {offsets = [2, 0], sizes = [1, 32], strides = [1, 1]} : vector<6x32xf32> to vector<1x32xf32>
    %273 = vector.extract_strided_slice %21 {offsets = [2, 128], sizes = [1, 32], strides = [1, 1]} : vector<6x256xf32> to vector<1x32xf32>
    %274 = arith.addf %272, %273 : vector<1x32xf32>
    %275 = vector.extract_strided_slice %22 {offsets = [0, 128], sizes = [1, 32], strides = [1, 1]} : vector<1x256xf32> to vector<1x32xf32>
    %276 = arith.addf %274, %275 : vector<1x32xf32>
    %c0_84 = arith.constant 0 : index
    %c12 = arith.constant 12 : index
    %c0_85 = arith.constant 0 : index
    %277 = vector.load %arg35[%c0_84, %c12, %c0_85] : memref<2x16x32xf32, #tpu.memory_space<vmem>>, vector<1x1x32xf32>
    %278 = vector.shape_cast %277 : vector<1x1x32xf32> to vector<1x32xf32>
    %279 = vector.shape_cast %276 : vector<1x32xf32> to vector<1x1x32xf32>
    tpu.vector_store %arg35[%c0_84, %c12, %c0_85], %279 {strides = array<i32>} : memref<2x16x32xf32, #tpu.memory_space<vmem>>, vector<1x1x32xf32>,
    %280 = vector.extract_strided_slice %271 {offsets = [4, 0], sizes = [1, 32], strides = [1, 1]} : vector<6x32xf32> to vector<1x32xf32>
    %281 = vector.extract_strided_slice %21 {offsets = [4, 128], sizes = [1, 32], strides = [1, 1]} : vector<6x256xf32> to vector<1x32xf32>
    %282 = arith.addf %280, %281 : vector<1x32xf32>
    %283 = vector.extract_strided_slice %22 {offsets = [0, 128], sizes = [1, 32], strides = [1, 1]} : vector<1x256xf32> to vector<1x32xf32>
    %284 = arith.addf %282, %283 : vector<1x32xf32>
    %c1_86 = arith.constant 1 : index
    %c12_87 = arith.constant 12 : index
    %c0_88 = arith.constant 0 : index
    %285 = vector.load %arg35[%c1_86, %c12_87, %c0_88] : memref<2x16x32xf32, #tpu.memory_space<vmem>>, vector<1x1x32xf32>
    %286 = vector.shape_cast %285 : vector<1x1x32xf32> to vector<1x32xf32>
    %287 = vector.shape_cast %284 : vector<1x32xf32> to vector<1x1x32xf32>
    tpu.vector_store %arg35[%c1_86, %c12_87, %c0_88], %287 {strides = array<i32>} : memref<2x16x32xf32, #tpu.memory_space<vmem>>, vector<1x1x32xf32>,
    %288 = vector.extract_strided_slice %10 {offsets = [0, 160], sizes = [6, 32], strides = [1, 1]} : vector<6x256xf32> to vector<6x32xf32>
    %289 = vector.extract_strided_slice %17 {offsets = [0, 160], sizes = [6, 32], strides = [1, 1]} : vector<6x256xf32> to vector<6x32xf32>
    %c5 = arith.constant 5 : index
    %c0_89 = arith.constant 0 : index
    %290 = vector.load %arg8[%c5, %c0_89] : memref<8x32xf32, #tpu.memory_space<vmem>>, vector<1x32xf32>
    %291 = vector.shape_cast %289 : vector<6x32xf32> to vector<6x1x32xf32>
    %292 = vector.shape_cast %288 : vector<6x32xf32> to vector<1x6x32xf32>
    %293 = vector.broadcast %291 : vector<6x1x32xf32> to vector<6x6x32xf32>
    %294 = vector.broadcast %292 : vector<1x6x32xf32> to vector<6x6x32xf32>
    %295 = arith.addf %293, %294 : vector<6x6x32xf32>
    %cst_90 = arith.constant 0.000000e+00 : f32
    %296 = vector.broadcast %cst_90 : f32 to vector<6x6x32xf32>
    %297 = arith.cmpf ogt, %295, %296 : vector<6x6x32xf32>
    %cst_91 = arith.constant 2.000000e-01 : f32
    %298 = vector.broadcast %cst_91 : f32 to vector<6x6x32xf32>
    %299 = arith.mulf %298, %295 : vector<6x6x32xf32>
    %300 = arith.select %297, %295, %299 : vector<6x6x32xi1>, vector<6x6x32xf32>
    %301 = vector.shape_cast %290 : vector<1x32xf32> to vector<1x1x32xf32>
    %302 = vector.broadcast %301 : vector<1x1x32xf32> to vector<6x6x32xf32>
    %303 = arith.mulf %300, %302 : vector<6x6x32xf32>
    %cst_92 = arith.constant dense<0.000000e+00> : vector<6x6xf32>
    %304 = vector.multi_reduction <add>, %303, %cst_92 [2] : vector<6x6x32xf32> to vector<6x6xf32>
    %cst_93 = arith.constant -1.000000e+30 : f32
    %305 = vector.broadcast %cst_93 : f32 to vector<6x6xf32>
    %306 = arith.select %3, %304, %305 : vector<6x6xi1>, vector<6x6xf32>
    %cst_94 = arith.constant dense<0xFF800000> : vector<6xf32>
    %307 = vector.multi_reduction <maximumf>, %306, %cst_94 [1] : vector<6x6xf32> to vector<6xf32>
    %308 = vector.shape_cast %307 : vector<6xf32> to vector<6x1xf32>
    %309 = vector.broadcast %308 : vector<6x1xf32> to vector<6x6xf32>
    %310 = arith.subf %306, %309 : vector<6x6xf32>
    %311 = math.exp %310 : vector<6x6xf32>
    %312 = arith.extui %3 : vector<6x6xi1> to vector<6x6xi32>
    %313 = arith.sitofp %312 : vector<6x6xi32> to vector<6x6xf32>
    %314 = arith.mulf %311, %313 : vector<6x6xf32>
    %cst_95 = arith.constant dense<0.000000e+00> : vector<6xf32>
    %315 = vector.multi_reduction <add>, %314, %cst_95 [1] : vector<6x6xf32> to vector<6xf32>
    %316 = vector.shape_cast %315 : vector<6xf32> to vector<6x1xf32>
    %cst_96 = arith.constant 9.99999971E-10 : f32
    %317 = vector.broadcast %cst_96 : f32 to vector<6x1xf32>
    %318 = arith.maximumf %316, %317 : vector<6x1xf32>
    %319 = tpu.reciprocal %318 {approx = true} : vector<6x1xf32> -> vector<6x1xf32>
    %320 = vector.broadcast %319 : vector<6x1xf32> to vector<6x6xf32>
    %321 = arith.mulf %314, %320 : vector<6x6xf32>
    %322 = arith.truncf %321 : vector<6x6xf32> to vector<6x6xbf16>
    %323 = arith.truncf %288 : vector<6x32xf32> to vector<6x32xbf16>
    %cst_97 = arith.constant dense<0.000000e+00> : vector<6x32xf32>
    %324 = tpu.matmul %322, %323, %cst_97 {dimension_numbers = #tpu.dot_dimension_numbers<[1], [0], [0], [1], [0, 0, 1, 1], [], []>} : vector<6x6xbf16>, vector<6x32xbf16>, vector<6x32xf32> -> vector<6x32xf32>
    %325 = vector.extract_strided_slice %324 {offsets = [2, 0], sizes = [1, 32], strides = [1, 1]} : vector<6x32xf32> to vector<1x32xf32>
    %326 = vector.extract_strided_slice %21 {offsets = [2, 160], sizes = [1, 32], strides = [1, 1]} : vector<6x256xf32> to vector<1x32xf32>
    %327 = arith.addf %325, %326 : vector<1x32xf32>
    %328 = vector.extract_strided_slice %22 {offsets = [0, 160], sizes = [1, 32], strides = [1, 1]} : vector<1x256xf32> to vector<1x32xf32>
    %329 = arith.addf %327, %328 : vector<1x32xf32>
    %c0_98 = arith.constant 0 : index
    %c13 = arith.constant 13 : index
    %c0_99 = arith.constant 0 : index
    %330 = vector.load %arg35[%c0_98, %c13, %c0_99] : memref<2x16x32xf32, #tpu.memory_space<vmem>>, vector<1x1x32xf32>
    %331 = vector.shape_cast %330 : vector<1x1x32xf32> to vector<1x32xf32>
    %332 = vector.shape_cast %329 : vector<1x32xf32> to vector<1x1x32xf32>
    tpu.vector_store %arg35[%c0_98, %c13, %c0_99], %332 {strides = array<i32>} : memref<2x16x32xf32, #tpu.memory_space<vmem>>, vector<1x1x32xf32>,
    %333 = vector.extract_strided_slice %324 {offsets = [4, 0], sizes = [1, 32], strides = [1, 1]} : vector<6x32xf32> to vector<1x32xf32>
    %334 = vector.extract_strided_slice %21 {offsets = [4, 160], sizes = [1, 32], strides = [1, 1]} : vector<6x256xf32> to vector<1x32xf32>
    %335 = arith.addf %333, %334 : vector<1x32xf32>
    %336 = vector.extract_strided_slice %22 {offsets = [0, 160], sizes = [1, 32], strides = [1, 1]} : vector<1x256xf32> to vector<1x32xf32>
    %337 = arith.addf %335, %336 : vector<1x32xf32>
    %c1_100 = arith.constant 1 : index
    %c13_101 = arith.constant 13 : index
    %c0_102 = arith.constant 0 : index
    %338 = vector.load %arg35[%c1_100, %c13_101, %c0_102] : memref<2x16x32xf32, #tpu.memory_space<vmem>>, vector<1x1x32xf32>
    %339 = vector.shape_cast %338 : vector<1x1x32xf32> to vector<1x32xf32>
    %340 = vector.shape_cast %337 : vector<1x32xf32> to vector<1x1x32xf32>
    tpu.vector_store %arg35[%c1_100, %c13_101, %c0_102], %340 {strides = array<i32>} : memref<2x16x32xf32, #tpu.memory_space<vmem>>, vector<1x1x32xf32>,
    %341 = vector.extract_strided_slice %10 {offsets = [0, 192], sizes = [6, 32], strides = [1, 1]} : vector<6x256xf32> to vector<6x32xf32>
    %342 = vector.extract_strided_slice %17 {offsets = [0, 192], sizes = [6, 32], strides = [1, 1]} : vector<6x256xf32> to vector<6x32xf32>
    %c6 = arith.constant 6 : index
    %c0_103 = arith.constant 0 : index
    %343 = vector.load %arg8[%c6, %c0_103] : memref<8x32xf32, #tpu.memory_space<vmem>>, vector<1x32xf32>
    %344 = vector.shape_cast %342 : vector<6x32xf32> to vector<6x1x32xf32>
    %345 = vector.shape_cast %341 : vector<6x32xf32> to vector<1x6x32xf32>
    %346 = vector.broadcast %344 : vector<6x1x32xf32> to vector<6x6x32xf32>
    %347 = vector.broadcast %345 : vector<1x6x32xf32> to vector<6x6x32xf32>
    %348 = arith.addf %346, %347 : vector<6x6x32xf32>
    %cst_104 = arith.constant 0.000000e+00 : f32
    %349 = vector.broadcast %cst_104 : f32 to vector<6x6x32xf32>
    %350 = arith.cmpf ogt, %348, %349 : vector<6x6x32xf32>
    %cst_105 = arith.constant 2.000000e-01 : f32
    %351 = vector.broadcast %cst_105 : f32 to vector<6x6x32xf32>
    %352 = arith.mulf %351, %348 : vector<6x6x32xf32>
    %353 = arith.select %350, %348, %352 : vector<6x6x32xi1>, vector<6x6x32xf32>
    %354 = vector.shape_cast %343 : vector<1x32xf32> to vector<1x1x32xf32>
    %355 = vector.broadcast %354 : vector<1x1x32xf32> to vector<6x6x32xf32>
    %356 = arith.mulf %353, %355 : vector<6x6x32xf32>
    %cst_106 = arith.constant dense<0.000000e+00> : vector<6x6xf32>
    %357 = vector.multi_reduction <add>, %356, %cst_106 [2] : vector<6x6x32xf32> to vector<6x6xf32>
    %cst_107 = arith.constant -1.000000e+30 : f32
    %358 = vector.broadcast %cst_107 : f32 to vector<6x6xf32>
    %359 = arith.select %3, %357, %358 : vector<6x6xi1>, vector<6x6xf32>
    %cst_108 = arith.constant dense<0xFF800000> : vector<6xf32>
    %360 = vector.multi_reduction <maximumf>, %359, %cst_108 [1] : vector<6x6xf32> to vector<6xf32>
    %361 = vector.shape_cast %360 : vector<6xf32> to vector<6x1xf32>
    %362 = vector.broadcast %361 : vector<6x1xf32> to vector<6x6xf32>
    %363 = arith.subf %359, %362 : vector<6x6xf32>
    %364 = math.exp %363 : vector<6x6xf32>
    %365 = arith.extui %3 : vector<6x6xi1> to vector<6x6xi32>
    %366 = arith.sitofp %365 : vector<6x6xi32> to vector<6x6xf32>
    %367 = arith.mulf %364, %366 : vector<6x6xf32>
    %cst_109 = arith.constant dense<0.000000e+00> : vector<6xf32>
    %368 = vector.multi_reduction <add>, %367, %cst_109 [1] : vector<6x6xf32> to vector<6xf32>
    %369 = vector.shape_cast %368 : vector<6xf32> to vector<6x1xf32>
    %cst_110 = arith.constant 9.99999971E-10 : f32
    %370 = vector.broadcast %cst_110 : f32 to vector<6x1xf32>
    %371 = arith.maximumf %369, %370 : vector<6x1xf32>
    %372 = tpu.reciprocal %371 {approx = true} : vector<6x1xf32> -> vector<6x1xf32>
    %373 = vector.broadcast %372 : vector<6x1xf32> to vector<6x6xf32>
    %374 = arith.mulf %367, %373 : vector<6x6xf32>
    %375 = arith.truncf %374 : vector<6x6xf32> to vector<6x6xbf16>
    %376 = arith.truncf %341 : vector<6x32xf32> to vector<6x32xbf16>
    %cst_111 = arith.constant dense<0.000000e+00> : vector<6x32xf32>
    %377 = tpu.matmul %375, %376, %cst_111 {dimension_numbers = #tpu.dot_dimension_numbers<[1], [0], [0], [1], [0, 0, 1, 1], [], []>} : vector<6x6xbf16>, vector<6x32xbf16>, vector<6x32xf32> -> vector<6x32xf32>
    %378 = vector.extract_strided_slice %377 {offsets = [2, 0], sizes = [1, 32], strides = [1, 1]} : vector<6x32xf32> to vector<1x32xf32>
    %379 = vector.extract_strided_slice %21 {offsets = [2, 192], sizes = [1, 32], strides = [1, 1]} : vector<6x256xf32> to vector<1x32xf32>
    %380 = arith.addf %378, %379 : vector<1x32xf32>
    %381 = vector.extract_strided_slice %22 {offsets = [0, 192], sizes = [1, 32], strides = [1, 1]} : vector<1x256xf32> to vector<1x32xf32>
    %382 = arith.addf %380, %381 : vector<1x32xf32>
    %c0_112 = arith.constant 0 : index
    %c14 = arith.constant 14 : index
    %c0_113 = arith.constant 0 : index
    %383 = vector.load %arg35[%c0_112, %c14, %c0_113] : memref<2x16x32xf32, #tpu.memory_space<vmem>>, vector<1x1x32xf32>
    %384 = vector.shape_cast %383 : vector<1x1x32xf32> to vector<1x32xf32>
    %385 = vector.shape_cast %382 : vector<1x32xf32> to vector<1x1x32xf32>
    tpu.vector_store %arg35[%c0_112, %c14, %c0_113], %385 {strides = array<i32>} : memref<2x16x32xf32, #tpu.memory_space<vmem>>, vector<1x1x32xf32>,
    %386 = vector.extract_strided_slice %377 {offsets = [4, 0], sizes = [1, 32], strides = [1, 1]} : vector<6x32xf32> to vector<1x32xf32>
    %387 = vector.extract_strided_slice %21 {offsets = [4, 192], sizes = [1, 32], strides = [1, 1]} : vector<6x256xf32> to vector<1x32xf32>
    %388 = arith.addf %386, %387 : vector<1x32xf32>
    %389 = vector.extract_strided_slice %22 {offsets = [0, 192], sizes = [1, 32], strides = [1, 1]} : vector<1x256xf32> to vector<1x32xf32>
    %390 = arith.addf %388, %389 : vector<1x32xf32>
    %c1_114 = arith.constant 1 : index
    %c14_115 = arith.constant 14 : index
    %c0_116 = arith.constant 0 : index
    %391 = vector.load %arg35[%c1_114, %c14_115, %c0_116] : memref<2x16x32xf32, #tpu.memory_space<vmem>>, vector<1x1x32xf32>
    %392 = vector.shape_cast %391 : vector<1x1x32xf32> to vector<1x32xf32>
    %393 = vector.shape_cast %390 : vector<1x32xf32> to vector<1x1x32xf32>
    tpu.vector_store %arg35[%c1_114, %c14_115, %c0_116], %393 {strides = array<i32>} : memref<2x16x32xf32, #tpu.memory_space<vmem>>, vector<1x1x32xf32>,
    %394 = vector.extract_strided_slice %10 {offsets = [0, 224], sizes = [6, 32], strides = [1, 1]} : vector<6x256xf32> to vector<6x32xf32>
    %395 = vector.extract_strided_slice %17 {offsets = [0, 224], sizes = [6, 32], strides = [1, 1]} : vector<6x256xf32> to vector<6x32xf32>
    %c7 = arith.constant 7 : index
    %c0_117 = arith.constant 0 : index
    %396 = vector.load %arg8[%c7, %c0_117] : memref<8x32xf32, #tpu.memory_space<vmem>>, vector<1x32xf32>
    %397 = vector.shape_cast %395 : vector<6x32xf32> to vector<6x1x32xf32>
    %398 = vector.shape_cast %394 : vector<6x32xf32> to vector<1x6x32xf32>
    %399 = vector.broadcast %397 : vector<6x1x32xf32> to vector<6x6x32xf32>
    %400 = vector.broadcast %398 : vector<1x6x32xf32> to vector<6x6x32xf32>
    %401 = arith.addf %399, %400 : vector<6x6x32xf32>
    %cst_118 = arith.constant 0.000000e+00 : f32
    %402 = vector.broadcast %cst_118 : f32 to vector<6x6x32xf32>
    %403 = arith.cmpf ogt, %401, %402 : vector<6x6x32xf32>
    %cst_119 = arith.constant 2.000000e-01 : f32
    %404 = vector.broadcast %cst_119 : f32 to vector<6x6x32xf32>
    %405 = arith.mulf %404, %401 : vector<6x6x32xf32>
    %406 = arith.select %403, %401, %405 : vector<6x6x32xi1>, vector<6x6x32xf32>
    %407 = vector.shape_cast %396 : vector<1x32xf32> to vector<1x1x32xf32>
    %408 = vector.broadcast %407 : vector<1x1x32xf32> to vector<6x6x32xf32>
    %409 = arith.mulf %406, %408 : vector<6x6x32xf32>
    %cst_120 = arith.constant dense<0.000000e+00> : vector<6x6xf32>
    %410 = vector.multi_reduction <add>, %409, %cst_120 [2] : vector<6x6x32xf32> to vector<6x6xf32>
    %cst_121 = arith.constant -1.000000e+30 : f32
    %411 = vector.broadcast %cst_121 : f32 to vector<6x6xf32>
    %412 = arith.select %3, %410, %411 : vector<6x6xi1>, vector<6x6xf32>
    %cst_122 = arith.constant dense<0xFF800000> : vector<6xf32>
    %413 = vector.multi_reduction <maximumf>, %412, %cst_122 [1] : vector<6x6xf32> to vector<6xf32>
    %414 = vector.shape_cast %413 : vector<6xf32> to vector<6x1xf32>
    %415 = vector.broadcast %414 : vector<6x1xf32> to vector<6x6xf32>
    %416 = arith.subf %412, %415 : vector<6x6xf32>
    %417 = math.exp %416 : vector<6x6xf32>
    %418 = arith.extui %3 : vector<6x6xi1> to vector<6x6xi32>
    %419 = arith.sitofp %418 : vector<6x6xi32> to vector<6x6xf32>
    %420 = arith.mulf %417, %419 : vector<6x6xf32>
    %cst_123 = arith.constant dense<0.000000e+00> : vector<6xf32>
    %421 = vector.multi_reduction <add>, %420, %cst_123 [1] : vector<6x6xf32> to vector<6xf32>
    %422 = vector.shape_cast %421 : vector<6xf32> to vector<6x1xf32>
    %cst_124 = arith.constant 9.99999971E-10 : f32
    %423 = vector.broadcast %cst_124 : f32 to vector<6x1xf32>
    %424 = arith.maximumf %422, %423 : vector<6x1xf32>
    %425 = tpu.reciprocal %424 {approx = true} : vector<6x1xf32> -> vector<6x1xf32>
    %426 = vector.broadcast %425 : vector<6x1xf32> to vector<6x6xf32>
    %427 = arith.mulf %420, %426 : vector<6x6xf32>
    %428 = arith.truncf %427 : vector<6x6xf32> to vector<6x6xbf16>
    %429 = arith.truncf %394 : vector<6x32xf32> to vector<6x32xbf16>
    %cst_125 = arith.constant dense<0.000000e+00> : vector<6x32xf32>
    %430 = tpu.matmul %428, %429, %cst_125 {dimension_numbers = #tpu.dot_dimension_numbers<[1], [0], [0], [1], [0, 0, 1, 1], [], []>} : vector<6x6xbf16>, vector<6x32xbf16>, vector<6x32xf32> -> vector<6x32xf32>
    %431 = vector.extract_strided_slice %430 {offsets = [2, 0], sizes = [1, 32], strides = [1, 1]} : vector<6x32xf32> to vector<1x32xf32>
    %432 = vector.extract_strided_slice %21 {offsets = [2, 224], sizes = [1, 32], strides = [1, 1]} : vector<6x256xf32> to vector<1x32xf32>
    %433 = arith.addf %431, %432 : vector<1x32xf32>
    %434 = vector.extract_strided_slice %22 {offsets = [0, 224], sizes = [1, 32], strides = [1, 1]} : vector<1x256xf32> to vector<1x32xf32>
    %435 = arith.addf %433, %434 : vector<1x32xf32>
    %c0_126 = arith.constant 0 : index
    %c15 = arith.constant 15 : index
    %c0_127 = arith.constant 0 : index
    %436 = vector.load %arg35[%c0_126, %c15, %c0_127] : memref<2x16x32xf32, #tpu.memory_space<vmem>>, vector<1x1x32xf32>
    %437 = vector.shape_cast %436 : vector<1x1x32xf32> to vector<1x32xf32>
    %438 = vector.shape_cast %435 : vector<1x32xf32> to vector<1x1x32xf32>
    tpu.vector_store %arg35[%c0_126, %c15, %c0_127], %438 {strides = array<i32>} : memref<2x16x32xf32, #tpu.memory_space<vmem>>, vector<1x1x32xf32>,
    %439 = vector.extract_strided_slice %430 {offsets = [4, 0], sizes = [1, 32], strides = [1, 1]} : vector<6x32xf32> to vector<1x32xf32>
    %440 = vector.extract_strided_slice %21 {offsets = [4, 224], sizes = [1, 32], strides = [1, 1]} : vector<6x256xf32> to vector<1x32xf32>
    %441 = arith.addf %439, %440 : vector<1x32xf32>
    %442 = vector.extract_strided_slice %22 {offsets = [0, 224], sizes = [1, 32], strides = [1, 1]} : vector<1x256xf32> to vector<1x32xf32>
    %443 = arith.addf %441, %442 : vector<1x32xf32>
    %c1_128 = arith.constant 1 : index
    %c15_129 = arith.constant 15 : index
    %c0_130 = arith.constant 0 : index
    %444 = vector.load %arg35[%c1_128, %c15_129, %c0_130] : memref<2x16x32xf32, #tpu.memory_space<vmem>>, vector<1x1x32xf32>
    %445 = vector.shape_cast %444 : vector<1x1x32xf32> to vector<1x32xf32>
    %446 = vector.shape_cast %443 : vector<1x32xf32> to vector<1x1x32xf32>
    tpu.vector_store %arg35[%c1_128, %c15_129, %c0_130], %446 {strides = array<i32>} : memref<2x16x32xf32, #tpu.memory_space<vmem>>, vector<1x1x32xf32>,
    %c0_131 = arith.constant 0 : index
    %c0_132 = arith.constant 0 : index
    %447 = vector.load %arg15[%c0_131, %c0_132] : memref<32x32xf32, #tpu.memory_space<vmem>>, vector<32x32xf32>
    %c0_133 = arith.constant 0 : index
    %c0_134 = arith.constant 0 : index
    %448 = vector.load %arg29[%c0_133, %c0_134] : memref<512x32xf32, #tpu.memory_space<vmem>>, vector<512x32xf32>
    %c0_135 = arith.constant 0 : index
    %c0_136 = arith.constant 0 : index
    %c0_137 = arith.constant 0 : index
    %449 = vector.load %arg0[%c0_135, %c0_136, %c0_137] : memref<2x8x32xf32, #tpu.memory_space<vmem>>, vector<1x8x32xf32>
    %450 = vector.shape_cast %449 : vector<1x8x32xf32> to vector<8x32xf32>
    %c0_138 = arith.constant 0 : index
    %c0_139 = arith.constant 0 : index
    %451 = vector.load %arg11[%c0_138, %c0_139] : memref<1x32xf32, #tpu.memory_space<vmem>>, vector<1x32xf32>
    %c0_140 = arith.constant 0 : index
    %c0_141 = arith.constant 0 : index
    %452 = vector.load %arg12[%c0_140, %c0_141] : memref<1x32xf32, #tpu.memory_space<vmem>>, vector<1x32xf32>
    %cst_142 = arith.constant dense<0.000000e+00> : vector<8xf32>
    %453 = vector.multi_reduction <add>, %450, %cst_142 [1] : vector<8x32xf32> to vector<8xf32>
    %454 = vector.shape_cast %453 : vector<8xf32> to vector<8x1xf32>
    %cst_143 = arith.constant 3.200000e+01 : f32
    %455 = vector.broadcast %cst_143 : f32 to vector<8x1xf32>
    %456 = arith.divf %454, %455 : vector<8x1xf32>
    %457 = vector.broadcast %456 : vector<8x1xf32> to vector<8x32xf32>
    %458 = arith.subf %450, %457 : vector<8x32xf32>
    %459 = arith.mulf %458, %458 : vector<8x32xf32>
    %cst_144 = arith.constant dense<0.000000e+00> : vector<8xf32>
    %460 = vector.multi_reduction <add>, %459, %cst_144 [1] : vector<8x32xf32> to vector<8xf32>
    %461 = vector.shape_cast %460 : vector<8xf32> to vector<8x1xf32>
    %cst_145 = arith.constant 3.200000e+01 : f32
    %462 = vector.broadcast %cst_145 : f32 to vector<8x1xf32>
    %463 = arith.divf %461, %462 : vector<8x1xf32>
    %464 = vector.broadcast %456 : vector<8x1xf32> to vector<8x32xf32>
    %465 = arith.subf %450, %464 : vector<8x32xf32>
    %cst_146 = arith.constant 9.99999996E-13 : f32
    %466 = vector.broadcast %cst_146 : f32 to vector<8x1xf32>
    %467 = arith.addf %463, %466 : vector<8x1xf32>
    %468 = math.rsqrt %467 : vector<8x1xf32>
    %469 = vector.broadcast %468 : vector<8x1xf32> to vector<8x32xf32>
    %470 = arith.mulf %465, %469 : vector<8x32xf32>
    %471 = vector.broadcast %451 : vector<1x32xf32> to vector<8x32xf32>
    %472 = arith.mulf %470, %471 : vector<8x32xf32>
    %473 = vector.broadcast %452 : vector<1x32xf32> to vector<8x32xf32>
    %474 = arith.addf %472, %473 : vector<8x32xf32>
    %c0_147 = arith.constant 0 : index
    %c0_148 = arith.constant 0 : index
    %475 = vector.load %arg1[%c0_147, %c0_148] : memref<2x8xf32, #tpu.memory_space<vmem>>, vector<1x8xf32>
    %cst_149 = arith.constant 1.000000e+00 : f32
    %476 = vector.broadcast %cst_149 : f32 to vector<1x8xf32>
    %477 = arith.subf %476, %475 : vector<1x8xf32>
    %cst_150 = arith.constant -1.000000e+09 : f32
    %478 = vector.broadcast %cst_150 : f32 to vector<1x8xf32>
    %479 = arith.mulf %477, %478 : vector<1x8xf32>
    %c0_151 = arith.constant 0 : index
    %c0_152 = arith.constant 0 : index
    %480 = vector.load %arg13[%c0_151, %c0_152] : memref<32x96xf32, #tpu.memory_space<vmem>>, vector<32x96xf32>
    %481 = arith.truncf %474 : vector<8x32xf32> to vector<8x32xbf16>
    %482 = arith.truncf %480 : vector<32x96xf32> to vector<32x96xbf16>
    %cst_153 = arith.constant dense<0.000000e+00> : vector<8x96xf32>
    %483 = tpu.matmul %481, %482, %cst_153 {dimension_numbers = #tpu.dot_dimension_numbers<[1], [0], [0], [1], [0, 0, 1, 1], [], []>} : vector<8x32xbf16>, vector<32x96xbf16>, vector<8x96xf32> -> vector<8x96xf32>
    %c0_154 = arith.constant 0 : index
    %c0_155 = arith.constant 0 : index
    %484 = vector.load %arg14[%c0_154, %c0_155] : memref<1x96xf32, #tpu.memory_space<vmem>>, vector<1x96xf32>
    %485 = vector.broadcast %484 : vector<1x96xf32> to vector<8x96xf32>
    %486 = arith.addf %483, %485 : vector<8x96xf32>
    %cst_156 = arith.constant 0.000000e+00 : f32
    %487 = vector.broadcast %cst_156 : f32 to vector<8x32xf32>
    %488 = vector.extract_strided_slice %486 {offsets = [0, 0], sizes = [8, 8], strides = [1, 1]} : vector<8x96xf32> to vector<8x8xf32>
    %489 = vector.extract_strided_slice %486 {offsets = [0, 32], sizes = [8, 8], strides = [1, 1]} : vector<8x96xf32> to vector<8x8xf32>
    %490 = vector.extract_strided_slice %486 {offsets = [0, 64], sizes = [8, 8], strides = [1, 1]} : vector<8x96xf32> to vector<8x8xf32>
    %491 = arith.truncf %488 : vector<8x8xf32> to vector<8x8xbf16>
    %492 = arith.truncf %489 : vector<8x8xf32> to vector<8x8xbf16>
    %cst_157 = arith.constant dense<0.000000e+00> : vector<8x8xf32>
    %493 = tpu.matmul %491, %492, %cst_157 {dimension_numbers = #tpu.dot_dimension_numbers<[1], [1], [0], [0], [0, 0, 1, 0], [], []>} : vector<8x8xbf16>, vector<8x8xbf16>, vector<8x8xf32> -> vector<8x8xf32>
    %cst_158 = arith.constant 0.353553385 : f32
    %494 = vector.broadcast %cst_158 : f32 to vector<8x8xf32>
    %495 = arith.mulf %493, %494 : vector<8x8xf32>
    %496 = vector.broadcast %479 : vector<1x8xf32> to vector<8x8xf32>
    %497 = arith.addf %495, %496 : vector<8x8xf32>
    %cst_159 = arith.constant dense<0xFF800000> : vector<8xf32>
    %498 = vector.multi_reduction <maximumf>, %497, %cst_159 [1] : vector<8x8xf32> to vector<8xf32>
    %499 = vector.shape_cast %498 : vector<8xf32> to vector<8x1xf32>
    %500 = vector.broadcast %499 : vector<8x1xf32> to vector<8x8xf32>
    %501 = arith.subf %497, %500 : vector<8x8xf32>
    %502 = math.exp %501 : vector<8x8xf32>
    %cst_160 = arith.constant dense<0.000000e+00> : vector<8xf32>
    %503 = vector.multi_reduction <add>, %502, %cst_160 [1] : vector<8x8xf32> to vector<8xf32>
    %504 = vector.shape_cast %503 : vector<8xf32> to vector<8x1xf32>
    %505 = tpu.reciprocal %504 {approx = true} : vector<8x1xf32> -> vector<8x1xf32>
    %506 = vector.broadcast %505 : vector<8x1xf32> to vector<8x8xf32>
    %507 = arith.mulf %502, %506 : vector<8x8xf32>
    %508 = arith.truncf %507 : vector<8x8xf32> to vector<8x8xbf16>
    %509 = arith.truncf %490 : vector<8x8xf32> to vector<8x8xbf16>
    %cst_161 = arith.constant dense<0.000000e+00> : vector<8x8xf32>
    %510 = tpu.matmul %508, %509, %cst_161 {dimension_numbers = #tpu.dot_dimension_numbers<[1], [0], [0], [1], [0, 0, 1, 1], [], []>} : vector<8x8xbf16>, vector<8x8xbf16>, vector<8x8xf32> -> vector<8x8xf32>
    %511 = vector.extract_strided_slice %447 {offsets = [0, 0], sizes = [8, 32], strides = [1, 1]} : vector<32x32xf32> to vector<8x32xf32>
    %512 = arith.truncf %510 : vector<8x8xf32> to vector<8x8xbf16>
    %513 = arith.truncf %511 : vector<8x32xf32> to vector<8x32xbf16>
    %cst_162 = arith.constant dense<0.000000e+00> : vector<8x32xf32>
    %514 = tpu.matmul %512, %513, %cst_162 {dimension_numbers = #tpu.dot_dimension_numbers<[1], [0], [0], [1], [0, 0, 1, 1], [], []>} : vector<8x8xbf16>, vector<8x32xbf16>, vector<8x32xf32> -> vector<8x32xf32>
    %515 = arith.addf %487, %514 : vector<8x32xf32>
    %516 = vector.extract_strided_slice %486 {offsets = [0, 8], sizes = [8, 8], strides = [1, 1]} : vector<8x96xf32> to vector<8x8xf32>
    %517 = vector.extract_strided_slice %486 {offsets = [0, 40], sizes = [8, 8], strides = [1, 1]} : vector<8x96xf32> to vector<8x8xf32>
    %518 = vector.extract_strided_slice %486 {offsets = [0, 72], sizes = [8, 8], strides = [1, 1]} : vector<8x96xf32> to vector<8x8xf32>
    %519 = arith.truncf %516 : vector<8x8xf32> to vector<8x8xbf16>
    %520 = arith.truncf %517 : vector<8x8xf32> to vector<8x8xbf16>
    %cst_163 = arith.constant dense<0.000000e+00> : vector<8x8xf32>
    %521 = tpu.matmul %519, %520, %cst_163 {dimension_numbers = #tpu.dot_dimension_numbers<[1], [1], [0], [0], [0, 0, 1, 0], [], []>} : vector<8x8xbf16>, vector<8x8xbf16>, vector<8x8xf32> -> vector<8x8xf32>
    %cst_164 = arith.constant 0.353553385 : f32
    %522 = vector.broadcast %cst_164 : f32 to vector<8x8xf32>
    %523 = arith.mulf %521, %522 : vector<8x8xf32>
    %524 = vector.broadcast %479 : vector<1x8xf32> to vector<8x8xf32>
    %525 = arith.addf %523, %524 : vector<8x8xf32>
    %cst_165 = arith.constant dense<0xFF800000> : vector<8xf32>
    %526 = vector.multi_reduction <maximumf>, %525, %cst_165 [1] : vector<8x8xf32> to vector<8xf32>
    %527 = vector.shape_cast %526 : vector<8xf32> to vector<8x1xf32>
    %528 = vector.broadcast %527 : vector<8x1xf32> to vector<8x8xf32>
    %529 = arith.subf %525, %528 : vector<8x8xf32>
    %530 = math.exp %529 : vector<8x8xf32>
    %cst_166 = arith.constant dense<0.000000e+00> : vector<8xf32>
    %531 = vector.multi_reduction <add>, %530, %cst_166 [1] : vector<8x8xf32> to vector<8xf32>
    %532 = vector.shape_cast %531 : vector<8xf32> to vector<8x1xf32>
    %533 = tpu.reciprocal %532 {approx = true} : vector<8x1xf32> -> vector<8x1xf32>
    %534 = vector.broadcast %533 : vector<8x1xf32> to vector<8x8xf32>
    %535 = arith.mulf %530, %534 : vector<8x8xf32>
    %536 = arith.truncf %535 : vector<8x8xf32> to vector<8x8xbf16>
    %537 = arith.truncf %518 : vector<8x8xf32> to vector<8x8xbf16>
    %cst_167 = arith.constant dense<0.000000e+00> : vector<8x8xf32>
    %538 = tpu.matmul %536, %537, %cst_167 {dimension_numbers = #tpu.dot_dimension_numbers<[1], [0], [0], [1], [0, 0, 1, 1], [], []>} : vector<8x8xbf16>, vector<8x8xbf16>, vector<8x8xf32> -> vector<8x8xf32>
    %539 = vector.extract_strided_slice %447 {offsets = [8, 0], sizes = [8, 32], strides = [1, 1]} : vector<32x32xf32> to vector<8x32xf32>
    %540 = arith.truncf %538 : vector<8x8xf32> to vector<8x8xbf16>
    %541 = arith.truncf %539 : vector<8x32xf32> to vector<8x32xbf16>
    %cst_168 = arith.constant dense<0.000000e+00> : vector<8x32xf32>
    %542 = tpu.matmul %540, %541, %cst_168 {dimension_numbers = #tpu.dot_dimension_numbers<[1], [0], [0], [1], [0, 0, 1, 1], [], []>} : vector<8x8xbf16>, vector<8x32xbf16>, vector<8x32xf32> -> vector<8x32xf32>
    %543 = arith.addf %515, %542 : vector<8x32xf32>
    %544 = vector.extract_strided_slice %486 {offsets = [0, 16], sizes = [8, 8], strides = [1, 1]} : vector<8x96xf32> to vector<8x8xf32>
    %545 = vector.extract_strided_slice %486 {offsets = [0, 48], sizes = [8, 8], strides = [1, 1]} : vector<8x96xf32> to vector<8x8xf32>
    %546 = vector.extract_strided_slice %486 {offsets = [0, 80], sizes = [8, 8], strides = [1, 1]} : vector<8x96xf32> to vector<8x8xf32>
    %547 = arith.truncf %544 : vector<8x8xf32> to vector<8x8xbf16>
    %548 = arith.truncf %545 : vector<8x8xf32> to vector<8x8xbf16>
    %cst_169 = arith.constant dense<0.000000e+00> : vector<8x8xf32>
    %549 = tpu.matmul %547, %548, %cst_169 {dimension_numbers = #tpu.dot_dimension_numbers<[1], [1], [0], [0], [0, 0, 1, 0], [], []>} : vector<8x8xbf16>, vector<8x8xbf16>, vector<8x8xf32> -> vector<8x8xf32>
    %cst_170 = arith.constant 0.353553385 : f32
    %550 = vector.broadcast %cst_170 : f32 to vector<8x8xf32>
    %551 = arith.mulf %549, %550 : vector<8x8xf32>
    %552 = vector.broadcast %479 : vector<1x8xf32> to vector<8x8xf32>
    %553 = arith.addf %551, %552 : vector<8x8xf32>
    %cst_171 = arith.constant dense<0xFF800000> : vector<8xf32>
    %554 = vector.multi_reduction <maximumf>, %553, %cst_171 [1] : vector<8x8xf32> to vector<8xf32>
    %555 = vector.shape_cast %554 : vector<8xf32> to vector<8x1xf32>
    %556 = vector.broadcast %555 : vector<8x1xf32> to vector<8x8xf32>
    %557 = arith.subf %553, %556 : vector<8x8xf32>
    %558 = math.exp %557 : vector<8x8xf32>
    %cst_172 = arith.constant dense<0.000000e+00> : vector<8xf32>
    %559 = vector.multi_reduction <add>, %558, %cst_172 [1] : vector<8x8xf32> to vector<8xf32>
    %560 = vector.shape_cast %559 : vector<8xf32> to vector<8x1xf32>
    %561 = tpu.reciprocal %560 {approx = true} : vector<8x1xf32> -> vector<8x1xf32>
    %562 = vector.broadcast %561 : vector<8x1xf32> to vector<8x8xf32>
    %563 = arith.mulf %558, %562 : vector<8x8xf32>
    %564 = arith.truncf %563 : vector<8x8xf32> to vector<8x8xbf16>
    %565 = arith.truncf %546 : vector<8x8xf32> to vector<8x8xbf16>
    %cst_173 = arith.constant dense<0.000000e+00> : vector<8x8xf32>
    %566 = tpu.matmul %564, %565, %cst_173 {dimension_numbers = #tpu.dot_dimension_numbers<[1], [0], [0], [1], [0, 0, 1, 1], [], []>} : vector<8x8xbf16>, vector<8x8xbf16>, vector<8x8xf32> -> vector<8x8xf32>
    %567 = vector.extract_strided_slice %447 {offsets = [16, 0], sizes = [8, 32], strides = [1, 1]} : vector<32x32xf32> to vector<8x32xf32>
    %568 = arith.truncf %566 : vector<8x8xf32> to vector<8x8xbf16>
    %569 = arith.truncf %567 : vector<8x32xf32> to vector<8x32xbf16>
    %cst_174 = arith.constant dense<0.000000e+00> : vector<8x32xf32>
    %570 = tpu.matmul %568, %569, %cst_174 {dimension_numbers = #tpu.dot_dimension_numbers<[1], [0], [0], [1], [0, 0, 1, 1], [], []>} : vector<8x8xbf16>, vector<8x32xbf16>, vector<8x32xf32> -> vector<8x32xf32>
    %571 = arith.addf %543, %570 : vector<8x32xf32>
    %572 = vector.extract_strided_slice %486 {offsets = [0, 24], sizes = [8, 8], strides = [1, 1]} : vector<8x96xf32> to vector<8x8xf32>
    %573 = vector.extract_strided_slice %486 {offsets = [0, 56], sizes = [8, 8], strides = [1, 1]} : vector<8x96xf32> to vector<8x8xf32>
    %574 = vector.extract_strided_slice %486 {offsets = [0, 88], sizes = [8, 8], strides = [1, 1]} : vector<8x96xf32> to vector<8x8xf32>
    %575 = arith.truncf %572 : vector<8x8xf32> to vector<8x8xbf16>
    %576 = arith.truncf %573 : vector<8x8xf32> to vector<8x8xbf16>
    %cst_175 = arith.constant dense<0.000000e+00> : vector<8x8xf32>
    %577 = tpu.matmul %575, %576, %cst_175 {dimension_numbers = #tpu.dot_dimension_numbers<[1], [1], [0], [0], [0, 0, 1, 0], [], []>} : vector<8x8xbf16>, vector<8x8xbf16>, vector<8x8xf32> -> vector<8x8xf32>
    %cst_176 = arith.constant 0.353553385 : f32
    %578 = vector.broadcast %cst_176 : f32 to vector<8x8xf32>
    %579 = arith.mulf %577, %578 : vector<8x8xf32>
    %580 = vector.broadcast %479 : vector<1x8xf32> to vector<8x8xf32>
    %581 = arith.addf %579, %580 : vector<8x8xf32>
    %cst_177 = arith.constant dense<0xFF800000> : vector<8xf32>
    %582 = vector.multi_reduction <maximumf>, %581, %cst_177 [1] : vector<8x8xf32> to vector<8xf32>
    %583 = vector.shape_cast %582 : vector<8xf32> to vector<8x1xf32>
    %584 = vector.broadcast %583 : vector<8x1xf32> to vector<8x8xf32>
    %585 = arith.subf %581, %584 : vector<8x8xf32>
    %586 = math.exp %585 : vector<8x8xf32>
    %cst_178 = arith.constant dense<0.000000e+00> : vector<8xf32>
    %587 = vector.multi_reduction <add>, %586, %cst_178 [1] : vector<8x8xf32> to vector<8xf32>
    %588 = vector.shape_cast %587 : vector<8xf32> to vector<8x1xf32>
    %589 = tpu.reciprocal %588 {approx = true} : vector<8x1xf32> -> vector<8x1xf32>
    %590 = vector.broadcast %589 : vector<8x1xf32> to vector<8x8xf32>
    %591 = arith.mulf %586, %590 : vector<8x8xf32>
    %592 = arith.truncf %591 : vector<8x8xf32> to vector<8x8xbf16>
    %593 = arith.truncf %574 : vector<8x8xf32> to vector<8x8xbf16>
    %cst_179 = arith.constant dense<0.000000e+00> : vector<8x8xf32>
    %594 = tpu.matmul %592, %593, %cst_179 {dimension_numbers = #tpu.dot_dimension_numbers<[1], [0], [0], [1], [0, 0, 1, 1], [], []>} : vector<8x8xbf16>, vector<8x8xbf16>, vector<8x8xf32> -> vector<8x8xf32>
    %595 = vector.extract_strided_slice %447 {offsets = [24, 0], sizes = [8, 32], strides = [1, 1]} : vector<32x32xf32> to vector<8x32xf32>
    %596 = arith.truncf %594 : vector<8x8xf32> to vector<8x8xbf16>
    %597 = arith.truncf %595 : vector<8x32xf32> to vector<8x32xbf16>
    %cst_180 = arith.constant dense<0.000000e+00> : vector<8x32xf32>
    %598 = tpu.matmul %596, %597, %cst_180 {dimension_numbers = #tpu.dot_dimension_numbers<[1], [0], [0], [1], [0, 0, 1, 1], [], []>} : vector<8x8xbf16>, vector<8x32xbf16>, vector<8x32xf32> -> vector<8x32xf32>
    %599 = arith.addf %571, %598 : vector<8x32xf32>
    %600 = arith.addf %474, %599 : vector<8x32xf32>
    %c0_181 = arith.constant 0 : index
    %c0_182 = arith.constant 0 : index
    %601 = vector.load %arg16[%c0_181, %c0_182] : memref<1x32xf32, #tpu.memory_space<vmem>>, vector<1x32xf32>
    %602 = vector.broadcast %601 : vector<1x32xf32> to vector<8x32xf32>
    %603 = arith.addf %600, %602 : vector<8x32xf32>
    %c0_183 = arith.constant 0 : index
    %c0_184 = arith.constant 0 : index
    %604 = vector.load %arg17[%c0_183, %c0_184] : memref<1x32xf32, #tpu.memory_space<vmem>>, vector<1x32xf32>
    %c0_185 = arith.constant 0 : index
    %c0_186 = arith.constant 0 : index
    %605 = vector.load %arg18[%c0_185, %c0_186] : memref<1x32xf32, #tpu.memory_space<vmem>>, vector<1x32xf32>
    %cst_187 = arith.constant dense<0.000000e+00> : vector<8xf32>
    %606 = vector.multi_reduction <add>, %603, %cst_187 [1] : vector<8x32xf32> to vector<8xf32>
    %607 = vector.shape_cast %606 : vector<8xf32> to vector<8x1xf32>
    %cst_188 = arith.constant 3.200000e+01 : f32
    %608 = vector.broadcast %cst_188 : f32 to vector<8x1xf32>
    %609 = arith.divf %607, %608 : vector<8x1xf32>
    %610 = vector.broadcast %609 : vector<8x1xf32> to vector<8x32xf32>
    %611 = arith.subf %603, %610 : vector<8x32xf32>
    %612 = arith.mulf %611, %611 : vector<8x32xf32>
    %cst_189 = arith.constant dense<0.000000e+00> : vector<8xf32>
    %613 = vector.multi_reduction <add>, %612, %cst_189 [1] : vector<8x32xf32> to vector<8xf32>
    %614 = vector.shape_cast %613 : vector<8xf32> to vector<8x1xf32>
    %cst_190 = arith.constant 3.200000e+01 : f32
    %615 = vector.broadcast %cst_190 : f32 to vector<8x1xf32>
    %616 = arith.divf %614, %615 : vector<8x1xf32>
    %617 = vector.broadcast %609 : vector<8x1xf32> to vector<8x32xf32>
    %618 = arith.subf %603, %617 : vector<8x32xf32>
    %cst_191 = arith.constant 9.99999996E-13 : f32
    %619 = vector.broadcast %cst_191 : f32 to vector<8x1xf32>
    %620 = arith.addf %616, %619 : vector<8x1xf32>
    %621 = math.rsqrt %620 : vector<8x1xf32>
    %622 = vector.broadcast %621 : vector<8x1xf32> to vector<8x32xf32>
    %623 = arith.mulf %618, %622 : vector<8x32xf32>
    %624 = vector.broadcast %604 : vector<1x32xf32> to vector<8x32xf32>
    %625 = arith.mulf %623, %624 : vector<8x32xf32>
    %626 = vector.broadcast %605 : vector<1x32xf32> to vector<8x32xf32>
    %627 = arith.addf %625, %626 : vector<8x32xf32>
    %c0_192 = arith.constant 0 : index
    %c0_193 = arith.constant 0 : index
    %628 = vector.load %arg19[%c0_192, %c0_193] : memref<32x64xf32, #tpu.memory_space<vmem>>, vector<32x64xf32>
    %629 = arith.truncf %627 : vector<8x32xf32> to vector<8x32xbf16>
    %630 = arith.truncf %628 : vector<32x64xf32> to vector<32x64xbf16>
    %cst_194 = arith.constant dense<0.000000e+00> : vector<8x64xf32>
    %631 = tpu.matmul %629, %630, %cst_194 {dimension_numbers = #tpu.dot_dimension_numbers<[1], [0], [0], [1], [0, 0, 1, 1], [], []>} : vector<8x32xbf16>, vector<32x64xbf16>, vector<8x64xf32> -> vector<8x64xf32>
    %c0_195 = arith.constant 0 : index
    %c0_196 = arith.constant 0 : index
    %632 = vector.load %arg20[%c0_195, %c0_196] : memref<1x64xf32, #tpu.memory_space<vmem>>, vector<1x64xf32>
    %633 = vector.broadcast %632 : vector<1x64xf32> to vector<8x64xf32>
    %634 = arith.addf %631, %633 : vector<8x64xf32>
    %635 = arith.mulf %634, %634 : vector<8x64xf32>
    %636 = arith.mulf %634, %635 : vector<8x64xf32>
    %cst_197 = arith.constant 4.471500e-02 : f32
    %637 = vector.broadcast %cst_197 : f32 to vector<8x64xf32>
    %638 = arith.mulf %637, %636 : vector<8x64xf32>
    %639 = arith.addf %634, %638 : vector<8x64xf32>
    %cst_198 = arith.constant 0.797884583 : f32
    %640 = vector.broadcast %cst_198 : f32 to vector<8x64xf32>
    %641 = arith.mulf %640, %639 : vector<8x64xf32>
    %642 = math.tanh %641 : vector<8x64xf32>
    %cst_199 = arith.constant 1.000000e+00 : f32
    %643 = vector.broadcast %cst_199 : f32 to vector<8x64xf32>
    %644 = arith.addf %643, %642 : vector<8x64xf32>
    %cst_200 = arith.constant 5.000000e-01 : f32
    %645 = vector.broadcast %cst_200 : f32 to vector<8x64xf32>
    %646 = arith.mulf %645, %644 : vector<8x64xf32>
    %647 = arith.mulf %634, %646 : vector<8x64xf32>
    %c0_201 = arith.constant 0 : index
    %c0_202 = arith.constant 0 : index
    %648 = vector.load %arg21[%c0_201, %c0_202] : memref<64x32xf32, #tpu.memory_space<vmem>>, vector<64x32xf32>
    %649 = arith.truncf %647 : vector<8x64xf32> to vector<8x64xbf16>
    %650 = arith.truncf %648 : vector<64x32xf32> to vector<64x32xbf16>
    %cst_203 = arith.constant dense<0.000000e+00> : vector<8x32xf32>
    %651 = tpu.matmul %649, %650, %cst_203 {dimension_numbers = #tpu.dot_dimension_numbers<[1], [0], [0], [1], [0, 0, 1, 1], [], []>} : vector<8x64xbf16>, vector<64x32xbf16>, vector<8x32xf32> -> vector<8x32xf32>
    %c0_204 = arith.constant 0 : index
    %c0_205 = arith.constant 0 : index
    %652 = vector.load %arg22[%c0_204, %c0_205] : memref<1x32xf32, #tpu.memory_space<vmem>>, vector<1x32xf32>
    %653 = vector.broadcast %652 : vector<1x32xf32> to vector<8x32xf32>
    %654 = arith.addf %651, %653 : vector<8x32xf32>
    %655 = arith.addf %627, %654 : vector<8x32xf32>
    %c0_206 = arith.constant 0 : index
    %c0_207 = arith.constant 0 : index
    %656 = vector.load %arg23[%c0_206, %c0_207] : memref<1x32xf32, #tpu.memory_space<vmem>>, vector<1x32xf32>
    %c0_208 = arith.constant 0 : index
    %c0_209 = arith.constant 0 : index
    %657 = vector.load %arg24[%c0_208, %c0_209] : memref<1x32xf32, #tpu.memory_space<vmem>>, vector<1x32xf32>
    %cst_210 = arith.constant dense<0.000000e+00> : vector<8xf32>
    %658 = vector.multi_reduction <add>, %655, %cst_210 [1] : vector<8x32xf32> to vector<8xf32>
    %659 = vector.shape_cast %658 : vector<8xf32> to vector<8x1xf32>
    %cst_211 = arith.constant 3.200000e+01 : f32
    %660 = vector.broadcast %cst_211 : f32 to vector<8x1xf32>
    %661 = arith.divf %659, %660 : vector<8x1xf32>
    %662 = vector.broadcast %661 : vector<8x1xf32> to vector<8x32xf32>
    %663 = arith.subf %655, %662 : vector<8x32xf32>
    %664 = arith.mulf %663, %663 : vector<8x32xf32>
    %cst_212 = arith.constant dense<0.000000e+00> : vector<8xf32>
    %665 = vector.multi_reduction <add>, %664, %cst_212 [1] : vector<8x32xf32> to vector<8xf32>
    %666 = vector.shape_cast %665 : vector<8xf32> to vector<8x1xf32>
    %cst_213 = arith.constant 3.200000e+01 : f32
    %667 = vector.broadcast %cst_213 : f32 to vector<8x1xf32>
    %668 = arith.divf %666, %667 : vector<8x1xf32>
    %669 = vector.broadcast %661 : vector<8x1xf32> to vector<8x32xf32>
    %670 = arith.subf %655, %669 : vector<8x32xf32>
    %cst_214 = arith.constant 9.99999996E-13 : f32
    %671 = vector.broadcast %cst_214 : f32 to vector<8x1xf32>
    %672 = arith.addf %668, %671 : vector<8x1xf32>
    %673 = math.rsqrt %672 : vector<8x1xf32>
    %674 = vector.broadcast %673 : vector<8x1xf32> to vector<8x32xf32>
    %675 = arith.mulf %670, %674 : vector<8x32xf32>
    %676 = vector.broadcast %656 : vector<1x32xf32> to vector<8x32xf32>
    %677 = arith.mulf %675, %676 : vector<8x32xf32>
    %678 = vector.broadcast %657 : vector<1x32xf32> to vector<8x32xf32>
    %679 = arith.addf %677, %678 : vector<8x32xf32>
    %c0_215 = arith.constant 0 : index
    %c0_216 = arith.constant 0 : index
    %c0_217 = arith.constant 0 : index
    %680 = vector.load %arg35[%c0_215, %c0_216, %c0_217] : memref<2x16x32xf32, #tpu.memory_space<vmem>>, vector<1x8x32xf32>
    %681 = vector.shape_cast %680 : vector<1x8x32xf32> to vector<8x32xf32>
    %682 = vector.shape_cast %679 : vector<8x32xf32> to vector<1x8x32xf32>
    tpu.vector_store %arg35[%c0_215, %c0_216, %c0_217], %682 {strides = array<i32>} : memref<2x16x32xf32, #tpu.memory_space<vmem>>, vector<1x8x32xf32>,
    %c0_218 = arith.constant 0 : index
    %c0_219 = arith.constant 0 : index
    %c0_220 = arith.constant 0 : index
    %683 = vector.load %arg35[%c0_218, %c0_219, %c0_220] : memref<2x16x32xf32, #tpu.memory_space<vmem>>, vector<1x16x32xf32>
    %684 = vector.shape_cast %683 : vector<1x16x32xf32> to vector<16x32xf32>
    %c0_221 = arith.constant 0 : index
    %c0_222 = arith.constant 0 : index
    %685 = vector.load %arg25[%c0_221, %c0_222] : memref<16x32xf32, #tpu.memory_space<vmem>>, vector<16x32xf32>
    %686 = arith.addf %684, %685 : vector<16x32xf32>
    %c0_223 = arith.constant 0 : index
    %c0_224 = arith.constant 0 : index
    %687 = vector.load %arg26[%c0_223, %c0_224] : memref<1x32xf32, #tpu.memory_space<vmem>>, vector<1x32xf32>
    %c0_225 = arith.constant 0 : index
    %c0_226 = arith.constant 0 : index
    %688 = vector.load %arg27[%c0_225, %c0_226] : memref<1x32xf32, #tpu.memory_space<vmem>>, vector<1x32xf32>
    %cst_227 = arith.constant dense<0.000000e+00> : vector<16xf32>
    %689 = vector.multi_reduction <add>, %686, %cst_227 [1] : vector<16x32xf32> to vector<16xf32>
    %690 = vector.shape_cast %689 : vector<16xf32> to vector<16x1xf32>
    %cst_228 = arith.constant 3.200000e+01 : f32
    %691 = vector.broadcast %cst_228 : f32 to vector<16x1xf32>
    %692 = arith.divf %690, %691 : vector<16x1xf32>
    %693 = vector.broadcast %692 : vector<16x1xf32> to vector<16x32xf32>
    %694 = arith.subf %686, %693 : vector<16x32xf32>
    %695 = arith.mulf %694, %694 : vector<16x32xf32>
    %cst_229 = arith.constant dense<0.000000e+00> : vector<16xf32>
    %696 = vector.multi_reduction <add>, %695, %cst_229 [1] : vector<16x32xf32> to vector<16xf32>
    %697 = vector.shape_cast %696 : vector<16xf32> to vector<16x1xf32>
    %cst_230 = arith.constant 3.200000e+01 : f32
    %698 = vector.broadcast %cst_230 : f32 to vector<16x1xf32>
    %699 = arith.divf %697, %698 : vector<16x1xf32>
    %700 = vector.broadcast %692 : vector<16x1xf32> to vector<16x32xf32>
    %701 = arith.subf %686, %700 : vector<16x32xf32>
    %cst_231 = arith.constant 9.99999997E-7 : f32
    %702 = vector.broadcast %cst_231 : f32 to vector<16x1xf32>
    %703 = arith.addf %699, %702 : vector<16x1xf32>
    %704 = math.rsqrt %703 : vector<16x1xf32>
    %705 = vector.broadcast %704 : vector<16x1xf32> to vector<16x32xf32>
    %706 = arith.mulf %701, %705 : vector<16x32xf32>
    %707 = vector.broadcast %687 : vector<1x32xf32> to vector<16x32xf32>
    %708 = arith.mulf %706, %707 : vector<16x32xf32>
    %709 = vector.broadcast %688 : vector<1x32xf32> to vector<16x32xf32>
    %710 = arith.addf %708, %709 : vector<16x32xf32>
    %c0_232 = arith.constant 0 : index
    %c0_233 = arith.constant 0 : index
    %711 = vector.load %arg28[%c0_232, %c0_233] : memref<32x1536xf32, #tpu.memory_space<vmem>>, vector<32x1536xf32>
    %712 = arith.truncf %710 : vector<16x32xf32> to vector<16x32xbf16>
    %713 = arith.truncf %711 : vector<32x1536xf32> to vector<32x1536xbf16>
    %cst_234 = arith.constant dense<0.000000e+00> : vector<16x1536xf32>
    %714 = tpu.matmul %712, %713, %cst_234 {dimension_numbers = #tpu.dot_dimension_numbers<[1], [0], [0], [1], [0, 0, 1, 1], [], []>} : vector<16x32xbf16>, vector<32x1536xbf16>, vector<16x1536xf32> -> vector<16x1536xf32>
    %cst_235 = arith.constant 0.000000e+00 : f32
    %715 = vector.broadcast %cst_235 : f32 to vector<16x32xf32>
    %716 = vector.extract_strided_slice %714 {offsets = [0, 0], sizes = [16, 64], strides = [1, 1]} : vector<16x1536xf32> to vector<16x64xf32>
    %717 = vector.extract_strided_slice %714 {offsets = [0, 512], sizes = [16, 64], strides = [1, 1]} : vector<16x1536xf32> to vector<16x64xf32>
    %718 = vector.extract_strided_slice %714 {offsets = [0, 1024], sizes = [16, 64], strides = [1, 1]} : vector<16x1536xf32> to vector<16x64xf32>
    %719 = arith.truncf %716 : vector<16x64xf32> to vector<16x64xbf16>
    %720 = arith.truncf %717 : vector<16x64xf32> to vector<16x64xbf16>
    %cst_236 = arith.constant dense<0.000000e+00> : vector<16x16xf32>
    %721 = tpu.matmul %719, %720, %cst_236 {dimension_numbers = #tpu.dot_dimension_numbers<[1], [1], [0], [0], [0, 0, 1, 0], [], []>} : vector<16x64xbf16>, vector<16x64xbf16>, vector<16x16xf32> -> vector<16x16xf32>
    %cst_237 = arith.constant 1.250000e-01 : f32
    %722 = vector.broadcast %cst_237 : f32 to vector<16x16xf32>
    %723 = arith.mulf %721, %722 : vector<16x16xf32>
    %cst_238 = arith.constant dense<0xFF800000> : vector<16xf32>
    %724 = vector.multi_reduction <maximumf>, %723, %cst_238 [1] : vector<16x16xf32> to vector<16xf32>
    %725 = vector.shape_cast %724 : vector<16xf32> to vector<16x1xf32>
    %726 = vector.broadcast %725 : vector<16x1xf32> to vector<16x16xf32>
    %727 = arith.subf %723, %726 : vector<16x16xf32>
    %728 = math.exp %727 : vector<16x16xf32>
    %cst_239 = arith.constant dense<0.000000e+00> : vector<16xf32>
    %729 = vector.multi_reduction <add>, %728, %cst_239 [1] : vector<16x16xf32> to vector<16xf32>
    %730 = vector.shape_cast %729 : vector<16xf32> to vector<16x1xf32>
    %731 = tpu.reciprocal %730 {approx = true} : vector<16x1xf32> -> vector<16x1xf32>
    %732 = vector.broadcast %731 : vector<16x1xf32> to vector<16x16xf32>
    %733 = arith.mulf %728, %732 : vector<16x16xf32>
    %734 = arith.truncf %733 : vector<16x16xf32> to vector<16x16xbf16>
    %735 = arith.truncf %718 : vector<16x64xf32> to vector<16x64xbf16>
    %cst_240 = arith.constant dense<0.000000e+00> : vector<16x64xf32>
    %736 = tpu.matmul %734, %735, %cst_240 {dimension_numbers = #tpu.dot_dimension_numbers<[1], [0], [0], [1], [0, 0, 1, 1], [], []>} : vector<16x16xbf16>, vector<16x64xbf16>, vector<16x64xf32> -> vector<16x64xf32>
    %737 = vector.extract_strided_slice %448 {offsets = [0, 0], sizes = [64, 32], strides = [1, 1]} : vector<512x32xf32> to vector<64x32xf32>
    %738 = arith.truncf %736 : vector<16x64xf32> to vector<16x64xbf16>
    %739 = arith.truncf %737 : vector<64x32xf32> to vector<64x32xbf16>
    %cst_241 = arith.constant dense<0.000000e+00> : vector<16x32xf32>
    %740 = tpu.matmul %738, %739, %cst_241 {dimension_numbers = #tpu.dot_dimension_numbers<[1], [0], [0], [1], [0, 0, 1, 1], [], []>} : vector<16x64xbf16>, vector<64x32xbf16>, vector<16x32xf32> -> vector<16x32xf32>
    %741 = arith.addf %715, %740 : vector<16x32xf32>
    %742 = vector.extract_strided_slice %714 {offsets = [0, 64], sizes = [16, 64], strides = [1, 1]} : vector<16x1536xf32> to vector<16x64xf32>
    %743 = vector.extract_strided_slice %714 {offsets = [0, 576], sizes = [16, 64], strides = [1, 1]} : vector<16x1536xf32> to vector<16x64xf32>
    %744 = vector.extract_strided_slice %714 {offsets = [0, 1088], sizes = [16, 64], strides = [1, 1]} : vector<16x1536xf32> to vector<16x64xf32>
    %745 = arith.truncf %742 : vector<16x64xf32> to vector<16x64xbf16>
    %746 = arith.truncf %743 : vector<16x64xf32> to vector<16x64xbf16>
    %cst_242 = arith.constant dense<0.000000e+00> : vector<16x16xf32>
    %747 = tpu.matmul %745, %746, %cst_242 {dimension_numbers = #tpu.dot_dimension_numbers<[1], [1], [0], [0], [0, 0, 1, 0], [], []>} : vector<16x64xbf16>, vector<16x64xbf16>, vector<16x16xf32> -> vector<16x16xf32>
    %cst_243 = arith.constant 1.250000e-01 : f32
    %748 = vector.broadcast %cst_243 : f32 to vector<16x16xf32>
    %749 = arith.mulf %747, %748 : vector<16x16xf32>
    %cst_244 = arith.constant dense<0xFF800000> : vector<16xf32>
    %750 = vector.multi_reduction <maximumf>, %749, %cst_244 [1] : vector<16x16xf32> to vector<16xf32>
    %751 = vector.shape_cast %750 : vector<16xf32> to vector<16x1xf32>
    %752 = vector.broadcast %751 : vector<16x1xf32> to vector<16x16xf32>
    %753 = arith.subf %749, %752 : vector<16x16xf32>
    %754 = math.exp %753 : vector<16x16xf32>
    %cst_245 = arith.constant dense<0.000000e+00> : vector<16xf32>
    %755 = vector.multi_reduction <add>, %754, %cst_245 [1] : vector<16x16xf32> to vector<16xf32>
    %756 = vector.shape_cast %755 : vector<16xf32> to vector<16x1xf32>
    %757 = tpu.reciprocal %756 {approx = true} : vector<16x1xf32> -> vector<16x1xf32>
    %758 = vector.broadcast %757 : vector<16x1xf32> to vector<16x16xf32>
    %759 = arith.mulf %754, %758 : vector<16x16xf32>
    %760 = arith.truncf %759 : vector<16x16xf32> to vector<16x16xbf16>
    %761 = arith.truncf %744 : vector<16x64xf32> to vector<16x64xbf16>
    %cst_246 = arith.constant dense<0.000000e+00> : vector<16x64xf32>
    %762 = tpu.matmul %760, %761, %cst_246 {dimension_numbers = #tpu.dot_dimension_numbers<[1], [0], [0], [1], [0, 0, 1, 1], [], []>} : vector<16x16xbf16>, vector<16x64xbf16>, vector<16x64xf32> -> vector<16x64xf32>
    %763 = vector.extract_strided_slice %448 {offsets = [64, 0], sizes = [64, 32], strides = [1, 1]} : vector<512x32xf32> to vector<64x32xf32>
    %764 = arith.truncf %762 : vector<16x64xf32> to vector<16x64xbf16>
    %765 = arith.truncf %763 : vector<64x32xf32> to vector<64x32xbf16>
    %cst_247 = arith.constant dense<0.000000e+00> : vector<16x32xf32>
    %766 = tpu.matmul %764, %765, %cst_247 {dimension_numbers = #tpu.dot_dimension_numbers<[1], [0], [0], [1], [0, 0, 1, 1], [], []>} : vector<16x64xbf16>, vector<64x32xbf16>, vector<16x32xf32> -> vector<16x32xf32>
    %767 = arith.addf %741, %766 : vector<16x32xf32>
    %768 = vector.extract_strided_slice %714 {offsets = [0, 128], sizes = [16, 64], strides = [1, 1]} : vector<16x1536xf32> to vector<16x64xf32>
    %769 = vector.extract_strided_slice %714 {offsets = [0, 640], sizes = [16, 64], strides = [1, 1]} : vector<16x1536xf32> to vector<16x64xf32>
    %770 = vector.extract_strided_slice %714 {offsets = [0, 1152], sizes = [16, 64], strides = [1, 1]} : vector<16x1536xf32> to vector<16x64xf32>
    %771 = arith.truncf %768 : vector<16x64xf32> to vector<16x64xbf16>
    %772 = arith.truncf %769 : vector<16x64xf32> to vector<16x64xbf16>
    %cst_248 = arith.constant dense<0.000000e+00> : vector<16x16xf32>
    %773 = tpu.matmul %771, %772, %cst_248 {dimension_numbers = #tpu.dot_dimension_numbers<[1], [1], [0], [0], [0, 0, 1, 0], [], []>} : vector<16x64xbf16>, vector<16x64xbf16>, vector<16x16xf32> -> vector<16x16xf32>
    %cst_249 = arith.constant 1.250000e-01 : f32
    %774 = vector.broadcast %cst_249 : f32 to vector<16x16xf32>
    %775 = arith.mulf %773, %774 : vector<16x16xf32>
    %cst_250 = arith.constant dense<0xFF800000> : vector<16xf32>
    %776 = vector.multi_reduction <maximumf>, %775, %cst_250 [1] : vector<16x16xf32> to vector<16xf32>
    %777 = vector.shape_cast %776 : vector<16xf32> to vector<16x1xf32>
    %778 = vector.broadcast %777 : vector<16x1xf32> to vector<16x16xf32>
    %779 = arith.subf %775, %778 : vector<16x16xf32>
    %780 = math.exp %779 : vector<16x16xf32>
    %cst_251 = arith.constant dense<0.000000e+00> : vector<16xf32>
    %781 = vector.multi_reduction <add>, %780, %cst_251 [1] : vector<16x16xf32> to vector<16xf32>
    %782 = vector.shape_cast %781 : vector<16xf32> to vector<16x1xf32>
    %783 = tpu.reciprocal %782 {approx = true} : vector<16x1xf32> -> vector<16x1xf32>
    %784 = vector.broadcast %783 : vector<16x1xf32> to vector<16x16xf32>
    %785 = arith.mulf %780, %784 : vector<16x16xf32>
    %786 = arith.truncf %785 : vector<16x16xf32> to vector<16x16xbf16>
    %787 = arith.truncf %770 : vector<16x64xf32> to vector<16x64xbf16>
    %cst_252 = arith.constant dense<0.000000e+00> : vector<16x64xf32>
    %788 = tpu.matmul %786, %787, %cst_252 {dimension_numbers = #tpu.dot_dimension_numbers<[1], [0], [0], [1], [0, 0, 1, 1], [], []>} : vector<16x16xbf16>, vector<16x64xbf16>, vector<16x64xf32> -> vector<16x64xf32>
    %789 = vector.extract_strided_slice %448 {offsets = [128, 0], sizes = [64, 32], strides = [1, 1]} : vector<512x32xf32> to vector<64x32xf32>
    %790 = arith.truncf %788 : vector<16x64xf32> to vector<16x64xbf16>
    %791 = arith.truncf %789 : vector<64x32xf32> to vector<64x32xbf16>
    %cst_253 = arith.constant dense<0.000000e+00> : vector<16x32xf32>
    %792 = tpu.matmul %790, %791, %cst_253 {dimension_numbers = #tpu.dot_dimension_numbers<[1], [0], [0], [1], [0, 0, 1, 1], [], []>} : vector<16x64xbf16>, vector<64x32xbf16>, vector<16x32xf32> -> vector<16x32xf32>
    %793 = arith.addf %767, %792 : vector<16x32xf32>
    %794 = vector.extract_strided_slice %714 {offsets = [0, 192], sizes = [16, 64], strides = [1, 1]} : vector<16x1536xf32> to vector<16x64xf32>
    %795 = vector.extract_strided_slice %714 {offsets = [0, 704], sizes = [16, 64], strides = [1, 1]} : vector<16x1536xf32> to vector<16x64xf32>
    %796 = vector.extract_strided_slice %714 {offsets = [0, 1216], sizes = [16, 64], strides = [1, 1]} : vector<16x1536xf32> to vector<16x64xf32>
    %797 = arith.truncf %794 : vector<16x64xf32> to vector<16x64xbf16>
    %798 = arith.truncf %795 : vector<16x64xf32> to vector<16x64xbf16>
    %cst_254 = arith.constant dense<0.000000e+00> : vector<16x16xf32>
    %799 = tpu.matmul %797, %798, %cst_254 {dimension_numbers = #tpu.dot_dimension_numbers<[1], [1], [0], [0], [0, 0, 1, 0], [], []>} : vector<16x64xbf16>, vector<16x64xbf16>, vector<16x16xf32> -> vector<16x16xf32>
    %cst_255 = arith.constant 1.250000e-01 : f32
    %800 = vector.broadcast %cst_255 : f32 to vector<16x16xf32>
    %801 = arith.mulf %799, %800 : vector<16x16xf32>
    %cst_256 = arith.constant dense<0xFF800000> : vector<16xf32>
    %802 = vector.multi_reduction <maximumf>, %801, %cst_256 [1] : vector<16x16xf32> to vector<16xf32>
    %803 = vector.shape_cast %802 : vector<16xf32> to vector<16x1xf32>
    %804 = vector.broadcast %803 : vector<16x1xf32> to vector<16x16xf32>
    %805 = arith.subf %801, %804 : vector<16x16xf32>
    %806 = math.exp %805 : vector<16x16xf32>
    %cst_257 = arith.constant dense<0.000000e+00> : vector<16xf32>
    %807 = vector.multi_reduction <add>, %806, %cst_257 [1] : vector<16x16xf32> to vector<16xf32>
    %808 = vector.shape_cast %807 : vector<16xf32> to vector<16x1xf32>
    %809 = tpu.reciprocal %808 {approx = true} : vector<16x1xf32> -> vector<16x1xf32>
    %810 = vector.broadcast %809 : vector<16x1xf32> to vector<16x16xf32>
    %811 = arith.mulf %806, %810 : vector<16x16xf32>
    %812 = arith.truncf %811 : vector<16x16xf32> to vector<16x16xbf16>
    %813 = arith.truncf %796 : vector<16x64xf32> to vector<16x64xbf16>
    %cst_258 = arith.constant dense<0.000000e+00> : vector<16x64xf32>
    %814 = tpu.matmul %812, %813, %cst_258 {dimension_numbers = #tpu.dot_dimension_numbers<[1], [0], [0], [1], [0, 0, 1, 1], [], []>} : vector<16x16xbf16>, vector<16x64xbf16>, vector<16x64xf32> -> vector<16x64xf32>
    %815 = vector.extract_strided_slice %448 {offsets = [192, 0], sizes = [64, 32], strides = [1, 1]} : vector<512x32xf32> to vector<64x32xf32>
    %816 = arith.truncf %814 : vector<16x64xf32> to vector<16x64xbf16>
    %817 = arith.truncf %815 : vector<64x32xf32> to vector<64x32xbf16>
    %cst_259 = arith.constant dense<0.000000e+00> : vector<16x32xf32>
    %818 = tpu.matmul %816, %817, %cst_259 {dimension_numbers = #tpu.dot_dimension_numbers<[1], [0], [0], [1], [0, 0, 1, 1], [], []>} : vector<16x64xbf16>, vector<64x32xbf16>, vector<16x32xf32> -> vector<16x32xf32>
    %819 = arith.addf %793, %818 : vector<16x32xf32>
    %820 = vector.extract_strided_slice %714 {offsets = [0, 256], sizes = [16, 64], strides = [1, 1]} : vector<16x1536xf32> to vector<16x64xf32>
    %821 = vector.extract_strided_slice %714 {offsets = [0, 768], sizes = [16, 64], strides = [1, 1]} : vector<16x1536xf32> to vector<16x64xf32>
    %822 = vector.extract_strided_slice %714 {offsets = [0, 1280], sizes = [16, 64], strides = [1, 1]} : vector<16x1536xf32> to vector<16x64xf32>
    %823 = arith.truncf %820 : vector<16x64xf32> to vector<16x64xbf16>
    %824 = arith.truncf %821 : vector<16x64xf32> to vector<16x64xbf16>
    %cst_260 = arith.constant dense<0.000000e+00> : vector<16x16xf32>
    %825 = tpu.matmul %823, %824, %cst_260 {dimension_numbers = #tpu.dot_dimension_numbers<[1], [1], [0], [0], [0, 0, 1, 0], [], []>} : vector<16x64xbf16>, vector<16x64xbf16>, vector<16x16xf32> -> vector<16x16xf32>
    %cst_261 = arith.constant 1.250000e-01 : f32
    %826 = vector.broadcast %cst_261 : f32 to vector<16x16xf32>
    %827 = arith.mulf %825, %826 : vector<16x16xf32>
    %cst_262 = arith.constant dense<0xFF800000> : vector<16xf32>
    %828 = vector.multi_reduction <maximumf>, %827, %cst_262 [1] : vector<16x16xf32> to vector<16xf32>
    %829 = vector.shape_cast %828 : vector<16xf32> to vector<16x1xf32>
    %830 = vector.broadcast %829 : vector<16x1xf32> to vector<16x16xf32>
    %831 = arith.subf %827, %830 : vector<16x16xf32>
    %832 = math.exp %831 : vector<16x16xf32>
    %cst_263 = arith.constant dense<0.000000e+00> : vector<16xf32>
    %833 = vector.multi_reduction <add>, %832, %cst_263 [1] : vector<16x16xf32> to vector<16xf32>
    %834 = vector.shape_cast %833 : vector<16xf32> to vector<16x1xf32>
    %835 = tpu.reciprocal %834 {approx = true} : vector<16x1xf32> -> vector<16x1xf32>
    %836 = vector.broadcast %835 : vector<16x1xf32> to vector<16x16xf32>
    %837 = arith.mulf %832, %836 : vector<16x16xf32>
    %838 = arith.truncf %837 : vector<16x16xf32> to vector<16x16xbf16>
    %839 = arith.truncf %822 : vector<16x64xf32> to vector<16x64xbf16>
    %cst_264 = arith.constant dense<0.000000e+00> : vector<16x64xf32>
    %840 = tpu.matmul %838, %839, %cst_264 {dimension_numbers = #tpu.dot_dimension_numbers<[1], [0], [0], [1], [0, 0, 1, 1], [], []>} : vector<16x16xbf16>, vector<16x64xbf16>, vector<16x64xf32> -> vector<16x64xf32>
    %841 = vector.extract_strided_slice %448 {offsets = [256, 0], sizes = [64, 32], strides = [1, 1]} : vector<512x32xf32> to vector<64x32xf32>
    %842 = arith.truncf %840 : vector<16x64xf32> to vector<16x64xbf16>
    %843 = arith.truncf %841 : vector<64x32xf32> to vector<64x32xbf16>
    %cst_265 = arith.constant dense<0.000000e+00> : vector<16x32xf32>
    %844 = tpu.matmul %842, %843, %cst_265 {dimension_numbers = #tpu.dot_dimension_numbers<[1], [0], [0], [1], [0, 0, 1, 1], [], []>} : vector<16x64xbf16>, vector<64x32xbf16>, vector<16x32xf32> -> vector<16x32xf32>
    %845 = arith.addf %819, %844 : vector<16x32xf32>
    %846 = vector.extract_strided_slice %714 {offsets = [0, 320], sizes = [16, 64], strides = [1, 1]} : vector<16x1536xf32> to vector<16x64xf32>
    %847 = vector.extract_strided_slice %714 {offsets = [0, 832], sizes = [16, 64], strides = [1, 1]} : vector<16x1536xf32> to vector<16x64xf32>
    %848 = vector.extract_strided_slice %714 {offsets = [0, 1344], sizes = [16, 64], strides = [1, 1]} : vector<16x1536xf32> to vector<16x64xf32>
    %849 = arith.truncf %846 : vector<16x64xf32> to vector<16x64xbf16>
    %850 = arith.truncf %847 : vector<16x64xf32> to vector<16x64xbf16>
    %cst_266 = arith.constant dense<0.000000e+00> : vector<16x16xf32>
    %851 = tpu.matmul %849, %850, %cst_266 {dimension_numbers = #tpu.dot_dimension_numbers<[1], [1], [0], [0], [0, 0, 1, 0], [], []>} : vector<16x64xbf16>, vector<16x64xbf16>, vector<16x16xf32> -> vector<16x16xf32>
    %cst_267 = arith.constant 1.250000e-01 : f32
    %852 = vector.broadcast %cst_267 : f32 to vector<16x16xf32>
    %853 = arith.mulf %851, %852 : vector<16x16xf32>
    %cst_268 = arith.constant dense<0xFF800000> : vector<16xf32>
    %854 = vector.multi_reduction <maximumf>, %853, %cst_268 [1] : vector<16x16xf32> to vector<16xf32>
    %855 = vector.shape_cast %854 : vector<16xf32> to vector<16x1xf32>
    %856 = vector.broadcast %855 : vector<16x1xf32> to vector<16x16xf32>
    %857 = arith.subf %853, %856 : vector<16x16xf32>
    %858 = math.exp %857 : vector<16x16xf32>
    %cst_269 = arith.constant dense<0.000000e+00> : vector<16xf32>
    %859 = vector.multi_reduction <add>, %858, %cst_269 [1] : vector<16x16xf32> to vector<16xf32>
    %860 = vector.shape_cast %859 : vector<16xf32> to vector<16x1xf32>
    %861 = tpu.reciprocal %860 {approx = true} : vector<16x1xf32> -> vector<16x1xf32>
    %862 = vector.broadcast %861 : vector<16x1xf32> to vector<16x16xf32>
    %863 = arith.mulf %858, %862 : vector<16x16xf32>
    %864 = arith.truncf %863 : vector<16x16xf32> to vector<16x16xbf16>
    %865 = arith.truncf %848 : vector<16x64xf32> to vector<16x64xbf16>
    %cst_270 = arith.constant dense<0.000000e+00> : vector<16x64xf32>
    %866 = tpu.matmul %864, %865, %cst_270 {dimension_numbers = #tpu.dot_dimension_numbers<[1], [0], [0], [1], [0, 0, 1, 1], [], []>} : vector<16x16xbf16>, vector<16x64xbf16>, vector<16x64xf32> -> vector<16x64xf32>
    %867 = vector.extract_strided_slice %448 {offsets = [320, 0], sizes = [64, 32], strides = [1, 1]} : vector<512x32xf32> to vector<64x32xf32>
    %868 = arith.truncf %866 : vector<16x64xf32> to vector<16x64xbf16>
    %869 = arith.truncf %867 : vector<64x32xf32> to vector<64x32xbf16>
    %cst_271 = arith.constant dense<0.000000e+00> : vector<16x32xf32>
    %870 = tpu.matmul %868, %869, %cst_271 {dimension_numbers = #tpu.dot_dimension_numbers<[1], [0], [0], [1], [0, 0, 1, 1], [], []>} : vector<16x64xbf16>, vector<64x32xbf16>, vector<16x32xf32> -> vector<16x32xf32>
    %871 = arith.addf %845, %870 : vector<16x32xf32>
    %872 = vector.extract_strided_slice %714 {offsets = [0, 384], sizes = [16, 64], strides = [1, 1]} : vector<16x1536xf32> to vector<16x64xf32>
    %873 = vector.extract_strided_slice %714 {offsets = [0, 896], sizes = [16, 64], strides = [1, 1]} : vector<16x1536xf32> to vector<16x64xf32>
    %874 = vector.extract_strided_slice %714 {offsets = [0, 1408], sizes = [16, 64], strides = [1, 1]} : vector<16x1536xf32> to vector<16x64xf32>
    %875 = arith.truncf %872 : vector<16x64xf32> to vector<16x64xbf16>
    %876 = arith.truncf %873 : vector<16x64xf32> to vector<16x64xbf16>
    %cst_272 = arith.constant dense<0.000000e+00> : vector<16x16xf32>
    %877 = tpu.matmul %875, %876, %cst_272 {dimension_numbers = #tpu.dot_dimension_numbers<[1], [1], [0], [0], [0, 0, 1, 0], [], []>} : vector<16x64xbf16>, vector<16x64xbf16>, vector<16x16xf32> -> vector<16x16xf32>
    %cst_273 = arith.constant 1.250000e-01 : f32
    %878 = vector.broadcast %cst_273 : f32 to vector<16x16xf32>
    %879 = arith.mulf %877, %878 : vector<16x16xf32>
    %cst_274 = arith.constant dense<0xFF800000> : vector<16xf32>
    %880 = vector.multi_reduction <maximumf>, %879, %cst_274 [1] : vector<16x16xf32> to vector<16xf32>
    %881 = vector.shape_cast %880 : vector<16xf32> to vector<16x1xf32>
    %882 = vector.broadcast %881 : vector<16x1xf32> to vector<16x16xf32>
    %883 = arith.subf %879, %882 : vector<16x16xf32>
    %884 = math.exp %883 : vector<16x16xf32>
    %cst_275 = arith.constant dense<0.000000e+00> : vector<16xf32>
    %885 = vector.multi_reduction <add>, %884, %cst_275 [1] : vector<16x16xf32> to vector<16xf32>
    %886 = vector.shape_cast %885 : vector<16xf32> to vector<16x1xf32>
    %887 = tpu.reciprocal %886 {approx = true} : vector<16x1xf32> -> vector<16x1xf32>
    %888 = vector.broadcast %887 : vector<16x1xf32> to vector<16x16xf32>
    %889 = arith.mulf %884, %888 : vector<16x16xf32>
    %890 = arith.truncf %889 : vector<16x16xf32> to vector<16x16xbf16>
    %891 = arith.truncf %874 : vector<16x64xf32> to vector<16x64xbf16>
    %cst_276 = arith.constant dense<0.000000e+00> : vector<16x64xf32>
    %892 = tpu.matmul %890, %891, %cst_276 {dimension_numbers = #tpu.dot_dimension_numbers<[1], [0], [0], [1], [0, 0, 1, 1], [], []>} : vector<16x16xbf16>, vector<16x64xbf16>, vector<16x64xf32> -> vector<16x64xf32>
    %893 = vector.extract_strided_slice %448 {offsets = [384, 0], sizes = [64, 32], strides = [1, 1]} : vector<512x32xf32> to vector<64x32xf32>
    %894 = arith.truncf %892 : vector<16x64xf32> to vector<16x64xbf16>
    %895 = arith.truncf %893 : vector<64x32xf32> to vector<64x32xbf16>
    %cst_277 = arith.constant dense<0.000000e+00> : vector<16x32xf32>
    %896 = tpu.matmul %894, %895, %cst_277 {dimension_numbers = #tpu.dot_dimension_numbers<[1], [0], [0], [1], [0, 0, 1, 1], [], []>} : vector<16x64xbf16>, vector<64x32xbf16>, vector<16x32xf32> -> vector<16x32xf32>
    %897 = arith.addf %871, %896 : vector<16x32xf32>
    %898 = vector.extract_strided_slice %714 {offsets = [0, 448], sizes = [16, 64], strides = [1, 1]} : vector<16x1536xf32> to vector<16x64xf32>
    %899 = vector.extract_strided_slice %714 {offsets = [0, 960], sizes = [16, 64], strides = [1, 1]} : vector<16x1536xf32> to vector<16x64xf32>
    %900 = vector.extract_strided_slice %714 {offsets = [0, 1472], sizes = [16, 64], strides = [1, 1]} : vector<16x1536xf32> to vector<16x64xf32>
    %901 = arith.truncf %898 : vector<16x64xf32> to vector<16x64xbf16>
    %902 = arith.truncf %899 : vector<16x64xf32> to vector<16x64xbf16>
    %cst_278 = arith.constant dense<0.000000e+00> : vector<16x16xf32>
    %903 = tpu.matmul %901, %902, %cst_278 {dimension_numbers = #tpu.dot_dimension_numbers<[1], [1], [0], [0], [0, 0, 1, 0], [], []>} : vector<16x64xbf16>, vector<16x64xbf16>, vector<16x16xf32> -> vector<16x16xf32>
    %cst_279 = arith.constant 1.250000e-01 : f32
    %904 = vector.broadcast %cst_279 : f32 to vector<16x16xf32>
    %905 = arith.mulf %903, %904 : vector<16x16xf32>
    %cst_280 = arith.constant dense<0xFF800000> : vector<16xf32>
    %906 = vector.multi_reduction <maximumf>, %905, %cst_280 [1] : vector<16x16xf32> to vector<16xf32>
    %907 = vector.shape_cast %906 : vector<16xf32> to vector<16x1xf32>
    %908 = vector.broadcast %907 : vector<16x1xf32> to vector<16x16xf32>
    %909 = arith.subf %905, %908 : vector<16x16xf32>
    %910 = math.exp %909 : vector<16x16xf32>
    %cst_281 = arith.constant dense<0.000000e+00> : vector<16xf32>
    %911 = vector.multi_reduction <add>, %910, %cst_281 [1] : vector<16x16xf32> to vector<16xf32>
    %912 = vector.shape_cast %911 : vector<16xf32> to vector<16x1xf32>
    %913 = tpu.reciprocal %912 {approx = true} : vector<16x1xf32> -> vector<16x1xf32>
    %914 = vector.broadcast %913 : vector<16x1xf32> to vector<16x16xf32>
    %915 = arith.mulf %910, %914 : vector<16x16xf32>
    %916 = arith.truncf %915 : vector<16x16xf32> to vector<16x16xbf16>
    %917 = arith.truncf %900 : vector<16x64xf32> to vector<16x64xbf16>
    %cst_282 = arith.constant dense<0.000000e+00> : vector<16x64xf32>
    %918 = tpu.matmul %916, %917, %cst_282 {dimension_numbers = #tpu.dot_dimension_numbers<[1], [0], [0], [1], [0, 0, 1, 1], [], []>} : vector<16x16xbf16>, vector<16x64xbf16>, vector<16x64xf32> -> vector<16x64xf32>
    %919 = vector.extract_strided_slice %448 {offsets = [448, 0], sizes = [64, 32], strides = [1, 1]} : vector<512x32xf32> to vector<64x32xf32>
    %920 = arith.truncf %918 : vector<16x64xf32> to vector<16x64xbf16>
    %921 = arith.truncf %919 : vector<64x32xf32> to vector<64x32xbf16>
    %cst_283 = arith.constant dense<0.000000e+00> : vector<16x32xf32>
    %922 = tpu.matmul %920, %921, %cst_283 {dimension_numbers = #tpu.dot_dimension_numbers<[1], [0], [0], [1], [0, 0, 1, 1], [], []>} : vector<16x64xbf16>, vector<64x32xbf16>, vector<16x32xf32> -> vector<16x32xf32>
    %923 = arith.addf %897, %922 : vector<16x32xf32>
    %924 = arith.addf %923, %710 : vector<16x32xf32>
    %c0_284 = arith.constant 0 : index
    %c0_285 = arith.constant 0 : index
    %925 = vector.load %arg30[%c0_284, %c0_285] : memref<1x32xf32, #tpu.memory_space<vmem>>, vector<1x32xf32>
    %c0_286 = arith.constant 0 : index
    %c0_287 = arith.constant 0 : index
    %926 = vector.load %arg31[%c0_286, %c0_287] : memref<1x32xf32, #tpu.memory_space<vmem>>, vector<1x32xf32>
    %cst_288 = arith.constant dense<0.000000e+00> : vector<16xf32>
    %927 = vector.multi_reduction <add>, %924, %cst_288 [1] : vector<16x32xf32> to vector<16xf32>
    %928 = vector.shape_cast %927 : vector<16xf32> to vector<16x1xf32>
    %cst_289 = arith.constant 3.200000e+01 : f32
    %929 = vector.broadcast %cst_289 : f32 to vector<16x1xf32>
    %930 = arith.divf %928, %929 : vector<16x1xf32>
    %931 = vector.broadcast %930 : vector<16x1xf32> to vector<16x32xf32>
    %932 = arith.subf %924, %931 : vector<16x32xf32>
    %933 = arith.mulf %932, %932 : vector<16x32xf32>
    %cst_290 = arith.constant dense<0.000000e+00> : vector<16xf32>
    %934 = vector.multi_reduction <add>, %933, %cst_290 [1] : vector<16x32xf32> to vector<16xf32>
    %935 = vector.shape_cast %934 : vector<16xf32> to vector<16x1xf32>
    %cst_291 = arith.constant 3.200000e+01 : f32
    %936 = vector.broadcast %cst_291 : f32 to vector<16x1xf32>
    %937 = arith.divf %935, %936 : vector<16x1xf32>
    %938 = vector.broadcast %930 : vector<16x1xf32> to vector<16x32xf32>
    %939 = arith.subf %924, %938 : vector<16x32xf32>
    %cst_292 = arith.constant 9.99999997E-7 : f32
    %940 = vector.broadcast %cst_292 : f32 to vector<16x1xf32>
    %941 = arith.addf %937, %940 : vector<16x1xf32>
    %942 = math.rsqrt %941 : vector<16x1xf32>
    %943 = vector.broadcast %942 : vector<16x1xf32> to vector<16x32xf32>
    %944 = arith.mulf %939, %943 : vector<16x32xf32>
    %945 = vector.broadcast %925 : vector<1x32xf32> to vector<16x32xf32>
    %946 = arith.mulf %944, %945 : vector<16x32xf32>
    %947 = vector.broadcast %926 : vector<1x32xf32> to vector<16x32xf32>
    %948 = arith.addf %946, %947 : vector<16x32xf32>
    %cst_293 = arith.constant dense<0.000000e+00> : vector<32xf32>
    %949 = vector.multi_reduction <add>, %948, %cst_293 [0] : vector<16x32xf32> to vector<32xf32>
    %950 = vector.shape_cast %949 : vector<32xf32> to vector<1x32xf32>
    %cst_294 = arith.constant 0.000000e+00 : f32
    %951 = vector.broadcast %cst_294 : f32 to vector<1x32xf32>
    %952 = arith.maximumf %950, %951 : vector<1x32xf32>
    %c0_295 = arith.constant 0 : index
    %c0_296 = arith.constant 0 : index
    %953 = vector.load %arg32[%c0_295, %c0_296] : memref<32x128xf32, #tpu.memory_space<vmem>>, vector<32x128xf32>
    %954 = arith.truncf %952 : vector<1x32xf32> to vector<1x32xbf16>
    %955 = arith.truncf %953 : vector<32x128xf32> to vector<32x128xbf16>
    %cst_297 = arith.constant dense<0.000000e+00> : vector<1x128xf32>
    %956 = tpu.matmul %954, %955, %cst_297 {dimension_numbers = #tpu.dot_dimension_numbers<[1], [0], [0], [1], [0, 0, 1, 1], [], []>} : vector<1x32xbf16>, vector<32x128xbf16>, vector<1x128xf32> -> vector<1x128xf32>
    %c0_298 = arith.constant 0 : index
    %c0_299 = arith.constant 0 : index
    %957 = vector.load %arg33[%c0_298, %c0_299] : memref<1x128xf32, #tpu.memory_space<vmem>>, vector<1x128xf32>
    %958 = arith.addf %956, %957 : vector<1x128xf32>
    %c0_300 = arith.constant 0 : index
    %c0_301 = arith.constant 0 : index
    %959 = vector.load %arg34[%c0_300, %c0_301] : memref<2x128xf32, #tpu.memory_space<vmem>>, vector<1x128xf32>
    tpu.vector_store %arg34[%c0_300, %c0_301], %958 {strides = array<i32>} : memref<2x128xf32, #tpu.memory_space<vmem>>, vector<1x128xf32>,
    %c1_302 = arith.constant 1 : index
    %c0_303 = arith.constant 0 : index
    %c0_304 = arith.constant 0 : index
    %960 = vector.load %arg0[%c1_302, %c0_303, %c0_304] : memref<2x8x32xf32, #tpu.memory_space<vmem>>, vector<1x8x32xf32>
    %961 = vector.shape_cast %960 : vector<1x8x32xf32> to vector<8x32xf32>
    %c0_305 = arith.constant 0 : index
    %c0_306 = arith.constant 0 : index
    %962 = vector.load %arg11[%c0_305, %c0_306] : memref<1x32xf32, #tpu.memory_space<vmem>>, vector<1x32xf32>
    %c0_307 = arith.constant 0 : index
    %c0_308 = arith.constant 0 : index
    %963 = vector.load %arg12[%c0_307, %c0_308] : memref<1x32xf32, #tpu.memory_space<vmem>>, vector<1x32xf32>
    %cst_309 = arith.constant dense<0.000000e+00> : vector<8xf32>
    %964 = vector.multi_reduction <add>, %961, %cst_309 [1] : vector<8x32xf32> to vector<8xf32>
    %965 = vector.shape_cast %964 : vector<8xf32> to vector<8x1xf32>
    %cst_310 = arith.constant 3.200000e+01 : f32
    %966 = vector.broadcast %cst_310 : f32 to vector<8x1xf32>
    %967 = arith.divf %965, %966 : vector<8x1xf32>
    %968 = vector.broadcast %967 : vector<8x1xf32> to vector<8x32xf32>
    %969 = arith.subf %961, %968 : vector<8x32xf32>
    %970 = arith.mulf %969, %969 : vector<8x32xf32>
    %cst_311 = arith.constant dense<0.000000e+00> : vector<8xf32>
    %971 = vector.multi_reduction <add>, %970, %cst_311 [1] : vector<8x32xf32> to vector<8xf32>
    %972 = vector.shape_cast %971 : vector<8xf32> to vector<8x1xf32>
    %cst_312 = arith.constant 3.200000e+01 : f32
    %973 = vector.broadcast %cst_312 : f32 to vector<8x1xf32>
    %974 = arith.divf %972, %973 : vector<8x1xf32>
    %975 = vector.broadcast %967 : vector<8x1xf32> to vector<8x32xf32>
    %976 = arith.subf %961, %975 : vector<8x32xf32>
    %cst_313 = arith.constant 9.99999996E-13 : f32
    %977 = vector.broadcast %cst_313 : f32 to vector<8x1xf32>
    %978 = arith.addf %974, %977 : vector<8x1xf32>
    %979 = math.rsqrt %978 : vector<8x1xf32>
    %980 = vector.broadcast %979 : vector<8x1xf32> to vector<8x32xf32>
    %981 = arith.mulf %976, %980 : vector<8x32xf32>
    %982 = vector.broadcast %962 : vector<1x32xf32> to vector<8x32xf32>
    %983 = arith.mulf %981, %982 : vector<8x32xf32>
    %984 = vector.broadcast %963 : vector<1x32xf32> to vector<8x32xf32>
    %985 = arith.addf %983, %984 : vector<8x32xf32>
    %c1_314 = arith.constant 1 : index
    %c0_315 = arith.constant 0 : index
    %986 = vector.load %arg1[%c1_314, %c0_315] : memref<2x8xf32, #tpu.memory_space<vmem>>, vector<1x8xf32>
    %cst_316 = arith.constant 1.000000e+00 : f32
    %987 = vector.broadcast %cst_316 : f32 to vector<1x8xf32>
    %988 = arith.subf %987, %986 : vector<1x8xf32>
    %cst_317 = arith.constant -1.000000e+09 : f32
    %989 = vector.broadcast %cst_317 : f32 to vector<1x8xf32>
    %990 = arith.mulf %988, %989 : vector<1x8xf32>
    %c0_318 = arith.constant 0 : index
    %c0_319 = arith.constant 0 : index
    %991 = vector.load %arg13[%c0_318, %c0_319] : memref<32x96xf32, #tpu.memory_space<vmem>>, vector<32x96xf32>
    %992 = arith.truncf %985 : vector<8x32xf32> to vector<8x32xbf16>
    %993 = arith.truncf %991 : vector<32x96xf32> to vector<32x96xbf16>
    %cst_320 = arith.constant dense<0.000000e+00> : vector<8x96xf32>
    %994 = tpu.matmul %992, %993, %cst_320 {dimension_numbers = #tpu.dot_dimension_numbers<[1], [0], [0], [1], [0, 0, 1, 1], [], []>} : vector<8x32xbf16>, vector<32x96xbf16>, vector<8x96xf32> -> vector<8x96xf32>
    %c0_321 = arith.constant 0 : index
    %c0_322 = arith.constant 0 : index
    %995 = vector.load %arg14[%c0_321, %c0_322] : memref<1x96xf32, #tpu.memory_space<vmem>>, vector<1x96xf32>
    %996 = vector.broadcast %995 : vector<1x96xf32> to vector<8x96xf32>
    %997 = arith.addf %994, %996 : vector<8x96xf32>
    %cst_323 = arith.constant 0.000000e+00 : f32
    %998 = vector.broadcast %cst_323 : f32 to vector<8x32xf32>
    %999 = vector.extract_strided_slice %997 {offsets = [0, 0], sizes = [8, 8], strides = [1, 1]} : vector<8x96xf32> to vector<8x8xf32>
    %1000 = vector.extract_strided_slice %997 {offsets = [0, 32], sizes = [8, 8], strides = [1, 1]} : vector<8x96xf32> to vector<8x8xf32>
    %1001 = vector.extract_strided_slice %997 {offsets = [0, 64], sizes = [8, 8], strides = [1, 1]} : vector<8x96xf32> to vector<8x8xf32>
    %1002 = arith.truncf %999 : vector<8x8xf32> to vector<8x8xbf16>
    %1003 = arith.truncf %1000 : vector<8x8xf32> to vector<8x8xbf16>
    %cst_324 = arith.constant dense<0.000000e+00> : vector<8x8xf32>
    %1004 = tpu.matmul %1002, %1003, %cst_324 {dimension_numbers = #tpu.dot_dimension_numbers<[1], [1], [0], [0], [0, 0, 1, 0], [], []>} : vector<8x8xbf16>, vector<8x8xbf16>, vector<8x8xf32> -> vector<8x8xf32>
    %cst_325 = arith.constant 0.353553385 : f32
    %1005 = vector.broadcast %cst_325 : f32 to vector<8x8xf32>
    %1006 = arith.mulf %1004, %1005 : vector<8x8xf32>
    %1007 = vector.broadcast %990 : vector<1x8xf32> to vector<8x8xf32>
    %1008 = arith.addf %1006, %1007 : vector<8x8xf32>
    %cst_326 = arith.constant dense<0xFF800000> : vector<8xf32>
    %1009 = vector.multi_reduction <maximumf>, %1008, %cst_326 [1] : vector<8x8xf32> to vector<8xf32>
    %1010 = vector.shape_cast %1009 : vector<8xf32> to vector<8x1xf32>
    %1011 = vector.broadcast %1010 : vector<8x1xf32> to vector<8x8xf32>
    %1012 = arith.subf %1008, %1011 : vector<8x8xf32>
    %1013 = math.exp %1012 : vector<8x8xf32>
    %cst_327 = arith.constant dense<0.000000e+00> : vector<8xf32>
    %1014 = vector.multi_reduction <add>, %1013, %cst_327 [1] : vector<8x8xf32> to vector<8xf32>
    %1015 = vector.shape_cast %1014 : vector<8xf32> to vector<8x1xf32>
    %1016 = tpu.reciprocal %1015 {approx = true} : vector<8x1xf32> -> vector<8x1xf32>
    %1017 = vector.broadcast %1016 : vector<8x1xf32> to vector<8x8xf32>
    %1018 = arith.mulf %1013, %1017 : vector<8x8xf32>
    %1019 = arith.truncf %1018 : vector<8x8xf32> to vector<8x8xbf16>
    %1020 = arith.truncf %1001 : vector<8x8xf32> to vector<8x8xbf16>
    %cst_328 = arith.constant dense<0.000000e+00> : vector<8x8xf32>
    %1021 = tpu.matmul %1019, %1020, %cst_328 {dimension_numbers = #tpu.dot_dimension_numbers<[1], [0], [0], [1], [0, 0, 1, 1], [], []>} : vector<8x8xbf16>, vector<8x8xbf16>, vector<8x8xf32> -> vector<8x8xf32>
    %1022 = vector.extract_strided_slice %447 {offsets = [0, 0], sizes = [8, 32], strides = [1, 1]} : vector<32x32xf32> to vector<8x32xf32>
    %1023 = arith.truncf %1021 : vector<8x8xf32> to vector<8x8xbf16>
    %1024 = arith.truncf %1022 : vector<8x32xf32> to vector<8x32xbf16>
    %cst_329 = arith.constant dense<0.000000e+00> : vector<8x32xf32>
    %1025 = tpu.matmul %1023, %1024, %cst_329 {dimension_numbers = #tpu.dot_dimension_numbers<[1], [0], [0], [1], [0, 0, 1, 1], [], []>} : vector<8x8xbf16>, vector<8x32xbf16>, vector<8x32xf32> -> vector<8x32xf32>
    %1026 = arith.addf %998, %1025 : vector<8x32xf32>
    %1027 = vector.extract_strided_slice %997 {offsets = [0, 8], sizes = [8, 8], strides = [1, 1]} : vector<8x96xf32> to vector<8x8xf32>
    %1028 = vector.extract_strided_slice %997 {offsets = [0, 40], sizes = [8, 8], strides = [1, 1]} : vector<8x96xf32> to vector<8x8xf32>
    %1029 = vector.extract_strided_slice %997 {offsets = [0, 72], sizes = [8, 8], strides = [1, 1]} : vector<8x96xf32> to vector<8x8xf32>
    %1030 = arith.truncf %1027 : vector<8x8xf32> to vector<8x8xbf16>
    %1031 = arith.truncf %1028 : vector<8x8xf32> to vector<8x8xbf16>
    %cst_330 = arith.constant dense<0.000000e+00> : vector<8x8xf32>
    %1032 = tpu.matmul %1030, %1031, %cst_330 {dimension_numbers = #tpu.dot_dimension_numbers<[1], [1], [0], [0], [0, 0, 1, 0], [], []>} : vector<8x8xbf16>, vector<8x8xbf16>, vector<8x8xf32> -> vector<8x8xf32>
    %cst_331 = arith.constant 0.353553385 : f32
    %1033 = vector.broadcast %cst_331 : f32 to vector<8x8xf32>
    %1034 = arith.mulf %1032, %1033 : vector<8x8xf32>
    %1035 = vector.broadcast %990 : vector<1x8xf32> to vector<8x8xf32>
    %1036 = arith.addf %1034, %1035 : vector<8x8xf32>
    %cst_332 = arith.constant dense<0xFF800000> : vector<8xf32>
    %1037 = vector.multi_reduction <maximumf>, %1036, %cst_332 [1] : vector<8x8xf32> to vector<8xf32>
    %1038 = vector.shape_cast %1037 : vector<8xf32> to vector<8x1xf32>
    %1039 = vector.broadcast %1038 : vector<8x1xf32> to vector<8x8xf32>
    %1040 = arith.subf %1036, %1039 : vector<8x8xf32>
    %1041 = math.exp %1040 : vector<8x8xf32>
    %cst_333 = arith.constant dense<0.000000e+00> : vector<8xf32>
    %1042 = vector.multi_reduction <add>, %1041, %cst_333 [1] : vector<8x8xf32> to vector<8xf32>
    %1043 = vector.shape_cast %1042 : vector<8xf32> to vector<8x1xf32>
    %1044 = tpu.reciprocal %1043 {approx = true} : vector<8x1xf32> -> vector<8x1xf32>
    %1045 = vector.broadcast %1044 : vector<8x1xf32> to vector<8x8xf32>
    %1046 = arith.mulf %1041, %1045 : vector<8x8xf32>
    %1047 = arith.truncf %1046 : vector<8x8xf32> to vector<8x8xbf16>
    %1048 = arith.truncf %1029 : vector<8x8xf32> to vector<8x8xbf16>
    %cst_334 = arith.constant dense<0.000000e+00> : vector<8x8xf32>
    %1049 = tpu.matmul %1047, %1048, %cst_334 {dimension_numbers = #tpu.dot_dimension_numbers<[1], [0], [0], [1], [0, 0, 1, 1], [], []>} : vector<8x8xbf16>, vector<8x8xbf16>, vector<8x8xf32> -> vector<8x8xf32>
    %1050 = vector.extract_strided_slice %447 {offsets = [8, 0], sizes = [8, 32], strides = [1, 1]} : vector<32x32xf32> to vector<8x32xf32>
    %1051 = arith.truncf %1049 : vector<8x8xf32> to vector<8x8xbf16>
    %1052 = arith.truncf %1050 : vector<8x32xf32> to vector<8x32xbf16>
    %cst_335 = arith.constant dense<0.000000e+00> : vector<8x32xf32>
    %1053 = tpu.matmul %1051, %1052, %cst_335 {dimension_numbers = #tpu.dot_dimension_numbers<[1], [0], [0], [1], [0, 0, 1, 1], [], []>} : vector<8x8xbf16>, vector<8x32xbf16>, vector<8x32xf32> -> vector<8x32xf32>
    %1054 = arith.addf %1026, %1053 : vector<8x32xf32>
    %1055 = vector.extract_strided_slice %997 {offsets = [0, 16], sizes = [8, 8], strides = [1, 1]} : vector<8x96xf32> to vector<8x8xf32>
    %1056 = vector.extract_strided_slice %997 {offsets = [0, 48], sizes = [8, 8], strides = [1, 1]} : vector<8x96xf32> to vector<8x8xf32>
    %1057 = vector.extract_strided_slice %997 {offsets = [0, 80], sizes = [8, 8], strides = [1, 1]} : vector<8x96xf32> to vector<8x8xf32>
    %1058 = arith.truncf %1055 : vector<8x8xf32> to vector<8x8xbf16>
    %1059 = arith.truncf %1056 : vector<8x8xf32> to vector<8x8xbf16>
    %cst_336 = arith.constant dense<0.000000e+00> : vector<8x8xf32>
    %1060 = tpu.matmul %1058, %1059, %cst_336 {dimension_numbers = #tpu.dot_dimension_numbers<[1], [1], [0], [0], [0, 0, 1, 0], [], []>} : vector<8x8xbf16>, vector<8x8xbf16>, vector<8x8xf32> -> vector<8x8xf32>
    %cst_337 = arith.constant 0.353553385 : f32
    %1061 = vector.broadcast %cst_337 : f32 to vector<8x8xf32>
    %1062 = arith.mulf %1060, %1061 : vector<8x8xf32>
    %1063 = vector.broadcast %990 : vector<1x8xf32> to vector<8x8xf32>
    %1064 = arith.addf %1062, %1063 : vector<8x8xf32>
    %cst_338 = arith.constant dense<0xFF800000> : vector<8xf32>
    %1065 = vector.multi_reduction <maximumf>, %1064, %cst_338 [1] : vector<8x8xf32> to vector<8xf32>
    %1066 = vector.shape_cast %1065 : vector<8xf32> to vector<8x1xf32>
    %1067 = vector.broadcast %1066 : vector<8x1xf32> to vector<8x8xf32>
    %1068 = arith.subf %1064, %1067 : vector<8x8xf32>
    %1069 = math.exp %1068 : vector<8x8xf32>
    %cst_339 = arith.constant dense<0.000000e+00> : vector<8xf32>
    %1070 = vector.multi_reduction <add>, %1069, %cst_339 [1] : vector<8x8xf32> to vector<8xf32>
    %1071 = vector.shape_cast %1070 : vector<8xf32> to vector<8x1xf32>
    %1072 = tpu.reciprocal %1071 {approx = true} : vector<8x1xf32> -> vector<8x1xf32>
    %1073 = vector.broadcast %1072 : vector<8x1xf32> to vector<8x8xf32>
    %1074 = arith.mulf %1069, %1073 : vector<8x8xf32>
    %1075 = arith.truncf %1074 : vector<8x8xf32> to vector<8x8xbf16>
    %1076 = arith.truncf %1057 : vector<8x8xf32> to vector<8x8xbf16>
    %cst_340 = arith.constant dense<0.000000e+00> : vector<8x8xf32>
    %1077 = tpu.matmul %1075, %1076, %cst_340 {dimension_numbers = #tpu.dot_dimension_numbers<[1], [0], [0], [1], [0, 0, 1, 1], [], []>} : vector<8x8xbf16>, vector<8x8xbf16>, vector<8x8xf32> -> vector<8x8xf32>
    %1078 = vector.extract_strided_slice %447 {offsets = [16, 0], sizes = [8, 32], strides = [1, 1]} : vector<32x32xf32> to vector<8x32xf32>
    %1079 = arith.truncf %1077 : vector<8x8xf32> to vector<8x8xbf16>
    %1080 = arith.truncf %1078 : vector<8x32xf32> to vector<8x32xbf16>
    %cst_341 = arith.constant dense<0.000000e+00> : vector<8x32xf32>
    %1081 = tpu.matmul %1079, %1080, %cst_341 {dimension_numbers = #tpu.dot_dimension_numbers<[1], [0], [0], [1], [0, 0, 1, 1], [], []>} : vector<8x8xbf16>, vector<8x32xbf16>, vector<8x32xf32> -> vector<8x32xf32>
    %1082 = arith.addf %1054, %1081 : vector<8x32xf32>
    %1083 = vector.extract_strided_slice %997 {offsets = [0, 24], sizes = [8, 8], strides = [1, 1]} : vector<8x96xf32> to vector<8x8xf32>
    %1084 = vector.extract_strided_slice %997 {offsets = [0, 56], sizes = [8, 8], strides = [1, 1]} : vector<8x96xf32> to vector<8x8xf32>
    %1085 = vector.extract_strided_slice %997 {offsets = [0, 88], sizes = [8, 8], strides = [1, 1]} : vector<8x96xf32> to vector<8x8xf32>
    %1086 = arith.truncf %1083 : vector<8x8xf32> to vector<8x8xbf16>
    %1087 = arith.truncf %1084 : vector<8x8xf32> to vector<8x8xbf16>
    %cst_342 = arith.constant dense<0.000000e+00> : vector<8x8xf32>
    %1088 = tpu.matmul %1086, %1087, %cst_342 {dimension_numbers = #tpu.dot_dimension_numbers<[1], [1], [0], [0], [0, 0, 1, 0], [], []>} : vector<8x8xbf16>, vector<8x8xbf16>, vector<8x8xf32> -> vector<8x8xf32>
    %cst_343 = arith.constant 0.353553385 : f32
    %1089 = vector.broadcast %cst_343 : f32 to vector<8x8xf32>
    %1090 = arith.mulf %1088, %1089 : vector<8x8xf32>
    %1091 = vector.broadcast %990 : vector<1x8xf32> to vector<8x8xf32>
    %1092 = arith.addf %1090, %1091 : vector<8x8xf32>
    %cst_344 = arith.constant dense<0xFF800000> : vector<8xf32>
    %1093 = vector.multi_reduction <maximumf>, %1092, %cst_344 [1] : vector<8x8xf32> to vector<8xf32>
    %1094 = vector.shape_cast %1093 : vector<8xf32> to vector<8x1xf32>
    %1095 = vector.broadcast %1094 : vector<8x1xf32> to vector<8x8xf32>
    %1096 = arith.subf %1092, %1095 : vector<8x8xf32>
    %1097 = math.exp %1096 : vector<8x8xf32>
    %cst_345 = arith.constant dense<0.000000e+00> : vector<8xf32>
    %1098 = vector.multi_reduction <add>, %1097, %cst_345 [1] : vector<8x8xf32> to vector<8xf32>
    %1099 = vector.shape_cast %1098 : vector<8xf32> to vector<8x1xf32>
    %1100 = tpu.reciprocal %1099 {approx = true} : vector<8x1xf32> -> vector<8x1xf32>
    %1101 = vector.broadcast %1100 : vector<8x1xf32> to vector<8x8xf32>
    %1102 = arith.mulf %1097, %1101 : vector<8x8xf32>
    %1103 = arith.truncf %1102 : vector<8x8xf32> to vector<8x8xbf16>
    %1104 = arith.truncf %1085 : vector<8x8xf32> to vector<8x8xbf16>
    %cst_346 = arith.constant dense<0.000000e+00> : vector<8x8xf32>
    %1105 = tpu.matmul %1103, %1104, %cst_346 {dimension_numbers = #tpu.dot_dimension_numbers<[1], [0], [0], [1], [0, 0, 1, 1], [], []>} : vector<8x8xbf16>, vector<8x8xbf16>, vector<8x8xf32> -> vector<8x8xf32>
    %1106 = vector.extract_strided_slice %447 {offsets = [24, 0], sizes = [8, 32], strides = [1, 1]} : vector<32x32xf32> to vector<8x32xf32>
    %1107 = arith.truncf %1105 : vector<8x8xf32> to vector<8x8xbf16>
    %1108 = arith.truncf %1106 : vector<8x32xf32> to vector<8x32xbf16>
    %cst_347 = arith.constant dense<0.000000e+00> : vector<8x32xf32>
    %1109 = tpu.matmul %1107, %1108, %cst_347 {dimension_numbers = #tpu.dot_dimension_numbers<[1], [0], [0], [1], [0, 0, 1, 1], [], []>} : vector<8x8xbf16>, vector<8x32xbf16>, vector<8x32xf32> -> vector<8x32xf32>
    %1110 = arith.addf %1082, %1109 : vector<8x32xf32>
    %1111 = arith.addf %985, %1110 : vector<8x32xf32>
    %c0_348 = arith.constant 0 : index
    %c0_349 = arith.constant 0 : index
    %1112 = vector.load %arg16[%c0_348, %c0_349] : memref<1x32xf32, #tpu.memory_space<vmem>>, vector<1x32xf32>
    %1113 = vector.broadcast %1112 : vector<1x32xf32> to vector<8x32xf32>
    %1114 = arith.addf %1111, %1113 : vector<8x32xf32>
    %c0_350 = arith.constant 0 : index
    %c0_351 = arith.constant 0 : index
    %1115 = vector.load %arg17[%c0_350, %c0_351] : memref<1x32xf32, #tpu.memory_space<vmem>>, vector<1x32xf32>
    %c0_352 = arith.constant 0 : index
    %c0_353 = arith.constant 0 : index
    %1116 = vector.load %arg18[%c0_352, %c0_353] : memref<1x32xf32, #tpu.memory_space<vmem>>, vector<1x32xf32>
    %cst_354 = arith.constant dense<0.000000e+00> : vector<8xf32>
    %1117 = vector.multi_reduction <add>, %1114, %cst_354 [1] : vector<8x32xf32> to vector<8xf32>
    %1118 = vector.shape_cast %1117 : vector<8xf32> to vector<8x1xf32>
    %cst_355 = arith.constant 3.200000e+01 : f32
    %1119 = vector.broadcast %cst_355 : f32 to vector<8x1xf32>
    %1120 = arith.divf %1118, %1119 : vector<8x1xf32>
    %1121 = vector.broadcast %1120 : vector<8x1xf32> to vector<8x32xf32>
    %1122 = arith.subf %1114, %1121 : vector<8x32xf32>
    %1123 = arith.mulf %1122, %1122 : vector<8x32xf32>
    %cst_356 = arith.constant dense<0.000000e+00> : vector<8xf32>
    %1124 = vector.multi_reduction <add>, %1123, %cst_356 [1] : vector<8x32xf32> to vector<8xf32>
    %1125 = vector.shape_cast %1124 : vector<8xf32> to vector<8x1xf32>
    %cst_357 = arith.constant 3.200000e+01 : f32
    %1126 = vector.broadcast %cst_357 : f32 to vector<8x1xf32>
    %1127 = arith.divf %1125, %1126 : vector<8x1xf32>
    %1128 = vector.broadcast %1120 : vector<8x1xf32> to vector<8x32xf32>
    %1129 = arith.subf %1114, %1128 : vector<8x32xf32>
    %cst_358 = arith.constant 9.99999996E-13 : f32
    %1130 = vector.broadcast %cst_358 : f32 to vector<8x1xf32>
    %1131 = arith.addf %1127, %1130 : vector<8x1xf32>
    %1132 = math.rsqrt %1131 : vector<8x1xf32>
    %1133 = vector.broadcast %1132 : vector<8x1xf32> to vector<8x32xf32>
    %1134 = arith.mulf %1129, %1133 : vector<8x32xf32>
    %1135 = vector.broadcast %1115 : vector<1x32xf32> to vector<8x32xf32>
    %1136 = arith.mulf %1134, %1135 : vector<8x32xf32>
    %1137 = vector.broadcast %1116 : vector<1x32xf32> to vector<8x32xf32>
    %1138 = arith.addf %1136, %1137 : vector<8x32xf32>
    %c0_359 = arith.constant 0 : index
    %c0_360 = arith.constant 0 : index
    %1139 = vector.load %arg19[%c0_359, %c0_360] : memref<32x64xf32, #tpu.memory_space<vmem>>, vector<32x64xf32>
    %1140 = arith.truncf %1138 : vector<8x32xf32> to vector<8x32xbf16>
    %1141 = arith.truncf %1139 : vector<32x64xf32> to vector<32x64xbf16>
    %cst_361 = arith.constant dense<0.000000e+00> : vector<8x64xf32>
    %1142 = tpu.matmul %1140, %1141, %cst_361 {dimension_numbers = #tpu.dot_dimension_numbers<[1], [0], [0], [1], [0, 0, 1, 1], [], []>} : vector<8x32xbf16>, vector<32x64xbf16>, vector<8x64xf32> -> vector<8x64xf32>
    %c0_362 = arith.constant 0 : index
    %c0_363 = arith.constant 0 : index
    %1143 = vector.load %arg20[%c0_362, %c0_363] : memref<1x64xf32, #tpu.memory_space<vmem>>, vector<1x64xf32>
    %1144 = vector.broadcast %1143 : vector<1x64xf32> to vector<8x64xf32>
    %1145 = arith.addf %1142, %1144 : vector<8x64xf32>
    %1146 = arith.mulf %1145, %1145 : vector<8x64xf32>
    %1147 = arith.mulf %1145, %1146 : vector<8x64xf32>
    %cst_364 = arith.constant 4.471500e-02 : f32
    %1148 = vector.broadcast %cst_364 : f32 to vector<8x64xf32>
    %1149 = arith.mulf %1148, %1147 : vector<8x64xf32>
    %1150 = arith.addf %1145, %1149 : vector<8x64xf32>
    %cst_365 = arith.constant 0.797884583 : f32
    %1151 = vector.broadcast %cst_365 : f32 to vector<8x64xf32>
    %1152 = arith.mulf %1151, %1150 : vector<8x64xf32>
    %1153 = math.tanh %1152 : vector<8x64xf32>
    %cst_366 = arith.constant 1.000000e+00 : f32
    %1154 = vector.broadcast %cst_366 : f32 to vector<8x64xf32>
    %1155 = arith.addf %1154, %1153 : vector<8x64xf32>
    %cst_367 = arith.constant 5.000000e-01 : f32
    %1156 = vector.broadcast %cst_367 : f32 to vector<8x64xf32>
    %1157 = arith.mulf %1156, %1155 : vector<8x64xf32>
    %1158 = arith.mulf %1145, %1157 : vector<8x64xf32>
    %c0_368 = arith.constant 0 : index
    %c0_369 = arith.constant 0 : index
    %1159 = vector.load %arg21[%c0_368, %c0_369] : memref<64x32xf32, #tpu.memory_space<vmem>>, vector<64x32xf32>
    %1160 = arith.truncf %1158 : vector<8x64xf32> to vector<8x64xbf16>
    %1161 = arith.truncf %1159 : vector<64x32xf32> to vector<64x32xbf16>
    %cst_370 = arith.constant dense<0.000000e+00> : vector<8x32xf32>
    %1162 = tpu.matmul %1160, %1161, %cst_370 {dimension_numbers = #tpu.dot_dimension_numbers<[1], [0], [0], [1], [0, 0, 1, 1], [], []>} : vector<8x64xbf16>, vector<64x32xbf16>, vector<8x32xf32> -> vector<8x32xf32>
    %c0_371 = arith.constant 0 : index
    %c0_372 = arith.constant 0 : index
    %1163 = vector.load %arg22[%c0_371, %c0_372] : memref<1x32xf32, #tpu.memory_space<vmem>>, vector<1x32xf32>
    %1164 = vector.broadcast %1163 : vector<1x32xf32> to vector<8x32xf32>
    %1165 = arith.addf %1162, %1164 : vector<8x32xf32>
    %1166 = arith.addf %1138, %1165 : vector<8x32xf32>
    %c0_373 = arith.constant 0 : index
    %c0_374 = arith.constant 0 : index
    %1167 = vector.load %arg23[%c0_373, %c0_374] : memref<1x32xf32, #tpu.memory_space<vmem>>, vector<1x32xf32>
    %c0_375 = arith.constant 0 : index
    %c0_376 = arith.constant 0 : index
    %1168 = vector.load %arg24[%c0_375, %c0_376] : memref<1x32xf32, #tpu.memory_space<vmem>>, vector<1x32xf32>
    %cst_377 = arith.constant dense<0.000000e+00> : vector<8xf32>
    %1169 = vector.multi_reduction <add>, %1166, %cst_377 [1] : vector<8x32xf32> to vector<8xf32>
    %1170 = vector.shape_cast %1169 : vector<8xf32> to vector<8x1xf32>
    %cst_378 = arith.constant 3.200000e+01 : f32
    %1171 = vector.broadcast %cst_378 : f32 to vector<8x1xf32>
    %1172 = arith.divf %1170, %1171 : vector<8x1xf32>
    %1173 = vector.broadcast %1172 : vector<8x1xf32> to vector<8x32xf32>
    %1174 = arith.subf %1166, %1173 : vector<8x32xf32>
    %1175 = arith.mulf %1174, %1174 : vector<8x32xf32>
    %cst_379 = arith.constant dense<0.000000e+00> : vector<8xf32>
    %1176 = vector.multi_reduction <add>, %1175, %cst_379 [1] : vector<8x32xf32> to vector<8xf32>
    %1177 = vector.shape_cast %1176 : vector<8xf32> to vector<8x1xf32>
    %cst_380 = arith.constant 3.200000e+01 : f32
    %1178 = vector.broadcast %cst_380 : f32 to vector<8x1xf32>
    %1179 = arith.divf %1177, %1178 : vector<8x1xf32>
    %1180 = vector.broadcast %1172 : vector<8x1xf32> to vector<8x32xf32>
    %1181 = arith.subf %1166, %1180 : vector<8x32xf32>
    %cst_381 = arith.constant 9.99999996E-13 : f32
    %1182 = vector.broadcast %cst_381 : f32 to vector<8x1xf32>
    %1183 = arith.addf %1179, %1182 : vector<8x1xf32>
    %1184 = math.rsqrt %1183 : vector<8x1xf32>
    %1185 = vector.broadcast %1184 : vector<8x1xf32> to vector<8x32xf32>
    %1186 = arith.mulf %1181, %1185 : vector<8x32xf32>
    %1187 = vector.broadcast %1167 : vector<1x32xf32> to vector<8x32xf32>
    %1188 = arith.mulf %1186, %1187 : vector<8x32xf32>
    %1189 = vector.broadcast %1168 : vector<1x32xf32> to vector<8x32xf32>
    %1190 = arith.addf %1188, %1189 : vector<8x32xf32>
    %c1_382 = arith.constant 1 : index
    %c0_383 = arith.constant 0 : index
    %c0_384 = arith.constant 0 : index
    %1191 = vector.load %arg35[%c1_382, %c0_383, %c0_384] : memref<2x16x32xf32, #tpu.memory_space<vmem>>, vector<1x8x32xf32>
    %1192 = vector.shape_cast %1191 : vector<1x8x32xf32> to vector<8x32xf32>
    %1193 = vector.shape_cast %1190 : vector<8x32xf32> to vector<1x8x32xf32>
    tpu.vector_store %arg35[%c1_382, %c0_383, %c0_384], %1193 {strides = array<i32>} : memref<2x16x32xf32, #tpu.memory_space<vmem>>, vector<1x8x32xf32>,
    %c1_385 = arith.constant 1 : index
    %c0_386 = arith.constant 0 : index
    %c0_387 = arith.constant 0 : index
    %1194 = vector.load %arg35[%c1_385, %c0_386, %c0_387] : memref<2x16x32xf32, #tpu.memory_space<vmem>>, vector<1x16x32xf32>
    %1195 = vector.shape_cast %1194 : vector<1x16x32xf32> to vector<16x32xf32>
    %c0_388 = arith.constant 0 : index
    %c0_389 = arith.constant 0 : index
    %1196 = vector.load %arg25[%c0_388, %c0_389] : memref<16x32xf32, #tpu.memory_space<vmem>>, vector<16x32xf32>
    %1197 = arith.addf %1195, %1196 : vector<16x32xf32>
    %c0_390 = arith.constant 0 : index
    %c0_391 = arith.constant 0 : index
    %1198 = vector.load %arg26[%c0_390, %c0_391] : memref<1x32xf32, #tpu.memory_space<vmem>>, vector<1x32xf32>
    %c0_392 = arith.constant 0 : index
    %c0_393 = arith.constant 0 : index
    %1199 = vector.load %arg27[%c0_392, %c0_393] : memref<1x32xf32, #tpu.memory_space<vmem>>, vector<1x32xf32>
    %cst_394 = arith.constant dense<0.000000e+00> : vector<16xf32>
    %1200 = vector.multi_reduction <add>, %1197, %cst_394 [1] : vector<16x32xf32> to vector<16xf32>
    %1201 = vector.shape_cast %1200 : vector<16xf32> to vector<16x1xf32>
    %cst_395 = arith.constant 3.200000e+01 : f32
    %1202 = vector.broadcast %cst_395 : f32 to vector<16x1xf32>
    %1203 = arith.divf %1201, %1202 : vector<16x1xf32>
    %1204 = vector.broadcast %1203 : vector<16x1xf32> to vector<16x32xf32>
    %1205 = arith.subf %1197, %1204 : vector<16x32xf32>
    %1206 = arith.mulf %1205, %1205 : vector<16x32xf32>
    %cst_396 = arith.constant dense<0.000000e+00> : vector<16xf32>
    %1207 = vector.multi_reduction <add>, %1206, %cst_396 [1] : vector<16x32xf32> to vector<16xf32>
    %1208 = vector.shape_cast %1207 : vector<16xf32> to vector<16x1xf32>
    %cst_397 = arith.constant 3.200000e+01 : f32
    %1209 = vector.broadcast %cst_397 : f32 to vector<16x1xf32>
    %1210 = arith.divf %1208, %1209 : vector<16x1xf32>
    %1211 = vector.broadcast %1203 : vector<16x1xf32> to vector<16x32xf32>
    %1212 = arith.subf %1197, %1211 : vector<16x32xf32>
    %cst_398 = arith.constant 9.99999997E-7 : f32
    %1213 = vector.broadcast %cst_398 : f32 to vector<16x1xf32>
    %1214 = arith.addf %1210, %1213 : vector<16x1xf32>
    %1215 = math.rsqrt %1214 : vector<16x1xf32>
    %1216 = vector.broadcast %1215 : vector<16x1xf32> to vector<16x32xf32>
    %1217 = arith.mulf %1212, %1216 : vector<16x32xf32>
    %1218 = vector.broadcast %1198 : vector<1x32xf32> to vector<16x32xf32>
    %1219 = arith.mulf %1217, %1218 : vector<16x32xf32>
    %1220 = vector.broadcast %1199 : vector<1x32xf32> to vector<16x32xf32>
    %1221 = arith.addf %1219, %1220 : vector<16x32xf32>
    %c0_399 = arith.constant 0 : index
    %c0_400 = arith.constant 0 : index
    %1222 = vector.load %arg28[%c0_399, %c0_400] : memref<32x1536xf32, #tpu.memory_space<vmem>>, vector<32x1536xf32>
    %1223 = arith.truncf %1221 : vector<16x32xf32> to vector<16x32xbf16>
    %1224 = arith.truncf %1222 : vector<32x1536xf32> to vector<32x1536xbf16>
    %cst_401 = arith.constant dense<0.000000e+00> : vector<16x1536xf32>
    %1225 = tpu.matmul %1223, %1224, %cst_401 {dimension_numbers = #tpu.dot_dimension_numbers<[1], [0], [0], [1], [0, 0, 1, 1], [], []>} : vector<16x32xbf16>, vector<32x1536xbf16>, vector<16x1536xf32> -> vector<16x1536xf32>
    %cst_402 = arith.constant 0.000000e+00 : f32
    %1226 = vector.broadcast %cst_402 : f32 to vector<16x32xf32>
    %1227 = vector.extract_strided_slice %1225 {offsets = [0, 0], sizes = [16, 64], strides = [1, 1]} : vector<16x1536xf32> to vector<16x64xf32>
    %1228 = vector.extract_strided_slice %1225 {offsets = [0, 512], sizes = [16, 64], strides = [1, 1]} : vector<16x1536xf32> to vector<16x64xf32>
    %1229 = vector.extract_strided_slice %1225 {offsets = [0, 1024], sizes = [16, 64], strides = [1, 1]} : vector<16x1536xf32> to vector<16x64xf32>
    %1230 = arith.truncf %1227 : vector<16x64xf32> to vector<16x64xbf16>
    %1231 = arith.truncf %1228 : vector<16x64xf32> to vector<16x64xbf16>
    %cst_403 = arith.constant dense<0.000000e+00> : vector<16x16xf32>
    %1232 = tpu.matmul %1230, %1231, %cst_403 {dimension_numbers = #tpu.dot_dimension_numbers<[1], [1], [0], [0], [0, 0, 1, 0], [], []>} : vector<16x64xbf16>, vector<16x64xbf16>, vector<16x16xf32> -> vector<16x16xf32>
    %cst_404 = arith.constant 1.250000e-01 : f32
    %1233 = vector.broadcast %cst_404 : f32 to vector<16x16xf32>
    %1234 = arith.mulf %1232, %1233 : vector<16x16xf32>
    %cst_405 = arith.constant dense<0xFF800000> : vector<16xf32>
    %1235 = vector.multi_reduction <maximumf>, %1234, %cst_405 [1] : vector<16x16xf32> to vector<16xf32>
    %1236 = vector.shape_cast %1235 : vector<16xf32> to vector<16x1xf32>
    %1237 = vector.broadcast %1236 : vector<16x1xf32> to vector<16x16xf32>
    %1238 = arith.subf %1234, %1237 : vector<16x16xf32>
    %1239 = math.exp %1238 : vector<16x16xf32>
    %cst_406 = arith.constant dense<0.000000e+00> : vector<16xf32>
    %1240 = vector.multi_reduction <add>, %1239, %cst_406 [1] : vector<16x16xf32> to vector<16xf32>
    %1241 = vector.shape_cast %1240 : vector<16xf32> to vector<16x1xf32>
    %1242 = tpu.reciprocal %1241 {approx = true} : vector<16x1xf32> -> vector<16x1xf32>
    %1243 = vector.broadcast %1242 : vector<16x1xf32> to vector<16x16xf32>
    %1244 = arith.mulf %1239, %1243 : vector<16x16xf32>
    %1245 = arith.truncf %1244 : vector<16x16xf32> to vector<16x16xbf16>
    %1246 = arith.truncf %1229 : vector<16x64xf32> to vector<16x64xbf16>
    %cst_407 = arith.constant dense<0.000000e+00> : vector<16x64xf32>
    %1247 = tpu.matmul %1245, %1246, %cst_407 {dimension_numbers = #tpu.dot_dimension_numbers<[1], [0], [0], [1], [0, 0, 1, 1], [], []>} : vector<16x16xbf16>, vector<16x64xbf16>, vector<16x64xf32> -> vector<16x64xf32>
    %1248 = vector.extract_strided_slice %448 {offsets = [0, 0], sizes = [64, 32], strides = [1, 1]} : vector<512x32xf32> to vector<64x32xf32>
    %1249 = arith.truncf %1247 : vector<16x64xf32> to vector<16x64xbf16>
    %1250 = arith.truncf %1248 : vector<64x32xf32> to vector<64x32xbf16>
    %cst_408 = arith.constant dense<0.000000e+00> : vector<16x32xf32>
    %1251 = tpu.matmul %1249, %1250, %cst_408 {dimension_numbers = #tpu.dot_dimension_numbers<[1], [0], [0], [1], [0, 0, 1, 1], [], []>} : vector<16x64xbf16>, vector<64x32xbf16>, vector<16x32xf32> -> vector<16x32xf32>
    %1252 = arith.addf %1226, %1251 : vector<16x32xf32>
    %1253 = vector.extract_strided_slice %1225 {offsets = [0, 64], sizes = [16, 64], strides = [1, 1]} : vector<16x1536xf32> to vector<16x64xf32>
    %1254 = vector.extract_strided_slice %1225 {offsets = [0, 576], sizes = [16, 64], strides = [1, 1]} : vector<16x1536xf32> to vector<16x64xf32>
    %1255 = vector.extract_strided_slice %1225 {offsets = [0, 1088], sizes = [16, 64], strides = [1, 1]} : vector<16x1536xf32> to vector<16x64xf32>
    %1256 = arith.truncf %1253 : vector<16x64xf32> to vector<16x64xbf16>
    %1257 = arith.truncf %1254 : vector<16x64xf32> to vector<16x64xbf16>
    %cst_409 = arith.constant dense<0.000000e+00> : vector<16x16xf32>
    %1258 = tpu.matmul %1256, %1257, %cst_409 {dimension_numbers = #tpu.dot_dimension_numbers<[1], [1], [0], [0], [0, 0, 1, 0], [], []>} : vector<16x64xbf16>, vector<16x64xbf16>, vector<16x16xf32> -> vector<16x16xf32>
    %cst_410 = arith.constant 1.250000e-01 : f32
    %1259 = vector.broadcast %cst_410 : f32 to vector<16x16xf32>
    %1260 = arith.mulf %1258, %1259 : vector<16x16xf32>
    %cst_411 = arith.constant dense<0xFF800000> : vector<16xf32>
    %1261 = vector.multi_reduction <maximumf>, %1260, %cst_411 [1] : vector<16x16xf32> to vector<16xf32>
    %1262 = vector.shape_cast %1261 : vector<16xf32> to vector<16x1xf32>
    %1263 = vector.broadcast %1262 : vector<16x1xf32> to vector<16x16xf32>
    %1264 = arith.subf %1260, %1263 : vector<16x16xf32>
    %1265 = math.exp %1264 : vector<16x16xf32>
    %cst_412 = arith.constant dense<0.000000e+00> : vector<16xf32>
    %1266 = vector.multi_reduction <add>, %1265, %cst_412 [1] : vector<16x16xf32> to vector<16xf32>
    %1267 = vector.shape_cast %1266 : vector<16xf32> to vector<16x1xf32>
    %1268 = tpu.reciprocal %1267 {approx = true} : vector<16x1xf32> -> vector<16x1xf32>
    %1269 = vector.broadcast %1268 : vector<16x1xf32> to vector<16x16xf32>
    %1270 = arith.mulf %1265, %1269 : vector<16x16xf32>
    %1271 = arith.truncf %1270 : vector<16x16xf32> to vector<16x16xbf16>
    %1272 = arith.truncf %1255 : vector<16x64xf32> to vector<16x64xbf16>
    %cst_413 = arith.constant dense<0.000000e+00> : vector<16x64xf32>
    %1273 = tpu.matmul %1271, %1272, %cst_413 {dimension_numbers = #tpu.dot_dimension_numbers<[1], [0], [0], [1], [0, 0, 1, 1], [], []>} : vector<16x16xbf16>, vector<16x64xbf16>, vector<16x64xf32> -> vector<16x64xf32>
    %1274 = vector.extract_strided_slice %448 {offsets = [64, 0], sizes = [64, 32], strides = [1, 1]} : vector<512x32xf32> to vector<64x32xf32>
    %1275 = arith.truncf %1273 : vector<16x64xf32> to vector<16x64xbf16>
    %1276 = arith.truncf %1274 : vector<64x32xf32> to vector<64x32xbf16>
    %cst_414 = arith.constant dense<0.000000e+00> : vector<16x32xf32>
    %1277 = tpu.matmul %1275, %1276, %cst_414 {dimension_numbers = #tpu.dot_dimension_numbers<[1], [0], [0], [1], [0, 0, 1, 1], [], []>} : vector<16x64xbf16>, vector<64x32xbf16>, vector<16x32xf32> -> vector<16x32xf32>
    %1278 = arith.addf %1252, %1277 : vector<16x32xf32>
    %1279 = vector.extract_strided_slice %1225 {offsets = [0, 128], sizes = [16, 64], strides = [1, 1]} : vector<16x1536xf32> to vector<16x64xf32>
    %1280 = vector.extract_strided_slice %1225 {offsets = [0, 640], sizes = [16, 64], strides = [1, 1]} : vector<16x1536xf32> to vector<16x64xf32>
    %1281 = vector.extract_strided_slice %1225 {offsets = [0, 1152], sizes = [16, 64], strides = [1, 1]} : vector<16x1536xf32> to vector<16x64xf32>
    %1282 = arith.truncf %1279 : vector<16x64xf32> to vector<16x64xbf16>
    %1283 = arith.truncf %1280 : vector<16x64xf32> to vector<16x64xbf16>
    %cst_415 = arith.constant dense<0.000000e+00> : vector<16x16xf32>
    %1284 = tpu.matmul %1282, %1283, %cst_415 {dimension_numbers = #tpu.dot_dimension_numbers<[1], [1], [0], [0], [0, 0, 1, 0], [], []>} : vector<16x64xbf16>, vector<16x64xbf16>, vector<16x16xf32> -> vector<16x16xf32>
    %cst_416 = arith.constant 1.250000e-01 : f32
    %1285 = vector.broadcast %cst_416 : f32 to vector<16x16xf32>
    %1286 = arith.mulf %1284, %1285 : vector<16x16xf32>
    %cst_417 = arith.constant dense<0xFF800000> : vector<16xf32>
    %1287 = vector.multi_reduction <maximumf>, %1286, %cst_417 [1] : vector<16x16xf32> to vector<16xf32>
    %1288 = vector.shape_cast %1287 : vector<16xf32> to vector<16x1xf32>
    %1289 = vector.broadcast %1288 : vector<16x1xf32> to vector<16x16xf32>
    %1290 = arith.subf %1286, %1289 : vector<16x16xf32>
    %1291 = math.exp %1290 : vector<16x16xf32>
    %cst_418 = arith.constant dense<0.000000e+00> : vector<16xf32>
    %1292 = vector.multi_reduction <add>, %1291, %cst_418 [1] : vector<16x16xf32> to vector<16xf32>
    %1293 = vector.shape_cast %1292 : vector<16xf32> to vector<16x1xf32>
    %1294 = tpu.reciprocal %1293 {approx = true} : vector<16x1xf32> -> vector<16x1xf32>
    %1295 = vector.broadcast %1294 : vector<16x1xf32> to vector<16x16xf32>
    %1296 = arith.mulf %1291, %1295 : vector<16x16xf32>
    %1297 = arith.truncf %1296 : vector<16x16xf32> to vector<16x16xbf16>
    %1298 = arith.truncf %1281 : vector<16x64xf32> to vector<16x64xbf16>
    %cst_419 = arith.constant dense<0.000000e+00> : vector<16x64xf32>
    %1299 = tpu.matmul %1297, %1298, %cst_419 {dimension_numbers = #tpu.dot_dimension_numbers<[1], [0], [0], [1], [0, 0, 1, 1], [], []>} : vector<16x16xbf16>, vector<16x64xbf16>, vector<16x64xf32> -> vector<16x64xf32>
    %1300 = vector.extract_strided_slice %448 {offsets = [128, 0], sizes = [64, 32], strides = [1, 1]} : vector<512x32xf32> to vector<64x32xf32>
    %1301 = arith.truncf %1299 : vector<16x64xf32> to vector<16x64xbf16>
    %1302 = arith.truncf %1300 : vector<64x32xf32> to vector<64x32xbf16>
    %cst_420 = arith.constant dense<0.000000e+00> : vector<16x32xf32>
    %1303 = tpu.matmul %1301, %1302, %cst_420 {dimension_numbers = #tpu.dot_dimension_numbers<[1], [0], [0], [1], [0, 0, 1, 1], [], []>} : vector<16x64xbf16>, vector<64x32xbf16>, vector<16x32xf32> -> vector<16x32xf32>
    %1304 = arith.addf %1278, %1303 : vector<16x32xf32>
    %1305 = vector.extract_strided_slice %1225 {offsets = [0, 192], sizes = [16, 64], strides = [1, 1]} : vector<16x1536xf32> to vector<16x64xf32>
    %1306 = vector.extract_strided_slice %1225 {offsets = [0, 704], sizes = [16, 64], strides = [1, 1]} : vector<16x1536xf32> to vector<16x64xf32>
    %1307 = vector.extract_strided_slice %1225 {offsets = [0, 1216], sizes = [16, 64], strides = [1, 1]} : vector<16x1536xf32> to vector<16x64xf32>
    %1308 = arith.truncf %1305 : vector<16x64xf32> to vector<16x64xbf16>
    %1309 = arith.truncf %1306 : vector<16x64xf32> to vector<16x64xbf16>
    %cst_421 = arith.constant dense<0.000000e+00> : vector<16x16xf32>
    %1310 = tpu.matmul %1308, %1309, %cst_421 {dimension_numbers = #tpu.dot_dimension_numbers<[1], [1], [0], [0], [0, 0, 1, 0], [], []>} : vector<16x64xbf16>, vector<16x64xbf16>, vector<16x16xf32> -> vector<16x16xf32>
    %cst_422 = arith.constant 1.250000e-01 : f32
    %1311 = vector.broadcast %cst_422 : f32 to vector<16x16xf32>
    %1312 = arith.mulf %1310, %1311 : vector<16x16xf32>
    %cst_423 = arith.constant dense<0xFF800000> : vector<16xf32>
    %1313 = vector.multi_reduction <maximumf>, %1312, %cst_423 [1] : vector<16x16xf32> to vector<16xf32>
    %1314 = vector.shape_cast %1313 : vector<16xf32> to vector<16x1xf32>
    %1315 = vector.broadcast %1314 : vector<16x1xf32> to vector<16x16xf32>
    %1316 = arith.subf %1312, %1315 : vector<16x16xf32>
    %1317 = math.exp %1316 : vector<16x16xf32>
    %cst_424 = arith.constant dense<0.000000e+00> : vector<16xf32>
    %1318 = vector.multi_reduction <add>, %1317, %cst_424 [1] : vector<16x16xf32> to vector<16xf32>
    %1319 = vector.shape_cast %1318 : vector<16xf32> to vector<16x1xf32>
    %1320 = tpu.reciprocal %1319 {approx = true} : vector<16x1xf32> -> vector<16x1xf32>
    %1321 = vector.broadcast %1320 : vector<16x1xf32> to vector<16x16xf32>
    %1322 = arith.mulf %1317, %1321 : vector<16x16xf32>
    %1323 = arith.truncf %1322 : vector<16x16xf32> to vector<16x16xbf16>
    %1324 = arith.truncf %1307 : vector<16x64xf32> to vector<16x64xbf16>
    %cst_425 = arith.constant dense<0.000000e+00> : vector<16x64xf32>
    %1325 = tpu.matmul %1323, %1324, %cst_425 {dimension_numbers = #tpu.dot_dimension_numbers<[1], [0], [0], [1], [0, 0, 1, 1], [], []>} : vector<16x16xbf16>, vector<16x64xbf16>, vector<16x64xf32> -> vector<16x64xf32>
    %1326 = vector.extract_strided_slice %448 {offsets = [192, 0], sizes = [64, 32], strides = [1, 1]} : vector<512x32xf32> to vector<64x32xf32>
    %1327 = arith.truncf %1325 : vector<16x64xf32> to vector<16x64xbf16>
    %1328 = arith.truncf %1326 : vector<64x32xf32> to vector<64x32xbf16>
    %cst_426 = arith.constant dense<0.000000e+00> : vector<16x32xf32>
    %1329 = tpu.matmul %1327, %1328, %cst_426 {dimension_numbers = #tpu.dot_dimension_numbers<[1], [0], [0], [1], [0, 0, 1, 1], [], []>} : vector<16x64xbf16>, vector<64x32xbf16>, vector<16x32xf32> -> vector<16x32xf32>
    %1330 = arith.addf %1304, %1329 : vector<16x32xf32>
    %1331 = vector.extract_strided_slice %1225 {offsets = [0, 256], sizes = [16, 64], strides = [1, 1]} : vector<16x1536xf32> to vector<16x64xf32>
    %1332 = vector.extract_strided_slice %1225 {offsets = [0, 768], sizes = [16, 64], strides = [1, 1]} : vector<16x1536xf32> to vector<16x64xf32>
    %1333 = vector.extract_strided_slice %1225 {offsets = [0, 1280], sizes = [16, 64], strides = [1, 1]} : vector<16x1536xf32> to vector<16x64xf32>
    %1334 = arith.truncf %1331 : vector<16x64xf32> to vector<16x64xbf16>
    %1335 = arith.truncf %1332 : vector<16x64xf32> to vector<16x64xbf16>
    %cst_427 = arith.constant dense<0.000000e+00> : vector<16x16xf32>
    %1336 = tpu.matmul %1334, %1335, %cst_427 {dimension_numbers = #tpu.dot_dimension_numbers<[1], [1], [0], [0], [0, 0, 1, 0], [], []>} : vector<16x64xbf16>, vector<16x64xbf16>, vector<16x16xf32> -> vector<16x16xf32>
    %cst_428 = arith.constant 1.250000e-01 : f32
    %1337 = vector.broadcast %cst_428 : f32 to vector<16x16xf32>
    %1338 = arith.mulf %1336, %1337 : vector<16x16xf32>
    %cst_429 = arith.constant dense<0xFF800000> : vector<16xf32>
    %1339 = vector.multi_reduction <maximumf>, %1338, %cst_429 [1] : vector<16x16xf32> to vector<16xf32>
    %1340 = vector.shape_cast %1339 : vector<16xf32> to vector<16x1xf32>
    %1341 = vector.broadcast %1340 : vector<16x1xf32> to vector<16x16xf32>
    %1342 = arith.subf %1338, %1341 : vector<16x16xf32>
    %1343 = math.exp %1342 : vector<16x16xf32>
    %cst_430 = arith.constant dense<0.000000e+00> : vector<16xf32>
    %1344 = vector.multi_reduction <add>, %1343, %cst_430 [1] : vector<16x16xf32> to vector<16xf32>
    %1345 = vector.shape_cast %1344 : vector<16xf32> to vector<16x1xf32>
    %1346 = tpu.reciprocal %1345 {approx = true} : vector<16x1xf32> -> vector<16x1xf32>
    %1347 = vector.broadcast %1346 : vector<16x1xf32> to vector<16x16xf32>
    %1348 = arith.mulf %1343, %1347 : vector<16x16xf32>
    %1349 = arith.truncf %1348 : vector<16x16xf32> to vector<16x16xbf16>
    %1350 = arith.truncf %1333 : vector<16x64xf32> to vector<16x64xbf16>
    %cst_431 = arith.constant dense<0.000000e+00> : vector<16x64xf32>
    %1351 = tpu.matmul %1349, %1350, %cst_431 {dimension_numbers = #tpu.dot_dimension_numbers<[1], [0], [0], [1], [0, 0, 1, 1], [], []>} : vector<16x16xbf16>, vector<16x64xbf16>, vector<16x64xf32> -> vector<16x64xf32>
    %1352 = vector.extract_strided_slice %448 {offsets = [256, 0], sizes = [64, 32], strides = [1, 1]} : vector<512x32xf32> to vector<64x32xf32>
    %1353 = arith.truncf %1351 : vector<16x64xf32> to vector<16x64xbf16>
    %1354 = arith.truncf %1352 : vector<64x32xf32> to vector<64x32xbf16>
    %cst_432 = arith.constant dense<0.000000e+00> : vector<16x32xf32>
    %1355 = tpu.matmul %1353, %1354, %cst_432 {dimension_numbers = #tpu.dot_dimension_numbers<[1], [0], [0], [1], [0, 0, 1, 1], [], []>} : vector<16x64xbf16>, vector<64x32xbf16>, vector<16x32xf32> -> vector<16x32xf32>
    %1356 = arith.addf %1330, %1355 : vector<16x32xf32>
    %1357 = vector.extract_strided_slice %1225 {offsets = [0, 320], sizes = [16, 64], strides = [1, 1]} : vector<16x1536xf32> to vector<16x64xf32>
    %1358 = vector.extract_strided_slice %1225 {offsets = [0, 832], sizes = [16, 64], strides = [1, 1]} : vector<16x1536xf32> to vector<16x64xf32>
    %1359 = vector.extract_strided_slice %1225 {offsets = [0, 1344], sizes = [16, 64], strides = [1, 1]} : vector<16x1536xf32> to vector<16x64xf32>
    %1360 = arith.truncf %1357 : vector<16x64xf32> to vector<16x64xbf16>
    %1361 = arith.truncf %1358 : vector<16x64xf32> to vector<16x64xbf16>
    %cst_433 = arith.constant dense<0.000000e+00> : vector<16x16xf32>
    %1362 = tpu.matmul %1360, %1361, %cst_433 {dimension_numbers = #tpu.dot_dimension_numbers<[1], [1], [0], [0], [0, 0, 1, 0], [], []>} : vector<16x64xbf16>, vector<16x64xbf16>, vector<16x16xf32> -> vector<16x16xf32>
    %cst_434 = arith.constant 1.250000e-01 : f32
    %1363 = vector.broadcast %cst_434 : f32 to vector<16x16xf32>
    %1364 = arith.mulf %1362, %1363 : vector<16x16xf32>
    %cst_435 = arith.constant dense<0xFF800000> : vector<16xf32>
    %1365 = vector.multi_reduction <maximumf>, %1364, %cst_435 [1] : vector<16x16xf32> to vector<16xf32>
    %1366 = vector.shape_cast %1365 : vector<16xf32> to vector<16x1xf32>
    %1367 = vector.broadcast %1366 : vector<16x1xf32> to vector<16x16xf32>
    %1368 = arith.subf %1364, %1367 : vector<16x16xf32>
    %1369 = math.exp %1368 : vector<16x16xf32>
    %cst_436 = arith.constant dense<0.000000e+00> : vector<16xf32>
    %1370 = vector.multi_reduction <add>, %1369, %cst_436 [1] : vector<16x16xf32> to vector<16xf32>
    %1371 = vector.shape_cast %1370 : vector<16xf32> to vector<16x1xf32>
    %1372 = tpu.reciprocal %1371 {approx = true} : vector<16x1xf32> -> vector<16x1xf32>
    %1373 = vector.broadcast %1372 : vector<16x1xf32> to vector<16x16xf32>
    %1374 = arith.mulf %1369, %1373 : vector<16x16xf32>
    %1375 = arith.truncf %1374 : vector<16x16xf32> to vector<16x16xbf16>
    %1376 = arith.truncf %1359 : vector<16x64xf32> to vector<16x64xbf16>
    %cst_437 = arith.constant dense<0.000000e+00> : vector<16x64xf32>
    %1377 = tpu.matmul %1375, %1376, %cst_437 {dimension_numbers = #tpu.dot_dimension_numbers<[1], [0], [0], [1], [0, 0, 1, 1], [], []>} : vector<16x16xbf16>, vector<16x64xbf16>, vector<16x64xf32> -> vector<16x64xf32>
    %1378 = vector.extract_strided_slice %448 {offsets = [320, 0], sizes = [64, 32], strides = [1, 1]} : vector<512x32xf32> to vector<64x32xf32>
    %1379 = arith.truncf %1377 : vector<16x64xf32> to vector<16x64xbf16>
    %1380 = arith.truncf %1378 : vector<64x32xf32> to vector<64x32xbf16>
    %cst_438 = arith.constant dense<0.000000e+00> : vector<16x32xf32>
    %1381 = tpu.matmul %1379, %1380, %cst_438 {dimension_numbers = #tpu.dot_dimension_numbers<[1], [0], [0], [1], [0, 0, 1, 1], [], []>} : vector<16x64xbf16>, vector<64x32xbf16>, vector<16x32xf32> -> vector<16x32xf32>
    %1382 = arith.addf %1356, %1381 : vector<16x32xf32>
    %1383 = vector.extract_strided_slice %1225 {offsets = [0, 384], sizes = [16, 64], strides = [1, 1]} : vector<16x1536xf32> to vector<16x64xf32>
    %1384 = vector.extract_strided_slice %1225 {offsets = [0, 896], sizes = [16, 64], strides = [1, 1]} : vector<16x1536xf32> to vector<16x64xf32>
    %1385 = vector.extract_strided_slice %1225 {offsets = [0, 1408], sizes = [16, 64], strides = [1, 1]} : vector<16x1536xf32> to vector<16x64xf32>
    %1386 = arith.truncf %1383 : vector<16x64xf32> to vector<16x64xbf16>
    %1387 = arith.truncf %1384 : vector<16x64xf32> to vector<16x64xbf16>
    %cst_439 = arith.constant dense<0.000000e+00> : vector<16x16xf32>
    %1388 = tpu.matmul %1386, %1387, %cst_439 {dimension_numbers = #tpu.dot_dimension_numbers<[1], [1], [0], [0], [0, 0, 1, 0], [], []>} : vector<16x64xbf16>, vector<16x64xbf16>, vector<16x16xf32> -> vector<16x16xf32>
    %cst_440 = arith.constant 1.250000e-01 : f32
    %1389 = vector.broadcast %cst_440 : f32 to vector<16x16xf32>
    %1390 = arith.mulf %1388, %1389 : vector<16x16xf32>
    %cst_441 = arith.constant dense<0xFF800000> : vector<16xf32>
    %1391 = vector.multi_reduction <maximumf>, %1390, %cst_441 [1] : vector<16x16xf32> to vector<16xf32>
    %1392 = vector.shape_cast %1391 : vector<16xf32> to vector<16x1xf32>
    %1393 = vector.broadcast %1392 : vector<16x1xf32> to vector<16x16xf32>
    %1394 = arith.subf %1390, %1393 : vector<16x16xf32>
    %1395 = math.exp %1394 : vector<16x16xf32>
    %cst_442 = arith.constant dense<0.000000e+00> : vector<16xf32>
    %1396 = vector.multi_reduction <add>, %1395, %cst_442 [1] : vector<16x16xf32> to vector<16xf32>
    %1397 = vector.shape_cast %1396 : vector<16xf32> to vector<16x1xf32>
    %1398 = tpu.reciprocal %1397 {approx = true} : vector<16x1xf32> -> vector<16x1xf32>
    %1399 = vector.broadcast %1398 : vector<16x1xf32> to vector<16x16xf32>
    %1400 = arith.mulf %1395, %1399 : vector<16x16xf32>
    %1401 = arith.truncf %1400 : vector<16x16xf32> to vector<16x16xbf16>
    %1402 = arith.truncf %1385 : vector<16x64xf32> to vector<16x64xbf16>
    %cst_443 = arith.constant dense<0.000000e+00> : vector<16x64xf32>
    %1403 = tpu.matmul %1401, %1402, %cst_443 {dimension_numbers = #tpu.dot_dimension_numbers<[1], [0], [0], [1], [0, 0, 1, 1], [], []>} : vector<16x16xbf16>, vector<16x64xbf16>, vector<16x64xf32> -> vector<16x64xf32>
    %1404 = vector.extract_strided_slice %448 {offsets = [384, 0], sizes = [64, 32], strides = [1, 1]} : vector<512x32xf32> to vector<64x32xf32>
    %1405 = arith.truncf %1403 : vector<16x64xf32> to vector<16x64xbf16>
    %1406 = arith.truncf %1404 : vector<64x32xf32> to vector<64x32xbf16>
    %cst_444 = arith.constant dense<0.000000e+00> : vector<16x32xf32>
    %1407 = tpu.matmul %1405, %1406, %cst_444 {dimension_numbers = #tpu.dot_dimension_numbers<[1], [0], [0], [1], [0, 0, 1, 1], [], []>} : vector<16x64xbf16>, vector<64x32xbf16>, vector<16x32xf32> -> vector<16x32xf32>
    %1408 = arith.addf %1382, %1407 : vector<16x32xf32>
    %1409 = vector.extract_strided_slice %1225 {offsets = [0, 448], sizes = [16, 64], strides = [1, 1]} : vector<16x1536xf32> to vector<16x64xf32>
    %1410 = vector.extract_strided_slice %1225 {offsets = [0, 960], sizes = [16, 64], strides = [1, 1]} : vector<16x1536xf32> to vector<16x64xf32>
    %1411 = vector.extract_strided_slice %1225 {offsets = [0, 1472], sizes = [16, 64], strides = [1, 1]} : vector<16x1536xf32> to vector<16x64xf32>
    %1412 = arith.truncf %1409 : vector<16x64xf32> to vector<16x64xbf16>
    %1413 = arith.truncf %1410 : vector<16x64xf32> to vector<16x64xbf16>
    %cst_445 = arith.constant dense<0.000000e+00> : vector<16x16xf32>
    %1414 = tpu.matmul %1412, %1413, %cst_445 {dimension_numbers = #tpu.dot_dimension_numbers<[1], [1], [0], [0], [0, 0, 1, 0], [], []>} : vector<16x64xbf16>, vector<16x64xbf16>, vector<16x16xf32> -> vector<16x16xf32>
    %cst_446 = arith.constant 1.250000e-01 : f32
    %1415 = vector.broadcast %cst_446 : f32 to vector<16x16xf32>
    %1416 = arith.mulf %1414, %1415 : vector<16x16xf32>
    %cst_447 = arith.constant dense<0xFF800000> : vector<16xf32>
    %1417 = vector.multi_reduction <maximumf>, %1416, %cst_447 [1] : vector<16x16xf32> to vector<16xf32>
    %1418 = vector.shape_cast %1417 : vector<16xf32> to vector<16x1xf32>
    %1419 = vector.broadcast %1418 : vector<16x1xf32> to vector<16x16xf32>
    %1420 = arith.subf %1416, %1419 : vector<16x16xf32>
    %1421 = math.exp %1420 : vector<16x16xf32>
    %cst_448 = arith.constant dense<0.000000e+00> : vector<16xf32>
    %1422 = vector.multi_reduction <add>, %1421, %cst_448 [1] : vector<16x16xf32> to vector<16xf32>
    %1423 = vector.shape_cast %1422 : vector<16xf32> to vector<16x1xf32>
    %1424 = tpu.reciprocal %1423 {approx = true} : vector<16x1xf32> -> vector<16x1xf32>
    %1425 = vector.broadcast %1424 : vector<16x1xf32> to vector<16x16xf32>
    %1426 = arith.mulf %1421, %1425 : vector<16x16xf32>
    %1427 = arith.truncf %1426 : vector<16x16xf32> to vector<16x16xbf16>
    %1428 = arith.truncf %1411 : vector<16x64xf32> to vector<16x64xbf16>
    %cst_449 = arith.constant dense<0.000000e+00> : vector<16x64xf32>
    %1429 = tpu.matmul %1427, %1428, %cst_449 {dimension_numbers = #tpu.dot_dimension_numbers<[1], [0], [0], [1], [0, 0, 1, 1], [], []>} : vector<16x16xbf16>, vector<16x64xbf16>, vector<16x64xf32> -> vector<16x64xf32>
    %1430 = vector.extract_strided_slice %448 {offsets = [448, 0], sizes = [64, 32], strides = [1, 1]} : vector<512x32xf32> to vector<64x32xf32>
    %1431 = arith.truncf %1429 : vector<16x64xf32> to vector<16x64xbf16>
    %1432 = arith.truncf %1430 : vector<64x32xf32> to vector<64x32xbf16>
    %cst_450 = arith.constant dense<0.000000e+00> : vector<16x32xf32>
    %1433 = tpu.matmul %1431, %1432, %cst_450 {dimension_numbers = #tpu.dot_dimension_numbers<[1], [0], [0], [1], [0, 0, 1, 1], [], []>} : vector<16x64xbf16>, vector<64x32xbf16>, vector<16x32xf32> -> vector<16x32xf32>
    %1434 = arith.addf %1408, %1433 : vector<16x32xf32>
    %1435 = arith.addf %1434, %1221 : vector<16x32xf32>
    %c0_451 = arith.constant 0 : index
    %c0_452 = arith.constant 0 : index
    %1436 = vector.load %arg30[%c0_451, %c0_452] : memref<1x32xf32, #tpu.memory_space<vmem>>, vector<1x32xf32>
    %c0_453 = arith.constant 0 : index
    %c0_454 = arith.constant 0 : index
    %1437 = vector.load %arg31[%c0_453, %c0_454] : memref<1x32xf32, #tpu.memory_space<vmem>>, vector<1x32xf32>
    %cst_455 = arith.constant dense<0.000000e+00> : vector<16xf32>
    %1438 = vector.multi_reduction <add>, %1435, %cst_455 [1] : vector<16x32xf32> to vector<16xf32>
    %1439 = vector.shape_cast %1438 : vector<16xf32> to vector<16x1xf32>
    %cst_456 = arith.constant 3.200000e+01 : f32
    %1440 = vector.broadcast %cst_456 : f32 to vector<16x1xf32>
    %1441 = arith.divf %1439, %1440 : vector<16x1xf32>
    %1442 = vector.broadcast %1441 : vector<16x1xf32> to vector<16x32xf32>
    %1443 = arith.subf %1435, %1442 : vector<16x32xf32>
    %1444 = arith.mulf %1443, %1443 : vector<16x32xf32>
    %cst_457 = arith.constant dense<0.000000e+00> : vector<16xf32>
    %1445 = vector.multi_reduction <add>, %1444, %cst_457 [1] : vector<16x32xf32> to vector<16xf32>
    %1446 = vector.shape_cast %1445 : vector<16xf32> to vector<16x1xf32>
    %cst_458 = arith.constant 3.200000e+01 : f32
    %1447 = vector.broadcast %cst_458 : f32 to vector<16x1xf32>
    %1448 = arith.divf %1446, %1447 : vector<16x1xf32>
    %1449 = vector.broadcast %1441 : vector<16x1xf32> to vector<16x32xf32>
    %1450 = arith.subf %1435, %1449 : vector<16x32xf32>
    %cst_459 = arith.constant 9.99999997E-7 : f32
    %1451 = vector.broadcast %cst_459 : f32 to vector<16x1xf32>
    %1452 = arith.addf %1448, %1451 : vector<16x1xf32>
    %1453 = math.rsqrt %1452 : vector<16x1xf32>
    %1454 = vector.broadcast %1453 : vector<16x1xf32> to vector<16x32xf32>
    %1455 = arith.mulf %1450, %1454 : vector<16x32xf32>
    %1456 = vector.broadcast %1436 : vector<1x32xf32> to vector<16x32xf32>
    %1457 = arith.mulf %1455, %1456 : vector<16x32xf32>
    %1458 = vector.broadcast %1437 : vector<1x32xf32> to vector<16x32xf32>
    %1459 = arith.addf %1457, %1458 : vector<16x32xf32>
    %cst_460 = arith.constant dense<0.000000e+00> : vector<32xf32>
    %1460 = vector.multi_reduction <add>, %1459, %cst_460 [0] : vector<16x32xf32> to vector<32xf32>
    %1461 = vector.shape_cast %1460 : vector<32xf32> to vector<1x32xf32>
    %cst_461 = arith.constant 0.000000e+00 : f32
    %1462 = vector.broadcast %cst_461 : f32 to vector<1x32xf32>
    %1463 = arith.maximumf %1461, %1462 : vector<1x32xf32>
    %c0_462 = arith.constant 0 : index
    %c0_463 = arith.constant 0 : index
    %1464 = vector.load %arg32[%c0_462, %c0_463] : memref<32x128xf32, #tpu.memory_space<vmem>>, vector<32x128xf32>
    %1465 = arith.truncf %1463 : vector<1x32xf32> to vector<1x32xbf16>
    %1466 = arith.truncf %1464 : vector<32x128xf32> to vector<32x128xbf16>
    %cst_464 = arith.constant dense<0.000000e+00> : vector<1x128xf32>
    %1467 = tpu.matmul %1465, %1466, %cst_464 {dimension_numbers = #tpu.dot_dimension_numbers<[1], [0], [0], [1], [0, 0, 1, 1], [], []>} : vector<1x32xbf16>, vector<32x128xbf16>, vector<1x128xf32> -> vector<1x128xf32>
    %c0_465 = arith.constant 0 : index
    %c0_466 = arith.constant 0 : index
    %1468 = vector.load %arg33[%c0_465, %c0_466] : memref<1x128xf32, #tpu.memory_space<vmem>>, vector<1x128xf32>
    %1469 = arith.addf %1467, %1468 : vector<1x128xf32>
    %c1_467 = arith.constant 1 : index
    %c0_468 = arith.constant 0 : index
    %1470 = vector.load %arg34[%c1_467, %c0_468] : memref<2x128xf32, #tpu.memory_space<vmem>>, vector<1x128xf32>
    tpu.vector_store %arg34[%c1_467, %c0_468], %1469 {strides = array<i32>} : memref<2x128xf32, #tpu.memory_space<vmem>>, vector<1x128xf32>,
    return
  }
}

</mosaic_0001>

<bundles_post_ra>
// kernel: tpu_custom_call.1
= control target key start
LH: loop header
LB: loop body
LE: loop exit
PB: predicated region body
PF: predicated region fallthrough
CT: control target
= control target key end

     0   :  { %s9375_s6 = smov 1   ;;  %s9376_s10 = smov 2   ;;  %s11548_s0 = inlined_call_operand.smem [shape: u32[35], index: -1, kind: input, shape index: {}] }
   0x1   :  { %s9450_s5 = sld [smem:[%s11548_s0]]   ;;  %s9377_s14 = smov 3  }
   0x2   :  { %s9455_s9 = sld [smem:[%s11548_s0 + %s9375_s6]]   ;;  %s9378_s18 = smov 4  }
   0x3   :  { %s9460_s13 = sld [smem:[%s11548_s0 + %s9376_s10]]   ;;  %s9379_s22 = smov 5  }
   0x4   :  { %s9465_s17 = sld [smem:[%s11548_s0 + %s9377_s14]]   ;;  %s9380_s26 = smov 6  }
   0x5   :  { %s9470_s21 = sld [smem:[%s11548_s0 + %s9378_s18]]   ;;  %s9381_s30 = smov 7  }
   0x6   :  { %s9475_s25 = sld [smem:[%s11548_s0 + %s9379_s22]]   ;;  %s9382_s4 = smov 8  }
   0x7   :  { %11563 = sst [smem:[#allocation40_spill]] %s9450_s5  ;;  %s9383_s10 = smov 9  }
   0x8   :  { %11564 = sst [smem:[#allocation41_spill]] %s9455_s9  ;;  %s9384_s15 = smov 10  }
   0x9   :  { %11565 = sst [smem:[#allocation42_spill]] %s9460_s13  ;;  %s9385_s20 = smov 11  }
   0xa   :  { %11566 = sst [smem:[#allocation43_spill]] %s9465_s17  ;;  %s9387_s1 = smov 13  }
   0xb   :  { %11567 = sst [smem:[#allocation44_spill]] %s9470_s21  ;;  %s9388_s7 = smov 14  }
   0xc   :  { %11568 = sst [smem:[#allocation45_spill]] %s9475_s25  ;;  %s9390_s22 = smov 16  }
   0xd   :  { %s9480_s29 = sld [smem:[%s11548_s0 + %s9380_s26]]   ;;  %s9386_s26 = smov 12  }
   0xe   :  { %s9485_s3 = sld [smem:[%s11548_s0 + %s9381_s30]]   ;;  %s9391_s28 = smov 17  }
   0xf   :  { %s9490_s8 = sld [smem:[%s11548_s0 + %s9382_s4]]  }
  0x10   :  { %s9495_s14 = sld [smem:[%s11548_s0 + %s9383_s10]]  }
  0x11   :  { %s9500_s19 = sld [smem:[%s11548_s0 + %s9384_s15]]   ;;  %s9389_s15 = smov 15  }
  0x12   :  { %s9505_s24 = sld [smem:[%s11548_s0 + %s9385_s20]]  }
  0x13   :  { %11569 = sst [smem:[#allocation46_spill]] %s9480_s29 }
  0x14   :  { %s9510_s30 = sld [smem:[%s11548_s0 + %s9386_s26]]  }
  0x15   :  { %s9515_s6 = sld [smem:[%s11548_s0 + %s9387_s1]]  }
  0x16   :  { %11570 = sst [smem:[#allocation47_spill]] %s9495_s14 }
  0x17   :  { %s9520_s12 = sld [smem:[%s11548_s0 + %s9388_s7]]   ;;  %s9392_s7 = smov 18  }
  0x18   :  { %11571 = sst [smem:[#allocation48_spill]] %s9505_s24 }
  0x19   :  { %s9525_s20 = sld [smem:[%s11548_s0 + %s9389_s15]]   ;;  %s9393_s15 = smov 19  }
  0x1a   :  { %s9530_s27 = sld [smem:[%s11548_s0 + %s9390_s22]]   ;;  %s9394_s22 = smov 20  }
  0x1b   :  { %11572 = sst [smem:[#allocation49_spill]] %s9515_s6 }
  0x1c   :  { %s9535_s4 = sld [smem:[%s11548_s0 + %s9391_s28]]   ;;  %s9395_s28 = smov 21  }
  0x1d   :  { %s9540_s9 = sld [smem:[%s11548_s0 + %s9392_s7]]   ;;  %s9396_s7 = smov 22  }
  0x1e   :  { %s9550_s24 = sld [smem:[%s11548_s0 + %s9394_s22]]   ;;  %s9398_s22 = smov 24  }
  0x1f   :  { %11573 = sst [smem:[#allocation50_spill]] %s9525_s20 }
  0x20   :  { %s9545_s20 = sld [smem:[%s11548_s0 + %s9393_s15]]   ;;  %s9397_s15 = smov 23  }
  0x21   :  { %s9555_s6 = sld [smem:[%s11548_s0 + %s9395_s28]]   ;;  %s9399_s28 = smov 25  }
  0x22   :  { %s9560_s14 = sld [smem:[%s11548_s0 + %s9396_s7]]   ;;  %s9400_s7 = smov 26  }
  0x23   :  { %s9570_s17 = sld [smem:[%s11548_s0 + %s9398_s22]]   ;;  %s9402_s22 = smov 28  }
  0x24   :  { %s9580_s25 = sld [smem:[%s11548_s0 + %s9400_s7]]   ;;  %s9404_s7 = smov 30  }
  0x25   :  { %s9590_s29 = sld [smem:[%s11548_s0 + %s9402_s22]]   ;;  %s9406_s22 = smov 32  }
  0x26   :  { %11574 = sst [smem:[#allocation51_spill]] %s9545_s20 }
  0x27   :  { %11575 = sst [smem:[#allocation52_spill]] %s9555_s6 }
  0x28   :  { %s9565_s20 = sld [smem:[%s11548_s0 + %s9397_s15]]   ;;  %s9401_s15 = smov 27  }
  0x29   :  { %s9575_s6 = sld [smem:[%s11548_s0 + %s9399_s28]]   ;;  %s9403_s28 = smov 29  }
  0x2a   :  { %s9585_s13 = sld [smem:[%s11548_s0 + %s9401_s15]]   ;;  %s9405_s15 = smov 31  }
  0x2b   :  { %11577 = sst [smem:[#allocation54_spill]] %s9590_s29 }
  0x2c   :  { %s9600_s21 = sld [smem:[%s11548_s0 + %s9404_s7]]   ;;  %s9408_s7 = smov 34  }
  0x2d   :  { %s9605_s5 = sld [smem:[%s11548_s0 + %s9405_s15]]  }
  0x2e   :  { %s9610_s29 = sld [smem:[%s11548_s0 + %s9406_s22]]  }
  0x2f   :  { %11576 = sst [smem:[#allocation53_spill]] %s9575_s6 }
  0x30   :  { %s9595_s6 = sld [smem:[%s11548_s0 + %s9403_s28]]   ;;  %s9407_s28 = smov 33  }
  0x32   :  { %11579 = sst [smem:[#allocation56_spill]] %s9600_s21 }
  0x33   :  { %s9620_s21 = sld [smem:[%s11548_s0 + %s9408_s7]]  }
  0x36   :  { %11578 = sst [smem:[#allocation55_spill]] %s9595_s6 }
  0x37   :  { %s9615_s6 = sld [smem:[%s11548_s0 + %s9407_s28]]  }
  0x38   :  { %74 = vsyncpa [#allocation4], 0 }
  0x39   :  { %75 = vsyncpa [#allocation7], 0 }
  0x3a   :  { %76 = vsyncpa [#allocation10], 0 }
  0x3b   :  { %77 = vsyncpa [#allocation13], 0 }
  0x3c   :  { %78 = vsyncpa [#allocation16], 0 }
  0x3d   :  { %79 = vsyncpa [#allocation19], 0 }
  0x3e   :  { %80 = vsyncpa [#allocation22], 0 }
  0x3f   :  { %81 = vsyncpa [#allocation25], 0 }
  0x40   :  { %82 = vsyncpa [#allocation28], 0 }
  0x41   :  { %83 = vsyncpa [#allocation5], 0  ;;  %s9409_s15 = smov [#allocation6]   ;;  %s9410_s18 = smov [#allocation9]  }
  0x42   :  { %s114_s16 = sshll.u32 %s9409_s15, 4  ;;  %s138_s22 = sshll.u32 %s9410_s18, 4  ;;  %s115_s16 = int_to_ptr.vmem [resolvable:$true] %s114_s16  ;;  %s139_s22 = int_to_ptr.vmem [resolvable:$true] %s138_s22 }
  0x43   :  { %s9023_s23 = scalar_lea.vmem %s115_s16, 128  ;;  %p9028_p1 = scmp.lt.s32.totalorder %s115_s16, %s115_s16 }
  0x44   :  { %p9024_p0 = scmp.ne.s32.totalorder %s115_s16, %s9023_s23  ;;  %p9029_p2 = scmp.lt.s32.totalorder %s9023_s23, %s9023_s23 }
  0x46   :  { %p9030_p3 = por %p9029_p2, %p9028_p1 }
  0x48   :  { %p9031_p4 = pnand %p9030_p3, %p9024_p0 }
  0x4a   :  { %9034 = shalt.err (!%p9031_p4)
}
  0x4b   :  { %117 = dma.hbm_to_vmem [thread:$0]  %s9490_s8, 128, %s115_s16, [#allocation7]  }
  0x4c   :  { %s9043_s0 = scalar_lea.vmem %s139_s22, 16  ;;  %s9047_s26 = scalar_lea.vmem %s139_s22, 32 }
  0x4d   :  { %p9044_p5 = scmp.ne.s32.totalorder %s139_s22, %s9043_s0  ;;  %p9048_p6 = scmp.lt.s32.totalorder %s139_s22, %s139_s22 }
  0x4e   :  { %p9049_p7 = scmp.lt.s32.totalorder %s9047_s26, %s9043_s0 }
  0x50   :  { %p9050_p8 = por %p9049_p7, %p9048_p6 }
  0x52   :  { %p9051_p9 = pnand %p9050_p8, %p9044_p5 }
  0x54   :  { %9054 = shalt.err (!%p9051_p9)
}
  0x55   :  { %141 = dma.hbm_to_vmem [thread:$0]  %s9510_s30, 16, %s139_s22, [#allocation10]  }
  0x56   :  { %s9411_s28 = smov [#allocation12]   ;;  %s9412_s2 = smov [#allocation15]  }
  0x57   :  { %s162_s1 = sshll.u32 %s9411_s28, 4  ;;  %s182_s7 = sshll.u32 %s9412_s2, 4  ;;  %s163_s1 = int_to_ptr.vmem [resolvable:$true] %s162_s1  ;;  %s183_s7 = int_to_ptr.vmem [resolvable:$true] %s182_s7 }
  0x58   :  { %s9063_s10 = scalar_lea.vmem %s163_s1, 16  ;;  %s9067_s11 = scalar_lea.vmem %s163_s1, 32 }
  0x59   :  { %p9064_p10 = scmp.ne.s32.totalorder %s163_s1, %s9063_s10  ;;  %p9068_p11 = scmp.lt.s32.totalorder %s163_s1, %s163_s1 }
  0x5a   :  { %p9069_p12 = scmp.lt.s32.totalorder %s9067_s11, %s9063_s10 }
  0x5c   :  { %p9070_p13 = por %p9069_p12, %p9068_p11 }
  0x5e   :  { %p9071_p0 = pnand %p9070_p13, %p9064_p10 }
  0x60   :  { %9074 = shalt.err (!%p9071_p0)
}
  0x61   :  { %165 = dma.hbm_to_vmem [thread:$0]  %s9530_s27, 16, %s163_s1, [#allocation13]  }
  0x62   :  { %s9083_s8 = scalar_lea.vmem %s183_s7, 16  ;;  %s9087_s15 = scalar_lea.vmem %s183_s7, 32 }
  0x63   :  { %p9084_p1 = scmp.ne.s32.totalorder %s183_s7, %s9083_s8  ;;  %p9088_p2 = scmp.lt.s32.totalorder %s183_s7, %s183_s7 }
  0x64   :  { %p9089_p3 = scmp.lt.s32.totalorder %s9087_s15, %s9083_s8 }
  0x66   :  { %p9090_p4 = por %p9089_p3, %p9088_p2 }
  0x68   :  { %p9091_p5 = pnand %p9090_p4, %p9084_p1 }
  0x6a   :  { %9094 = shalt.err (!%p9091_p5)
}
  0x6b   :  { %185 = dma.hbm_to_vmem [thread:$0]  %s9540_s9, 16, %s183_s7, [#allocation16]  }
  0x6c   :  { %s9413_s30 = smov [#allocation18]   ;;  %s9414_s18 = smov [#allocation21]  }
  0x6d   :  { %s206_s16 = sshll.u32 %s9413_s30, 4  ;;  %s226_s22 = sshll.u32 %s9414_s18, 4  ;;  %s207_s16 = int_to_ptr.vmem [resolvable:$true] %s206_s16  ;;  %s227_s22 = int_to_ptr.vmem [resolvable:$true] %s226_s22 }
  0x6e   :  { %s9103_s23 = scalar_lea.vmem %s207_s16, 16  ;;  %s9107_s0 = scalar_lea.vmem %s207_s16, 32 }
  0x6f   :  { %p9104_p6 = scmp.ne.s32.totalorder %s207_s16, %s9103_s23  ;;  %p9108_p7 = scmp.lt.s32.totalorder %s207_s16, %s207_s16 }
  0x70   :  { %p9109_p8 = scmp.lt.s32.totalorder %s9107_s0, %s9103_s23 }
  0x72   :  { %p9110_p9 = por %p9109_p8, %p9108_p7 }
  0x74   :  { %p9111_p10 = pnand %p9110_p9, %p9104_p6 }
  0x76   :  { %9114 = shalt.err (!%p9111_p10)
}
  0x77   :  { %209 = dma.hbm_to_vmem [thread:$0]  %s9560_s14, 16, %s207_s16, [#allocation19]  }
  0x78   :  { %s9123_s27 = scalar_lea.vmem %s227_s22, 16  ;;  %s9127_s26 = scalar_lea.vmem %s227_s22, 32 }
  0x79   :  { %p9124_p11 = scmp.ne.s32.totalorder %s227_s22, %s9123_s27  ;;  %p9128_p12 = scmp.lt.s32.totalorder %s227_s22, %s227_s22 }
  0x7a   :  { %p9129_p13 = scmp.lt.s32.totalorder %s9127_s26, %s9123_s27 }
  0x7c   :  { %p9130_p0 = por %p9129_p13, %p9128_p12 }
  0x7e   :  { %p9131_p1 = pnand %p9130_p0, %p9124_p11 }
  0x80   :  { %9134 = shalt.err (!%p9131_p1)
}
  0x81   :  { %229 = dma.hbm_to_vmem [thread:$0]  %s9570_s17, 16, %s227_s22, [#allocation22]  }
  0x82   :  { %s9415_s9 = smov [#allocation24]   ;;  %s9416_s1 = smov [#allocation3]  }
  0x83   :  { %s248_s28 = sshll.u32 %s9415_s9, 4  ;;  %s104_s2 = sshll.u32 %s9416_s1, 4  ;;  %s249_s28 = int_to_ptr.vmem [resolvable:$true] %s248_s28  ;;  %s105_s2 = int_to_ptr.vmem [resolvable:$true] %s104_s2 }
  0x84   :  { %s9143_s7 = scalar_lea.vmem %s249_s28, 16  ;;  %s9147_s10 = scalar_lea.vmem %s249_s28, 32 }
  0x85   :  { %p9144_p2 = scmp.ne.s32.totalorder %s249_s28, %s9143_s7  ;;  %p9148_p3 = scmp.lt.s32.totalorder %s249_s28, %s249_s28 }
  0x86   :  { %p9149_p4 = scmp.lt.s32.totalorder %s9147_s10, %s9143_s7 }
  0x88   :  { %p9150_p5 = por %p9149_p4, %p9148_p3 }
  0x8a   :  { %p9151_p6 = pnand %p9150_p5, %p9144_p2 }
  0x8c   :  { %9154 = shalt.err (!%p9151_p6)
}
  0x8d   :  { %251 = dma.hbm_to_vmem [thread:$0]  %s9585_s13, 16, %s249_s28, [#allocation25]  }
  0x8e   :  { %s9163_s14 = scalar_lea.vmem %s105_s2, 32  ;;  %p9168_p8 = scmp.lt.s32.totalorder %s105_s2, %s105_s2 }
  0x8f   :  { %p9164_p7 = scmp.ne.s32.totalorder %s105_s2, %s9163_s14  ;;  %p9169_p9 = scmp.lt.s32.totalorder %s9163_s14, %s9163_s14 }
  0x91   :  { %p9170_p10 = por %p9169_p9, %p9168_p8 }
  0x93   :  { %p9171_p11 = pnand %p9170_p10, %p9164_p7 }
  0x95   :  { %9174 = shalt.err (!%p9171_p11)
}
  0x96   :  { %107 = dma.hbm_to_vmem [thread:$0]  %s9485_s3, 32, %s105_s2, [#allocation4]  }
  0x97   :  { %s9417_s17 = smov [#allocation8]   ;;  %s9418_s8 = smov [#allocation11]  }
  0x98   :  { %s126_s11 = sshll.u32 %s9417_s17, 4  ;;  %s150_s15 = sshll.u32 %s9418_s8, 4  ;;  %s127_s11 = int_to_ptr.vmem [resolvable:$true] %s126_s11  ;;  %s151_s15 = int_to_ptr.vmem [resolvable:$true] %s150_s15 }
  0x99   :  { %s9183_s30 = scalar_lea.vmem %s127_s11, 32  ;;  %p9188_p13 = scmp.lt.s32.totalorder %s127_s11, %s127_s11 }
  0x9a   :  { %p9184_p12 = scmp.ne.s32.totalorder %s127_s11, %s9183_s30  ;;  %p9189_p0 = scmp.lt.s32.totalorder %s9183_s30, %s9183_s30 }
  0x9c   :  { %p9190_p1 = por %p9189_p0, %p9188_p13 }
  0x9e   :  { %p9191_p2 = pnand %p9190_p1, %p9184_p12 }
  0xa0   :  { %9194 = shalt.err (!%p9191_p2)
}
  0xa1   :  { %129 = dma.hbm_to_vmem [thread:$0]  %s9500_s19, 32, %s127_s11, [#allocation7]  }
  0xa2   :  { %s9203_s13 = scalar_lea.vmem %s151_s15, 16  ;;  %s9207_s16 = scalar_lea.vmem %s151_s15, 32 }
  0xa3   :  { %p9204_p3 = scmp.ne.s32.totalorder %s151_s15, %s9203_s13  ;;  %p9208_p4 = scmp.lt.s32.totalorder %s151_s15, %s151_s15 }
  0xa4   :  { %p9209_p5 = scmp.lt.s32.totalorder %s9207_s16, %s9203_s13 }
  0xa6   :  { %p9210_p6 = por %p9209_p5, %p9208_p4 }
  0xa8   :  { %p9211_p7 = pnand %p9210_p6, %p9204_p3 }
  0xaa   :  { %9214 = shalt.err (!%p9211_p7)
}
  0xab   :  { %153 = dma.hbm_to_vmem [thread:$0]  %s9520_s12, 16, %s151_s15, [#allocation10]  }
  0xac   :  { %s9419_s3 = smov [#allocation14]   ;;  %s9420_s22 = smov [#allocation17]  }
  0xad   :  { %s172_s18 = sshll.u32 %s9419_s3, 4  ;;  %s194_s23 = sshll.u32 %s9420_s22, 4  ;;  %s173_s18 = int_to_ptr.vmem [resolvable:$true] %s172_s18  ;;  %s195_s23 = int_to_ptr.vmem [resolvable:$true] %s194_s23 }
  0xae   :  { %s9223_s0 = scalar_lea.vmem %s173_s18, 16  ;;  %s9227_s27 = scalar_lea.vmem %s173_s18, 32 }
  0xaf   :  { %p9224_p8 = scmp.ne.s32.totalorder %s173_s18, %s9223_s0  ;;  %p9228_p9 = scmp.lt.s32.totalorder %s173_s18, %s173_s18 }
  0xb0   :  { %p9229_p10 = scmp.lt.s32.totalorder %s9227_s27, %s9223_s0 }
  0xb2   :  { %p9230_p11 = por %p9229_p10, %p9228_p9 }
  0xb4   :  { %p9231_p12 = pnand %p9230_p11, %p9224_p8 }
  0xb6   :  { %9234 = shalt.err (!%p9231_p12)
}
  0xb7   :  { %175 = dma.hbm_to_vmem [thread:$0]  %s9535_s4, 16, %s173_s18, [#allocation13]  }
  0xb8   :  { %s9243_s19 = scalar_lea.vmem %s195_s23, 16  ;;  %s9247_s26 = scalar_lea.vmem %s195_s23, 32 }
  0xb9   :  { %p9244_p13 = scmp.ne.s32.totalorder %s195_s23, %s9243_s19  ;;  %p9248_p0 = scmp.lt.s32.totalorder %s195_s23, %s195_s23 }
  0xba   :  { %p9249_p1 = scmp.lt.s32.totalorder %s9247_s26, %s9243_s19 }
  0xbc   :  { %p9250_p2 = por %p9249_p1, %p9248_p0 }
  0xbe   :  { %p9251_p3 = pnand %p9250_p2, %p9244_p13 }
  0xc0   :  { %9254 = shalt.err (!%p9251_p3)
}
  0xc1   :  { %197 = dma.hbm_to_vmem [thread:$0]  %s9550_s24, 16, %s195_s23, [#allocation16]  }
  0xc2   :  { %s9421_s12 = smov [#allocation20]   ;;  %s9422_s28 = smov [#allocation23]  }
  0xc3   :  { %s216_s9 = sshll.u32 %s9421_s12, 4  ;;  %s238_s1 = sshll.u32 %s9422_s28, 4  ;;  %s217_s9 = int_to_ptr.vmem [resolvable:$true] %s216_s9  ;;  %s239_s1 = int_to_ptr.vmem [resolvable:$true] %s238_s1 }
  0xc4   :  { %s9263_s2 = scalar_lea.vmem %s217_s9, 16  ;;  %s9267_s7 = scalar_lea.vmem %s217_s9, 32 }
  0xc5   :  { %p9264_p4 = scmp.ne.s32.totalorder %s217_s9, %s9263_s2  ;;  %p9268_p5 = scmp.lt.s32.totalorder %s217_s9, %s217_s9 }
  0xc6   :  { %p9269_p6 = scmp.lt.s32.totalorder %s9267_s7, %s9263_s2 }
  0xc8   :  { %p9270_p7 = por %p9269_p6, %p9268_p5 }
  0xca   :  { %p9271_p8 = pnand %p9270_p7, %p9264_p4 }
  0xcc   :  { %9274 = shalt.err (!%p9271_p8)
}
  0xcd   :  { %219 = dma.hbm_to_vmem [thread:$0]  %s9565_s20, 16, %s217_s9, [#allocation19]  }
  0xce   :  { %s9283_s4 = scalar_lea.vmem %s239_s1, 16  ;;  %s9287_s10 = scalar_lea.vmem %s239_s1, 32 }
  0xcf   :  { %p9284_p9 = scmp.ne.s32.totalorder %s239_s1, %s9283_s4  ;;  %p9288_p10 = scmp.lt.s32.totalorder %s239_s1, %s239_s1 }
  0xd0   :  { %p9289_p11 = scmp.lt.s32.totalorder %s9287_s10, %s9283_s4 }
  0xd2   :  { %p9290_p12 = por %p9289_p11, %p9288_p10 }
  0xd4   :  { %p9291_p13 = pnand %p9290_p12, %p9284_p9 }
  0xd6   :  { %9294 = shalt.err (!%p9291_p13)
}
  0xd7   :  { %241 = dma.hbm_to_vmem [thread:$0]  %s9580_s25, 16, %s239_s1, [#allocation22]  }
  0xd8   :  { %s9423_s24 = smov [#allocation26]   ;;  %s9424_s17 = smov [#allocation27]  }
  0xd9   :  { %s264_s14 = sshll.u32 %s9423_s24, 4  ;;  %s276_s11 = sshll.u32 %s9424_s17, 4  ;;  %s265_s14 = int_to_ptr.vmem [resolvable:$true] %s264_s14  ;;  %s277_s11 = int_to_ptr.vmem [resolvable:$true] %s276_s11 }
  0xda   :  { %s9303_s8 = scalar_lea.vmem %s265_s14, 16  ;;  %s9307_s15 = scalar_lea.vmem %s265_s14, 32 }
  0xdb   :  { %p9304_p0 = scmp.ne.s32.totalorder %s265_s14, %s9303_s8  ;;  %p9308_p1 = scmp.lt.s32.totalorder %s265_s14, %s265_s14 }
  0xdc   :  { %p9309_p2 = scmp.lt.s32.totalorder %s9307_s15, %s9303_s8 }
  0xde   :  { %p9310_p3 = por %p9309_p2, %p9308_p1 }
  0xe0   :  { %p9311_p4 = pnand %p9310_p3, %p9304_p0 }
  0xe2   :  { %9314 = shalt.err (!%p9311_p4)
}
  0xe3   :  { %267 = dma.hbm_to_vmem [thread:$0]  %s9605_s5, 16, %s265_s14, [#allocation25]  }
  0xe4   :  { %s9323_s20 = scalar_lea.vmem %s277_s11, 16  ;;  %s9327_s30 = scalar_lea.vmem %s277_s11, 32 }
  0xe5   :  { %p9324_p5 = scmp.ne.s32.totalorder %s277_s11, %s9323_s20  ;;  %p9328_p6 = scmp.lt.s32.totalorder %s277_s11, %s277_s11 }
  0xe6   :  { %p9329_p7 = scmp.lt.s32.totalorder %s9327_s30, %s9323_s20 }
  0xe8   :  { %p9330_p8 = por %p9329_p7, %p9328_p6 }
  0xea   :  { %p9331_p9 = pnand %p9330_p8, %p9324_p5 }
  0xec   :  { %9334 = shalt.err (!%p9331_p9)
}
  0xed   :  { %279 = dma.hbm_to_vmem [thread:$0]  %s9615_s6, 16, %s277_s11, [#allocation28]  }
  0xee   :  { %9355 = dma.done.wait [#allocation4], 32  }
  0xef   :  { %9356 = vsyncadd [#allocation4], 4294967264 }
  0xf0   :  { %9357 = dma.done.wait [#allocation7], 160  }
  0xf1   :  { %9358 = vsyncadd [#allocation7], 4294967136 }
  0xf2   :  { %9359 = dma.done.wait [#allocation10], 32  }
  0xf3   :  { %9360 = vsyncadd [#allocation10], 4294967264 }
  0xf4   :  { %9361 = dma.done.wait [#allocation13], 32  }
  0xf5   :  { %9362 = vsyncadd [#allocation13], 4294967264 }
  0xf6   :  { %9363 = dma.done.wait [#allocation16], 32  }
  0xf7   :  { %9364 = vsyncadd [#allocation16], 4294967264 }
  0xf8   :  { %9365 = dma.done.wait [#allocation19], 32  }
  0xf9   :  { %9366 = vsyncadd [#allocation19], 4294967264 }
  0xfa   :  { %9367 = dma.done.wait [#allocation22], 32  }
  0xfb   :  { %9368 = vsyncadd [#allocation22], 4294967264 }
  0xfc   :  { %9369 = dma.done.wait [#allocation25], 32  }
  0xfd   :  { %9370 = vsyncadd [#allocation25], 4294967264 }
  0xfe   :  { %9371 = dma.done.wait [#allocation28], 16  }
  0xff   :  { %9372 = vsyncadd [#allocation28], 4294967280  ;;  %s11580_s5 = sld [smem:[#allocation40_spill]]  ;;  %v9425_v0 = vmov 0   ;;  %vm2067_vm0 = vcmask 261120   ;;  %s9426_s16 = smov 64   ;;  %v341_v23 = vlaneseq }
 0x100   :  { %s11581_s25 = sld [smem:[#allocation44_spill]]  ;;  %387 = vmatprep.mubr.bf16.mxu0 %v9425_v0  ;;  %446 = vmatprep.mubr.bf16.mxu1 %v9425_v0  ;;  %v7707_v16 = vld [vmem:[#allocation6 + $0x2] ss:$0 sm:$0xff]  ;;  %vm351_vm1 = vcmask 130048   ;;  %v7715_v18 = vld [vmem:[#allocation6 + $0x6] ss:$0 sm:$0xff] }
 0x101   :  { %s11582_s6 = sld [smem:[#allocation46_spill]]  ;;  %932 = vrot.lane.b32.xlu0 %v7707_v16, %s9426_s16  ;;  %v7705_v19 = vld [vmem:[#allocation6 + $0x1] ss:$0 sm:$0xff]  ;;  %s9427_s3 = smov 32   ;;  %v7717_v20 = vld [vmem:[#allocation6 + $0x7] ss:$0 sm:$0xff] }
 0x102   :  { %s11583_s13 = sld [smem:[#allocation42_spill]]  ;;  %v7709_v21 = vld [vmem:[#allocation6 + $0x3] ss:$0 sm:$0xff]  ;;  %s9428_s18 = smov 96   ;;  %v7713_v22 = vld [vmem:[#allocation6 + $0x5] ss:$0 sm:$0xff] }
 0x103   :  { %s11584_s22 = sld [smem:[#allocation45_spill]]  ;;  %v342_v24 = vshrl.u32 %v341_v23, 7  ;;  %v642_v25 = vand.u32 127, %v341_v23  ;;  %v9429_v27 = vmov 0.0   ;;  %v9430_v33 = vmov 1966171168  }
 0x104   :  { %v507_v34 = vunpack.c.l.s4 %v9430_v33  ;;  %v402_v37 = vld [vmem:[#allocation3] sm:$0x3]  ;;  %vm701_vm2 = vcmask 1042432   ;;  %v9712_v16 = vld [vmem:[#allocation6] ss:$0 sm:$0xff]  ;;  %vm616_vm4 = vcmask 259072  }
 0x105   :  { %v2064_v1 = vld [vmem:[%s11580_s5] sm:$0xff]  ;;  %1670 = vrot.lane.b32.xlu0 %v7715_v18, %s9426_s16  ;;  %v9664_v26 = vsub.s32 %v642_v25, %v342_v24  ;;  %v9672_v35 = vsub.s32 0, %v342_v24  ;;  %v9675_v39 = vsub.s32 1, %v342_v24  ;;  %s11585_s23 = sld [smem:[#allocation43_spill]]  ;;  %s9432_s26 = smov 88  }
 0x106   :  { %v333_v2 = vld [vmem:[%s11581_s25 + $0x8] sm:$0xff]  ;;  %v335_v3 = vld [vmem:[%s11581_s25 + $0x18] sm:$0xff]  ;;  %v2068_v4 = vsel %vm2067_vm0, %v2064_v1, 0.0  ;;  %v332_v8 = vld [vmem:[%s11581_s25] sm:$0xff]  ;;  %v508_v38 = vunpack.c.0.s8 %v507_v34  ;;  %s11586_s0 = sld [smem:[#allocation47_spill]]  ;;  %s9433_s12 = smov 120  }
 0x107   :  { %v338_v5 = vpack.c.bf16 %v335_v3, %v333_v2  ;;  %v397_v6 = vld [vmem:[%s11582_s6 + $0x8] sm:$0xff]  ;;  %v399_v7 = vld [vmem:[%s11582_s6 + $0x18] sm:$0xff]  ;;  %2069 = vadd.xlane.f32.xlu1 %v2068_v4  ;;  %v334_v10 = vld [vmem:[%s11581_s25 + $0x10] sm:$0xff]  ;;  %v407_v41 = vrot.slane %v402_v37, %v9672_v35  ;;  %v411_v43 = vrot.slane %v402_v37, %v9675_v39  ;;  %s11587_s27 = sld [smem:[#allocation49_spill]]  ;;  %s9434_s28 = smov 56  }
 0x108   :  { %v401_v9 = vpack.c.bf16 %v399_v7, %v397_v6  ;;  %v396_v11 = vld [vmem:[%s11582_s6] sm:$0xff]  ;;  %v398_v12 = vld [vmem:[%s11582_s6 + $0x10] sm:$0xff]  ;;  %v337_v13 = vpack.c.bf16 %v334_v10, %v332_v8  ;;  %v9679_v42 = vsub.s32 %v508_v38, %v342_v24  ;;  %s11588_s19 = sld [smem:[#allocation48_spill]]  ;;  %s9435_s1 = smov 112  }
 0x109   :  { %369 = vmatprep.subr.bf16.mxu0 %v338_v5  ;;  %v400_v14 = vpack.c.bf16 %v398_v12, %v396_v11  ;;  %v329_v15 = vld [vmem:[%s11583_s13] sm:$0x3f]  ;;  %764 = vrot.lane.b32.xlu0 %v7705_v19, %s9427_s3  ;;  %s11589_s9 = sld [smem:[#allocation41_spill]]  ;;  %s9436_s2 = smov 80  }
 0x10a   :  { %428 = vmatprep.subr.bf16.mxu1 %v401_v9  ;;  %v9651_v17 = vpack.c.bf16 %v329_v15, %v329_v15  ;;  %370 = vmatpush1.bf16.msra.mxu0 %v337_v13  ;;  %v339_v36 = vld [vmem:[%s11584_s22] sm:$0x3]  ;;  %s11590_s7 = sld [smem:[#allocation50_spill]]  ;;  %s9437_s4 = smov 72  }
 0x10b   :  { %429 = vmatpush1.bf16.msra.mxu1 %v400_v14  ;;  %v344_v40 = vrot.slane %v339_v36, %v9672_v35  ;;  %v348_v14 = vrot.slane %v339_v36, %v9675_v39  ;;  %s9438_s10 = smov 104   ;;  %s9439_s24 = smov 48  }
 0x10c   :  { %8076 = vmatprep.subr.bf16.mxu1 %v9429_v27  ;;  %s9440_s14 = smov 40   ;;  %s11591_s17 = sld [smem:[#allocation51_spill]] }
 0x10d   :  { %7699 = vmatmul.mubr.msk.bf16.vlgmr.msra.gmra.mxu0 %vm351_vm1, %v9651_v17  ;;  %1836 = vrot.lane.b32.xlu0 %v7717_v20, %s9428_s18  ;;  %s11592_s11 = sld [smem:[#allocation52_spill]] }
 0x10e   :  { %7700 = vmatmul.mubr.msk.bf16.vlgmr.msra.gmra.mxu1 %vm351_vm1, %v9651_v17  ;;  %493 = vmatprep.mubr.bf16.mxu0 %v9425_v0  ;;  %s11593_s8 = sld [smem:[#allocation53_spill]] }
 0x10f   :  { %s11594_s15 = sld [smem:[#allocation54_spill]] }
 0x110   :  { %s11595_s20 = sld [smem:[#allocation55_spill]] }
 0x111   :  { %s11596_s30 = sld [smem:[#allocation56_spill]] }
 0x118   :  { %1098 = vrot.lane.b32.xlu1 %v7709_v21, %s9428_s18 }
 0x11c   :  { %1502 = vrot.lane.b32.xlu1 %v7713_v22, %s9427_s3 }
 0x173   :  { %v9697_v2 = vpop.permute.xlu0 %932 }
 0x177   :  { %v9708_v12 = vpop.permute.xlu0 %1670 }
 0x190   :  { %v2070_v28 = vpop.xlane.xlu1 %2069 }
 0x191   :  { %v2072_v29 = vmul.f32 0.03125, %v2070_v28 }
 0x193   :  { %v9667_v30 = vsub.f32 %v2064_v1, %v2072_v29 }
 0x195   :  { %v2074_v31 = vmul.f32 %v9667_v30, %v9667_v30 }
 0x197   :  { %v2075_v32 = vsel %vm2067_vm0, %v2074_v31, 0.0 }
 0x198   :  { %2076 = vadd.xlane.f32.xlu0 %v2075_v32  ;;  %v9728_v32 = vpop.permute.xlu0 %764 }
 0x1cd   :  { %v389_v44 = vpop.f32.mrf.mxu0 }
 0x1ce   :  { %v448_v45 = vpop.f32.mrf.mxu1  ;;  %v9682_v46 = vadd.f32 %v389_v44, %v344_v40 }
 0x1cf   :  { %v449_v47 = vadd.f32 %v448_v45, %v407_v41  ;;  %v391_v48 = vpop.f32.mrf.mxu0 }
 0x1d0   :  { %v450_v49 = vpop.f32.mrf.mxu1  ;;  %v9687_v55 = vpack.c.bf16 %v9682_v46, %v9682_v46  ;;  %v9723_v25 = vadd.f32 %v391_v48, %v348_v14 }
 0x1d1   :  { %v505_v50 = vcombine.high %v449_v47, %v449_v47  ;;  %v512_v51 = vrot.slane %v449_v47, %v9679_v42  ;;  %v451_v52 = vadd.f32 %v450_v49, %v411_v43  ;;  %v393_v53 = vpop.f32.mrf.mxu0 }
 0x1d2   :  { %v452_v54 = vpop.f32.mrf.mxu1  ;;  %v703_v62 = vsel %vm701_vm2, %v9687_v55, 0 }
 0x1d3   :  { %v520_v56 = vcombine.high %v512_v51, %v512_v51  ;;  %v528_v57 = vrot.slane %v512_v51, %v9679_v42  ;;  %v1260_v58 = vcombine.high %v451_v52, %v451_v52  ;;  %v1267_v59 = vrot.slane %v451_v52, %v9679_v42  ;;  %v394_v60 = vpop.f32.mrf.mxu0  ;;  %8077 = vmatpush3.bf16.msra.mxu1 %v703_v62 }
 0x1d4   :  { %v453_v61 = vpop.f32.mrf.mxu1  ;;  %v9694_v63 = vrot.slane %v505_v50, %v9679_v42  ;;  %8088 = vmatprep.subr.bf16.mxu1 %v9429_v27  ;;  %v9754_v60 = vld [vmem:[#allocation6 + $0x4] ss:$0 sm:$0xff] }
 0x1d5   :  { %v542_v1 = vrot.slane %v520_v56, %v9679_v42  ;;  %v555_v3 = vrot.slane %v528_v57, %v9672_v35  ;;  %v1275_v4 = vcombine.high %v1267_v59, %v1267_v59  ;;  %v1274_v7 = vrot.slane %v1260_v58, %v9679_v42 }
 0x1d6   :  { %v521_v8 = vcombine.high %v9694_v63, %v9694_v63  ;;  %v550_v36 = vcombine.high %v528_v57, %v528_v57  ;;  %v535_v41 = vrot.slane %v9694_v63, %v9679_v42  ;;  %v1283_v54 = vrot.slane %v1267_v59, %v9679_v42 }
 0x1d7   :  { %v559_v5 = vrot.slane %v542_v1, %v9672_v35  ;;  %v582_v6 = vadd.f32 %v555_v3, %v9682_v46  ;;  %v551_v9 = vcombine.high %v542_v1, %v542_v1  ;;  %v1297_v10 = vrot.slane %v1275_v4, %v9679_v42 }
 0x1d8   :  { %v1290_v15 = vrot.slane %v1274_v7, %v9679_v42  ;;  %v549_v18 = vrot.slane %v521_v8, %v9679_v42  ;;  %v1276_v28 = vcombine.high %v1274_v7, %v1274_v7  ;;  %v563_v49 = vrot.slane %v550_v36, %v9672_v35 }
 0x1d9   :  { %v583_v11 = vadd.f32 %v559_v5, %v9682_v46  ;;  %vm588_vm3 = vcmp.gt.f32.partialorder %v582_v6, 0.0  ;;  %v594_v13 = vmul.f32 0.2, %v582_v6  ;;  %v567_v19 = vrot.slane %v551_v9, %v9672_v35 }
 0x1da   :  { %v1314_v21 = vrot.slane %v1297_v10, %v9672_v35  ;;  %v1326_v29 = vrot.slane %v1290_v15, %v9672_v35  ;;  %v575_v31 = vrot.slane %v549_v18, %v9672_v35  ;;  %v1304_v43 = vrot.slane %v1276_v28, %v9679_v42 }
 0x1db   :  { %v9716_v20 = vsel %vm588_vm3, %v582_v6, %v594_v13  ;;  %v595_v24 = vmul.f32 0.2, %v583_v11  ;;  %vm589_vm5 = vcmp.gt.f32.partialorder %v583_v11, 0.0  ;;  %v585_v34 = vadd.f32 %v567_v19, %v9682_v46 }
 0x1dc   :  { %v935_v22 = vmul.f32 %v9697_v2, %v9716_v20  ;;  %v610_v23 = vmul.f32 %v9712_v16, %v9716_v20  ;;  %v1338_v37 = vadd.f32 %v1314_v21, %v9723_v25  ;;  %v767_v38 = vmul.f32 %v9728_v32, %v9716_v20 }
 0x1dd   :  { %v9735_v40 = vsel %vm589_vm5, %v583_v11, %v595_v24  ;;  %v1341_v44 = vadd.f32 %v1326_v29, %v9723_v25  ;;  %v1306_v45 = vcombine.high %v1297_v10, %v1297_v10  ;;  %vm591_vm6 = vcmp.gt.f32.partialorder %v585_v34, 0.0 }
 0x1de   :  { %947 = vrot.lane.b32.xlu1 %v935_v22, %s9426_s16  ;;  %v617_v33 = vsel %vm616_vm4, %v610_v23, 0.0  ;;  %v597_v47 = vmul.f32 0.2, %v585_v34  ;;  %v587_v48 = vadd.f32 %v575_v31, %v9682_v46  ;;  %v936_v50 = vmul.f32 %v9697_v2, %v9735_v40 }
 0x1df   :  { %618 = vadd.xlane.f32.xlu0 %v617_v33  ;;  %vm1344_vm7 = vcmp.gt.f32.partialorder %v1338_v37, 0.0  ;;  %v1350_v51 = vmul.f32 0.2, %v1338_v37  ;;  %v1330_v56 = vrot.slane %v1304_v43, %v9672_v35  ;;  %vm1347_vm9 = vcmp.gt.f32.partialorder %v1341_v44, 0.0 }
 0x1e0   :  { %v9746_v52 = vsel %vm591_vm6, %v585_v34, %v597_v47  ;;  %vm593_vm8 = vcmp.gt.f32.partialorder %v587_v48, 0.0  ;;  %v599_v53 = vmul.f32 0.2, %v587_v48  ;;  %v1322_v58 = vrot.slane %v1306_v45, %v9672_v35 }
 0x1e1   :  { %v9751_v57 = vsel %vm1344_vm7, %v1338_v37, %v1350_v51  ;;  %v1353_v62 = vmul.f32 0.2, %v1341_v44  ;;  %v9760_v63 = vmul.f32 %v9712_v16, %v9746_v52  ;;  %v571_v42 = vrot.slane %v535_v41, %v9672_v35 }
 0x1e2   :  { %779 = vrot.lane.b32.xlu1 %v767_v38, %s9428_s18  ;;  %v9756_v61 = vsel %vm593_vm8, %v587_v48, %v599_v53  ;;  %v584_v59 = vadd.f32 %v563_v49, %v9682_v46  ;;  %v9770_v3 = vmul.f32 %v9754_v60, %v9751_v57  ;;  %v1340_v6 = vadd.f32 %v1322_v58, %v9723_v25 }
 0x1e3   :  { %v9766_v1 = vmul.f32 %v9712_v16, %v9756_v61  ;;  %v9772_v4 = vsel %vm1347_vm9, %v1341_v44, %v1353_v62  ;;  %v1342_v7 = vadd.f32 %v1330_v56, %v9723_v25  ;;  %v586_v8 = vadd.f32 %v571_v42, %v9682_v46  ;;  %v9838_v42 = vpop.permute.xlu1 %1098 }
 0x1e4   :  { %v1369_v5 = vmul.f32 %v9754_v60, %v9772_v4  ;;  %v1310_v9 = vrot.slane %v1283_v54, %v9672_v35  ;;  %v596_v10 = vmul.f32 0.2, %v584_v59  ;;  %vm1346_vm10 = vcmp.gt.f32.partialorder %v1340_v6, 0.0 }
 0x1e5   :  { %v1352_v11 = vmul.f32 0.2, %v1340_v6  ;;  %vm1348_vm11 = vcmp.gt.f32.partialorder %v1342_v7, 0.0  ;;  %v1354_v13 = vmul.f32 0.2, %v1342_v7  ;;  %vm590_vm12 = vcmp.gt.f32.partialorder %v584_v59, 0.0 }
 0x1e6   :  { %949 = vrot.lane.b32.xlu1 %v936_v50, %s9426_s16  ;;  %v1337_v46 = vadd.f32 %v1310_v9, %v9723_v25  ;;  %v9789_v21 = vsel %vm590_vm12, %v584_v59, %v596_v10  ;;  %v598_v22 = vmul.f32 0.2, %v586_v8  ;;  %vm592_vm13 = vcmp.gt.f32.partialorder %v586_v8, 0.0 }
 0x1e7   :  { %v9780_v14 = vsel %vm1346_vm10, %v1340_v6, %v1352_v11  ;;  %v9782_v15 = vsel %vm1348_vm11, %v1342_v7, %v1354_v13  ;;  %v937_v23 = vmul.f32 %v9697_v2, %v9789_v21  ;;  %v611_v34 = vmul.f32 %v9712_v16, %v9735_v40  ;;  %v9843_v7 = vpop.permute.xlu1 %1502 }
 0x1e8   :  { %v1368_v18 = vmul.f32 %v9754_v60, %v9780_v14  ;;  %v1370_v19 = vmul.f32 %v9754_v60, %v9782_v15  ;;  %v9793_v24 = vsel %vm592_vm13, %v586_v8, %v598_v22  ;;  %v1349_v28 = vmul.f32 0.2, %v1337_v46 }
 0x1e9   :  { %vm1343_vm14 = vcmp.gt.f32.partialorder %v1337_v46, 0.0  ;;  %v939_v29 = vmul.f32 %v9697_v2, %v9793_v24  ;;  %v620_v36 = vsel %vm616_vm4, %v611_v34, 0.0  ;;  %v614_v37 = vmul.f32 %v9712_v16, %v9793_v24 }
 0x1ea   :  { %v9798_v31 = vsel %vm1343_vm14, %v1337_v46, %v1349_v28  ;;  %v612_v44 = vmul.f32 %v9712_v16, %v9789_v21  ;;  %v1305_v47 = vcombine.high %v1283_v54, %v1283_v54  ;;  %v938_v48 = vmul.f32 %v9697_v2, %v9746_v52  ;;  %v9860_v46 = vpop.permute.xlu0 %1836 }
 0x1eb   :  { %v1673_v33 = vmul.f32 %v9708_v12, %v9798_v31  ;;  %v629_v38 = vsel %vm616_vm4, %v614_v37, 0.0  ;;  %v1365_v41 = vmul.f32 %v9754_v60, %v9798_v31  ;;  %v940_v50 = vmul.f32 %v9697_v2, %v9756_v61 }
 0x1ec   :  { %v623_v45 = vsel %vm616_vm4, %v612_v44, 0.0  ;;  %v1318_v49 = vrot.slane %v1305_v47, %v9672_v35  ;;  %v1674_v16 = vmul.f32 %v9708_v12, %v9751_v57  ;;  %v1677_v2 = vmul.f32 %v9708_v12, %v9772_v4 }
 0x1ed   :  { %v1371_v43 = vsel %vm616_vm4, %v1365_v41, 0.0  ;;  %v1383_v59 = vsel %vm616_vm4, %v1369_v5, 0.0  ;;  %v626_v6 = vsel %vm616_vm4, %v9760_v63, 0.0  ;;  %v632_v8 = vsel %vm616_vm4, %v9766_v1, 0.0 }
 0x1ee   :  { %v1339_v51 = vadd.f32 %v1318_v49, %v9723_v25  ;;  %v1380_v5 = vsel %vm616_vm4, %v1368_v18, 0.0  ;;  %v1676_v63 = vmul.f32 %v9708_v12, %v9780_v14  ;;  %v1386_v11 = vsel %vm616_vm4, %v1370_v19, 0.0 }
 0x1ef   :  { %v1678_v1 = vmul.f32 %v9708_v12, %v9782_v15  ;;  %vm667_vm3 = vcmask 1041409   ;;  %vm669_vm5 = vcmask 1042434   ;;  %vm671_vm6 = vcmask 1043459  }
 0x1f0   :  { %v1351_v53 = vmul.f32 0.2, %v1339_v51  ;;  %vm1345_vm15 = vcmp.gt.f32.partialorder %v1339_v51, 0.0  ;;  %vm673_vm7 = vcmask 1044484   ;;  %vm675_vm8 = vcmask 1045509  }
 0x1f1   :  { %vm679_vm10 = vcmask 46080   ;;  %vm9431_vm11 = vmmov 0   ;;  %vm697_vm12 = vcmask 48128   ;;  %vm756_vm13 = vcmask 258052  }
 0x1f2   :  { %v9827_v54 = vsel %vm1345_vm15, %v1339_v51, %v1351_v53  ;;  %8078 = vmatprep.mubr.msk.bf16.mxu1 %vm9431_vm11, %v9429_v27  ;;  %vm2160_vm14 = vcmask 64512   ;;  %vm2928_vm15 = vcmask 523264  }
 0x1f3   :  { %v1675_v56 = vmul.f32 %v9708_v12, %v9827_v54  ;;  %v1367_v58 = vmul.f32 %v9754_v60, %v9827_v54  ;;  %v1374_v60 = vsel %vm616_vm4, %v9770_v3, 0.0 }
 0x1f5   :  { %951 = vrot.lane.b32.xlu0 %v937_v23, %s9426_s16  ;;  %v1377_v62 = vsel %vm616_vm4, %v1367_v58, 0.0 }
 0x1f9   :  { %955 = vrot.lane.b32.xlu0 %v939_v29, %s9426_s16 }
 0x1fd   :  { %1685 = vrot.lane.b32.xlu0 %v1673_v33, %s9426_s16 }
 0x20a   :  { %621 = vadd.xlane.f32.xlu1 %v620_v36 }
 0x20e   :  { %630 = vadd.xlane.f32.xlu1 %v629_v38 }
 0x212   :  { %1372 = vadd.xlane.f32.xlu1 %v1371_v43 }
 0x21c   :  { %624 = vadd.xlane.f32.xlu0 %v623_v45 }
 0x221   :  { %v9862_v18 = vpop.xlane.xlu0 %2076 }
 0x223   :  { %953 = vrot.lane.b32.xlu1 %v938_v48, %s9426_s16 }
 0x227   :  { %957 = vrot.lane.b32.xlu1 %v940_v50, %s9426_s16 }
 0x22b   :  { %1687 = vrot.lane.b32.xlu1 %v1674_v16, %s9426_s16 }
 0x232   :  { %1689 = vrot.lane.b32.xlu0 %v1675_v56, %s9426_s16  ;;  %v769_v56 = vmul.f32 %v9728_v32, %v9789_v21 }
 0x236   :  { %1693 = vrot.lane.b32.xlu0 %v1677_v2, %s9426_s16  ;;  %v770_v2 = vmul.f32 %v9728_v32, %v9746_v52 }
 0x24f   :  { %1378 = vadd.xlane.f32.xlu1 %v1377_v62 }
 0x250   :  { %v948_v9 = vpop.permute.xlu1 %947 }
 0x251   :  { %v965_v28 = vsel %vm616_vm4, %v948_v9, 0.0 }
 0x253   :  { %1384 = vadd.xlane.f32.xlu1 %v1383_v59 }
 0x254   :  { %v9849_v10 = vpop.permute.xlu1 %779 }
 0x255   :  { %627 = vadd.xlane.f32.xlu0 %v626_v6 }
 0x258   :  { %v950_v13 = vpop.permute.xlu1 %949 }
 0x259   :  { %633 = vadd.xlane.f32.xlu0 %v632_v8  ;;  %v968_v3 = vsel %vm616_vm4, %v950_v13, 0.0 }
 0x25d   :  { %1375 = vadd.xlane.f32.xlu0 %v1374_v60 }
 0x261   :  { %1381 = vadd.xlane.f32.xlu0 %v1380_v5 }
 0x264   :  { %1691 = vrot.lane.b32.xlu1 %v1676_v63, %s9426_s16 }
 0x265   :  { %1387 = vadd.xlane.f32.xlu0 %v1386_v11 }
 0x268   :  { %1695 = vrot.lane.b32.xlu1 %v1678_v1, %s9426_s16  ;;  %v619_v22 = vpop.xlane.xlu0 %618  ;;  %v9887_v1 = vld [vmem:[%s11585_s23] sm:$0x3f] }
 0x269   :  { %969 = vadd.xlane.f32.xlu0 %v968_v3  ;;  %v646_v8 = vrot.slane %v619_v22, %v9664_v26  ;;  %vm331_vm9 = vcmp.gt.f32.partialorder %v9887_v1, 0.0 }
 0x26c   :  { %v952_v23 = vpop.permute.xlu0 %951 }
 0x26d   :  { %v971_v29 = vsel %vm616_vm4, %v952_v23, 0.0 }
 0x270   :  { %v956_v19 = vpop.permute.xlu0 %955 }
 0x271   :  { %v977_v12 = vsel %vm616_vm4, %v956_v19, 0.0 }
 0x274   :  { %v1686_v34 = vpop.permute.xlu0 %1685 }
 0x275   :  { %v1703_v37 = vsel %vm616_vm4, %v1686_v34, 0.0 }
 0x28c   :  { %966 = vadd.xlane.f32.xlu1 %v965_v28 }
 0x290   :  { %972 = vadd.xlane.f32.xlu1 %v971_v29 }
 0x293   :  { %v622_v33 = vpop.xlane.xlu1 %621 }
 0x294   :  { %978 = vadd.xlane.f32.xlu1 %v977_v12  ;;  %v650_v62 = vrot.slane %v622_v33, %v9664_v26 }
 0x296   :  { %v668_v60 = vsel %vm667_vm3, %v650_v62, %v646_v8  ;;  %v768_v62 = vmul.f32 %v9728_v32, %v9735_v40  ;;  %v1103_v8 = vmul.f32 %v9838_v42, %v9789_v21  ;;  %v9942_v21 = vpack.c.bf16 %v9723_v25, %v9723_v25 }
 0x297   :  { %v631_v36 = vpop.xlane.xlu1 %630 }
 0x298   :  { %1704 = vadd.xlane.f32.xlu1 %v1703_v37  ;;  %v662_v22 = vrot.slane %v631_v36, %v9664_v26 }
 0x29b   :  { %v1373_v38 = vpop.xlane.xlu1 %1372 }
 0x29c   :  { %v1398_v36 = vrot.slane %v1373_v38, %v9664_v26 }
 0x29f   :  { %v954_v41 = vpop.permute.xlu1 %953 }
 0x2a0   :  { %v974_v43 = vsel %vm616_vm4, %v954_v41, 0.0 }
 0x2a1   :  { %975 = vadd.xlane.f32.xlu0 %v974_v43 }
 0x2a3   :  { %v958_v44 = vpop.permute.xlu1 %957 }
 0x2a4   :  { %v980_v45 = vsel %vm616_vm4, %v958_v44, 0.0 }
 0x2a5   :  { %981 = vadd.xlane.f32.xlu0 %v980_v45  ;;  %v625_v47 = vpop.xlane.xlu0 %624 }
 0x2a6   :  { %v654_v6 = vrot.slane %v625_v47, %v9664_v26 }
 0x2a7   :  { %v1688_v48 = vpop.permute.xlu1 %1687 }
 0x2a8   :  { %v1706_v49 = vsel %vm616_vm4, %v1688_v48, 0.0  ;;  %v670_v11 = vsel %vm669_vm5, %v654_v6, %v668_v60  ;;  %v1101_v6 = vmul.f32 %v9838_v42, %v9716_v20  ;;  %v1505_v60 = vmul.f32 %v9843_v7, %v9798_v31 }
 0x2a9   :  { %1707 = vadd.xlane.f32.xlu0 %v1706_v49  ;;  %v1690_v50 = vpop.permute.xlu0 %1689  ;;  %v1507_v20 = vmul.f32 %v9843_v7, %v9827_v54 }
 0x2aa   :  { %v1709_v51 = vsel %vm616_vm4, %v1690_v50, 0.0 }
 0x2ab   :  { %1710 = vadd.xlane.f32.xlu1 %v1709_v51 }
 0x2ad   :  { %v1694_v16 = vpop.permute.xlu0 %1693 }
 0x2ae   :  { %v1715_v53 = vsel %vm616_vm4, %v1694_v16, 0.0 }
 0x2af   :  { %1716 = vadd.xlane.f32.xlu1 %v1715_v53 }
 0x2c0   :  { %783 = vrot.lane.b32.xlu1 %v769_v56, %s9428_s18 }
 0x2c4   :  { %785 = vrot.lane.b32.xlu1 %v770_v2, %s9428_s18 }
 0x2d8   :  { %v1379_v58 = vpop.xlane.xlu1 %1378 }
 0x2d9   :  { %v1406_v45 = vrot.slane %v1379_v58, %v9664_v26 }
 0x2dc   :  { %v1385_v59 = vpop.xlane.xlu1 %1384 }
 0x2dd   :  { %v1414_v51 = vrot.slane %v1385_v59, %v9664_v26  ;;  %v771_v59 = vmul.f32 %v9728_v32, %v9793_v24 }
 0x2de   :  { %v628_v9 = vpop.xlane.xlu0 %627 }
 0x2df   :  { %v658_v5 = vrot.slane %v628_v9, %v9664_v26  ;;  %v1105_v9 = vmul.f32 %v9838_v42, %v9793_v24 }
 0x2e0   :  { %v1692_v63 = vpop.permute.xlu1 %1691 }
 0x2e1   :  { %v1712_v13 = vsel %vm616_vm4, %v1692_v63, 0.0  ;;  %v672_v3 = vsel %vm671_vm6, %v658_v5, %v670_v11 }
 0x2e2   :  { %1713 = vadd.xlane.f32.xlu0 %v1712_v13  ;;  %v634_v23 = vpop.xlane.xlu0 %633  ;;  %v674_v33 = vsel %vm673_vm7, %v662_v22, %v672_v3 }
 0x2e3   :  { %v666_v28 = vrot.slane %v634_v23, %v9664_v26 }
 0x2e4   :  { %v1696_v19 = vpop.permute.xlu1 %1695 }
 0x2e5   :  { %v1718_v29 = vsel %vm616_vm4, %v1696_v19, 0.0  ;;  %v676_v12 = vsel %vm675_vm8, %v666_v28, %v674_v33 }
 0x2e6   :  { %1719 = vadd.xlane.f32.xlu0 %v1718_v29  ;;  %v1376_v34 = vpop.xlane.xlu0 %1375  ;;  %v9898_v37 = vsel %vm331_vm9, %v676_v12, -1e+30 }
 0x2e7   :  { %v1402_v41 = vrot.slane %v1376_v34, %v9664_v26  ;;  %v680_v43 = vsel %vm679_vm10, %v9898_v37, -inf }
 0x2e8   :  { %681 = vmax.xlane.f32.xlu1 %v680_v43 }
 0x2e9   :  { %v1419_v44 = vsel %vm667_vm3, %v1402_v41, %v1398_v36 }
 0x2ea   :  { %v1382_v47 = vpop.xlane.xlu0 %1381  ;;  %v1420_v49 = vsel %vm669_vm5, %v1406_v45, %v1419_v44 }
 0x2eb   :  { %v1410_v48 = vrot.slane %v1382_v47, %v9664_v26 }
 0x2ed   :  { %v1421_v50 = vsel %vm671_vm6, %v1410_v48, %v1420_v49 }
 0x2ee   :  { %v1388_v38 = vpop.xlane.xlu0 %1387  ;;  %v1422_v53 = vsel %vm673_vm7, %v1414_v51, %v1421_v50 }
 0x2ef   :  { %v1418_v16 = vrot.slane %v1388_v38, %v9664_v26 }
 0x2f1   :  { %v1423_v56 = vsel %vm675_vm8, %v1418_v16, %v1422_v53 }
 0x2f2   :  { %v9915_v2 = vsel %vm331_vm9, %v1423_v56, -1e+30  ;;  %v970_v63 = vpop.xlane.xlu0 %969 }
 0x2f3   :  { %v1426_v58 = vsel %vm679_vm10, %v9915_v2, -inf  ;;  %v996_v3 = vrot.slane %v970_v63, %v9664_v26 }
 0x2f4   :  { %1427 = vmax.xlane.f32.xlu1 %v1426_v58 }
 0x2fc   :  { %781 = vrot.lane.b32.xlu0 %v768_v62, %s9428_s18 }
 0x305   :  { %787 = vrot.lane.b32.xlu1 %v771_v59, %s9428_s18 }
 0x309   :  { %1113 = vrot.lane.b32.xlu1 %v1101_v6, %s9427_s3 }
 0x30d   :  { %1117 = vrot.lane.b32.xlu1 %v1103_v8, %s9427_s3 }
 0x311   :  { %1121 = vrot.lane.b32.xlu1 %v1105_v9, %s9427_s3 }
 0x315   :  { %1517 = vrot.lane.b32.xlu1 %v1505_v60, %s9428_s18  ;;  %v967_v24 = vpop.xlane.xlu1 %966 }
 0x316   :  { %v992_v11 = vrot.slane %v967_v24, %v9664_v26 }
 0x318   :  { %v1013_v23 = vsel %vm667_vm3, %v996_v3, %v992_v11 }
 0x319   :  { %1521 = vrot.lane.b32.xlu1 %v1507_v20, %s9428_s18  ;;  %v973_v5 = vpop.xlane.xlu1 %972 }
 0x31a   :  { %v1000_v13 = vrot.slane %v973_v5, %v9664_v26 }
 0x31c   :  { %v1014_v25 = vsel %vm669_vm5, %v1000_v13, %v1013_v23 }
 0x31d   :  { %1772 = vrot.lane.b32.xlu1 %v9942_v21, %s9426_s16  ;;  %v979_v28 = vpop.xlane.xlu1 %978 }
 0x31e   :  { %v1008_v33 = vrot.slane %v979_v28, %v9664_v26 }
 0x321   :  { %v1705_v45 = vpop.xlane.xlu1 %1704 }
 0x322   :  { %v1730_v51 = vrot.slane %v1705_v45, %v9664_v26  ;;  %v457_v45 = vld [vmem:[%s11586_s0 + $0x10] sm:$0xff] }
 0x32a   :  { %v976_v22 = vpop.xlane.xlu0 %975 }
 0x32b   :  { %v1004_v19 = vrot.slane %v976_v22, %v9664_v26  ;;  %v9990_v22 = vsel %vm331_vm9, 1.0, %v9429_v27 }
 0x32d   :  { %v1015_v29 = vsel %vm671_vm6, %v1004_v19, %v1014_v25  ;;  %v772_v19 = vmul.f32 %v9728_v32, %v9756_v61  ;;  %v1102_v25 = vmul.f32 %v9838_v42, %v9735_v40  ;;  %v1510_v32 = vmul.f32 %v9843_v7, %v9782_v15 }
 0x32e   :  { %v982_v12 = vpop.xlane.xlu0 %981  ;;  %v1016_v36 = vsel %vm673_vm7, %v1008_v33, %v1015_v29  ;;  %v1104_v29 = vmul.f32 %v9838_v42, %v9746_v52  ;;  %v1106_v33 = vmul.f32 %v9838_v42, %v9756_v61  ;;  %v1506_v40 = vmul.f32 %v9843_v7, %v9751_v57 }
 0x32f   :  { %v1012_v34 = vrot.slane %v982_v12, %v9664_v26  ;;  %v1840_v52 = vmul.f32 %v9860_v46, %v9751_v57  ;;  %v1508_v61 = vmul.f32 %v9843_v7, %v9780_v14  ;;  %v456_v12 = vld [vmem:[%s11586_s0 + $0x8] sm:$0xff] }
 0x331   :  { %v1017_v41 = vsel %vm675_vm8, %v1012_v34, %v1016_v36  ;;  %v458_v34 = vld [vmem:[%s11586_s0 + $0x18] sm:$0xff]  ;;  %v455_v36 = vld [vmem:[%s11586_s0] sm:$0xff] }
 0x332   :  { %v9959_v43 = vsel %vm331_vm9, %v1017_v41, -1e+30  ;;  %v1708_v49 = vpop.xlane.xlu0 %1707  ;;  %v459_v57 = vpack.c.bf16 %v457_v45, %v455_v36 }
 0x333   :  { %v1020_v44 = vsel %vm679_vm10, %v9959_v43, -inf  ;;  %v1734_v50 = vrot.slane %v1708_v49, %v9664_v26 }
 0x334   :  { %1021 = vmax.xlane.f32.xlu0 %v1020_v44  ;;  %v1711_v47 = vpop.xlane.xlu1 %1710  ;;  %v460_v44 = vpack.c.bf16 %v458_v34, %v456_v12  ;;  %v1842_v34 = vmul.f32 %v9860_v46, %v9780_v14 }
 0x335   :  { %v1738_v16 = vrot.slane %v1711_v47, %v9664_v26  ;;  %v1751_v53 = vsel %vm667_vm3, %v1734_v50, %v1730_v51 }
 0x336   :  { %475 = vmatprep.subr.bf16.mxu0 %v460_v44 }
 0x337   :  { %v1752_v62 = vsel %vm669_vm5, %v1738_v16, %v1751_v53  ;;  %476 = vmatpush1.bf16.msra.mxu0 %v459_v57 }
 0x338   :  { %v1717_v48 = vpop.xlane.xlu1 %1716  ;;  %8082 = vmatprep.subr.bf16.mxu0 %v9429_v27 }
 0x339   :  { %v1746_v8 = vrot.slane %v1717_v48, %v9664_v26 }
 0x33a   :  { %7701 = vmatmul.mubr.msk.bf16.vlgmr.msra.gmra.mxu0 %vm351_vm1, %v9651_v17 }
 0x33b   :  { %8084 = vmatprep.mubr.msk.bf16.mxu0 %vm9431_vm11, %v9429_v27 }
 0x33c   :  { %v9967_v38 = vpop.permute.xlu1 %783 }
 0x340   :  { %v9973_v59 = vpop.permute.xlu1 %785 }
 0x34a   :  { %1034 = vrot.lane.b32.xlu0 %v9687_v55, %s9426_s16 }
 0x36b   :  { %v1714_v56 = vpop.xlane.xlu0 %1713 }
 0x36c   :  { %v1742_v58 = vrot.slane %v1714_v56, %v9664_v26 }
 0x36e   :  { %v1753_v6 = vsel %vm671_vm6, %v1742_v58, %v1752_v62  ;;  %v1509_v62 = vmul.f32 %v9843_v7, %v9772_v4 }
 0x36f   :  { %v1720_v9 = vpop.xlane.xlu0 %1719  ;;  %v1754_v20 = vsel %vm673_vm7, %v1746_v8, %v1753_v6 }
 0x370   :  { %v1750_v60 = vrot.slane %v1720_v9, %v9664_v26  ;;  %v1841_v9 = vmul.f32 %v9860_v46, %v9827_v54 }
 0x371   :  { %v682_v24 = vpop.xlane.xlu1 %681 }
 0x372   :  { %v1755_v5 = vsel %vm675_vm8, %v1750_v60, %v1754_v20  ;;  %v683_v63 = vsub.f32 %v9898_v37, %v682_v24  ;;  %v1843_v60 = vmul.f32 %v9860_v46, %v9772_v4 }
 0x373   :  { %v9983_v11 = vsel %vm331_vm9, %v1755_v5, -1e+30  ;;  %v10033_v48 = vpop.permute.xlu0 %781 }
 0x374   :  { %v1758_v13 = vsel %vm679_vm10, %v9983_v11, -inf  ;;  %v684_v3 = vmul.f32 1.442695, %v683_v63 }
 0x375   :  { %1759 = vmax.xlane.f32.xlu0 %v1758_v13 }
 0x376   :  { %8791 = vpow2.f32 %v684_v3 }
 0x37d   :  { %v1428_v42 = vpop.xlane.xlu1 %1427 }
 0x37e   :  { %v1429_v41 = vsub.f32 %v9915_v2, %v1428_v42 }
 0x380   :  { %v1430_v47 = vmul.f32 1.442695, %v1429_v41 }
 0x381   :  { %v10048_v6 = vpop.permute.xlu1 %787 }
 0x382   :  { %8793 = vpow2.f32 %v1430_v47 }
 0x383   :  { %v8792_v23 = vpop.eup %8791 }
 0x384   :  { %v9993_v28 = vmul.f32 %v8792_v23, %v9990_v22 }
 0x385   :  { %v10054_v8 = vpop.permute.xlu1 %1113 }
 0x386   :  { %v689_v37 = vsel %vm679_vm10, %v9993_v28, 0.0 }
 0x387   :  { %690 = vadd.xlane.f32.xlu1 %v689_v37 }
 0x389   :  { %v10061_v7 = vpop.permute.xlu1 %1117 }
 0x38b   :  { %789 = vrot.lane.b32.xlu0 %v772_v19, %s9428_s18 }
 0x38d   :  { %v10064_v24 = vpop.permute.xlu1 %1121 }
 0x38f   :  { %1115 = vrot.lane.b32.xlu0 %v1102_v25, %s9427_s3  ;;  %v8794_v2 = vpop.eup %8793 }
 0x390   :  { %v10036_v49 = vmul.f32 %v8794_v2, %v9990_v22 }
 0x391   :  { %v10067_v63 = vpop.permute.xlu1 %1517 }
 0x392   :  { %v1433_v51 = vsel %vm679_vm10, %v10036_v49, 0.0 }
 0x393   :  { %1119 = vrot.lane.b32.xlu0 %v1104_v29, %s9427_s3  ;;  %v797_v29 = vsel %vm616_vm4, %v9849_v10, 0.0 }
 0x395   :  { %v10069_v54 = vpop.permute.xlu1 %1521 }
 0x397   :  { %1123 = vrot.lane.b32.xlu0 %v1106_v33, %s9427_s3  ;;  %v803_v33 = vsel %vm616_vm4, %v9967_v38, 0.0 }
 0x398   :  { %1527 = vrot.lane.b32.xlu1 %v1510_v32, %s9428_s18 }
 0x399   :  { %v10071_v3 = vpop.permute.xlu1 %1772 }
 0x39b   :  { %1519 = vrot.lane.b32.xlu0 %v1506_v40, %s9428_s18  ;;  %v806_v40 = vsel %vm616_vm4, %v9973_v59, 0.0 }
 0x39c   :  { %1853 = vrot.lane.b32.xlu1 %v1840_v52, %s9427_s3 }
 0x39f   :  { %1523 = vrot.lane.b32.xlu0 %v1508_v61, %s9428_s18 }
 0x3bd   :  { %v1022_v50 = vpop.xlane.xlu0 %1021 }
 0x3be   :  { %v1023_v16 = vsub.f32 %v9959_v43, %v1022_v50  ;;  %1434 = vadd.xlane.f32.xlu0 %v1433_v51  ;;  %v1839_v43 = vmul.f32 %v9860_v46, %v9798_v31  ;;  %v800_v51 = vsel %vm616_vm4, %v10033_v48, 0.0 }
 0x3c0   :  { %v1024_v53 = vmul.f32 1.442695, %v1023_v16  ;;  %v809_v16 = vsel %vm616_vm4, %v10048_v6, 0.0  ;;  %v1535_v6 = vsel %vm616_vm4, %v10067_v63, 0.0 }
 0x3c1   :  { %v1035_v20 = vpop.permute.xlu0 %1034 }
 0x3c2   :  { %8795 = vpow2.f32 %v1024_v53  ;;  %v1040_v59 = vsel %vm701_vm2, %v1035_v20, 0  ;;  %v1131_v53 = vsel %vm616_vm4, %v10054_v8, 0.0  ;;  %v1541_v8 = vsel %vm616_vm4, %v10069_v54, 0.0 }
 0x3c3   :  { %v1445_v54 = vsel %vm701_vm2, %v9942_v21, 0 }
 0x3cf   :  { %v8796_v17 = vpop.eup %8795 }
 0x3d0   :  { %v10042_v56 = vmul.f32 %v8796_v17, %v9990_v22 }
 0x3d2   :  { %v1027_v58 = vsel %vm679_vm10, %v10042_v56, 0.0 }
 0x3d3   :  { %1028 = vadd.xlane.f32.xlu0 %v1027_v58  ;;  %v1137_v58 = vsel %vm616_vm4, %v10061_v7, 0.0 }
 0x3e9   :  { %1525 = vrot.lane.b32.xlu0 %v1509_v62, %s9428_s18 }
 0x3ed   :  { %1851 = vrot.lane.b32.xlu0 %v1839_v43, %s9427_s3  ;;  %v1143_v43 = vsel %vm616_vm4, %v10064_v24, 0.0 }
 0x3f1   :  { %1855 = vrot.lane.b32.xlu0 %v1841_v9, %s9427_s3 }
 0x3f5   :  { %1859 = vrot.lane.b32.xlu0 %v1843_v60, %s9427_s3 }
 0x3fe   :  { %v1760_v31 = vpop.xlane.xlu0 %1759 }
 0x3ff   :  { %v1761_v5 = vsub.f32 %v9983_v11, %v1760_v31 }
 0x401   :  { %v1762_v13 = vmul.f32 1.442695, %v1761_v5 }
 0x402   :  { %v790_v19 = vpop.permute.xlu0 %789 }
 0x403   :  { %8797 = vpow2.f32 %v1762_v13  ;;  %v812_v61 = vsel %vm616_vm4, %v790_v19, 0.0 }
 0x406   :  { %v1116_v32 = vpop.permute.xlu0 %1115 }
 0x407   :  { %v1134_v12 = vsel %vm616_vm4, %v1116_v32, 0.0 }
 0x40a   :  { %v1120_v52 = vpop.permute.xlu0 %1119 }
 0x40b   :  { %v1140_v41 = vsel %vm616_vm4, %v1120_v52, 0.0 }
 0x40e   :  { %v1124_v38 = vpop.permute.xlu0 %1123 }
 0x40f   :  { %v1146_v44 = vsel %vm616_vm4, %v1124_v38, 0.0 }
 0x410   :  { %v8798_v23 = vpop.eup %8797  ;;  %v691_v4 = vpop.xlane.xlu1 %690 }
 0x411   :  { %v10074_v37 = vmul.f32 %v8798_v23, %v9990_v22  ;;  %v692_v25 = vmax.f32 %v691_v4, 1e-09 }
 0x412   :  { %v1520_v14 = vpop.permute.xlu0 %1519 }
 0x413   :  { %v1765_v11 = vsel %vm679_vm10, %v10074_v37, 0.0  ;;  %8799 = vrcp.f32 %v692_v25  ;;  %v1538_v45 = vsel %vm616_vm4, %v1520_v14, 0.0  ;;  %v2099_v14 = vld [vmem:[%s11587_s27] sm:$0xff] }
 0x414   :  { %798 = vadd.xlane.f32.xlu0 %v797_v29  ;;  %1766 = vadd.xlane.f32.xlu1 %v1765_v11  ;;  %v1528_v47 = vpop.permute.xlu1 %1527  ;;  %v1778_v11 = vsel %vm701_vm2, %v10071_v3, 0 }
 0x416   :  { %v1524_v57 = vpop.permute.xlu0 %1523 }
 0x417   :  { %v1544_v2 = vsel %vm616_vm4, %v1524_v57, 0.0  ;;  %v7720_v57 = vld [vmem:[#allocation9] ss:$0 sm:$0xff] }
 0x418   :  { %804 = vadd.xlane.f32.xlu0 %v803_v33  ;;  %v2078_v33 = vmul.f32 0.03125, %v9862_v18  ;;  %v2101_v18 = vld [vmem:[%s11587_s27 + $0x10] sm:$0xff] }
 0x41c   :  { %807 = vadd.xlane.f32.xlu0 %v806_v40 }
 0x420   :  { %813 = vadd.xlane.f32.xlu0 %v812_v61  ;;  %v8800_v10 = vpop.eup %8799 }
 0x421   :  { %v694_v42 = vmul.f32 %v8800_v10, %v9993_v28  ;;  %v1844_v28 = vmul.f32 %v9860_v46, %v9782_v15  ;;  %v1550_v15 = vsel %vm616_vm4, %v1528_v47, 0.0  ;;  %v1854_v46 = vpop.permute.xlu1 %1853 }
 0x422   :  { %v1872_v50 = vsel %vm616_vm4, %v1854_v46, 0.0 }
 0x423   :  { %v695_v36 = vpack.c.bf16 %v694_v42, %v694_v42 }
 0x424   :  { %1135 = vadd.xlane.f32.xlu0 %v1134_v12 }
 0x425   :  { %1857 = vrot.lane.b32.xlu1 %v1842_v34, %s9427_s3  ;;  %8079 = vmatmul.mubr.msk.bf16.vlgmr.msra.gmra.mxu1 %vm697_vm12, %v695_v36  ;;  %v2102_v34 = vld [vmem:[%s11587_s27 + $0x18] sm:$0xff]  ;;  %v7719_v36 = vld [vmem:[%s11588_s19] ss:$0 sm:$0xff] }
 0x426   :  { %8089 = vmatpush3.bf16.msra.mxu1 %v1040_v59  ;;  %8090 = vmatprep.mubr.msk.bf16.mxu1 %vm9431_vm11, %v9429_v27 }
 0x427   :  { %8100 = vmatprep.subr.bf16.mxu1 %v9429_v27 }
 0x428   :  { %1141 = vadd.xlane.f32.xlu0 %v1140_v41  ;;  %v2105_v41 = vpack.c.bf16 %v2102_v34, %v2101_v18 }
 0x429   :  { %1861 = vrot.lane.b32.xlu1 %v1844_v28, %s9427_s3 }
 0x42c   :  { %1147 = vadd.xlane.f32.xlu0 %v1146_v44  ;;  %v2100_v44 = vld [vmem:[%s11587_s27 + $0x8] sm:$0xff] }
 0x42d   :  { %v2104_v47 = vpack.c.bf16 %v2100_v44, %v2099_v14 }
 0x430   :  { %1539 = vadd.xlane.f32.xlu0 %v1538_v45 }
 0x434   :  { %1545 = vadd.xlane.f32.xlu0 %v1544_v2  ;;  %v10152_v2 = vpop.f32.mrf.mxu0 }
 0x438   :  { %1551 = vadd.xlane.f32.xlu0 %v1550_v15 }
 0x43c   :  { %1873 = vadd.xlane.f32.xlu0 %v1872_v50 }
 0x447   :  { %v1435_v17 = vpop.xlane.xlu0 %1434 }
 0x448   :  { %v1436_v48 = vmax.f32 %v1435_v17, 1e-09 }
 0x44d   :  { %801 = vadd.xlane.f32.xlu1 %v800_v51 }
 0x451   :  { %810 = vadd.xlane.f32.xlu1 %v809_v16 }
 0x455   :  { %1132 = vadd.xlane.f32.xlu1 %v1131_v53 }
 0x459   :  { %1138 = vadd.xlane.f32.xlu1 %v1137_v58 }
 0x45c   :  { %v1029_v62 = vpop.xlane.xlu0 %1028 }
 0x45d   :  { %v1030_v9 = vmax.f32 %v1029_v62, 1e-09  ;;  %1144 = vadd.xlane.f32.xlu1 %v1143_v43 }
 0x45f   :  { %8801 = vrcp.f32 %v1030_v9 }
 0x460   :  { %v1526_v60 = vpop.permute.xlu0 %1525  ;;  %8803 = vrcp.f32 %v1436_v48 }
 0x461   :  { %1536 = vadd.xlane.f32.xlu1 %v1535_v6  ;;  %v1547_v7 = vsel %vm616_vm4, %v1526_v60, 0.0 }
 0x464   :  { %v1852_v20 = vpop.permute.xlu0 %1851 }
 0x465   :  { %1542 = vadd.xlane.f32.xlu1 %v1541_v8  ;;  %v1869_v5 = vsel %vm616_vm4, %v1852_v20, 0.0 }
 0x468   :  { %v1856_v31 = vpop.permute.xlu0 %1855 }
 0x469   :  { %1548 = vadd.xlane.f32.xlu1 %v1547_v7  ;;  %v1875_v63 = vsel %vm616_vm4, %v1856_v31, 0.0 }
 0x46c   :  { %v8802_v24 = vpop.eup %8801  ;;  %v1860_v19 = vpop.permute.xlu0 %1859 }
 0x46d   :  { %1870 = vadd.xlane.f32.xlu1 %v1869_v5  ;;  %v1032_v13 = vmul.f32 %v8802_v24, %v10042_v56  ;;  %v8804_v4 = vpop.eup %8803  ;;  %v1881_v56 = vsel %vm616_vm4, %v1860_v19, 0.0 }
 0x46e   :  { %v1438_v25 = vmul.f32 %v8804_v4, %v10036_v49  ;;  %v2079_v49 = vadd.f32 1e-12, %v2078_v33 }
 0x46f   :  { %v1033_v23 = vpack.c.bf16 %v1032_v13, %v1032_v13 }
 0x470   :  { %v1439_v29 = vpack.c.bf16 %v1438_v25, %v1438_v25  ;;  %8805 = vrsqrt.f32 %v2079_v49 }
 0x471   :  { %8091 = vmatmul.mubr.msk.bf16.vlgmr.msra.gmra.mxu1 %vm697_vm12, %v1033_v23  ;;  %1876 = vadd.xlane.f32.xlu1 %v1875_v63 }
 0x472   :  { %8101 = vmatpush3.bf16.msra.mxu1 %v1445_v54  ;;  %8102 = vmatprep.mubr.msk.bf16.mxu1 %vm9431_vm11, %v9429_v27 }
 0x473   :  { %8112 = vmatprep.subr.bf16.mxu1 %v9429_v27 }
 0x475   :  { %1882 = vadd.xlane.f32.xlu1 %v1881_v56 }
 0x479   :  { %8103 = vmatmul.mubr.msk.bf16.vlgmr.msra.gmra.mxu1 %vm697_vm12, %v1439_v29 }
 0x47a   :  { %8113 = vmatpush3.bf16.msra.mxu1 %v1778_v11  ;;  %8114 = vmatprep.mubr.msk.bf16.mxu1 %vm9431_vm11, %v9429_v27  ;;  %v10181_v11 = vld [vmem:[#allocation8] sm:$0x3] }
 0x47b   :  { %8124 = vmatprep.subr.bf16.mxu1 %v9429_v27 }
 0x47d   :  { %v8806_v42 = vpop.eup %8805 }
 0x47e   :  { %v2081_v12 = vmul.f32 %v8806_v42, %v9667_v30 }
 0x480   :  { %v2088_v45 = vmul.f32 %v7719_v36, %v2081_v12 }
 0x482   :  { %v10150_v30 = vadd.f32 %v7720_v57, %v2088_v45 }
 0x484   :  { %v2103_v15 = vpack.c.bf16 %v10150_v30, %v10150_v30 }
 0x49d   :  { %v1767_v32 = vpop.xlane.xlu1 %1766  ;;  %v799_v50 = vpop.xlane.xlu0 %798 }
 0x49e   :  { %v1768_v40 = vmax.f32 %v1767_v32, 1e-09  ;;  %v824_v43 = vrot.slane %v799_v50, %v9664_v26 }
 0x4a0   :  { %8807 = vrcp.f32 %v1768_v40 }
 0x4a1   :  { %v1858_v3 = vpop.permute.xlu1 %1857  ;;  %v805_v16 = vpop.xlane.xlu0 %804 }
 0x4a2   :  { %v1878_v52 = vsel %vm616_vm4, %v1858_v3, 0.0  ;;  %v832_v48 = vrot.slane %v805_v16, %v9664_v26  ;;  %v10188_v3 = vrot.slane %v10181_v11, %v9672_v35 }
 0x4a3   :  { %1879 = vadd.xlane.f32.xlu0 %v1878_v52 }
 0x4a5   :  { %v1862_v61 = vpop.permute.xlu1 %1861  ;;  %v808_v53 = vpop.xlane.xlu0 %807 }
 0x4a6   :  { %v1884_v10 = vsel %vm616_vm4, %v1862_v61, 0.0  ;;  %v836_v60 = vrot.slane %v808_v53, %v9664_v26  ;;  %vm753_vm4 = vcmask 256002  }
 0x4a7   :  { %1885 = vadd.xlane.f32.xlu0 %v1884_v10 }
 0x4a9   :  { %v814_v17 = vpop.xlane.xlu0 %813 }
 0x4aa   :  { %v844_v5 = vrot.slane %v814_v17, %v9664_v26 }
 0x4ad   :  { %v8808_v38 = vpop.eup %8807  ;;  %v1136_v58 = vpop.xlane.xlu0 %1135 }
 0x4ae   :  { %v1770_v59 = vmul.f32 %v8808_v38, %v10074_v37  ;;  %v10154_v37 = vpop.f32.mrf.mxu0  ;;  %v1162_v56 = vrot.slane %v1136_v58, %v9664_v26 }
 0x4b0   :  { %v1771_v28 = vpack.c.bf16 %v1770_v59, %v1770_v59  ;;  %v499_v46 = vpop.f32.mrf.mxu0 }
 0x4b1   :  { %v1142_v6 = vpop.xlane.xlu0 %1141 }
 0x4b2   :  { %8115 = vmatmul.mubr.msk.bf16.vlgmr.msra.gmra.mxu1 %vm697_vm12, %v1771_v28  ;;  %v500_v51 = vpop.f32.mrf.mxu0  ;;  %v1170_v52 = vrot.slane %v1142_v6, %v9664_v26 }
 0x4b3   :  { %8125 = vmatpush3.bf16.msra.mxu1 %v2105_v41  ;;  %8128 = vmatprep.mubr.msk.bf16.mxu1 %vm9431_vm11, %v9429_v27 }
 0x4b4   :  { %8126 = vmatprep.subr.bf16.mxu1 %v9429_v27 }
 0x4b5   :  { %v1148_v63 = vpop.xlane.xlu0 %1147 }
 0x4b6   :  { %v1178_v18 = vrot.slane %v1148_v63, %v9664_v26 }
 0x4b7   :  { %8127 = vmatpush3.bf16.msra.mxu1 %v2104_v47 }
 0x4b8   :  { %8138 = vmatprep.subr.bf16.mxu1 %v9429_v27 }
 0x4b9   :  { %v1540_v32 = vpop.xlane.xlu0 %1539 }
 0x4ba   :  { %8129 = vmatmul.mubr.msk.bf16.vlgmr.msra.gmra.mxu1 %vm2067_vm0, %v2103_v15  ;;  %v1566_v46 = vrot.slane %v1540_v32, %v9664_v26 }
 0x4bb   :  { %8140 = vmatprep.mubr.msk.bf16.mxu1 %vm9431_vm11, %v9429_v27 }
 0x4bd   :  { %v1546_v44 = vpop.xlane.xlu0 %1545 }
 0x4be   :  { %v1574_v58 = vrot.slane %v1546_v44, %v9664_v26 }
 0x4c1   :  { %v1552_v53 = vpop.xlane.xlu0 %1551 }
 0x4d6   :  { %v802_v62 = vpop.xlane.xlu1 %801 }
 0x4d7   :  { %v828_v9 = vrot.slane %v802_v62, %v9664_v26 }
 0x4d9   :  { %v845_v8 = vsel %vm667_vm3, %v828_v9, %v824_v43  ;;  %v1582_v9 = vrot.slane %v1552_v53, %v9664_v26 }
 0x4da   :  { %v846_v20 = vsel %vm669_vm5, %v832_v48, %v845_v8  ;;  %v811_v7 = vpop.xlane.xlu1 %810 }
 0x4db   :  { %v840_v31 = vrot.slane %v811_v7, %v9664_v26  ;;  %v847_v24 = vsel %vm671_vm6, %v836_v60, %v846_v20 }
 0x4dd   :  { %v848_v13 = vsel %vm673_vm7, %v840_v31, %v847_v24  ;;  %v1874_v24 = vpop.xlane.xlu0 %1873 }
 0x4de   :  { %v1133_v23 = vpop.xlane.xlu1 %1132  ;;  %v849_v4 = vsel %vm675_vm8, %v844_v5, %v848_v13 }
 0x4df   :  { %v10175_v19 = vsel %vm331_vm9, %v849_v4, -1e+30  ;;  %v1158_v54 = vrot.slane %v1133_v23, %v9664_v26  ;;  %v1900_v23 = vrot.slane %v1874_v24, %v9664_v26 }
 0x4e0   :  { %v852_v25 = vsel %vm679_vm10, %v10175_v19, -inf }
 0x4e1   :  { %853 = vmax.xlane.f32.xlu1 %v852_v25  ;;  %v1179_v49 = vsel %vm667_vm3, %v1162_v56, %v1158_v54 }
 0x4e2   :  { %v1139_v29 = vpop.xlane.xlu1 %1138 }
 0x4e3   :  { %v1166_v33 = vrot.slane %v1139_v29, %v9664_v26 }
 0x4e5   :  { %v1180_v40 = vsel %vm669_vm5, %v1166_v33, %v1179_v49  ;;  %v739_v61 = vpop.f32.mrf.mxu1 }
 0x4e6   :  { %v1145_v10 = vpop.xlane.xlu1 %1144  ;;  %v745_v42 = vadd.f32 %v739_v61, %v10152_v2  ;;  %v1181_v38 = vsel %vm671_vm6, %v1170_v52, %v1180_v40 }
 0x4e7   :  { %v1174_v12 = vrot.slane %v1145_v10, %v9664_v26  ;;  %v8080_v34 = vpop.f32.mrf.mxu1 }
 0x4e8   :  { %v752_v36 = vadd.f32 %v10188_v3, %v745_v42 }
 0x4e9   :  { %v1182_v59 = vsel %vm673_vm7, %v1174_v12, %v1181_v38  ;;  %v742_v41 = vpop.f32.mrf.mxu1  ;;  %v10241_v38 = vrot.slane %v10181_v11, %v9675_v39 }
 0x4ea   :  { %v1537_v28 = vpop.xlane.xlu1 %1536  ;;  %v1183_v14 = vsel %vm675_vm8, %v1178_v18, %v1182_v59  ;;  %754 = vst.msk [vmem:[#allocation2 + $0x6] sm:$0x4] %vm753_vm4, %v752_v36 }
 0x4eb   :  { %757 = vst.msk [vmem:[#allocation2 + $0x14] sm:$0x10] %vm756_vm13, %v752_v36  ;;  %v10202_v45 = vsel %vm331_vm9, %v1183_v14, -1e+30  ;;  %v1562_v57 = vrot.slane %v1537_v28, %v9664_v26  ;;  %v8081_v47 = vpop.f32.mrf.mxu1 }
 0x4ec   :  { %v1186_v15 = vsel %vm679_vm10, %v10202_v45, -inf }
 0x4ed   :  { %1187 = vmax.xlane.f32.xlu0 %v1186_v15  ;;  %v1583_v16 = vsel %vm667_vm3, %v1566_v46, %v1562_v57 }
 0x4ee   :  { %v1543_v50 = vpop.xlane.xlu1 %1542 }
 0x4ef   :  { %v1570_v51 = vrot.slane %v1543_v50, %v9664_v26 }
 0x4f1   :  { %v1584_v17 = vsel %vm669_vm5, %v1570_v51, %v1583_v16 }
 0x4f2   :  { %v1549_v62 = vpop.xlane.xlu1 %1548  ;;  %v1585_v48 = vsel %vm671_vm6, %v1574_v58, %v1584_v17 }
 0x4f3   :  { %v1578_v43 = vrot.slane %v1549_v62, %v9664_v26 }
 0x4f5   :  { %v1586_v60 = vsel %vm673_vm7, %v1578_v43, %v1585_v48 }
 0x4f6   :  { %v1587_v6 = vsel %vm675_vm8, %v1582_v9, %v1586_v60  ;;  %v1871_v7 = vpop.xlane.xlu1 %1870 }
 0x4f7   :  { %v10219_v8 = vsel %vm331_vm9, %v1587_v6, -1e+30  ;;  %v1896_v5 = vrot.slane %v1871_v7, %v9664_v26 }
 0x4f8   :  { %v1590_v20 = vsel %vm679_vm10, %v10219_v8, -inf }
 0x4f9   :  { %1591 = vmax.xlane.f32.xlu1 %v1590_v20  ;;  %v1917_v63 = vsel %vm667_vm3, %v1900_v23, %v1896_v5 }
 0x4fa   :  { %v1877_v31 = vpop.xlane.xlu1 %1876 }
 0x4fb   :  { %v1904_v13 = vrot.slane %v1877_v31, %v9664_v26 }
 0x4fd   :  { %v1918_v56 = vsel %vm669_vm5, %v1904_v13, %v1917_v63 }
 0x4fe   :  { %v1883_v54 = vpop.xlane.xlu1 %1882 }
 0x4ff   :  { %v1912_v33 = vrot.slane %v1883_v54, %v9664_v26 }
 0x52c   :  { %v1880_v4 = vpop.xlane.xlu0 %1879 }
 0x52d   :  { %v1908_v25 = vrot.slane %v1880_v4, %v9664_v26  ;;  %v7721_v4 = vld [vmem:[#allocation11] ss:$0 sm:$0xff] }
 0x52f   :  { %v1919_v29 = vsel %vm671_vm6, %v1908_v25, %v1918_v56 }
 0x530   :  { %v1886_v49 = vpop.xlane.xlu0 %1885  ;;  %v1920_v52 = vsel %vm673_vm7, %v1912_v33, %v1919_v29 }
 0x531   :  { %v1916_v32 = vrot.slane %v1886_v49, %v9664_v26  ;;  %v10232_v40 = vpop.f32.mrf.mxu1 }
 0x533   :  { %v8092_v61 = vpop.f32.mrf.mxu1  ;;  %v1921_v10 = vsel %vm675_vm8, %v1916_v32, %v1920_v52 }
 0x534   :  { %v1923_v42 = vsel %vm331_vm9, %v1921_v10, -1e+30 }
 0x535   :  { %v1079_v12 = vpop.f32.mrf.mxu1  ;;  %v1924_v18 = vsel %vm679_vm10, %v1923_v42, -inf }
 0x536   :  { %1925 = vmax.xlane.f32.xlu0 %v1924_v18 }
 0x537   :  { %v8093_v34 = vpop.f32.mrf.mxu1 }
 0x539   :  { %v1481_v26 = vpop.f32.mrf.mxu1 }
 0x53a   :  { %v1487_v36 = vadd.f32 %v1481_v26, %v10154_v37 }
 0x53b   :  { %v8104_v59 = vpop.f32.mrf.mxu1 }
 0x53c   :  { %v1493_v41 = vadd.f32 %v10241_v38, %v1487_v36 }
 0x53d   :  { %v1484_v28 = vpop.f32.mrf.mxu1 }
 0x53e   :  { %1494 = vst.msk [vmem:[#allocation2 + $0xa] sm:$0x4] %vm753_vm4, %v1493_v41 }
 0x53f   :  { %1495 = vst.msk [vmem:[#allocation2 + $0x18] sm:$0x10] %vm756_vm13, %v1493_v41  ;;  %v8105_v1 = vpop.f32.mrf.mxu1 }
 0x56a   :  { %v854_v14 = vpop.xlane.xlu1 %853 }
 0x56b   :  { %v855_v44 = vsub.f32 %v10175_v19, %v854_v14 }
 0x56d   :  { %v856_v57 = vmul.f32 1.442695, %v855_v44 }
 0x56f   :  { %8809 = vpow2.f32 %v856_v57 }
 0x572   :  { %v10248_v47 = vpop.f32.mrf.mxu1 }
 0x574   :  { %v8116_v39 = vpop.f32.mrf.mxu1 }
 0x576   :  { %v1817_v11 = vpop.f32.mrf.mxu1  ;;  %v1188_v15 = vpop.xlane.xlu0 %1187 }
 0x577   :  { %v1189_v46 = vsub.f32 %v10202_v45, %v1188_v15 }
 0x578   :  { %v8117_v50 = vpop.f32.mrf.mxu1 }
 0x579   :  { %v1190_v51 = vmul.f32 1.442695, %v1189_v46 }
 0x57a   :  { %v2150_v16 = vpop.f32.mrf.mxu1 }
 0x57b   :  { %8811 = vpow2.f32 %v1190_v51  ;;  %v2151_v63 = vadd.f32 %v7721_v4, %v2150_v16 }
 0x57c   :  { %v8810_v53 = vpop.eup %8809  ;;  %v8130_v17 = vpop.f32.mrf.mxu1 }
 0x57d   :  { %v858_v58 = vmul.f32 %v8810_v53, %v9990_v22 }
 0x57e   :  { %v2153_v62 = vpop.f32.mrf.mxu1 }
 0x57f   :  { %v859_v19 = vsel %vm679_vm10, %v858_v58, 0.0 }
 0x580   :  { %v8131_v43 = vpop.f32.mrf.mxu1  ;;  %860 = vadd.xlane.f32.xlu1 %v859_v19 }
 0x582   :  { %v1592_v45 = vpop.xlane.xlu1 %1591 }
 0x583   :  { %v1593_v6 = vsub.f32 %v10219_v8, %v1592_v45  ;;  %v10264_v8 = vpack.c.bf16 %v2151_v63, %v2151_v63 }
 0x585   :  { %v1594_v20 = vmul.f32 1.442695, %v1593_v6 }
 0x587   :  { %8813 = vpow2.f32 %v1594_v20 }
 0x588   :  { %v8812_v9 = vpop.eup %8811 }
 0x589   :  { %v1192_v48 = vmul.f32 %v8812_v9, %v9990_v22 }
 0x58b   :  { %v1193_v60 = vsel %vm679_vm10, %v1192_v48, 0.0 }
 0x58c   :  { %1194 = vadd.xlane.f32.xlu0 %v1193_v60 }
 0x591   :  { %867 = vrot.lane.b32.xlu1 %v9687_v55, %s9428_s18 }
 0x594   :  { %v8814_v7 = vpop.eup %8813 }
 0x595   :  { %v1596_v31 = vmul.f32 %v8814_v7, %v9990_v22 }
 0x597   :  { %v1597_v24 = vsel %vm679_vm10, %v1596_v31, 0.0 }
 0x5b5   :  { %1598 = vadd.xlane.f32.xlu1 %v1597_v24  ;;  %v2096_v24 = vld [vmem:[%s11589_s9] sm:$0x1] }
 0x5bf   :  { %v1926_v5 = vpop.xlane.xlu0 %1925 }
 0x5c0   :  { %v1927_v13 = vsub.f32 %v1923_v42, %v1926_v5 }
 0x5c2   :  { %v1928_v23 = vmul.f32 1.442695, %v1927_v13  ;;  %v2097_v13 = vsub.f32 1.0, %v2096_v24 }
 0x5c4   :  { %8815 = vpow2.f32 %v1928_v23  ;;  %v2098_v63 = vmul.f32 -1e+09, %v2097_v13 }
 0x5c6   :  { %1605 = vrot.lane.b32.xlu1 %v9942_v21, %s9428_s18 }
 0x5ca   :  { %1938 = vrot.lane.b32.xlu1 %v9942_v21, %s9427_s3 }
 0x5ce   :  { %2278 = vrot.lane.b32.xlu1 %v10264_v8, %s9432_s26 }
 0x5d1   :  { %v8816_v54 = vpop.eup %8815 }
 0x5d2   :  { %v1930_v25 = vmul.f32 %v8816_v54, %v9990_v22 }
 0x5d4   :  { %v1931_v56 = vsel %vm679_vm10, %v1930_v25, 0.0 }
 0x5d5   :  { %1932 = vadd.xlane.f32.xlu0 %v1931_v56  ;;  %v10317_v56 = vrot.slane %v2098_v63, %v9672_v35 }
 0x5eb   :  { %1200 = vrot.lane.b32.xlu0 %v9687_v55, %s9427_s3 }
 0x5ef   :  { %2158 = vrot.lane.b32.xlu0 %v10264_v8, %s9428_s18 }
 0x5f3   :  { %2276 = vrot.lane.b32.xlu0 %v10264_v8, %s9433_s12 }
 0x609   :  { %v861_v21 = vpop.xlane.xlu1 %860 }
 0x60a   :  { %v862_v29 = vmax.f32 %v861_v21, 1e-09 }
 0x60c   :  { %8817 = vrcp.f32 %v862_v29 }
 0x60d   :  { %v868_v33 = vpop.permute.xlu1 %867 }
 0x60e   :  { %v873_v49 = vsel %vm701_vm2, %v868_v33, 0 }
 0x60f   :  { %8083 = vmatpush3.bf16.msra.mxu0 %v873_v49 }
 0x610   :  { %8094 = vmatprep.subr.bf16.mxu0 %v9429_v27 }
 0x615   :  { %v1195_v55 = vpop.xlane.xlu0 %1194 }
 0x616   :  { %v1196_v61 = vmax.f32 %v1195_v55, 1e-09 }
 0x618   :  { %8819 = vrcp.f32 %v1196_v61 }
 0x619   :  { %v8818_v22 = vpop.eup %8817 }
 0x61a   :  { %v864_v32 = vmul.f32 %v8818_v22, %v858_v58 }
 0x61c   :  { %v865_v52 = vpack.c.bf16 %v864_v32, %v864_v32 }
 0x61e   :  { %8085 = vmatmul.mubr.msk.bf16.vlgmr.msra.gmra.mxu0 %vm697_vm12, %v865_v52 }
 0x61f   :  { %8096 = vmatprep.mubr.msk.bf16.mxu0 %vm9431_vm11, %v9429_v27 }
 0x625   :  { %v8820_v12 = vpop.eup %8819 }
 0x626   :  { %v1198_v26 = vmul.f32 %v8820_v12, %v1192_v48 }
 0x628   :  { %v1199_v28 = vpack.c.bf16 %v1198_v26, %v1198_v26 }
 0x63e   :  { %v1599_v10 = vpop.xlane.xlu1 %1598 }
 0x63f   :  { %v1600_v42 = vmax.f32 %v1599_v10, 1e-09 }
 0x641   :  { %8821 = vrcp.f32 %v1600_v42 }
 0x642   :  { %v1606_v41 = vpop.permute.xlu1 %1605 }
 0x643   :  { %v1611_v14 = vsel %vm701_vm2, %v1606_v41, 0 }
 0x646   :  { %v1939_v57 = vpop.permute.xlu1 %1938 }
 0x647   :  { %v1944_v15 = vsel %vm701_vm2, %v1939_v57, 0 }
 0x64a   :  { %v2279_v53 = vpop.permute.xlu1 %2278 }
 0x64b   :  { %v2284_v17 = vsel %vm2160_vm14, %v2279_v53, 0 }
 0x64e   :  { %v8822_v1 = vpop.eup %8821 }
 0x64f   :  { %v1602_v44 = vmul.f32 %v8822_v1, %v1596_v31 }
 0x651   :  { %v1603_v39 = vpack.c.bf16 %v1602_v44, %v1602_v44 }
 0x65e   :  { %v1933_v18 = vpop.xlane.xlu0 %1932 }
 0x65f   :  { %v1934_v34 = vmax.f32 %v1933_v18, 1e-09 }
 0x661   :  { %8823 = vrcp.f32 %v1934_v34 }
 0x662   :  { %v1201_v36 = vpop.permute.xlu0 %1200 }
 0x663   :  { %v1206_v59 = vsel %vm701_vm2, %v1201_v36, 0  ;;  %vm2230_vm2 = vcmask 1043456  }
 0x664   :  { %8095 = vmatpush3.bf16.msra.mxu0 %v1206_v59 }
 0x665   :  { %8106 = vmatprep.subr.bf16.mxu0 %v9429_v27 }
 0x666   :  { %v2159_v50 = vpop.permute.xlu0 %2158 }
 0x667   :  { %8097 = vmatmul.mubr.msk.bf16.vlgmr.msra.gmra.mxu0 %vm697_vm12, %v1199_v28  ;;  %v2165_v16 = vsel %vm2160_vm14, %v2159_v50, 0 }
 0x668   :  { %8107 = vmatpush3.bf16.msra.mxu0 %v1611_v14  ;;  %8108 = vmatprep.mubr.msk.bf16.mxu0 %vm9431_vm11, %v9429_v27 }
 0x669   :  { %8118 = vmatprep.subr.bf16.mxu0 %v9429_v27 }
 0x66a   :  { %v2277_v58 = vpop.permute.xlu0 %2276 }
 0x66e   :  { %v8824_v11 = vpop.eup %8823 }
 0x66f   :  { %8109 = vmatmul.mubr.msk.bf16.vlgmr.msra.gmra.mxu0 %vm697_vm12, %v1603_v39  ;;  %v1936_v46 = vmul.f32 %v8824_v11, %v1930_v25 }
 0x670   :  { %8119 = vmatpush3.bf16.msra.mxu0 %v1944_v15  ;;  %8120 = vmatprep.mubr.msk.bf16.mxu0 %vm9431_vm11, %v9429_v27 }
 0x671   :  { %8132 = vmatprep.subr.bf16.mxu0 %v9429_v27  ;;  %v1937_v51 = vpack.c.bf16 %v1936_v46, %v1936_v46 }
 0x677   :  { %8121 = vmatmul.mubr.msk.bf16.vlgmr.msra.gmra.mxu0 %vm697_vm12, %v1937_v51 }
 0x678   :  { %8133 = vmatpush3.bf16.xpose.msra.mxu0 %v2165_v16  ;;  %8134 = vmatprep.mubr.msk.bf16.mxu0 %vm9431_vm11, %v9429_v27 }
 0x679   :  { %8144 = vmatprep.subr.bf16.mxu0 %v9429_v27 }
 0x67f   :  { %8135 = vmatmul.mubr.msk.bf16.vlgmr.msra.gmra.mxu0 %vm2160_vm14, %v10264_v8 }
 0x680   :  { %8145 = vmatpush3.bf16.xpose.msra.mxu0 %v2284_v17  ;;  %8146 = vmatprep.mubr.msk.bf16.mxu0 %vm9431_vm11, %v9429_v27 }
 0x681   :  { %8156 = vmatprep.subr.bf16.mxu0 %v9429_v27 }
 0x687   :  { %8147 = vmatmul.mubr.msk.bf16.vlgmr.msra.gmra.mxu0 %vm2160_vm14, %v2277_v58 }
 0x688   :  { %8158 = vmatprep.mubr.msk.bf16.mxu0 %vm9431_vm11, %v9429_v27 }
 0x6de   :  { %v10307_v62 = vpop.f32.mrf.mxu0 }
 0x6e0   :  { %v8086_v19 = vpop.f32.mrf.mxu0 }
 0x6e2   :  { %v912_v43 = vpop.f32.mrf.mxu0 }
 0x6e4   :  { %v8087_v9 = vpop.f32.mrf.mxu0 }
 0x727   :  { %v10309_v48 = vpop.f32.mrf.mxu0 }
 0x729   :  { %v8098_v60 = vpop.f32.mrf.mxu0 }
 0x72a   :  { %v1996_v60 = vld [vmem:[%s11590_s7] sm:$0xff] }
 0x72b   :  { %v1245_v45 = vpop.f32.mrf.mxu0 }
 0x72c   :  { %v2275_v45 = vpack.c.bf16 %v1996_v60, %v1996_v60 }
 0x72d   :  { %v8099_v6 = vpop.f32.mrf.mxu0 }
 0x72e   :  { %v10345_v6 = vsel %vm2230_vm2, %v2275_v45, 0  ;;  %v1998_v45 = vld [vmem:[%s11590_s7 + $0x10] sm:$0xff] }
 0x72f   :  { %v10311_v20 = vpop.f32.mrf.mxu0 }
 0x731   :  { %v8110_v7 = vpop.f32.mrf.mxu0 }
 0x732   :  { %v1997_v7 = vld [vmem:[%s11590_s7 + $0x8] sm:$0xff] }
 0x733   :  { %v1650_v31 = vpop.f32.mrf.mxu0 }
 0x734   :  { %v2389_v31 = vpack.c.bf16 %v1997_v7, %v1997_v7  ;;  %v2595_v7 = vpack.c.bf16 %v1998_v45, %v1998_v45 }
 0x735   :  { %v8111_v5 = vpop.f32.mrf.mxu0 }
 0x736   :  { %v10351_v24 = vsel %vm2230_vm2, %v2389_v31, 0  ;;  %v10389_v31 = vsel %vm2230_vm2, %v2595_v7, 0 }
 0x737   :  { %v10314_v23 = vpop.f32.mrf.mxu0  ;;  %8157 = vmatpush3.bf16.msra.mxu0 %v10351_v24 }
 0x738   :  { %8168 = vmatprep.subr.bf16.mxu0 %v9429_v27 }
 0x739   :  { %v8122_v4 = vpop.f32.mrf.mxu0 }
 0x73b   :  { %v1983_v54 = vpop.f32.mrf.mxu0 }
 0x73d   :  { %v8123_v25 = vpop.f32.mrf.mxu0 }
 0x73f   :  { %v2201_v21 = vpop.f32.mrf.mxu0 }
 0x740   :  { %v2207_v29 = vmul.f32 0.35355338, %v2201_v21 }
 0x741   :  { %v8136_v33 = vpop.f32.mrf.mxu0 }
 0x742   :  { %v2212_v49 = vadd.f32 %v10317_v56, %v2207_v29 }
 0x743   :  { %v2204_v22 = vpop.f32.mrf.mxu0 }
 0x744   :  { %v2213_v32 = vsel %vm2160_vm14, %v2212_v49, -inf }
 0x745   :  { %2214 = vmax.xlane.f32.xlu1 %v2213_v32  ;;  %v8137_v52 = vpop.f32.mrf.mxu0 }
 0x747   :  { %v2320_v55 = vpop.f32.mrf.mxu0 }
 0x748   :  { %v2326_v61 = vmul.f32 0.35355338, %v2320_v55 }
 0x749   :  { %v8148_v10 = vpop.f32.mrf.mxu0 }
 0x74a   :  { %v2327_v42 = vadd.f32 %v2326_v61, %v10317_v56 }
 0x74b   :  { %v2323_v12 = vpop.f32.mrf.mxu0 }
 0x74c   :  { %v2328_v18 = vsel %vm2160_vm14, %v2327_v42, -inf }
 0x74d   :  { %2329 = vmax.xlane.f32.xlu0 %v2328_v18  ;;  %v8149_v34 = vpop.f32.mrf.mxu0 }
 0x7ce   :  { %v2215_v26 = vpop.xlane.xlu1 %2214 }
 0x7cf   :  { %v2216_v36 = vsub.f32 %v2212_v49, %v2215_v26 }
 0x7d1   :  { %v2217_v59 = vmul.f32 1.442695, %v2216_v36 }
 0x7d3   :  { %8825 = vpow2.f32 %v2217_v59 }
 0x7d6   :  { %v2330_v41 = vpop.xlane.xlu0 %2329 }
 0x7d7   :  { %v2331_v28 = vsub.f32 %v2327_v42, %v2330_v41 }
 0x7d9   :  { %v2332_v1 = vmul.f32 1.442695, %v2331_v28 }
 0x7db   :  { %8827 = vpow2.f32 %v2332_v1 }
 0x7e0   :  { %v8826_v14 = vpop.eup %8825 }
 0x7e1   :  { %v2219_v44 = vsel %vm2160_vm14, %v8826_v14, 0.0 }
 0x7e2   :  { %2220 = vadd.xlane.f32.xlu0 %v2219_v44 }
 0x7e8   :  { %v8828_v57 = vpop.eup %8827 }
 0x7e9   :  { %v2334_v39 = vsel %vm2160_vm14, %v8828_v57, 0.0 }
 0x7ea   :  { %2335 = vadd.xlane.f32.xlu1 %v2334_v39 }
 0x7f8   :  { %2225 = vrot.lane.b32.xlu0 %v10264_v8, %s9426_s16 }
 0x7fb   :  { %2340 = vrot.lane.b32.xlu1 %v10264_v8, %s9434_s28 }
 0x7fc   :  { %2482 = vrot.lane.b32.xlu0 %v10264_v8, %s9435_s1 }
 0x7ff   :  { %2484 = vrot.lane.b32.xlu1 %v10264_v8, %s9436_s2 }
 0x86b   :  { %v2221_v11 = vpop.xlane.xlu0 %2220 }
 0x86c   :  { %8829 = vrcp.f32 %v2221_v11 }
 0x86f   :  { %v2226_v15 = vpop.permute.xlu0 %2225 }
 0x870   :  { %v2232_v46 = vsel %vm2230_vm2, %v2226_v15, 0 }
 0x871   :  { %8139 = vmatpush3.bf16.msra.mxu1 %v2232_v46 }
 0x872   :  { %8150 = vmatprep.subr.bf16.mxu1 %v9429_v27 }
 0x873   :  { %v2336_v50 = vpop.xlane.xlu1 %2335  ;;  %v2483_v52 = vpop.permute.xlu0 %2482 }
 0x874   :  { %8831 = vrcp.f32 %v2336_v50 }
 0x877   :  { %v2341_v53 = vpop.permute.xlu1 %2340 }
 0x878   :  { %v2346_v58 = vsel %vm2230_vm2, %v2341_v53, 0 }
 0x879   :  { %v8830_v51 = vpop.eup %8829 }
 0x87a   :  { %v2223_v16 = vmul.f32 %v8830_v51, %v8826_v14 }
 0x87b   :  { %v2485_v25 = vpop.permute.xlu1 %2484 }
 0x87c   :  { %v2224_v17 = vpack.c.bf16 %v2223_v16, %v2223_v16  ;;  %v2490_v49 = vsel %vm2160_vm14, %v2485_v25, 0 }
 0x87e   :  { %8141 = vmatmul.mubr.msk.bf16.vlgmr.msra.gmra.mxu1 %vm2160_vm14, %v2224_v17 }
 0x87f   :  { %8151 = vmatpush3.bf16.msra.mxu1 %v2346_v58  ;;  %8152 = vmatprep.mubr.msk.bf16.mxu1 %vm9431_vm11, %v9429_v27 }
 0x880   :  { %8162 = vmatprep.subr.bf16.mxu1 %v9429_v27 }
 0x881   :  { %v8832_v19 = vpop.eup %8831 }
 0x882   :  { %v2338_v43 = vmul.f32 %v8832_v19, %v8828_v57 }
 0x884   :  { %v2339_v9 = vpack.c.bf16 %v2338_v43, %v2338_v43 }
 0x886   :  { %8153 = vmatmul.mubr.msk.bf16.vlgmr.msra.gmra.mxu1 %vm2160_vm14, %v2339_v9 }
 0x887   :  { %8164 = vmatprep.mubr.msk.bf16.mxu1 %vm9431_vm11, %v9429_v27  ;;  %8163 = vmatpush3.bf16.msra.mxu1 %v10345_v6 }
 0x888   :  { %8174 = vmatprep.subr.bf16.mxu1 %v9429_v27 }
 0x93e   :  { %v2268_v5 = vpop.f32.mrf.mxu1 }
 0x93f   :  { %v2274_v13 = vpack.c.bf16 %v2268_v5, %v2268_v5 }
 0x940   :  { %v8142_v4 = vpop.f32.mrf.mxu1 }
 0x941   :  { %8165 = vmatmul.mubr.msk.bf16.vlgmr.msra.gmra.mxu1 %vm2160_vm14, %v2274_v13 }
 0x942   :  { %v2271_v63 = vpop.f32.mrf.mxu1  ;;  %8176 = vmatprep.mubr.msk.bf16.mxu1 %vm9431_vm11, %v9429_v27 }
 0x944   :  { %v8143_v54 = vpop.f32.mrf.mxu1 }
 0x946   :  { %v2382_v21 = vpop.f32.mrf.mxu1 }
 0x947   :  { %v2388_v29 = vpack.c.bf16 %v2382_v21, %v2382_v21 }
 0x948   :  { %v8154_v33 = vpop.f32.mrf.mxu1 }
 0x949   :  { %8159 = vmatmul.mubr.msk.bf16.vlgmr.msra.gmra.mxu0 %vm2160_vm14, %v2388_v29 }
 0x94a   :  { %8169 = vmatpush3.bf16.xpose.msra.mxu0 %v2490_v49  ;;  %v2385_v22 = vpop.f32.mrf.mxu1  ;;  %8170 = vmatprep.mubr.msk.bf16.mxu0 %vm9431_vm11, %v9429_v27 }
 0x94b   :  { %8180 = vmatprep.subr.bf16.mxu0 %v9429_v27 }
 0x94c   :  { %v8155_v32 = vpop.f32.mrf.mxu1 }
 0x951   :  { %8171 = vmatmul.mubr.msk.bf16.vlgmr.msra.gmra.mxu0 %vm2160_vm14, %v2483_v52 }
 0x952   :  { %8182 = vmatprep.mubr.msk.bf16.mxu0 %vm9431_vm11, %v9429_v27  ;;  %8181 = vmatpush3.bf16.msra.mxu0 %v10389_v31 }
 0x953   :  { %8192 = vmatprep.subr.bf16.mxu0 %v9429_v27 }
 0xa01   :  { %v2476_v55 = vpop.f32.mrf.mxu1 }
 0xa03   :  { %v8166_v61 = vpop.f32.mrf.mxu1 }
 0xa05   :  { %v2479_v10 = vpop.f32.mrf.mxu1 }
 0xa07   :  { %v8167_v42 = vpop.f32.mrf.mxu1 }
 0xa09   :  { %v2430_v12 = vpop.f32.mrf.mxu0 }
 0xa0a   :  { %v10366_v18 = vadd.f32 %v2476_v55, %v2430_v12 }
 0xa0b   :  { %v8160_v34 = vpop.f32.mrf.mxu0 }
 0xa0d   :  { %v2433_v26 = vpop.f32.mrf.mxu0 }
 0xa0f   :  { %v8161_v36 = vpop.f32.mrf.mxu0 }
 0xa11   :  { %v2526_v59 = vpop.f32.mrf.mxu0 }
 0xa12   :  { %v2532_v41 = vmul.f32 0.35355338, %v2526_v59 }
 0xa13   :  { %v8172_v28 = vpop.f32.mrf.mxu0 }
 0xa14   :  { %v2533_v1 = vadd.f32 %v2532_v41, %v10317_v56 }
 0xa15   :  { %v2529_v14 = vpop.f32.mrf.mxu0 }
 0xa16   :  { %v2534_v44 = vsel %vm2160_vm14, %v2533_v1, -inf }
 0xa17   :  { %2535 = vmax.xlane.f32.xlu1 %v2534_v44  ;;  %v8173_v57 = vpop.f32.mrf.mxu0 }
 0xa28   :  { %2645 = vrot.lane.b32.xlu1 %v10264_v8, %s9437_s4 }
 0xa2c   :  { %2643 = vrot.lane.b32.xlu1 %v10264_v8, %s9438_s10 }
 0xaa0   :  { %v2536_v39 = vpop.xlane.xlu1 %2535 }
 0xaa1   :  { %v2537_v11 = vsub.f32 %v2533_v1, %v2536_v39 }
 0xaa3   :  { %v2538_v15 = vmul.f32 1.442695, %v2537_v11 }
 0xaa4   :  { %v2646_v19 = vpop.permute.xlu1 %2645 }
 0xaa5   :  { %8833 = vpow2.f32 %v2538_v15  ;;  %v2651_v9 = vsel %vm2160_vm14, %v2646_v19, 0 }
 0xaa8   :  { %v2644_v60 = vpop.permute.xlu1 %2643 }
 0xab2   :  { %v8834_v46 = vpop.eup %8833 }
 0xab3   :  { %v2540_v50 = vsel %vm2160_vm14, %v8834_v46, 0.0 }
 0xab4   :  { %2541 = vadd.xlane.f32.xlu0 %v2540_v50 }
 0xaca   :  { %2546 = vrot.lane.b32.xlu0 %v10264_v8, %s9439_s24 }
 0xb3d   :  { %v2542_v51 = vpop.xlane.xlu0 %2541 }
 0xb3e   :  { %8835 = vrcp.f32 %v2542_v51 }
 0xb41   :  { %v2547_v16 = vpop.permute.xlu0 %2546 }
 0xb42   :  { %v2552_v53 = vsel %vm2230_vm2, %v2547_v16, 0 }
 0xb43   :  { %8175 = vmatpush3.bf16.msra.mxu1 %v2552_v53 }
 0xb44   :  { %8186 = vmatprep.subr.bf16.mxu1 %v9429_v27 }
 0xb4b   :  { %v8836_v17 = vpop.eup %8835 }
 0xb4c   :  { %v2544_v58 = vmul.f32 %v8836_v17, %v8834_v46  ;;  %v1999_v17 = vld [vmem:[%s11590_s7 + $0x18] sm:$0xff] }
 0xb4e   :  { %v2545_v43 = vpack.c.bf16 %v2544_v58, %v2544_v58  ;;  %v2756_v58 = vpack.c.bf16 %v1999_v17, %v1999_v17  ;;  %v7738_v17 = vld [vmem:[#allocation17] ss:$0 sm:$0xff] }
 0xb50   :  { %8177 = vmatmul.mubr.msk.bf16.vlgmr.msra.gmra.mxu1 %vm2160_vm14, %v2545_v43  ;;  %v10438_v19 = vsel %vm2230_vm2, %v2756_v58, 0 }
 0xb51   :  { %8187 = vmatpush3.bf16.xpose.msra.mxu1 %v2651_v9  ;;  %8188 = vmatprep.mubr.msk.bf16.mxu1 %vm9431_vm11, %v9429_v27 }
 0xb52   :  { %8198 = vmatprep.subr.bf16.mxu1 %v9429_v27 }
 0xb58   :  { %8189 = vmatmul.mubr.msk.bf16.vlgmr.msra.gmra.mxu1 %vm2160_vm14, %v2644_v60 }
 0xb59   :  { %8200 = vmatprep.mubr.msk.bf16.mxu1 %vm9431_vm11, %v9429_v27  ;;  %8199 = vmatpush3.bf16.msra.mxu1 %v10438_v19 }
 0xb5a   :  { %8212 = vmatprep.subr.bf16.mxu1 %v9429_v27 }
 0xc10   :  { %v2588_v5 = vpop.f32.mrf.mxu1 }
 0xc11   :  { %v2594_v13 = vpack.c.bf16 %v2588_v5, %v2588_v5 }
 0xc12   :  { %v8178_v4 = vpop.f32.mrf.mxu1 }
 0xc13   :  { %8183 = vmatmul.mubr.msk.bf16.vlgmr.msra.gmra.mxu0 %vm2160_vm14, %v2594_v13  ;;  %v7735_v4 = vld [vmem:[#allocation12] ss:$0 sm:$0xff] }
 0xc14   :  { %v2591_v63 = vpop.f32.mrf.mxu1  ;;  %8194 = vmatprep.mubr.msk.bf16.mxu0 %vm9431_vm11, %v9429_v27 }
 0xc16   :  { %v8179_v54 = vpop.f32.mrf.mxu1 }
 0xc18   :  { %v2687_v25 = vpop.f32.mrf.mxu1 }
 0xc19   :  { %v2693_v21 = vmul.f32 0.35355338, %v2687_v25 }
 0xc1a   :  { %v8190_v29 = vpop.f32.mrf.mxu1 }
 0xc1b   :  { %v2694_v33 = vadd.f32 %v2693_v21, %v10317_v56 }
 0xc1c   :  { %v2690_v49 = vpop.f32.mrf.mxu1 }
 0xc1d   :  { %v2695_v22 = vsel %vm2160_vm14, %v2694_v33, -inf }
 0xc1e   :  { %2696 = vmax.xlane.f32.xlu0 %v2695_v22  ;;  %v8191_v32 = vpop.f32.mrf.mxu1 }
 0xc34   :  { %2707 = vrot.lane.b32.xlu0 %v10264_v8, %s9440_s14 }
 0xc38   :  { %1082 = vrot.lane.b32.xlu0 %v10152_v2, %s9426_s16 }
 0xc3c   :  { %1248 = vrot.lane.b32.xlu0 %v10152_v2, %s9427_s3 }
 0xc40   :  { %1654 = vrot.lane.b32.xlu0 %v10154_v37, %s9428_s18 }
 0xc44   :  { %1820 = vrot.lane.b32.xlu0 %v10154_v37, %s9426_s16 }
 0xc48   :  { %1986 = vrot.lane.b32.xlu0 %v10154_v37, %s9427_s3 }
 0xc4c   :  { %1086 = vrot.lane.b32.xlu0 %v10188_v3, %s9426_s16 }
 0xc50   :  { %1658 = vrot.lane.b32.xlu0 %v10241_v38, %s9428_s18 }
 0xc54   :  { %1990 = vrot.lane.b32.xlu0 %v10241_v38, %s9427_s3 }
 0xca7   :  { %v2697_v8 = vpop.xlane.xlu0 %2696 }
 0xca8   :  { %v2698_v56 = vsub.f32 %v2694_v33, %v2697_v8 }
 0xcaa   :  { %v2699_v52 = vmul.f32 1.442695, %v2698_v56  ;;  %v2844_v56 = vld [vmem:[%s11591_s17 + $0x10] sm:$0xff] }
 0xcab   :  { %v2708_v55 = vpop.permute.xlu0 %2707 }
 0xcac   :  { %8837 = vpow2.f32 %v2699_v52  ;;  %v2713_v61 = vsel %vm2230_vm2, %v2708_v55, 0  ;;  %v2845_v52 = vld [vmem:[%s11591_s17 + $0x18] sm:$0xff]  ;;  %v2842_v55 = vld [vmem:[%s11591_s17] sm:$0xff] }
 0xcad   :  { %8193 = vmatpush3.bf16.msra.mxu0 %v2713_v61  ;;  %v2848_v61 = vpack.c.bf16 %v2845_v52, %v2844_v56 }
 0xcae   :  { %8204 = vmatprep.subr.bf16.mxu0 %v9429_v27 }
 0xcaf   :  { %v1083_v37 = vpop.permute.xlu0 %1082 }
 0xcb0   :  { %v1085_v59 = vadd.f32 %v1083_v37, %v10232_v40  ;;  %v2843_v37 = vld [vmem:[%s11591_s17 + $0x8] sm:$0xff] }
 0xcb3   :  { %v10418_v10 = vpop.permute.xlu0 %1248 }
 0xcb7   :  { %v1655_v42 = vpop.permute.xlu0 %1654 }
 0xcb8   :  { %v1657_v1 = vadd.f32 %v1655_v42, %v10311_v20 }
 0xcb9   :  { %v8838_v12 = vpop.eup %8837 }
 0xcba   :  { %v2701_v34 = vsel %vm2160_vm14, %v8838_v12, 0.0 }
 0xcbb   :  { %2702 = vadd.xlane.f32.xlu1 %v2701_v34  ;;  %v10421_v26 = vpop.permute.xlu0 %1820 }
 0xcbf   :  { %v1987_v36 = vpop.permute.xlu0 %1986 }
 0xcc0   :  { %v1989_v57 = vadd.f32 %v1987_v36, %v10314_v23 }
 0xcc3   :  { %v1087_v41 = vpop.permute.xlu0 %1086 }
 0xcc4   :  { %v1089_v28 = vadd.f32 %v1087_v41, %v1085_v59  ;;  %v7736_v59 = vld [vmem:[#allocation14] ss:$0 sm:$0xff] }
 0xcc6   :  { %1090 = vst.msk [vmem:[#allocation2 + $0x8] sm:$0x4] %vm753_vm4, %v1089_v28 }
 0xcc7   :  { %1091 = vst.msk [vmem:[#allocation2 + $0x16] sm:$0x10] %vm756_vm13, %v1089_v28  ;;  %v1659_v14 = vpop.permute.xlu0 %1658  ;;  %v7737_v28 = vld [vmem:[#allocation15] ss:$0 sm:$0xff] }
 0xcc8   :  { %v1661_v44 = vadd.f32 %v1659_v14, %v1657_v1 }
 0xcca   :  { %1662 = vst.msk [vmem:[#allocation2 + $0xb] sm:$0x4] %vm753_vm4, %v1661_v44 }
 0xccb   :  { %1663 = vst.msk [vmem:[#allocation2 + $0x19] sm:$0x10] %vm756_vm13, %v1661_v44  ;;  %v1991_v39 = vpop.permute.xlu0 %1990 }
 0xccc   :  { %v1993_v11 = vadd.f32 %v1991_v39, %v1989_v57  ;;  %v2914_v57 = vld [vmem:[%s11592_s11 + $0x30] sm:$0xff]  ;;  %v2915_v39 = vld [vmem:[%s11592_s11 + $0x38] sm:$0xff] }
 0xcce   :  { %1994 = vst.msk [vmem:[#allocation2 + $0xd] sm:$0x4] %vm753_vm4, %v1993_v11 }
 0xccf   :  { %1995 = vst.msk [vmem:[#allocation2 + $0x1b] sm:$0x10] %vm756_vm13, %v1993_v11  ;;  %v2912_v11 = vld [vmem:[%s11592_s11 + $0x20] sm:$0xff] }
 0xcd3   :  { %v2636_v40 = vpop.f32.mrf.mxu0 }
 0xcd4   :  { %v2642_v20 = vadd.f32 %v2636_v40, %v10366_v18  ;;  %v2920_v40 = vpack.c.bf16 %v2915_v39, %v2914_v57  ;;  %v3006_v57 = vld [vmem:[%s11593_s8 + $0x8] sm:$0xff] }
 0xcd5   :  { %v8184_v15 = vpop.f32.mrf.mxu0 }
 0xcd7   :  { %v2639_v46 = vpop.f32.mrf.mxu0 }
 0xcd8   :  { %v2910_v46 = vld [vmem:[%s11592_s11 + $0x10] sm:$0xff] }
 0xcd9   :  { %v8185_v50 = vpop.f32.mrf.mxu0 }
 0xcda   :  { %v2911_v50 = vld [vmem:[%s11592_s11 + $0x18] sm:$0xff] }
 0xd44   :  { %v2703_v51 = vpop.xlane.xlu1 %2702 }
 0xd45   :  { %8839 = vrcp.f32 %v2703_v51  ;;  %v2918_v51 = vpack.c.bf16 %v2911_v50, %v2910_v46  ;;  %v7743_v46 = vld [vmem:[#allocation21] ss:$0 sm:$0xff]  ;;  %v3005_v50 = vld [vmem:[%s11593_s8] sm:$0xff] }
 0xd52   :  { %v8840_v23 = vpop.eup %8839 }
 0xd53   :  { %v2705_v16 = vmul.f32 %v8840_v23, %v8838_v12  ;;  %v2908_v23 = vld [vmem:[%s11592_s11] sm:$0xff] }
 0xd55   :  { %v2706_v53 = vpack.c.bf16 %v2705_v16, %v2705_v16  ;;  %v2909_v16 = vld [vmem:[%s11592_s11 + $0x8] sm:$0xff] }
 0xd57   :  { %8195 = vmatmul.mubr.msk.bf16.vlgmr.msra.gmra.mxu0 %vm2160_vm14, %v2706_v53  ;;  %v2917_v53 = vpack.c.bf16 %v2909_v16, %v2908_v23 }
 0xd58   :  { %8208 = vmatprep.mubr.msk.bf16.mxu0 %vm9431_vm11, %v9429_v27  ;;  %8205 = vmatpush3.bf16.msra.mxu0 %v2848_v61 }
 0xd59   :  { %8206 = vmatprep.subr.bf16.mxu0 %v9429_v27 }
 0xe17   :  { %v2749_v18 = vpop.f32.mrf.mxu0 }
 0xe18   :  { %v2755_v43 = vpack.c.bf16 %v2749_v18, %v2749_v18 }
 0xe19   :  { %v8196_v9 = vpop.f32.mrf.mxu0 }
 0xe1a   :  { %8201 = vmatmul.mubr.msk.bf16.vlgmr.msra.gmra.mxu1 %vm2160_vm14, %v2755_v43 }
 0xe1b   :  { %v2752_v60 = vpop.f32.mrf.mxu0  ;;  %8220 = vmatprep.mubr.msk.bf16.mxu1 %vm9431_vm11, %v9429_v27  ;;  %8213 = vmatpush3.bf16.msra.mxu1 %v2920_v40 }
 0xe1c   :  { %8214 = vmatprep.subr.bf16.mxu1 %v9429_v27 }
 0xe1d   :  { %v8197_v45 = vpop.f32.mrf.mxu0 }
 0xeda   :  { %v2797_v7 = vpop.f32.mrf.mxu1 }
 0xedb   :  { %v2803_v5 = vadd.f32 %v2797_v7, %v2642_v20  ;;  %v2913_v20 = vld [vmem:[%s11592_s11 + $0x28] sm:$0xff] }
 0xedc   :  { %v8202_v13 = vpop.f32.mrf.mxu1  ;;  %v2919_v15 = vpack.c.bf16 %v2913_v20, %v2912_v11  ;;  %v7742_v20 = vld [vmem:[#allocation20] ss:$0 sm:$0xff] }
 0xedd   :  { %v2804_v63 = vadd.f32 %v2803_v5, %v10150_v30  ;;  %v2847_v30 = vpack.c.bf16 %v2843_v37, %v2842_v55 }
 0xede   :  { %v2800_v54 = vpop.f32.mrf.mxu1  ;;  %8215 = vmatpush3.bf16.msra.mxu1 %v2919_v15 }
 0xedf   :  { %v2812_v25 = vadd.f32 %v7735_v4, %v2804_v63  ;;  %8207 = vmatpush3.bf16.msra.mxu0 %v2847_v30  ;;  %8216 = vmatprep.subr.bf16.mxu1 %v9429_v27 }
 0xee0   :  { %v8203_v21 = vpop.f32.mrf.mxu1 }
 0xee1   :  { %v2815_v29 = vsel %vm2067_vm0, %v2812_v25, 0.0 }
 0xee2   :  { %2816 = vadd.xlane.f32.xlu1 %v2815_v29  ;;  %8217 = vmatpush3.bf16.msra.mxu1 %v2918_v51 }
 0xee3   :  { %8218 = vmatprep.subr.bf16.mxu1 %v9429_v27 }
 0xee6   :  { %8219 = vmatpush3.bf16.msra.mxu1 %v2917_v53 }
 0xf6b   :  { %v2817_v33 = vpop.xlane.xlu1 %2816 }
 0xf6c   :  { %v2818_v49 = vmul.f32 0.03125, %v2817_v33  ;;  %v7740_v33 = vld [vmem:[#allocation18] ss:$0 sm:$0xff] }
 0xf6e   :  { %v2819_v22 = vsub.f32 %v2812_v25, %v2818_v49 }
 0xf70   :  { %v2820_v32 = vmul.f32 %v2819_v22, %v2819_v22 }
 0xf72   :  { %v2821_v8 = vsel %vm2067_vm0, %v2820_v32, 0.0 }
 0xf73   :  { %2822 = vadd.xlane.f32.xlu1 %v2821_v8 }
 0xffc   :  { %v2823_v42 = vpop.xlane.xlu1 %2822 }
 0xffd   :  { %v2824_v12 = vmul.f32 0.03125, %v2823_v42 }
 0xfff   :  { %v2825_v34 = vadd.f32 1e-12, %v2824_v12 }
0x1001   :  { %8841 = vrsqrt.f32 %v2825_v34 }
0x100e   :  { %v8842_v36 = vpop.eup %8841 }
0x100f   :  { %v2827_v41 = vmul.f32 %v8842_v36, %v2819_v22 }
0x1011   :  { %v2834_v1 = vmul.f32 %v7736_v59, %v2827_v41 }
0x1013   :  { %v2841_v14 = vadd.f32 %v7737_v28, %v2834_v1 }
0x1015   :  { %v2846_v44 = vpack.c.bf16 %v2841_v14, %v2841_v14 }
0x1017   :  { %8209 = vmatmul.mubr.msk.bf16.vlgmr.msra.gmra.mxu0 %vm2067_vm0, %v2846_v44 }
0x1018   :  { %3161 = vmatprep.mubr.bf16.mxu0 %v9425_v0 }
0x10d7   :  { %v2893_v58 = vpop.f32.mrf.mxu0 }
0x10d8   :  { %v2894_v18 = vadd.f32 %v7738_v17, %v2893_v58 }
0x10d9   :  { %v8210_v43 = vpop.f32.mrf.mxu0 }
0x10da   :  { %v2899_v9 = vmul.f32 %v2894_v18, %v2894_v18 }
0x10db   :  { %v2896_v60 = vpop.f32.mrf.mxu0 }
0x10dc   :  { %v2900_v45 = vmul.f32 %v2899_v9, %v2894_v18 }
0x10dd   :  { %v8211_v7 = vpop.f32.mrf.mxu0 }
0x10de   :  { %v2901_v5 = vmul.f32 0.044715, %v2900_v45 }
0x10e0   :  { %v2902_v13 = vadd.f32 %v2901_v5, %v2894_v18 }
0x10e2   :  { %v2903_v4 = vmul.f32 0.7978846, %v2902_v13  ;;  %v3078_v13 = vld [vmem:[%s11594_s15 + $0xc8] sm:$0xff] }
0x10e4   :  { %8843 = vtanh.f32 %v2903_v4  ;;  %v3090_v4 = vld [vmem:[%s11594_s15 + $0x128] sm:$0xff] }
0x10f1   :  { %v8844_v63 = vpop.eup %8843 }
0x10f2   :  { %v2905_v54 = vadd.f32 1.0, %v8844_v63  ;;  %v3082_v63 = vld [vmem:[%s11594_s15 + $0xe8] sm:$0xff] }
0x10f4   :  { %v2906_v25 = vmul.f32 0.5, %v2905_v54  ;;  %v3115_v54 = vpack.c.bf16 %v3090_v4, %v3078_v13 }
0x10f6   :  { %v2907_v21 = vmul.f32 %v2906_v25, %v2894_v18  ;;  %v3094_v25 = vld [vmem:[%s11594_s15 + $0x148] sm:$0xff]  ;;  %3141 = vmatprep.subr.bf16.mxu0 %v3115_v54  ;;  %v3067_v54 = vld [vmem:[%s11594_s15 + $0x70] sm:$0xff] }
0x10f8   :  { %v2916_v29 = vpack.c.bf16 %v2907_v21, %v2907_v21  ;;  %v3077_v21 = vld [vmem:[%s11594_s15 + $0xc0] sm:$0xff] }
0x10fa   :  { %8221 = vmatmul.mubr.msk.bf16.vlgmr.msra.gmra.mxu1 %vm2928_vm15, %v2916_v29  ;;  %v3089_v29 = vld [vmem:[%s11594_s15 + $0x120] sm:$0xff] }
0x10fb   :  { %3247 = vmatprep.mubr.bf16.mxu1 %v9425_v0 }
0x11ba   :  { %v2966_v49 = vpop.f32.mrf.mxu1 }
0x11bb   :  { %v2967_v22 = vadd.f32 %v7740_v33, %v2966_v49  ;;  %v3119_v33 = vpack.c.bf16 %v3094_v25, %v3082_v63  ;;  %v3114_v49 = vpack.c.bf16 %v3089_v29, %v3077_v21  ;;  %v3061_v25 = vld [vmem:[%s11594_s15 + $0x40] sm:$0xff]  ;;  %v3084_v29 = vld [vmem:[%s11594_s15 + $0xf8] sm:$0xff] }
0x11bc   :  { %v8222_v32 = vpop.f32.mrf.mxu1  ;;  %v3073_v21 = vld [vmem:[%s11594_s15 + $0xa0] sm:$0xff] }
0x11bd   :  { %v2972_v8 = vadd.f32 %v2967_v22, %v2841_v14  ;;  %v1823_v14 = vadd.f32 %v10421_v26, %v10248_v47  ;;  %v3081_v22 = vld [vmem:[%s11594_s15 + $0xe0] sm:$0xff]  ;;  %3227 = vmatprep.subr.bf16.mxu1 %v3119_v33  ;;  %3142 = vmatpush1.bf16.msra.mxu0 %v3114_v49  ;;  %v3096_v33 = vld [vmem:[%s11594_s15 + $0x158] sm:$0xff] }
0x11be   :  { %v2969_v56 = vpop.f32.mrf.mxu1  ;;  %v3093_v32 = vld [vmem:[%s11594_s15 + $0x140] sm:$0xff] }
0x11bf   :  { %v2975_v52 = vsel %vm2067_vm0, %v2972_v8, 0.0  ;;  %v3118_v56 = vpack.c.bf16 %v3093_v32, %v3081_v22  ;;  %v3110_v22 = vpack.c.bf16 %v3073_v21, %v3061_v25  ;;  %v3121_v32 = vpack.c.bf16 %v3096_v33, %v3084_v29 }
0x11c0   :  { %2976 = vadd.xlane.f32.xlu1 %v2975_v52  ;;  %v8223_v55 = vpop.f32.mrf.mxu1  ;;  %v3066_v52 = vld [vmem:[%s11594_s15 + $0x68] sm:$0xff] }
0x11c1   :  { %v3058_v55 = vld [vmem:[%s11594_s15 + $0x28] sm:$0xff]  ;;  %3228 = vmatpush1.bf16.msra.mxu1 %v3118_v56  ;;  %v3095_v56 = vld [vmem:[%s11594_s15 + $0x150] sm:$0xff] }
0x11d1   :  { %916 = vrot.lane.b32.xlu1 %v10152_v2, %s9428_s18  ;;  %v1251_v2 = vadd.f32 %v10418_v10, %v10309_v48 }
0x11d5   :  { %920 = vrot.lane.b32.xlu1 %v10188_v3, %s9428_s18 }
0x11d9   :  { %1252 = vrot.lane.b32.xlu1 %v10188_v3, %s9427_s3 }
0x1249   :  { %v2977_v61 = vpop.xlane.xlu1 %2976 }
0x124a   :  { %v2978_v37 = vmul.f32 0.03125, %v2977_v61  ;;  %v3070_v61 = vld [vmem:[%s11594_s15 + $0x88] sm:$0xff] }
0x124c   :  { %v2979_v30 = vsub.f32 %v2972_v8, %v2978_v37  ;;  %v3054_v8 = vld [vmem:[%s11594_s15 + $0x8] sm:$0xff] }
0x124d   :  { %v917_v42 = vpop.permute.xlu1 %916  ;;  %v3103_v37 = vpack.c.bf16 %v3066_v52, %v3054_v8  ;;  %v3083_v8 = vld [vmem:[%s11594_s15 + $0xf0] sm:$0xff]  ;;  %v3060_v52 = vld [vmem:[%s11594_s15 + $0x38] sm:$0xff] }
0x124e   :  { %v2980_v12 = vmul.f32 %v2979_v30, %v2979_v30  ;;  %v919_v34 = vadd.f32 %v917_v42, %v10307_v62  ;;  %v3053_v42 = vld [vmem:[%s11594_s15] sm:$0xff] }
0x124f   :  { %3143 = vmatprep.subr.bf16.mxu0 %v3103_v37 }
0x1250   :  { %v2981_v36 = vsel %vm2067_vm0, %v2980_v12, 0.0  ;;  %v3065_v12 = vld [vmem:[%s11594_s15 + $0x60] sm:$0xff] }
0x1251   :  { %2982 = vadd.xlane.f32.xlu1 %v2981_v36  ;;  %v921_v59 = vpop.permute.xlu1 %920  ;;  %v3102_v36 = vpack.c.bf16 %v3065_v12, %v3053_v42  ;;  %v3071_v42 = vld [vmem:[%s11594_s15 + $0x90] sm:$0xff]  ;;  %v3088_v12 = vld [vmem:[%s11594_s15 + $0x118] sm:$0xff] }
0x1252   :  { %v923_v41 = vadd.f32 %v921_v59, %v919_v34  ;;  %v3057_v34 = vld [vmem:[%s11594_s15 + $0x20] sm:$0xff] }
0x1253   :  { %v3069_v59 = vld [vmem:[%s11594_s15 + $0x80] sm:$0xff]  ;;  %3144 = vmatpush1.bf16.msra.mxu0 %v3102_v36 }
0x1254   :  { %924 = vst.msk [vmem:[#allocation2 + $0x7] sm:$0x4] %vm753_vm4, %v923_v41 }
0x1255   :  { %925 = vst.msk [vmem:[#allocation2 + $0x15] sm:$0x10] %vm756_vm13, %v923_v41  ;;  %v1253_v3 = vpop.permute.xlu1 %1252  ;;  %v3106_v41 = vpack.c.bf16 %v3069_v59, %v3057_v34  ;;  %v3100_v34 = vld [vmem:[%s11594_s15 + $0x178] sm:$0xff] }
0x1256   :  { %v1255_v28 = vadd.f32 %v1253_v3, %v1251_v2  ;;  %v3080_v2 = vld [vmem:[%s11594_s15 + $0xd8] sm:$0xff]  ;;  %v3125_v59 = vpack.c.bf16 %v3100_v34, %v3088_v12 }
0x1257   :  { %v3092_v3 = vld [vmem:[%s11594_s15 + $0x138] sm:$0xff] }
0x1258   :  { %1256 = vst.msk [vmem:[#allocation2 + $0x9] sm:$0x4] %vm753_vm4, %v1255_v28 }
0x1259   :  { %1257 = vst.msk [vmem:[#allocation2 + $0x17] sm:$0x10] %vm756_vm13, %v1255_v28  ;;  %v3086_v28 = vld [vmem:[%s11594_s15 + $0x108] sm:$0xff] }
0x1262   :  { %1824 = vrot.lane.b32.xlu1 %v10241_v38, %s9426_s16 }
0x12da   :  { %v2983_v62 = vpop.xlane.xlu1 %2982 }
0x12db   :  { %v2984_v1 = vmul.f32 0.03125, %v2983_v62  ;;  %v3117_v62 = vpack.c.bf16 %v3092_v3, %v3080_v2  ;;  %v3099_v2 = vld [vmem:[%s11594_s15 + $0x170] sm:$0xff]  ;;  %v3064_v3 = vld [vmem:[%s11594_s15 + $0x58] sm:$0xff] }
0x12dd   :  { %v2985_v48 = vadd.f32 1e-12, %v2984_v1  ;;  %v3098_v1 = vld [vmem:[%s11594_s15 + $0x168] sm:$0xff]  ;;  %3184 = vmatprep.subr.bf16.mxu0 %v3117_v62 }
0x12de   :  { %v1825_v10 = vpop.permute.xlu1 %1824 }
0x12df   :  { %8845 = vrsqrt.f32 %v2985_v48  ;;  %v1827_v44 = vadd.f32 %v1825_v10, %v1823_v14  ;;  %v3123_v14 = vpack.c.bf16 %v3098_v1, %v3086_v28  ;;  %v3076_v28 = vld [vmem:[%s11594_s15 + $0xb8] sm:$0xff] }
0x12e0   :  { %v3113_v1 = vpack.c.bf16 %v3076_v28, %v3064_v3 }
0x12e1   :  { %1828 = vst.msk [vmem:[#allocation2 + $0xc] sm:$0x4] %vm753_vm4, %v1827_v44 }
0x12e2   :  { %1829 = vst.msk [vmem:[#allocation2 + $0x1a] sm:$0x10] %vm756_vm13, %v1827_v44 }
0x12e8   :  { %v3004_v39 = vld [vmem:[#allocation2 + $0x8] sm:$0xff] }
0x12e9   :  { %v3008_v11 = vadd.f32 %v3006_v57, %v3004_v39 }
0x12eb   :  { %v3014_v40 = vsel %vm2067_vm0, %v3008_v11, 0.0 }
0x12ec   :  { %v8846_v38 = vpop.eup %8845  ;;  %3015 = vadd.xlane.f32.xlu0 %v3014_v40 }
0x12ed   :  { %v2987_v15 = vmul.f32 %v8846_v38, %v2979_v30  ;;  %v3107_v30 = vpack.c.bf16 %v3070_v61, %v3058_v55  ;;  %v3072_v55 = vld [vmem:[%s11594_s15 + $0x98] sm:$0xff]  ;;  %v3120_v61 = vpack.c.bf16 %v3095_v56, %v3083_v8 }
0x12ee   :  { %v3109_v37 = vpack.c.bf16 %v3072_v55, %v3060_v52 }
0x12ef   :  { %v2994_v47 = vmul.f32 %v7742_v20, %v2987_v15  ;;  %3229 = vmatprep.subr.bf16.mxu1 %v3107_v30  ;;  %v7744_v20 = vld [vmem:[#allocation23] ss:$0 sm:$0xff]  ;;  %v3059_v30 = vld [vmem:[%s11594_s15 + $0x30] sm:$0xff] }
0x12f0   :  { %3230 = vmatpush1.bf16.msra.mxu1 %v3106_v41  ;;  %v3108_v36 = vpack.c.bf16 %v3071_v42, %v3059_v30  ;;  %v3087_v41 = vld [vmem:[%s11594_s15 + $0x110] sm:$0xff] }
0x12f1   :  { %v3001_v26 = vadd.f32 %v7743_v46, %v2994_v47  ;;  %3313 = vmatprep.subr.bf16.mxu1 %v3123_v14  ;;  %v3124_v62 = vpack.c.bf16 %v3099_v2, %v3087_v41  ;;  %v3063_v14 = vld [vmem:[%s11594_s15 + $0x50] sm:$0xff] }
0x12f3   :  { %3002 = vst.msk [vmem:[#allocation2] sm:$0xff] %vm2067_vm0, %v3001_v26  ;;  %v7745_v26 = vld [vmem:[#allocation24] ss:$0 sm:$0xff] }
0x12fa   :  { %v3003_v51 = vld [vmem:[#allocation2] sm:$0xff] }
0x12fb   :  { %v3007_v23 = vadd.f32 %v3005_v50, %v3003_v51  ;;  %v3079_v50 = vld [vmem:[%s11594_s15 + $0xd0] sm:$0xff] }
0x12fc   :  { %v3091_v51 = vld [vmem:[%s11594_s15 + $0x130] sm:$0xff] }
0x12fd   :  { %v3011_v16 = vsel %vm2067_vm0, %v3007_v23, 0.0 }
0x12fe   :  { %3012 = vadd.xlane.f32.xlu1 %v3011_v16  ;;  %v3085_v16 = vld [vmem:[%s11594_s15 + $0x100] sm:$0xff] }
0x1375   :  { %v3016_v53 = vpop.xlane.xlu0 %3015 }
0x1376   :  { %v3018_v17 = vmul.f32 0.03125, %v3016_v53  ;;  %v3097_v53 = vld [vmem:[%s11594_s15 + $0x160] sm:$0xff] }
0x1378   :  { %v3020_v58 = vsub.f32 %v3008_v11, %v3018_v17  ;;  %v3056_v17 = vld [vmem:[%s11594_s15 + $0x18] sm:$0xff] }
0x137a   :  { %v3022_v18 = vmul.f32 %v3020_v58, %v3020_v58 }
0x137c   :  { %v3026_v43 = vsel %vm2067_vm0, %v3022_v18, 0.0  ;;  %v3068_v18 = vld [vmem:[%s11594_s15 + $0x78] sm:$0xff] }
0x137d   :  { %3027 = vadd.xlane.f32.xlu1 %v3026_v43  ;;  %v3062_v43 = vld [vmem:[%s11594_s15 + $0x48] sm:$0xff]  ;;  %v3105_v4 = vpack.c.bf16 %v3068_v18, %v3056_v17 }
0x1387   :  { %v3013_v9 = vpop.xlane.xlu1 %3012 }
0x1388   :  { %v3017_v60 = vmul.f32 0.03125, %v3013_v9 }
0x138a   :  { %v3019_v45 = vsub.f32 %v3007_v23, %v3017_v60 }
0x138c   :  { %v3021_v7 = vmul.f32 %v3019_v45, %v3019_v45 }
0x138e   :  { %v3023_v5 = vsel %vm2067_vm0, %v3021_v7, 0.0  ;;  %v3122_v7 = vpack.c.bf16 %v3097_v53, %v3085_v16 }
0x138f   :  { %3024 = vadd.xlane.f32.xlu0 %v3023_v5  ;;  %v3055_v5 = vld [vmem:[%s11594_s15 + $0x10] sm:$0xff] }
0x1390   :  { %v3104_v49 = vpack.c.bf16 %v3067_v54, %v3055_v5 }
0x1406   :  { %v3028_v48 = vpop.xlane.xlu1 %3027 }
0x1407   :  { %v3030_v10 = vmul.f32 0.03125, %v3028_v48  ;;  %v3075_v48 = vld [vmem:[%s11594_s15 + $0xb0] sm:$0xff] }
0x1409   :  { %v3032_v44 = vadd.f32 1e-06, %v3030_v10  ;;  %v3112_v10 = vpack.c.bf16 %v3075_v48, %v3063_v14 }
0x140b   :  { %8847 = vrsqrt.f32 %v3032_v44 }
0x1418   :  { %v3025_v57 = vpop.xlane.xlu0 %3024  ;;  %v8848_v40 = vpop.eup %8847 }
0x1419   :  { %v3029_v39 = vmul.f32 0.03125, %v3025_v57  ;;  %v3036_v38 = vmul.f32 %v8848_v40, %v3020_v58  ;;  %v3074_v58 = vld [vmem:[%s11594_s15 + $0xa8] sm:$0xff] }
0x141a   :  { %v3111_v63 = vpack.c.bf16 %v3074_v58, %v3062_v43 }
0x141b   :  { %v3031_v11 = vadd.f32 1e-06, %v3029_v39  ;;  %v3044_v46 = vmul.f32 %v7744_v20, %v3036_v38 }
0x141d   :  { %8849 = vrsqrt.f32 %v3031_v11  ;;  %v10526_v60 = vadd.f32 %v7745_v26, %v3044_v46 }
0x142a   :  { %v8850_v15 = vpop.eup %8849 }
0x142b   :  { %v3035_v47 = vmul.f32 %v8850_v15, %v3019_v45  ;;  %v3116_v45 = vpack.c.bf16 %v3091_v51, %v3079_v50 }
0x142d   :  { %v3043_v23 = vmul.f32 %v7744_v20, %v3035_v47 }
0x142f   :  { %v10524_v9 = vadd.f32 %v7745_v26, %v3043_v23 }
0x1431   :  { %v3101_v13 = vpack.c.bf16 %v10526_v60, %v10524_v9 }
0x1433   :  { %7746 = vmatmul.mubr.msk.bf16.vlgmr.msra.gmra.mxu0 %vm2067_vm0, %v3101_v13  ;;  %7748 = vmatmul.mubr.msk.bf16.vlgmr.msra.gmra.mxu1 %vm2067_vm0, %v3101_v13 }
0x1434   :  { %3185 = vmatpush1.bf16.msra.mxu0 %v3116_v45  ;;  %3314 = vmatpush1.bf16.msra.mxu1 %v3122_v7 }
0x1435   :  { %3186 = vmatprep.subr.bf16.mxu0 %v3105_v4  ;;  %3315 = vmatprep.subr.bf16.mxu1 %v3111_v63 }
0x1436   :  { %3204 = vmatprep.mubr.bf16.mxu0 %v9425_v0  ;;  %3333 = vmatprep.mubr.bf16.mxu1 %v9425_v0 }
0x1438   :  { %3187 = vmatpush1.bf16.msra.mxu0 %v3104_v49  ;;  %3316 = vmatpush1.bf16.msra.mxu1 %v3110_v22 }
0x1439   :  { %3270 = vmatprep.subr.bf16.mxu0 %v3121_v32  ;;  %8224 = vmatprep.subr.bf16.mxu1 %v9429_v27 }
0x143b   :  { %7747 = vmatmul.mubr.msk.bf16.vlgmr.msra.gmra.mxu0 %vm2067_vm0, %v3101_v13  ;;  %7750 = vmatmul.mubr.msk.bf16.vlgmr.msra.gmra.mxu1 %vm2067_vm0, %v3101_v13 }
0x143c   :  { %3271 = vmatpush1.bf16.msra.mxu0 %v3120_v61  ;;  %3290 = vmatprep.mubr.bf16.mxu0 %v9425_v0 }
0x143d   :  { %3272 = vmatprep.subr.bf16.mxu0 %v3109_v37  ;;  %8226 = vmatprep.mubr.msk.bf16.mxu1 %vm9431_vm11, %v9429_v27 }
0x1440   :  { %3273 = vmatpush1.bf16.msra.mxu0 %v3108_v36 }
0x1441   :  { %3356 = vmatprep.subr.bf16.mxu0 %v3125_v59 }
0x1443   :  { %7749 = vmatmul.mubr.msk.bf16.vlgmr.msra.gmra.mxu0 %vm2067_vm0, %v3101_v13 }
0x1444   :  { %3357 = vmatpush1.bf16.msra.mxu0 %v3124_v62  ;;  %3376 = vmatprep.mubr.bf16.mxu0 %v9425_v0 }
0x1445   :  { %3358 = vmatprep.subr.bf16.mxu0 %v3113_v1 }
0x1448   :  { %3359 = vmatpush1.bf16.msra.mxu0 %v3112_v10 }
0x1449   :  { %8230 = vmatprep.subr.bf16.mxu0 %v9429_v27 }
0x144b   :  { %7751 = vmatmul.mubr.msk.bf16.vlgmr.msra.gmra.mxu0 %vm2067_vm0, %v3101_v13 }
0x144c   :  { %8232 = vmatprep.mubr.msk.bf16.mxu0 %vm9431_vm11, %v9429_v27 }
0x14f3   :  { %v3163_v44 = vpop.f32.mrf.mxu0  ;;  %v3249_v57 = vpop.f32.mrf.mxu1 }
0x14f5   :  { %v10566_v39 = vpop.f32.mrf.mxu0  ;;  %v10568_v11 = vpop.f32.mrf.mxu1 }
0x14f7   :  { %v3167_v40 = vpop.f32.mrf.mxu0  ;;  %v3253_v38 = vpop.f32.mrf.mxu1 }
0x14f8   :  { %v3387_v20 = vpack.c.bf16 %v3167_v40, %v3163_v44  ;;  %v3388_v15 = vpack.c.bf16 %v3253_v38, %v3249_v57 }
0x14f9   :  { %v10570_v46 = vpop.f32.mrf.mxu0  ;;  %v10572_v47 = vpop.f32.mrf.mxu1 }
0x14fa   :  { %v3393_v26 = vsel %vm2928_vm15, %v3388_v15, 0  ;;  %3515 = vrot.lane.b32.xlu0 %v3388_v15, %s9426_s16  ;;  %3512 = vrot.lane.b32.xlu1 %v3387_v20, %s9426_s16 }
0x14fb   :  { %v3206_v50 = vpop.f32.mrf.mxu0  ;;  %v3335_v51 = vpop.f32.mrf.mxu1  ;;  %8225 = vmatpush3.bf16.xpose.msra.mxu1 %v3393_v26 }
0x14fc   :  { %8236 = vmatprep.subr.bf16.mxu1 %v9429_v27 }
0x14fd   :  { %v10578_v23 = vpop.f32.mrf.mxu0  ;;  %v10580_v16 = vpop.f32.mrf.mxu1 }
0x14ff   :  { %v3210_v53 = vpop.f32.mrf.mxu0  ;;  %v3339_v17 = vpop.f32.mrf.mxu1 }
0x1500   :  { %v10582_v18 = vpack.c.bf16 %v3210_v53, %v3206_v50  ;;  %v10584_v43 = vpack.c.bf16 %v3339_v17, %v3335_v51 }
0x1501   :  { %v10586_v58 = vpop.f32.mrf.mxu0  ;;  %v10608_v22 = vpop.f32.mrf.mxu1 }
0x1502   :  { %8227 = vmatmul.mubr.msk.bf16.vlgmr.msra.gmra.mxu1 %vm2928_vm15, %v3387_v20  ;;  %8231 = vmatpush3.bf16.msra.mxu0 %v10584_v43 }
0x1503   :  { %v3292_v45 = vpop.f32.mrf.mxu0  ;;  %8238 = vmatprep.mubr.msk.bf16.mxu1 %vm9431_vm11, %v9429_v27  ;;  %8242 = vmatprep.subr.bf16.mxu0 %v9429_v27 }
0x1505   :  { %v10593_v7 = vpop.f32.mrf.mxu0 }
0x1507   :  { %v3296_v5 = vpop.f32.mrf.mxu0 }
0x1508   :  { %v10595_v13 = vpack.c.bf16 %v3296_v5, %v3292_v45 }
0x1509   :  { %v10597_v4 = vpop.f32.mrf.mxu0 }
0x150b   :  { %v3378_v63 = vpop.f32.mrf.mxu0 }
0x150d   :  { %v10599_v54 = vpop.f32.mrf.mxu0 }
0x150f   :  { %v3382_v25 = vpop.f32.mrf.mxu0 }
0x1510   :  { %v10601_v21 = vpack.c.bf16 %v3382_v25, %v3378_v63 }
0x156c   :  { %v3516_v29 = vpop.permute.xlu0 %3515  ;;  %v3513_v49 = vpop.permute.xlu1 %3512 }
0x156d   :  { %v3521_v33 = vsel %vm2928_vm15, %v3516_v29, 0  ;;  %v10622_v29 = vpack.c.bf16 %v10570_v46, %v10566_v39  ;;  %v2014_v39 = vld [vmem:[%s11595_s20 + $0x70] sm:$0xff]  ;;  %v2015_v46 = vld [vmem:[%s11595_s20 + $0x78] sm:$0xff] }
0x156e   :  { %8237 = vmatpush3.bf16.xpose.msra.mxu1 %v3521_v33 }
0x156f   :  { %8248 = vmatprep.subr.bf16.mxu1 %v9429_v27 }
0x1575   :  { %8239 = vmatmul.mubr.msk.bf16.vlgmr.msra.gmra.mxu1 %vm2928_vm15, %v3513_v49 }
0x1576   :  { %8256 = vmatprep.mubr.msk.bf16.mxu1 %vm9431_vm11, %v9429_v27 }
0x15c2   :  { %v3429_v32 = vpop.f32.mrf.mxu1 }
0x15c3   :  { %v3436_v8 = vmul.f32 0.125, %v3429_v32 }
0x15c4   :  { %v8228_v56 = vpop.f32.mrf.mxu1 }
0x15c5   :  { %v3438_v52 = vsel %vm351_vm1, %v3436_v8, -inf }
0x15c6   :  { %3439 = vmax.xlane.f32.xlu1 %v3438_v52  ;;  %v3432_v55 = vpop.f32.mrf.mxu1  ;;  %v2012_v52 = vld [vmem:[%s11595_s20 + $0x60] sm:$0xff] }
0x15c7   :  { %v3437_v61 = vmul.f32 0.125, %v3432_v55  ;;  %v10632_v55 = vpack.c.bf16 %v2015_v46, %v2014_v39 }
0x15c8   :  { %v8229_v37 = vpop.f32.mrf.mxu1 }
0x15c9   :  { %v3441_v30 = vsel %vm351_vm1, %v3437_v61, -inf  ;;  %8249 = vmatpush3.bf16.msra.mxu1 %v10632_v55 }
0x15ca   :  { %3442 = vmax.xlane.f32.xlu0 %v3441_v30  ;;  %8250 = vmatprep.subr.bf16.mxu1 %v9429_v27  ;;  %v2010_v30 = vld [vmem:[%s11595_s20 + $0x50] sm:$0xff] }
0x1635   :  { %v3557_v42 = vpop.f32.mrf.mxu1 }
0x1636   :  { %v3564_v12 = vmul.f32 0.125, %v3557_v42  ;;  %v2011_v42 = vld [vmem:[%s11595_s20 + $0x58] sm:$0xff] }
0x1637   :  { %v8240_v34 = vpop.f32.mrf.mxu1 }
0x1638   :  { %v3566_v36 = vsel %vm351_vm1, %v3564_v12, -inf }
0x1639   :  { %3567 = vmax.xlane.f32.xlu0 %v3566_v36  ;;  %v3560_v59 = vpop.f32.mrf.mxu1 }
0x163a   :  { %v3565_v41 = vmul.f32 0.125, %v3560_v59 }
0x163b   :  { %v8241_v2 = vpop.f32.mrf.mxu1 }
0x163c   :  { %v3569_v3 = vsel %vm351_vm1, %v3565_v41, -inf  ;;  %v2006_v2 = vld [vmem:[%s11595_s20 + $0x30] sm:$0xff] }
0x163d   :  { %3570 = vmax.xlane.f32.xlu1 %v3569_v3  ;;  %v2007_v3 = vld [vmem:[%s11595_s20 + $0x38] sm:$0xff] }
0x164f   :  { %v3440_v28 = vpop.xlane.xlu1 %3439 }
0x1650   :  { %v3444_v62 = vsub.f32 %v3436_v8, %v3440_v28 }
0x1652   :  { %v3446_v1 = vmul.f32 1.442695, %v3444_v62 }
0x1653   :  { %v3443_v14 = vpop.xlane.xlu0 %3442 }
0x1654   :  { %8851 = vpow2.f32 %v3446_v1  ;;  %v3445_v48 = vsub.f32 %v3437_v61, %v3443_v14  ;;  %v2013_v61 = vld [vmem:[%s11595_s20 + $0x68] sm:$0xff]  ;;  %v10650_v14 = vpack.c.bf16 %v2007_v3, %v2006_v2 }
0x1655   :  { %v10636_v37 = vpack.c.bf16 %v2013_v61, %v2012_v52 }
0x1656   :  { %v3448_v10 = vmul.f32 1.442695, %v3445_v48 }
0x1657   :  { %8251 = vmatpush3.bf16.msra.mxu1 %v10636_v37 }
0x1658   :  { %8853 = vpow2.f32 %v3448_v10  ;;  %8252 = vmatprep.subr.bf16.mxu1 %v9429_v27  ;;  %v2004_v10 = vld [vmem:[%s11595_s20 + $0x20] sm:$0xff] }
0x1661   :  { %v8852_v44 = vpop.eup %8851 }
0x1662   :  { %v3450_v57 = vsel %vm351_vm1, %v8852_v44, 0.0 }
0x1663   :  { %3451 = vadd.xlane.f32.xlu0 %v3450_v57 }
0x1665   :  { %v8854_v40 = vpop.eup %8853 }
0x1666   :  { %v3453_v38 = vsel %vm351_vm1, %v8854_v40, 0.0 }
0x1667   :  { %3454 = vadd.xlane.f32.xlu1 %v3453_v38  ;;  %v2003_v38 = vld [vmem:[%s11595_s20 + $0x18] sm:$0xff] }
0x16c2   :  { %v3568_v20 = vpop.xlane.xlu0 %3567 }
0x16c3   :  { %v3572_v15 = vsub.f32 %v3564_v12, %v3568_v20  ;;  %v10642_v12 = vpack.c.bf16 %v2011_v42, %v2010_v30 }
0x16c5   :  { %v3574_v26 = vmul.f32 1.442695, %v3572_v15  ;;  %8253 = vmatpush3.bf16.msra.mxu1 %v10642_v12  ;;  %v2000_v15 = vld [vmem:[%s11595_s20] sm:$0xff] }
0x16c6   :  { %v3571_v50 = vpop.xlane.xlu1 %3570  ;;  %8254 = vmatprep.subr.bf16.mxu1 %v9429_v27 }
0x16c7   :  { %8855 = vpow2.f32 %v3574_v26  ;;  %v3573_v51 = vsub.f32 %v3565_v41, %v3571_v50  ;;  %v2001_v26 = vld [vmem:[%s11595_s20 + $0x8] sm:$0xff] }
0x16c8   :  { %v10670_v50 = vpack.c.bf16 %v2001_v26, %v2000_v15 }
0x16c9   :  { %v3576_v53 = vmul.f32 1.442695, %v3573_v51  ;;  %v2008_v51 = vld [vmem:[%s11595_s20 + $0x40] sm:$0xff] }
0x16cb   :  { %8857 = vpow2.f32 %v3576_v53  ;;  %v2009_v53 = vld [vmem:[%s11595_s20 + $0x48] sm:$0xff] }
0x16d4   :  { %v8856_v17 = vpop.eup %8855 }
0x16d5   :  { %v3578_v45 = vsel %vm351_vm1, %v8856_v17, 0.0 }
0x16d6   :  { %3579 = vadd.xlane.f32.xlu0 %v3578_v45  ;;  %v10681_v45 = vpop.f32.mrf.mxu0 }
0x16d8   :  { %v8858_v5 = vpop.eup %8857 }
0x16d9   :  { %v3581_v63 = vsel %vm351_vm1, %v8858_v5, 0.0 }
0x16da   :  { %3582 = vadd.xlane.f32.xlu1 %v3581_v63 }
0x16ec   :  { %3590 = vrot.lane.b32.xlu0 %v10584_v43, %s9426_s16  ;;  %v3452_v25 = vpop.xlane.xlu0 %3451 }
0x16ed   :  { %8859 = vrcp.f32 %v3452_v25 }
0x16f0   :  { %v3455_v33 = vpop.xlane.xlu1 %3454  ;;  %3901 = vrot.lane.b32.xlu0 %v10622_v29, %s9426_s16 }
0x16f1   :  { %8861 = vrcp.f32 %v3455_v33 }
0x16fa   :  { %v8860_v49 = vpop.eup %8859 }
0x16fb   :  { %v3458_v8 = vmul.f32 %v8860_v49, %v8852_v44  ;;  %v2005_v44 = vld [vmem:[%s11595_s20 + $0x28] sm:$0xff]  ;;  %v10685_v49 = vpack.c.bf16 %v10608_v22, %v10580_v16 }
0x16fc   :  { %v10656_v57 = vpack.c.bf16 %v2005_v44, %v2004_v10 }
0x16fe   :  { %v8862_v32 = vpop.eup %8861 }
0x16ff   :  { %v3459_v56 = vmul.f32 %v8862_v32, %v8854_v40  ;;  %v2002_v40 = vld [vmem:[%s11595_s20 + $0x10] sm:$0xff] }
0x1700   :  { %v10664_v20 = vpack.c.bf16 %v2003_v38, %v2002_v40 }
0x1701   :  { %v3460_v43 = vpack.c.bf16 %v3459_v56, %v3458_v8 }
0x1703   :  { %8233 = vmatmul.mubr.msk.bf16.vlgmr.msra.gmra.mxu0 %vm351_vm1, %v3460_v43  ;;  %v3731_v43 = vpack.c.bf16 %v10572_v47, %v10568_v11 }
0x1704   :  { %8244 = vmatprep.mubr.msk.bf16.mxu0 %vm9431_vm11, %v9429_v27 }
0x1705   :  { %v3736_v16 = vsel %vm2928_vm15, %v3731_v43, 0 }
0x175f   :  { %v3580_v34 = vpop.xlane.xlu0 %3579 }
0x1760   :  { %8863 = vrcp.f32 %v3580_v34 }
0x1763   :  { %v3591_v36 = vpop.permute.xlu0 %3590  ;;  %v3583_v59 = vpop.xlane.xlu1 %3582 }
0x1764   :  { %8865 = vrcp.f32 %v3583_v59  ;;  %8243 = vmatpush3.bf16.msra.mxu0 %v3591_v36 }
0x1765   :  { %8260 = vmatprep.subr.bf16.mxu0 %v9429_v27 }
0x176d   :  { %v8864_v41 = vpop.eup %8863 }
0x176e   :  { %v3586_v62 = vmul.f32 %v8864_v41, %v8856_v17  ;;  %v10677_v17 = vpack.c.bf16 %v2009_v53, %v2008_v51 }
0x1770   :  { %8255 = vmatpush3.bf16.msra.mxu1 %v10677_v17 }
0x1771   :  { %v8866_v28 = vpop.eup %8865  ;;  %8272 = vmatprep.subr.bf16.mxu1 %v9429_v27 }
0x1772   :  { %v3587_v1 = vmul.f32 %v8866_v28, %v8858_v5 }
0x1774   :  { %v3588_v48 = vpack.c.bf16 %v3587_v1, %v3586_v62 }
0x1776   :  { %8245 = vmatmul.mubr.msk.bf16.vlgmr.msra.gmra.mxu0 %vm351_vm1, %v3588_v48 }
0x1777   :  { %8261 = vmatpush3.bf16.msra.mxu0 %v10650_v14  ;;  %8268 = vmatprep.mubr.msk.bf16.mxu0 %vm9431_vm11, %v9429_v27 }
0x1778   :  { %8262 = vmatprep.subr.bf16.mxu0 %v9429_v27 }
0x177b   :  { %8263 = vmatpush3.bf16.msra.mxu0 %v10656_v57 }
0x177c   :  { %8264 = vmatprep.subr.bf16.mxu0 %v9429_v27 }
0x177f   :  { %8265 = vmatpush3.bf16.msra.mxu0 %v10664_v20 }
0x1780   :  { %8266 = vmatprep.subr.bf16.mxu0 %v9429_v27 }
0x1783   :  { %8267 = vmatpush3.bf16.msra.mxu0 %v10670_v50 }
0x1784   :  { %8278 = vmatprep.subr.bf16.mxu0 %v9429_v27 }
0x17c3   :  { %v3499_v5 = vpop.f32.mrf.mxu0 }
0x17c5   :  { %v8234_v63 = vpop.f32.mrf.mxu0 }
0x17c6   :  { %v2022_v63 = vld [vmem:[%s11595_s20 + $0xb0] sm:$0xff] }
0x17c7   :  { %v3502_v25 = vpop.f32.mrf.mxu0 }
0x17c8   :  { %v3506_v33 = vpack.c.bf16 %v3502_v25, %v3499_v5  ;;  %v2023_v25 = vld [vmem:[%s11595_s20 + $0xb8] sm:$0xff] }
0x17c9   :  { %v8235_v32 = vpop.f32.mrf.mxu0 }
0x17ca   :  { %8269 = vmatmul.mubr.msk.bf16.vlgmr.msra.gmra.mxu0 %vm2928_vm15, %v3506_v33  ;;  %v2020_v33 = vld [vmem:[%s11595_s20 + $0xa0] sm:$0xff]  ;;  %v10719_v32 = vpack.c.bf16 %v2023_v25, %v2022_v63 }
0x17cb   :  { %8279 = vmatpush3.bf16.msra.mxu0 %v10685_v49  ;;  %8280 = vmatprep.mubr.msk.bf16.mxu0 %vm9431_vm11, %v9429_v27 }
0x17cc   :  { %8296 = vmatprep.subr.bf16.mxu0 %v9429_v27 }
0x1836   :  { %v3630_v8 = vpop.f32.mrf.mxu0 }
0x1838   :  { %v8246_v56 = vpop.f32.mrf.mxu0 }
0x183a   :  { %v3633_v39 = vpop.f32.mrf.mxu0 }
0x183b   :  { %v3637_v46 = vpack.c.bf16 %v3633_v39, %v3630_v8  ;;  %v2021_v8 = vld [vmem:[%s11595_s20 + $0xa8] sm:$0xff] }
0x183c   :  { %v8247_v52 = vpop.f32.mrf.mxu0  ;;  %v10723_v56 = vpack.c.bf16 %v2021_v8, %v2020_v33 }
0x183d   :  { %8257 = vmatmul.mubr.msk.bf16.vlgmr.msra.gmra.mxu1 %vm2928_vm15, %v3637_v46 }
0x183e   :  { %8273 = vmatpush3.bf16.xpose.msra.mxu1 %v3736_v16  ;;  %8274 = vmatprep.mubr.msk.bf16.mxu1 %vm9431_vm11, %v9429_v27 }
0x183f   :  { %8284 = vmatprep.subr.bf16.mxu1 %v9429_v27 }
0x1845   :  { %8275 = vmatmul.mubr.msk.bf16.vlgmr.msra.gmra.mxu1 %vm2928_vm15, %v10622_v29 }
0x1846   :  { %8292 = vmatprep.mubr.msk.bf16.mxu1 %vm9431_vm11, %v9429_v27  ;;  %8285 = vmatpush3.bf16.msra.mxu1 %v10719_v32 }
0x1847   :  { %8286 = vmatprep.subr.bf16.mxu1 %v9429_v27 }
0x184a   :  { %8287 = vmatpush3.bf16.msra.mxu1 %v10723_v56 }
0x184b   :  { %8288 = vmatprep.subr.bf16.mxu1 %v9429_v27 }
0x188a   :  { %v10703_v11 = vpop.f32.mrf.mxu0 }
0x188c   :  { %v8270_v47 = vpop.f32.mrf.mxu0 }
0x188e   :  { %v10705_v22 = vpop.f32.mrf.mxu0 }
0x1890   :  { %v8271_v61 = vpop.f32.mrf.mxu0 }
0x18fd   :  { %v10707_v30 = vpop.f32.mrf.mxu1 }
0x18ff   :  { %v8258_v42 = vpop.f32.mrf.mxu1 }
0x1901   :  { %v10709_v34 = vpop.f32.mrf.mxu1 }
0x1903   :  { %v8259_v36 = vpop.f32.mrf.mxu1 }
0x1905   :  { %v3772_v59 = vpop.f32.mrf.mxu1 }
0x1906   :  { %v3779_v41 = vmul.f32 0.125, %v3772_v59  ;;  %v3902_v59 = vpop.permute.xlu0 %3901 }
0x1907   :  { %v8276_v2 = vpop.f32.mrf.mxu1 }
0x1908   :  { %v3781_v29 = vsel %vm351_vm1, %v3779_v41, -inf  ;;  %v2019_v2 = vld [vmem:[%s11595_s20 + $0x98] sm:$0xff] }
0x1909   :  { %3782 = vmax.xlane.f32.xlu1 %v3781_v29  ;;  %v3775_v3 = vpop.f32.mrf.mxu1 }
0x190a   :  { %v3780_v28 = vmul.f32 0.125, %v3775_v3  ;;  %v2016_v3 = vld [vmem:[%s11595_s20 + $0x80] sm:$0xff] }
0x190b   :  { %v8277_v62 = vpop.f32.mrf.mxu1 }
0x190c   :  { %v3784_v1 = vsel %vm351_vm1, %v3780_v28, -inf }
0x190d   :  { %3785 = vmax.xlane.f32.xlu1 %v3784_v1 }
0x1992   :  { %v3783_v48 = vpop.xlane.xlu1 %3782 }
0x1993   :  { %v3787_v10 = vsub.f32 %v3779_v41, %v3783_v48  ;;  %v2018_v41 = vld [vmem:[%s11595_s20 + $0x90] sm:$0xff] }
0x1994   :  { %v10738_v29 = vpack.c.bf16 %v2019_v2, %v2018_v41 }
0x1995   :  { %v3789_v44 = vmul.f32 1.442695, %v3787_v10 }
0x1996   :  { %v3786_v40 = vpop.xlane.xlu1 %3785  ;;  %8289 = vmatpush3.bf16.msra.mxu1 %v10738_v29 }
0x1997   :  { %8867 = vpow2.f32 %v3789_v44  ;;  %v3788_v38 = vsub.f32 %v3780_v28, %v3786_v40  ;;  %8290 = vmatprep.subr.bf16.mxu1 %v9429_v27  ;;  %v2017_v28 = vld [vmem:[%s11595_s20 + $0x88] sm:$0xff] }
0x1998   :  { %v10744_v62 = vpack.c.bf16 %v2017_v28, %v2016_v3  ;;  %v3727_v3 = vadd.f32 %v10705_v22, %v10709_v34 }
0x1999   :  { %v3791_v15 = vmul.f32 1.442695, %v3788_v38 }
0x199a   :  { %8291 = vmatpush3.bf16.msra.mxu1 %v10744_v62 }
0x199b   :  { %8869 = vpow2.f32 %v3791_v15  ;;  %8308 = vmatprep.subr.bf16.mxu1 %v9429_v27 }
0x19a4   :  { %v8868_v26 = vpop.eup %8867 }
0x19a5   :  { %v3793_v51 = vsel %vm351_vm1, %v8868_v26, 0.0 }
0x19a6   :  { %3794 = vadd.xlane.f32.xlu1 %v3793_v51 }
0x19a8   :  { %v8870_v53 = vpop.eup %8869 }
0x19a9   :  { %v3796_v5 = vsel %vm351_vm1, %v8870_v53, 0.0 }
0x19aa   :  { %3797 = vadd.xlane.f32.xlu1 %v3796_v5 }
0x19bb   :  { %3904 = vrot.lane.b32.xlu1 %v3731_v43, %s9426_s16 }
0x1a2f   :  { %v3795_v39 = vpop.xlane.xlu1 %3794 }
0x1a30   :  { %8871 = vrcp.f32 %v3795_v39 }
0x1a33   :  { %v3798_v46 = vpop.xlane.xlu1 %3797 }
0x1a34   :  { %8873 = vrcp.f32 %v3798_v46 }
0x1a37   :  { %v3905_v61 = vpop.permute.xlu1 %3904 }
0x1a38   :  { %v3910_v36 = vsel %vm2928_vm15, %v3905_v61, 0 }
0x1a3d   :  { %v8872_v43 = vpop.eup %8871 }
0x1a3e   :  { %v3801_v16 = vmul.f32 %v8872_v43, %v8868_v26 }
0x1a41   :  { %v8874_v52 = vpop.eup %8873 }
0x1a42   :  { %v3802_v47 = vmul.f32 %v8874_v52, %v8870_v53 }
0x1a44   :  { %v3803_v42 = vpack.c.bf16 %v3802_v47, %v3801_v16 }
0x1a46   :  { %8281 = vmatmul.mubr.msk.bf16.vlgmr.msra.gmra.mxu0 %vm351_vm1, %v3803_v42 }
0x1a47   :  { %8297 = vmatpush3.bf16.xpose.msra.mxu0 %v3910_v36  ;;  %8298 = vmatprep.mubr.msk.bf16.mxu0 %vm9431_vm11, %v9429_v27  ;;  %v3724_v36 = vadd.f32 %v10703_v11, %v10707_v30  ;;  %v2029_v11 = vld [vmem:[%s11595_s20 + $0xe8] sm:$0xff] }
0x1a48   :  { %8302 = vmatprep.subr.bf16.mxu0 %v9429_v27 }
0x1a4e   :  { %8299 = vmatmul.mubr.msk.bf16.vlgmr.msra.gmra.mxu0 %vm2928_vm15, %v3902_v59 }
0x1a4f   :  { %8304 = vmatprep.mubr.msk.bf16.mxu0 %vm9431_vm11, %v9429_v27 }
0x1b06   :  { %v3842_v1 = vpop.f32.mrf.mxu0 }
0x1b08   :  { %v8282_v48 = vpop.f32.mrf.mxu0 }
0x1b0a   :  { %v3845_v10 = vpop.f32.mrf.mxu0 }
0x1b0b   :  { %v3849_v44 = vpack.c.bf16 %v3845_v10, %v3842_v1  ;;  %v2030_v10 = vld [vmem:[%s11595_s20 + $0xf0] sm:$0xff] }
0x1b0c   :  { %v8283_v40 = vpop.f32.mrf.mxu0 }
0x1b0d   :  { %8293 = vmatmul.mubr.msk.bf16.vlgmr.msra.gmra.mxu1 %vm2928_vm15, %v3849_v44  ;;  %v2031_v44 = vld [vmem:[%s11595_s20 + $0xf8] sm:$0xff] }
0x1b0e   :  { %v3946_v38 = vpop.f32.mrf.mxu0  ;;  %8316 = vmatprep.mubr.msk.bf16.mxu1 %vm9431_vm11, %v9429_v27  ;;  %v10770_v40 = vpack.c.bf16 %v2031_v44, %v2030_v10 }
0x1b0f   :  { %v3953_v15 = vmul.f32 0.125, %v3946_v38 }
0x1b10   :  { %v8300_v26 = vpop.f32.mrf.mxu0  ;;  %8309 = vmatpush3.bf16.msra.mxu1 %v10770_v40 }
0x1b11   :  { %v3955_v51 = vsel %vm351_vm1, %v3953_v15, -inf  ;;  %8310 = vmatprep.subr.bf16.mxu1 %v9429_v27 }
0x1b12   :  { %3956 = vmax.xlane.f32.xlu0 %v3955_v51  ;;  %v3949_v53 = vpop.f32.mrf.mxu0 }
0x1b13   :  { %v3954_v5 = vmul.f32 0.125, %v3949_v53 }
0x1b14   :  { %v8301_v63 = vpop.f32.mrf.mxu0 }
0x1b15   :  { %v3958_v25 = vsel %vm351_vm1, %v3954_v5, -inf  ;;  %v4083_v63 = vsel %vm2928_vm15, %v10595_v13, 0 }
0x1b16   :  { %3959 = vmax.xlane.f32.xlu1 %v3958_v25  ;;  %v2026_v25 = vld [vmem:[%s11595_s20 + $0xd0] sm:$0xff] }
0x1b9b   :  { %v3957_v33 = vpop.xlane.xlu0 %3956 }
0x1b9c   :  { %v3961_v8 = vsub.f32 %v3953_v15, %v3957_v33  ;;  %v2027_v33 = vld [vmem:[%s11595_s20 + $0xd8] sm:$0xff] }
0x1b9e   :  { %v3963_v39 = vmul.f32 1.442695, %v3961_v8  ;;  %v10794_v8 = vpack.c.bf16 %v2027_v33, %v2026_v25 }
0x1b9f   :  { %v3960_v46 = vpop.xlane.xlu1 %3959 }
0x1ba0   :  { %8875 = vpow2.f32 %v3963_v39  ;;  %v3962_v43 = vsub.f32 %v3954_v5, %v3960_v46  ;;  %v2024_v39 = vld [vmem:[%s11595_s20 + $0xc0] sm:$0xff]  ;;  %v2025_v46 = vld [vmem:[%s11595_s20 + $0xc8] sm:$0xff] }
0x1ba2   :  { %v3965_v52 = vmul.f32 1.442695, %v3962_v43  ;;  %v10800_v43 = vpack.c.bf16 %v2025_v46, %v2024_v39 }
0x1ba4   :  { %8877 = vpow2.f32 %v3965_v52 }
0x1bad   :  { %v8876_v16 = vpop.eup %8875 }
0x1bae   :  { %v3967_v47 = vsel %vm351_vm1, %v8876_v16, 0.0 }
0x1baf   :  { %3968 = vadd.xlane.f32.xlu0 %v3967_v47 }
0x1bb1   :  { %v8878_v61 = vpop.eup %8877 }
0x1bb2   :  { %v3970_v42 = vsel %vm351_vm1, %v8878_v61, 0.0 }
0x1bb3   :  { %3971 = vadd.xlane.f32.xlu0 %v3970_v42 }
0x1bc9   :  { %3979 = vrot.lane.b32.xlu0 %v10685_v49, %s9426_s16  ;;  %v2028_v49 = vld [vmem:[%s11595_s20 + $0xe0] sm:$0xff] }
0x1bca   :  { %v10774_v30 = vpack.c.bf16 %v2029_v11, %v2028_v49 }
0x1bcc   :  { %8311 = vmatpush3.bf16.msra.mxu1 %v10774_v30 }
0x1bcd   :  { %v3891_v59 = vpop.f32.mrf.mxu1  ;;  %4248 = vrot.lane.b32.xlu0 %v10582_v18, %s9426_s16  ;;  %8312 = vmatprep.subr.bf16.mxu1 %v9429_v27 }
0x1bce   :  { %v10761_v41 = vadd.f32 %v3891_v59, %v3724_v36 }
0x1bcf   :  { %v8294_v2 = vpop.f32.mrf.mxu1 }
0x1bd0   :  { %8313 = vmatpush3.bf16.msra.mxu1 %v10794_v8 }
0x1bd1   :  { %v3894_v28 = vpop.f32.mrf.mxu1  ;;  %8314 = vmatprep.subr.bf16.mxu1 %v9429_v27 }
0x1bd2   :  { %v10765_v1 = vadd.f32 %v3894_v28, %v3727_v3 }
0x1bd3   :  { %v8295_v48 = vpop.f32.mrf.mxu1 }
0x1bd4   :  { %8315 = vmatpush3.bf16.msra.mxu1 %v10800_v43 }
0x1bd5   :  { %8332 = vmatprep.subr.bf16.mxu1 %v9429_v27 }
0x1c38   :  { %v3969_v22 = vpop.xlane.xlu0 %3968 }
0x1c39   :  { %8879 = vrcp.f32 %v3969_v22 }
0x1c3c   :  { %v3972_v34 = vpop.xlane.xlu0 %3971 }
0x1c3d   :  { %8881 = vrcp.f32 %v3972_v34 }
0x1c40   :  { %v3980_v38 = vpop.permute.xlu0 %3979 }
0x1c41   :  { %8303 = vmatpush3.bf16.msra.mxu0 %v3980_v38 }
0x1c42   :  { %8320 = vmatprep.subr.bf16.mxu0 %v9429_v27 }
0x1c46   :  { %v8880_v15 = vpop.eup %8879 }
0x1c47   :  { %v3975_v51 = vmul.f32 %v8880_v15, %v8876_v16 }
0x1c4a   :  { %v8882_v26 = vpop.eup %8881 }
0x1c4b   :  { %v3976_v53 = vmul.f32 %v8882_v26, %v8878_v61 }
0x1c4d   :  { %v3977_v5 = vpack.c.bf16 %v3976_v53, %v3975_v51 }
0x1c4f   :  { %8305 = vmatmul.mubr.msk.bf16.vlgmr.msra.gmra.mxu0 %vm351_vm1, %v3977_v5 }
0x1c50   :  { %8321 = vmatpush3.bf16.xpose.msra.mxu0 %v4083_v63  ;;  %8322 = vmatprep.mubr.msk.bf16.mxu0 %vm9431_vm11, %v9429_v27 }
0x1c51   :  { %8326 = vmatprep.subr.bf16.mxu0 %v9429_v27 }
0x1c57   :  { %8323 = vmatmul.mubr.msk.bf16.vlgmr.msra.gmra.mxu0 %vm2928_vm15, %v10582_v18 }
0x1c58   :  { %8327 = vmatpush3.bf16.msra.mxu0 %v10601_v21  ;;  %8328 = vmatprep.mubr.msk.bf16.mxu0 %vm9431_vm11, %v9429_v27 }
0x1c59   :  { %8344 = vmatprep.subr.bf16.mxu0 %v9429_v27 }
0x1d0f   :  { %v4019_v18 = vpop.f32.mrf.mxu0 }
0x1d11   :  { %v8306_v52 = vpop.f32.mrf.mxu0 }
0x1d12   :  { %v2039_v52 = vld [vmem:[%s11595_s20 + $0x138] sm:$0xff] }
0x1d13   :  { %v4022_v16 = vpop.f32.mrf.mxu0 }
0x1d14   :  { %v4026_v47 = vpack.c.bf16 %v4022_v16, %v4019_v18  ;;  %v2038_v18 = vld [vmem:[%s11595_s20 + $0x130] sm:$0xff]  ;;  %v2036_v16 = vld [vmem:[%s11595_s20 + $0x120] sm:$0xff] }
0x1d15   :  { %v8307_v61 = vpop.f32.mrf.mxu0 }
0x1d16   :  { %8317 = vmatmul.mubr.msk.bf16.vlgmr.msra.gmra.mxu1 %vm2928_vm15, %v4026_v47  ;;  %v10822_v47 = vpack.c.bf16 %v2039_v52, %v2038_v18  ;;  %v2037_v61 = vld [vmem:[%s11595_s20 + $0x128] sm:$0xff] }
0x1d17   :  { %v4119_v42 = vpop.f32.mrf.mxu0  ;;  %8340 = vmatprep.mubr.msk.bf16.mxu1 %vm9431_vm11, %v9429_v27 }
0x1d18   :  { %v4126_v36 = vmul.f32 0.125, %v4119_v42  ;;  %8333 = vmatpush3.bf16.msra.mxu1 %v10822_v47  ;;  %v10826_v42 = vpack.c.bf16 %v2037_v61, %v2036_v16 }
0x1d19   :  { %v8324_v59 = vpop.f32.mrf.mxu0  ;;  %8334 = vmatprep.subr.bf16.mxu1 %v9429_v27 }
0x1d1a   :  { %v4128_v2 = vsel %vm351_vm1, %v4126_v36, -inf }
0x1d1b   :  { %4129 = vmax.xlane.f32.xlu1 %v4128_v2  ;;  %v4122_v3 = vpop.f32.mrf.mxu0 }
0x1d1c   :  { %v4127_v28 = vmul.f32 0.125, %v4122_v3  ;;  %8335 = vmatpush3.bf16.msra.mxu1 %v10826_v42 }
0x1d1d   :  { %v8325_v48 = vpop.f32.mrf.mxu0  ;;  %8336 = vmatprep.subr.bf16.mxu1 %v9429_v27 }
0x1d1e   :  { %v4131_v10 = vsel %vm351_vm1, %v4127_v28, -inf }
0x1d1f   :  { %4132 = vmax.xlane.f32.xlu1 %v4131_v10  ;;  %v4249_v10 = vpop.permute.xlu0 %4248 }
0x1da4   :  { %v4130_v44 = vpop.xlane.xlu1 %4129 }
0x1da5   :  { %v4134_v49 = vsub.f32 %v4126_v36, %v4130_v44  ;;  %v2034_v44 = vld [vmem:[%s11595_s20 + $0x110] sm:$0xff] }
0x1da7   :  { %v4136_v11 = vmul.f32 1.442695, %v4134_v49  ;;  %v2035_v49 = vld [vmem:[%s11595_s20 + $0x118] sm:$0xff] }
0x1da8   :  { %v4133_v22 = vpop.xlane.xlu1 %4132 }
0x1da9   :  { %8883 = vpow2.f32 %v4136_v11  ;;  %v4135_v34 = vsub.f32 %v4127_v28, %v4133_v22  ;;  %v10841_v11 = vpack.c.bf16 %v2035_v49, %v2034_v44  ;;  %v2032_v22 = vld [vmem:[%s11595_s20 + $0x100] sm:$0xff]  ;;  %v4425_v49 = vpack.c.bf16 %v10597_v4, %v10593_v7 }
0x1dab   :  { %v4138_v38 = vmul.f32 1.442695, %v4135_v34  ;;  %8337 = vmatpush3.bf16.msra.mxu1 %v10841_v11  ;;  %v2033_v34 = vld [vmem:[%s11595_s20 + $0x108] sm:$0xff] }
0x1dac   :  { %8338 = vmatprep.subr.bf16.mxu1 %v9429_v27 }
0x1dad   :  { %8885 = vpow2.f32 %v4138_v38  ;;  %v10847_v38 = vpack.c.bf16 %v2033_v34, %v2032_v22 }
0x1daf   :  { %8339 = vmatpush3.bf16.msra.mxu1 %v10847_v38 }
0x1db0   :  { %8356 = vmatprep.subr.bf16.mxu1 %v9429_v27 }
0x1db6   :  { %v8884_v15 = vpop.eup %8883 }
0x1db7   :  { %v4140_v26 = vsel %vm351_vm1, %v8884_v15, 0.0 }
0x1db8   :  { %4141 = vadd.xlane.f32.xlu1 %v4140_v26 }
0x1dba   :  { %v8886_v51 = vpop.eup %8885 }
0x1dbb   :  { %v4143_v53 = vsel %vm351_vm1, %v8886_v51, 0.0 }
0x1dbc   :  { %4144 = vadd.xlane.f32.xlu1 %v4143_v53 }
0x1dcd   :  { %4251 = vrot.lane.b32.xlu1 %v10595_v13, %s9426_s16 }
0x1dd6   :  { %v4068_v5 = vpop.f32.mrf.mxu1 }
0x1dd7   :  { %v10814_v63 = vadd.f32 %v4068_v5, %v10761_v41 }
0x1dd8   :  { %v8318_v25 = vpop.f32.mrf.mxu1 }
0x1dda   :  { %v4071_v33 = vpop.f32.mrf.mxu1 }
0x1ddb   :  { %v10817_v39 = vadd.f32 %v4071_v33, %v10765_v1 }
0x1ddc   :  { %v8319_v46 = vpop.f32.mrf.mxu1 }
0x1e41   :  { %v4142_v13 = vpop.xlane.xlu1 %4141 }
0x1e42   :  { %8887 = vrcp.f32 %v4142_v13 }
0x1e45   :  { %v4145_v41 = vpop.xlane.xlu1 %4144 }
0x1e46   :  { %8889 = vrcp.f32 %v4145_v41 }
0x1e49   :  { %v4252_v3 = vpop.permute.xlu1 %4251 }
0x1e4a   :  { %v4257_v48 = vsel %vm2928_vm15, %v4252_v3, 0 }
0x1e4f   :  { %v8888_v1 = vpop.eup %8887 }
0x1e50   :  { %v4148_v59 = vmul.f32 %v8888_v1, %v8884_v15 }
0x1e53   :  { %v8890_v36 = vpop.eup %8889 }
0x1e54   :  { %v4149_v2 = vmul.f32 %v8890_v36, %v8886_v51 }
0x1e56   :  { %v4150_v28 = vpack.c.bf16 %v4149_v2, %v4148_v59 }
0x1e58   :  { %8329 = vmatmul.mubr.msk.bf16.vlgmr.msra.gmra.mxu0 %vm351_vm1, %v4150_v28 }
0x1e59   :  { %8345 = vmatpush3.bf16.xpose.msra.mxu0 %v4257_v48  ;;  %8346 = vmatprep.mubr.msk.bf16.mxu0 %vm9431_vm11, %v9429_v27 }
0x1e5a   :  { %8350 = vmatprep.subr.bf16.mxu0 %v9429_v27 }
0x1e60   :  { %8347 = vmatmul.mubr.msk.bf16.vlgmr.msra.gmra.mxu0 %vm2928_vm15, %v4249_v10 }
0x1e61   :  { %8352 = vmatprep.mubr.msk.bf16.mxu0 %vm9431_vm11, %v9429_v27 }
0x1f18   :  { %v4189_v15 = vpop.f32.mrf.mxu0 }
0x1f1a   :  { %v8330_v26 = vpop.f32.mrf.mxu0 }
0x1f1c   :  { %v4192_v51 = vpop.f32.mrf.mxu0 }
0x1f1d   :  { %v4196_v53 = vpack.c.bf16 %v4192_v51, %v4189_v15 }
0x1f1e   :  { %v8331_v5 = vpop.f32.mrf.mxu0 }
0x1f1f   :  { %8341 = vmatmul.mubr.msk.bf16.vlgmr.msra.gmra.mxu1 %vm2928_vm15, %v4196_v53  ;;  %v2046_v5 = vld [vmem:[%s11595_s20 + $0x170] sm:$0xff] }
0x1f20   :  { %v4293_v25 = vpop.f32.mrf.mxu0  ;;  %8364 = vmatprep.mubr.msk.bf16.mxu1 %vm9431_vm11, %v9429_v27 }
0x1f21   :  { %v4300_v33 = vmul.f32 0.125, %v4293_v25  ;;  %v2047_v25 = vld [vmem:[%s11595_s20 + $0x178] sm:$0xff] }
0x1f22   :  { %v8348_v46 = vpop.f32.mrf.mxu0 }
0x1f23   :  { %v4302_v18 = vsel %vm351_vm1, %v4300_v33, -inf  ;;  %v10872_v46 = vpack.c.bf16 %v2047_v25, %v2046_v5 }
0x1f24   :  { %4303 = vmax.xlane.f32.xlu0 %v4302_v18  ;;  %v4296_v52 = vpop.f32.mrf.mxu0 }
0x1f25   :  { %v4301_v16 = vmul.f32 0.125, %v4296_v52  ;;  %8357 = vmatpush3.bf16.msra.mxu1 %v10872_v46 }
0x1f26   :  { %v8349_v61 = vpop.f32.mrf.mxu0  ;;  %8358 = vmatprep.subr.bf16.mxu1 %v9429_v27 }
0x1f27   :  { %v4305_v13 = vsel %vm351_vm1, %v4301_v16, -inf }
0x1f28   :  { %4306 = vmax.xlane.f32.xlu1 %v4305_v13 }
0x1fad   :  { %v4304_v41 = vpop.xlane.xlu0 %4303 }
0x1fae   :  { %v4308_v1 = vsub.f32 %v4300_v33, %v4304_v41  ;;  %v2044_v33 = vld [vmem:[%s11595_s20 + $0x160] sm:$0xff]  ;;  %v4430_v41 = vsel %vm2928_vm15, %v4425_v49, 0 }
0x1fb0   :  { %v4310_v36 = vmul.f32 1.442695, %v4308_v1  ;;  %v4424_v1 = vpack.c.bf16 %v10586_v58, %v10578_v23  ;;  %v2040_v23 = vld [vmem:[%s11595_s20 + $0x140] sm:$0xff]  ;;  %v2041_v58 = vld [vmem:[%s11595_s20 + $0x148] sm:$0xff] }
0x1fb1   :  { %v4307_v59 = vpop.xlane.xlu1 %4306 }
0x1fb2   :  { %8891 = vpow2.f32 %v4310_v36  ;;  %v4309_v2 = vsub.f32 %v4301_v16, %v4307_v59  ;;  %v10891_v36 = vpack.c.bf16 %v10681_v45, %v10599_v54  ;;  %v2042_v59 = vld [vmem:[%s11595_s20 + $0x150] sm:$0xff]  ;;  %v10906_v54 = vpack.c.bf16 %v2041_v58, %v2040_v23 }
0x1fb4   :  { %v4312_v3 = vmul.f32 1.442695, %v4309_v2  ;;  %v2043_v2 = vld [vmem:[%s11595_s20 + $0x158] sm:$0xff] }
0x1fb6   :  { %8893 = vpow2.f32 %v4312_v3  ;;  %v10900_v3 = vpack.c.bf16 %v2043_v2, %v2042_v59 }
0x1fbf   :  { %v8892_v28 = vpop.eup %8891 }
0x1fc0   :  { %v4314_v48 = vsel %vm351_vm1, %v8892_v28, 0.0 }
0x1fc1   :  { %4315 = vadd.xlane.f32.xlu0 %v4314_v48 }
0x1fc3   :  { %v8894_v10 = vpop.eup %8893 }
0x1fc4   :  { %v4317_v44 = vsel %vm351_vm1, %v8894_v10, 0.0 }
0x1fc5   :  { %4318 = vadd.xlane.f32.xlu0 %v4317_v44 }
0x1fdb   :  { %4326 = vrot.lane.b32.xlu0 %v10601_v21, %s9426_s16  ;;  %v2045_v21 = vld [vmem:[%s11595_s20 + $0x168] sm:$0xff] }
0x1fdc   :  { %v10876_v7 = vpack.c.bf16 %v2045_v21, %v2044_v33 }
0x1fde   :  { %8359 = vmatpush3.bf16.msra.mxu1 %v10876_v7 }
0x1fdf   :  { %v4238_v22 = vpop.f32.mrf.mxu1  ;;  %4598 = vrot.lane.b32.xlu0 %v4425_v49, %s9426_s16  ;;  %8360 = vmatprep.subr.bf16.mxu1 %v9429_v27 }
0x1fe0   :  { %v10864_v34 = vadd.f32 %v4238_v22, %v10814_v63 }
0x1fe1   :  { %v8342_v15 = vpop.f32.mrf.mxu1 }
0x1fe2   :  { %8361 = vmatpush3.bf16.msra.mxu1 %v10900_v3 }
0x1fe3   :  { %v4241_v26 = vpop.f32.mrf.mxu1  ;;  %8362 = vmatprep.subr.bf16.mxu1 %v9429_v27 }
0x1fe4   :  { %v10867_v51 = vadd.f32 %v4241_v26, %v10817_v39 }
0x1fe5   :  { %v8343_v53 = vpop.f32.mrf.mxu1 }
0x1fe6   :  { %8363 = vmatpush3.bf16.msra.mxu1 %v10906_v54 }
0x1fe7   :  { %8380 = vmatprep.subr.bf16.mxu1 %v9429_v27 }
0x204a   :  { %v4316_v4 = vpop.xlane.xlu0 %4315 }
0x204b   :  { %8895 = vrcp.f32 %v4316_v4 }
0x204e   :  { %v4319_v63 = vpop.xlane.xlu0 %4318 }
0x204f   :  { %8897 = vrcp.f32 %v4319_v63 }
0x2052   :  { %v4327_v39 = vpop.permute.xlu0 %4326 }
0x2053   :  { %8351 = vmatpush3.bf16.msra.mxu0 %v4327_v39 }
0x2054   :  { %8368 = vmatprep.subr.bf16.mxu0 %v9429_v27 }
0x2058   :  { %v8896_v18 = vpop.eup %8895 }
0x2059   :  { %v4322_v16 = vmul.f32 %v8896_v18, %v8892_v28 }
0x205c   :  { %v8898_v52 = vpop.eup %8897 }
0x205d   :  { %v4323_v61 = vmul.f32 %v8898_v52, %v8894_v10 }
0x205f   :  { %v4324_v13 = vpack.c.bf16 %v4323_v61, %v4322_v16 }
0x2061   :  { %8353 = vmatmul.mubr.msk.bf16.vlgmr.msra.gmra.mxu0 %vm351_vm1, %v4324_v13 }
0x2062   :  { %8369 = vmatpush3.bf16.xpose.msra.mxu0 %v4430_v41  ;;  %8370 = vmatprep.mubr.msk.bf16.mxu0 %vm9431_vm11, %v9429_v27 }
0x2063   :  { %8374 = vmatprep.subr.bf16.mxu0 %v9429_v27 }
0x2069   :  { %8371 = vmatmul.mubr.msk.bf16.vlgmr.msra.gmra.mxu0 %vm2928_vm15, %v4424_v1 }
0x206a   :  { %8375 = vmatpush3.bf16.msra.mxu0 %v10891_v36  ;;  %8376 = vmatprep.mubr.msk.bf16.mxu0 %vm9431_vm11, %v9429_v27 }
0x206b   :  { %8392 = vmatprep.subr.bf16.mxu0 %v9429_v27 }
0x2121   :  { %v4366_v45 = vpop.f32.mrf.mxu0 }
0x2123   :  { %v8354_v28 = vpop.f32.mrf.mxu0 }
0x2125   :  { %v4369_v48 = vpop.f32.mrf.mxu0 }
0x2126   :  { %v4373_v10 = vpack.c.bf16 %v4369_v48, %v4366_v45  ;;  %v2054_v48 = vld [vmem:[%s11595_s20 + $0x1b0] sm:$0xff] }
0x2127   :  { %v8355_v44 = vpop.f32.mrf.mxu0 }
0x2128   :  { %8365 = vmatmul.mubr.msk.bf16.vlgmr.msra.gmra.mxu1 %vm2928_vm15, %v4373_v10  ;;  %v2055_v10 = vld [vmem:[%s11595_s20 + $0x1b8] sm:$0xff]  ;;  %v2052_v44 = vld [vmem:[%s11595_s20 + $0x1a0] sm:$0xff] }
0x2129   :  { %v4466_v49 = vpop.f32.mrf.mxu0  ;;  %8388 = vmatprep.mubr.msk.bf16.mxu1 %vm9431_vm11, %v9429_v27 }
0x212a   :  { %v4473_v22 = vmul.f32 0.125, %v4466_v49  ;;  %v10927_v49 = vpack.c.bf16 %v2055_v10, %v2054_v48 }
0x212b   :  { %v8372_v15 = vpop.f32.mrf.mxu0 }
0x212c   :  { %v4475_v26 = vsel %vm351_vm1, %v4473_v22, -inf  ;;  %8381 = vmatpush3.bf16.msra.mxu1 %v10927_v49 }
0x212d   :  { %4476 = vmax.xlane.f32.xlu1 %v4475_v26  ;;  %v4469_v53 = vpop.f32.mrf.mxu0  ;;  %8382 = vmatprep.subr.bf16.mxu1 %v9429_v27 }
0x212e   :  { %v4474_v5 = vmul.f32 0.125, %v4469_v53 }
0x212f   :  { %v8373_v25 = vpop.f32.mrf.mxu0 }
0x2130   :  { %v4478_v33 = vsel %vm351_vm1, %v4474_v5, -inf  ;;  %v4599_v25 = vpop.permute.xlu0 %4598 }
0x2131   :  { %4479 = vmax.xlane.f32.xlu1 %v4478_v33 }
0x21b6   :  { %v4477_v21 = vpop.xlane.xlu1 %4476 }
0x21b7   :  { %v4481_v4 = vsub.f32 %v4473_v22, %v4477_v21  ;;  %v2053_v22 = vld [vmem:[%s11595_s20 + $0x1a8] sm:$0xff]  ;;  %v4604_v21 = vsel %vm2928_vm15, %v4599_v25, 0 }
0x21b8   :  { %v10931_v15 = vpack.c.bf16 %v2053_v22, %v2052_v44 }
0x21b9   :  { %v4483_v63 = vmul.f32 1.442695, %v4481_v4 }
0x21ba   :  { %v4480_v39 = vpop.xlane.xlu1 %4479  ;;  %8383 = vmatpush3.bf16.msra.mxu1 %v10931_v15 }
0x21bb   :  { %8899 = vpow2.f32 %v4483_v63  ;;  %v4482_v18 = vsub.f32 %v4474_v5, %v4480_v39  ;;  %8384 = vmatprep.subr.bf16.mxu1 %v9429_v27  ;;  %v2050_v63 = vld [vmem:[%s11595_s20 + $0x190] sm:$0xff]  ;;  %v2051_v39 = vld [vmem:[%s11595_s20 + $0x198] sm:$0xff] }
0x21bd   :  { %v4485_v52 = vmul.f32 1.442695, %v4482_v18  ;;  %v10946_v18 = vpack.c.bf16 %v2051_v39, %v2050_v63 }
0x21bf   :  { %8901 = vpow2.f32 %v4485_v52  ;;  %8385 = vmatpush3.bf16.msra.mxu1 %v10946_v18  ;;  %v2048_v52 = vld [vmem:[%s11595_s20 + $0x180] sm:$0xff] }
0x21c0   :  { %8386 = vmatprep.subr.bf16.mxu1 %v9429_v27 }
0x21c8   :  { %v8900_v16 = vpop.eup %8899 }
0x21c9   :  { %v4487_v61 = vsel %vm351_vm1, %v8900_v16, 0.0 }
0x21ca   :  { %4488 = vadd.xlane.f32.xlu1 %v4487_v61 }
0x21cc   :  { %v8902_v13 = vpop.eup %8901 }
0x21cd   :  { %v4490_v41 = vsel %vm351_vm1, %v8902_v13, 0.0 }
0x21ce   :  { %4491 = vadd.xlane.f32.xlu1 %v4490_v41 }
0x21df   :  { %4595 = vrot.lane.b32.xlu1 %v4424_v1, %s9426_s16 }
0x21e8   :  { %v4415_v59 = vpop.f32.mrf.mxu1 }
0x21e9   :  { %v10919_v2 = vadd.f32 %v4415_v59, %v10864_v34 }
0x21ea   :  { %v8366_v23 = vpop.f32.mrf.mxu1 }
0x21ec   :  { %v4418_v58 = vpop.f32.mrf.mxu1 }
0x21ed   :  { %v10922_v45 = vadd.f32 %v4418_v58, %v10867_v51 }
0x21ee   :  { %v8367_v28 = vpop.f32.mrf.mxu1 }
0x2253   :  { %v4489_v34 = vpop.xlane.xlu1 %4488 }
0x2254   :  { %8903 = vrcp.f32 %v4489_v34 }
0x2257   :  { %v4492_v51 = vpop.xlane.xlu1 %4491 }
0x2258   :  { %8905 = vrcp.f32 %v4492_v51 }
0x225b   :  { %v4596_v4 = vpop.permute.xlu1 %4595 }
0x2261   :  { %v8904_v1 = vpop.eup %8903 }
0x2262   :  { %v4495_v53 = vmul.f32 %v8904_v1, %v8900_v16  ;;  %v2049_v16 = vld [vmem:[%s11595_s20 + $0x188] sm:$0xff] }
0x2263   :  { %v10952_v61 = vpack.c.bf16 %v2049_v16, %v2048_v52 }
0x2265   :  { %v8906_v26 = vpop.eup %8905  ;;  %8387 = vmatpush3.bf16.msra.mxu1 %v10952_v61 }
0x2266   :  { %v4496_v5 = vmul.f32 %v8906_v26, %v8902_v13  ;;  %8404 = vmatprep.subr.bf16.mxu1 %v9429_v27 }
0x2268   :  { %v4497_v33 = vpack.c.bf16 %v4496_v5, %v4495_v53 }
0x226a   :  { %8377 = vmatmul.mubr.msk.bf16.vlgmr.msra.gmra.mxu0 %vm351_vm1, %v4497_v33 }
0x226b   :  { %8393 = vmatpush3.bf16.xpose.msra.mxu0 %v4604_v21  ;;  %8394 = vmatprep.mubr.msk.bf16.mxu0 %vm9431_vm11, %v9429_v27 }
0x226c   :  { %8398 = vmatprep.subr.bf16.mxu0 %v9429_v27 }
0x2272   :  { %8395 = vmatmul.mubr.msk.bf16.vlgmr.msra.gmra.mxu0 %vm2928_vm15, %v4596_v4 }
0x2273   :  { %8400 = vmatprep.mubr.msk.bf16.mxu0 %vm9431_vm11, %v9429_v27 }
0x232a   :  { %v4536_v13 = vpop.f32.mrf.mxu0 }
0x232c   :  { %v8378_v41 = vpop.f32.mrf.mxu0 }
0x232e   :  { %v4539_v59 = vpop.f32.mrf.mxu0 }
0x232f   :  { %v4543_v23 = vpack.c.bf16 %v4539_v59, %v4536_v13  ;;  %v2062_v59 = vld [vmem:[%s11595_s20 + $0x1f0] sm:$0xff] }
0x2330   :  { %v8379_v58 = vpop.f32.mrf.mxu0 }
0x2331   :  { %8389 = vmatmul.mubr.msk.bf16.vlgmr.msra.gmra.mxu1 %vm2928_vm15, %v4543_v23  ;;  %v2063_v23 = vld [vmem:[%s11595_s20 + $0x1f8] sm:$0xff]  ;;  %v2060_v58 = vld [vmem:[%s11595_s20 + $0x1e0] sm:$0xff] }
0x2332   :  { %v4640_v28 = vpop.f32.mrf.mxu0  ;;  %8412 = vmatprep.mubr.msk.bf16.mxu1 %vm9431_vm11, %v9429_v27 }
0x2333   :  { %v4647_v48 = vmul.f32 0.125, %v4640_v28  ;;  %v10969_v28 = vpack.c.bf16 %v2063_v23, %v2062_v59 }
0x2334   :  { %v8396_v10 = vpop.f32.mrf.mxu0 }
0x2335   :  { %v4649_v44 = vsel %vm351_vm1, %v4647_v48, -inf  ;;  %8405 = vmatpush3.bf16.msra.mxu1 %v10969_v28 }
0x2336   :  { %4650 = vmax.xlane.f32.xlu0 %v4649_v44  ;;  %v4643_v22 = vpop.f32.mrf.mxu0  ;;  %8406 = vmatprep.subr.bf16.mxu1 %v9429_v27 }
0x2337   :  { %v4648_v34 = vmul.f32 0.125, %v4643_v22 }
0x2338   :  { %v8397_v51 = vpop.f32.mrf.mxu0 }
0x2339   :  { %v4652_v1 = vsel %vm351_vm1, %v4648_v34, -inf }
0x233a   :  { %4653 = vmax.xlane.f32.xlu1 %v4652_v1 }
0x23bf   :  { %v4651_v26 = vpop.xlane.xlu0 %4650 }
0x23c0   :  { %v4655_v53 = vsub.f32 %v4647_v48, %v4651_v26  ;;  %v2061_v48 = vld [vmem:[%s11595_s20 + $0x1e8] sm:$0xff] }
0x23c1   :  { %v10974_v22 = vpack.c.bf16 %v2061_v48, %v2060_v58 }
0x23c2   :  { %v4657_v5 = vmul.f32 1.442695, %v4655_v53 }
0x23c3   :  { %v4654_v25 = vpop.xlane.xlu1 %4653  ;;  %8407 = vmatpush3.bf16.msra.mxu1 %v10974_v22 }
0x23c4   :  { %8907 = vpow2.f32 %v4657_v5  ;;  %v4656_v33 = vsub.f32 %v4648_v34, %v4654_v25  ;;  %8408 = vmatprep.subr.bf16.mxu1 %v9429_v27  ;;  %v2058_v25 = vld [vmem:[%s11595_s20 + $0x1d0] sm:$0xff] }
0x23c6   :  { %v4659_v21 = vmul.f32 1.442695, %v4656_v33  ;;  %v2059_v33 = vld [vmem:[%s11595_s20 + $0x1d8] sm:$0xff] }
0x23c8   :  { %8909 = vpow2.f32 %v4659_v21  ;;  %v10985_v21 = vpack.c.bf16 %v2059_v33, %v2058_v25 }
0x23ca   :  { %8409 = vmatpush3.bf16.msra.mxu1 %v10985_v21 }
0x23cb   :  { %8410 = vmatprep.subr.bf16.mxu1 %v9429_v27 }
0x23d1   :  { %v8908_v4 = vpop.eup %8907 }
0x23d2   :  { %v4661_v63 = vsel %vm351_vm1, %v8908_v4, 0.0 }
0x23d3   :  { %4662 = vadd.xlane.f32.xlu0 %v4661_v63  ;;  %v2056_v63 = vld [vmem:[%s11595_s20 + $0x1c0] sm:$0xff] }
0x23d5   :  { %v8910_v39 = vpop.eup %8909 }
0x23d6   :  { %v4664_v52 = vsel %vm351_vm1, %v8910_v39, 0.0 }
0x23d7   :  { %4665 = vadd.xlane.f32.xlu0 %v4664_v52  ;;  %v2057_v52 = vld [vmem:[%s11595_s20 + $0x1c8] sm:$0xff] }
0x23ed   :  { %4673 = vrot.lane.b32.xlu0 %v10891_v36, %s9426_s16 }
0x23f1   :  { %v4585_v16 = vpop.f32.mrf.mxu1 }
0x23f2   :  { %v4592_v13 = vadd.f32 %v4585_v16, %v10919_v2  ;;  %v10991_v16 = vpack.c.bf16 %v2057_v52, %v2056_v63 }
0x23f3   :  { %v8390_v41 = vpop.f32.mrf.mxu1 }
0x23f4   :  { %8411 = vmatpush3.bf16.msra.mxu1 %v10991_v16 }
0x23f5   :  { %v4588_v10 = vpop.f32.mrf.mxu1  ;;  %8432 = vmatprep.subr.bf16.mxu1 %v9429_v27 }
0x23f6   :  { %v4593_v44 = vadd.f32 %v4588_v10, %v10922_v45 }
0x23f7   :  { %v8391_v34 = vpop.f32.mrf.mxu1 }
0x245c   :  { %v4663_v36 = vpop.xlane.xlu0 %4662 }
0x245d   :  { %8911 = vrcp.f32 %v4663_v36 }
0x2460   :  { %v4666_v2 = vpop.xlane.xlu0 %4665 }
0x2461   :  { %8913 = vrcp.f32 %v4666_v2 }
0x2464   :  { %v4674_v51 = vpop.permute.xlu0 %4673 }
0x2465   :  { %8399 = vmatpush3.bf16.msra.mxu0 %v4674_v51 }
0x2466   :  { %8416 = vmatprep.subr.bf16.mxu0 %v9429_v27 }
0x246a   :  { %v8912_v45 = vpop.eup %8911 }
0x246b   :  { %v4669_v26 = vmul.f32 %v8912_v45, %v8908_v4 }
0x246e   :  { %v8914_v1 = vpop.eup %8913 }
0x246f   :  { %v4670_v53 = vmul.f32 %v8914_v1, %v8910_v39 }
0x2471   :  { %v4671_v5 = vpack.c.bf16 %v4670_v53, %v4669_v26  ;;  %v7779_v26 = vld [vmem:[%s11580_s5 + $0x8] sm:$0xff] }
0x2473   :  { %8401 = vmatmul.mubr.msk.bf16.vlgmr.msra.gmra.mxu0 %vm351_vm1, %v4671_v5  ;;  %v4883_v5 = vsel %vm2067_vm0, %v7779_v26, 0.0 }
0x2474   :  { %8420 = vmatprep.mubr.msk.bf16.mxu0 %vm9431_vm11, %v9429_v27 }
0x2533   :  { %v4713_v4 = vpop.f32.mrf.mxu0 }
0x2535   :  { %v8402_v39 = vpop.f32.mrf.mxu0 }
0x2537   :  { %v4716_v41 = vpop.f32.mrf.mxu0 }
0x2538   :  { %v4720_v59 = vpack.c.bf16 %v4716_v41, %v4713_v4 }
0x2539   :  { %v8403_v23 = vpop.f32.mrf.mxu0 }
0x253a   :  { %8413 = vmatmul.mubr.msk.bf16.vlgmr.msra.gmra.mxu1 %vm2928_vm15, %v4720_v59 }
0x253b   :  { %8434 = vmatprep.mubr.msk.bf16.mxu1 %vm9431_vm11, %v9429_v27 }
0x25fa   :  { %v4762_v58 = vpop.f32.mrf.mxu1 }
0x25fb   :  { %v4769_v48 = vadd.f32 %v4762_v58, %v4592_v13 }
0x25fc   :  { %v8414_v10 = vpop.f32.mrf.mxu1 }
0x25fd   :  { %v4771_v34 = vadd.f32 %v4769_v48, %v10524_v9  ;;  %v4829_v10 = vld [vmem:[%s9610_s29 + $0x10] sm:$0xff] }
0x25fe   :  { %v4765_v36 = vpop.f32.mrf.mxu1 }
0x25ff   :  { %v4770_v2 = vadd.f32 %v4765_v36, %v4593_v44  ;;  %v4775_v51 = vsel %vm2067_vm0, %v4771_v34, 0.0 }
0x2600   :  { %4776 = vadd.xlane.f32.xlu1 %v4775_v51  ;;  %v8415_v45 = vpop.f32.mrf.mxu1  ;;  %v4828_v51 = vld [vmem:[%s9610_s29 + $0x8] sm:$0xff] }
0x2601   :  { %v4772_v1 = vadd.f32 %v4770_v2, %v10526_v60  ;;  %v4827_v2 = vld [vmem:[%s9610_s29] sm:$0xff] }
0x2602   :  { %v4832_v45 = vpack.c.bf16 %v4828_v51, %v4827_v2 }
0x2603   :  { %v4778_v53 = vsel %vm2067_vm0, %v4772_v1, 0.0 }
0x2604   :  { %4779 = vadd.xlane.f32.xlu1 %v4778_v53 }
0x2608   :  { %4884 = vadd.xlane.f32.xlu1 %v4883_v5 }
0x2689   :  { %v4777_v25 = vpop.xlane.xlu1 %4776 }
0x268a   :  { %v4781_v13 = vmul.f32 0.03125, %v4777_v25 }
0x268c   :  { %v4783_v33 = vsub.f32 %v4771_v34, %v4781_v13  ;;  %v4830_v34 = vld [vmem:[%s9610_s29 + $0x18] sm:$0xff] }
0x268d   :  { %v4780_v9 = vpop.xlane.xlu1 %4779  ;;  %v4833_v36 = vpack.c.bf16 %v4830_v34, %v4829_v10 }
0x268e   :  { %v4782_v44 = vmul.f32 0.03125, %v4780_v9  ;;  %v4785_v63 = vmul.f32 %v4783_v33, %v4783_v33 }
0x268f   :  { %8417 = vmatpush3.bf16.msra.mxu0 %v4833_v36 }
0x2690   :  { %v4784_v52 = vsub.f32 %v4772_v1, %v4782_v44  ;;  %v4787_v60 = vsel %vm2067_vm0, %v4785_v63, 0.0  ;;  %8418 = vmatprep.subr.bf16.mxu0 %v9429_v27  ;;  %v7776_v63 = vld [vmem:[%s11596_s30] ss:$0 sm:$0xff] }
0x2691   :  { %4788 = vadd.xlane.f32.xlu0 %v4787_v60  ;;  %v4885_v4 = vpop.xlane.xlu1 %4884 }
0x2692   :  { %v4886_v39 = vmul.f32 0.03125, %v4885_v4  ;;  %v4786_v41 = vmul.f32 %v4784_v52, %v4784_v52 }
0x2693   :  { %8419 = vmatpush3.bf16.msra.mxu0 %v4832_v45 }
0x2694   :  { %v4887_v59 = vsub.f32 %v7779_v26, %v4886_v39  ;;  %v4790_v23 = vsel %vm2067_vm0, %v4786_v41, 0.0  ;;  %8424 = vmatprep.subr.bf16.mxu0 %v9429_v27 }
0x2695   :  { %4791 = vadd.xlane.f32.xlu1 %v4790_v23  ;;  %v7777_v23 = vld [vmem:[#allocation26] ss:$0 sm:$0xff] }
0x2696   :  { %v4888_v58 = vmul.f32 %v4887_v59, %v4887_v59 }
0x2698   :  { %v4889_v48 = vsel %vm2067_vm0, %v4888_v58, 0.0 }
0x2699   :  { %4890 = vadd.xlane.f32.xlu1 %v4889_v48 }
0x271a   :  { %v4789_v1 = vpop.xlane.xlu0 %4788 }
0x271b   :  { %v4793_v26 = vmul.f32 0.03125, %v4789_v1 }
0x271d   :  { %v4795_v53 = vadd.f32 1e-06, %v4793_v26 }
0x271e   :  { %v4792_v5 = vpop.xlane.xlu1 %4791 }
0x271f   :  { %8915 = vrsqrt.f32 %v4795_v53  ;;  %v4794_v25 = vmul.f32 0.03125, %v4792_v5 }
0x2721   :  { %v4796_v13 = vadd.f32 1e-06, %v4794_v25 }
0x2722   :  { %v4891_v9 = vpop.xlane.xlu1 %4890 }
0x2723   :  { %8917 = vrsqrt.f32 %v4796_v13  ;;  %v4892_v60 = vmul.f32 0.03125, %v4891_v9  ;;  %v4915_v9 = vld [vmem:[%s11587_s27 + $0x10] sm:$0xff] }
0x2725   :  { %v4893_v58 = vadd.f32 1e-12, %v4892_v60 }
0x2727   :  { %8919 = vrsqrt.f32 %v4893_v58  ;;  %v4914_v58 = vld [vmem:[%s11587_s27 + $0x8] sm:$0xff] }
0x272c   :  { %v8916_v44 = vpop.eup %8915 }
0x272d   :  { %v4799_v4 = vmul.f32 %v8916_v44, %v4783_v33  ;;  %v4916_v44 = vld [vmem:[%s11587_s27 + $0x18] sm:$0xff] }
0x272f   :  { %v4807_v39 = vmul.f32 %v7776_v63, %v4799_v4  ;;  %v4919_v4 = vpack.c.bf16 %v4916_v44, %v4915_v9 }
0x2730   :  { %v8918_v41 = vpop.eup %8917 }
0x2731   :  { %v4800_v48 = vmul.f32 %v8918_v41, %v4784_v52  ;;  %v4815_v10 = vadd.f32 %v7777_v23, %v4807_v39 }
0x2733   :  { %v4808_v34 = vmul.f32 %v7776_v63, %v4800_v48  ;;  %v4817_v2 = vsel %vm2067_vm0, %v4815_v10, 0.0  ;;  %v7780_v63 = vld [vmem:[%s11588_s19] ss:$0 sm:$0xff]  ;;  %v7781_v48 = vld [vmem:[#allocation9] ss:$0 sm:$0xff] }
0x2734   :  { %v8920_v5 = vpop.eup %8919 }
0x2735   :  { %v4816_v36 = vadd.f32 %v7777_v23, %v4808_v34  ;;  %v4895_v25 = vmul.f32 %v8920_v5, %v4887_v59  ;;  %v4913_v23 = vld [vmem:[%s11587_s27] sm:$0xff] }
0x2736   :  { %v4918_v10 = vpack.c.bf16 %v4914_v58, %v4913_v23 }
0x2737   :  { %v4818_v51 = vsel %vm2067_vm0, %v4816_v36, 0.0  ;;  %v4902_v39 = vmul.f32 %v7780_v63, %v4895_v25  ;;  %v4834_v36 = vld [vmem:[#allocation27] sm:$0x1] }
0x2738   :  { %v4819_v45 = vadd.f32 %v4818_v51, %v4817_v2 }
0x2739   :  { %v11025_v59 = vadd.f32 %v7781_v48, %v4902_v39 }
0x273a   :  { %v4820_v1 = vrot.slane %v4819_v45, 4 }
0x273b   :  { %v4917_v34 = vpack.c.bf16 %v11025_v59, %v11025_v59 }
0x273c   :  { %v4821_v33 = vadd.f32 %v4820_v1, %v4819_v45 }
0x273e   :  { %v4822_v26 = vrot.slane %v4821_v33, 2 }
0x2740   :  { %v4823_v53 = vadd.f32 %v4822_v26, %v4821_v33  ;;  %v7782_v26 = vld [vmem:[#allocation11] ss:$0 sm:$0xff] }
0x2742   :  { %v4824_v52 = vrot.slane %v4823_v53, 1 }
0x2744   :  { %v4825_v13 = vadd.f32 %v4824_v52, %v4823_v53 }
0x2746   :  { %v4826_v60 = vmax.f32 %v4825_v13, 0.0 }
0x2748   :  { %v4831_v41 = vpack.c.bf16 %v4826_v60, %v4826_v60 }
0x274a   :  { %8421 = vmatmul.mubr.msk.bf16.vlgmr.msra.gmra.mxu0 %vm2067_vm0, %v4831_v41  ;;  %v4910_v41 = vld [vmem:[%s11589_s9 + $0x1] sm:$0x1] }
0x274b   :  { %8425 = vmatpush3.bf16.msra.mxu0 %v4919_v4  ;;  %8428 = vmatprep.mubr.msk.bf16.mxu0 %vm9431_vm11, %v9429_v27  ;;  %v4911_v23 = vsub.f32 1.0, %v4910_v41 }
0x274c   :  { %8426 = vmatprep.subr.bf16.mxu0 %v9429_v27 }
0x274d   :  { %v4912_v58 = vmul.f32 -1e+09, %v4911_v23 }
0x274f   :  { %8427 = vmatpush3.bf16.msra.mxu0 %v4918_v10  ;;  %v11056_v48 = vrot.slane %v4912_v58, %v9672_v35 }
0x2750   :  { %8438 = vmatprep.subr.bf16.mxu0 %v9429_v27 }
0x2752   :  { %8429 = vmatmul.mubr.msk.bf16.vlgmr.msra.gmra.mxu0 %vm2067_vm0, %v4917_v34 }
0x2753   :  { %8440 = vmatprep.mubr.msk.bf16.mxu0 %vm9431_vm11, %v9429_v27 }
0x280a   :  { %v4872_v2 = vpop.f32.mrf.mxu0 }
0x280b   :  { %v4873_v51 = vadd.f32 %v4872_v2, %v4834_v36 }
0x280c   :  { %v8422_v45 = vpop.f32.mrf.mxu0 }
0x280d   :  { %4878 = vst [vmem:[#allocation29] sm:$0x1] %v4873_v51 }
0x280e   :  { %v4875_v1 = vpop.f32.mrf.mxu0 }
0x2810   :  { %v8423_v33 = vpop.f32.mrf.mxu0 }
0x2812   :  { %v4964_v53 = vpop.f32.mrf.mxu0 }
0x2813   :  { %v4965_v5 = vadd.f32 %v7782_v26, %v4964_v53 }
0x2814   :  { %v8430_v52 = vpop.f32.mrf.mxu0 }
0x2815   :  { %v11033_v25 = vpack.c.bf16 %v4965_v5, %v4965_v5 }
0x2816   :  { %v4967_v13 = vpop.f32.mrf.mxu0 }
0x2817   :  { %5087 = vrot.lane.b32.xlu0 %v11033_v25, %s9433_s12  ;;  %4972 = vrot.lane.b32.xlu1 %v11033_v25, %s9428_s18 }
0x2818   :  { %v8431_v9 = vpop.f32.mrf.mxu0 }
0x281b   :  { %5089 = vrot.lane.b32.xlu1 %v11033_v25, %s9432_s26 }
0x2889   :  { %v4973_v44 = vpop.permute.xlu1 %4972  ;;  %v5088_v39 = vpop.permute.xlu0 %5087 }
0x288a   :  { %v4978_v63 = vsel %vm2160_vm14, %v4973_v44, 0 }
0x288b   :  { %8433 = vmatpush3.bf16.xpose.msra.mxu1 %v4978_v63 }
0x288c   :  { %8444 = vmatprep.subr.bf16.mxu1 %v9429_v27 }
0x288d   :  { %v5090_v60 = vpop.permute.xlu1 %5089 }
0x288e   :  { %v5095_v4 = vsel %vm2160_vm14, %v5090_v60, 0 }
0x2892   :  { %8435 = vmatmul.mubr.msk.bf16.vlgmr.msra.gmra.mxu1 %vm2160_vm14, %v11033_v25 }
0x2893   :  { %8445 = vmatpush3.bf16.xpose.msra.mxu1 %v5095_v4  ;;  %8446 = vmatprep.mubr.msk.bf16.mxu1 %vm9431_vm11, %v9429_v27 }
0x2894   :  { %8456 = vmatprep.subr.bf16.mxu1 %v9429_v27 }
0x289a   :  { %8447 = vmatmul.mubr.msk.bf16.vlgmr.msra.gmra.mxu1 %vm2160_vm14, %v5088_v39 }
0x289b   :  { %8457 = vmatpush3.bf16.msra.mxu1 %v10351_v24  ;;  %8458 = vmatprep.mubr.msk.bf16.mxu1 %vm9431_vm11, %v9429_v27 }
0x289c   :  { %8468 = vmatprep.subr.bf16.mxu1 %v9429_v27 }
0x2952   :  { %v5014_v10 = vpop.f32.mrf.mxu1 }
0x2953   :  { %v5020_v34 = vmul.f32 0.35355338, %v5014_v10 }
0x2954   :  { %v8436_v36 = vpop.f32.mrf.mxu1 }
0x2955   :  { %v5025_v2 = vadd.f32 %v11056_v48, %v5020_v34 }
0x2956   :  { %v5017_v51 = vpop.f32.mrf.mxu1 }
0x2957   :  { %v5026_v45 = vsel %vm2160_vm14, %v5025_v2, -inf }
0x2958   :  { %5027 = vmax.xlane.f32.xlu1 %v5026_v45  ;;  %v8437_v24 = vpop.f32.mrf.mxu1 }
0x295a   :  { %v5131_v1 = vpop.f32.mrf.mxu1 }
0x295b   :  { %v5137_v33 = vmul.f32 0.35355338, %v5131_v1 }
0x295c   :  { %v8448_v26 = vpop.f32.mrf.mxu1 }
0x295d   :  { %v5138_v53 = vadd.f32 %v5137_v33, %v11056_v48 }
0x295e   :  { %v5134_v5 = vpop.f32.mrf.mxu1 }
0x295f   :  { %v5139_v52 = vsel %vm2160_vm14, %v5138_v53, -inf }
0x2960   :  { %5140 = vmax.xlane.f32.xlu0 %v5139_v52  ;;  %v8449_v35 = vpop.f32.mrf.mxu1 }
0x2976   :  { %5151 = vrot.lane.b32.xlu0 %v11033_v25, %s9434_s28 }
0x29e1   :  { %v5028_v13 = vpop.xlane.xlu1 %5027 }
0x29e2   :  { %v5029_v9 = vsub.f32 %v5025_v2, %v5028_v13 }
0x29e4   :  { %v5030_v44 = vmul.f32 1.442695, %v5029_v9 }
0x29e6   :  { %8921 = vpow2.f32 %v5030_v44 }
0x29e9   :  { %v5141_v63 = vpop.xlane.xlu0 %5140 }
0x29ea   :  { %v5142_v60 = vsub.f32 %v5138_v53, %v5141_v63 }
0x29ec   :  { %v5143_v4 = vmul.f32 1.442695, %v5142_v60 }
0x29ed   :  { %v5152_v24 = vpop.permute.xlu0 %5151 }
0x29ee   :  { %8923 = vpow2.f32 %v5143_v4  ;;  %v5157_v33 = vsel %vm2230_vm2, %v5152_v24, 0 }
0x29f3   :  { %v8922_v39 = vpop.eup %8921 }
0x29f4   :  { %v5032_v41 = vsel %vm2160_vm14, %v8922_v39, 0.0 }
0x29f5   :  { %5033 = vadd.xlane.f32.xlu1 %v5032_v41 }
0x29fb   :  { %v8924_v23 = vpop.eup %8923 }
0x29fc   :  { %v5145_v58 = vsel %vm2160_vm14, %v8924_v23, 0.0 }
0x29fd   :  { %5146 = vadd.xlane.f32.xlu1 %v5145_v58 }
0x2a0e   :  { %5038 = vrot.lane.b32.xlu1 %v11033_v25, %s9426_s16 }
0x2a12   :  { %5288 = vrot.lane.b32.xlu1 %v11033_v25, %s9436_s2 }
0x2a16   :  { %5286 = vrot.lane.b32.xlu1 %v11033_v25, %s9435_s1 }
0x2a7e   :  { %v5034_v10 = vpop.xlane.xlu1 %5033 }
0x2a7f   :  { %8925 = vrcp.f32 %v5034_v10 }
0x2a86   :  { %v5147_v34 = vpop.xlane.xlu1 %5146 }
0x2a87   :  { %8927 = vrcp.f32 %v5147_v34 }
0x2a8a   :  { %v5039_v36 = vpop.permute.xlu1 %5038 }
0x2a8b   :  { %v5044_v2 = vsel %vm2230_vm2, %v5039_v36, 0 }
0x2a8c   :  { %v8926_v51 = vpop.eup %8925  ;;  %8439 = vmatpush3.bf16.msra.mxu0 %v5044_v2 }
0x2a8d   :  { %v5036_v45 = vmul.f32 %v8926_v51, %v8922_v39  ;;  %8450 = vmatprep.subr.bf16.mxu0 %v9429_v27 }
0x2a8e   :  { %v5289_v63 = vpop.permute.xlu1 %5288 }
0x2a8f   :  { %v5037_v1 = vpack.c.bf16 %v5036_v45, %v5036_v45 }
0x2a91   :  { %8441 = vmatmul.mubr.msk.bf16.vlgmr.msra.gmra.mxu0 %vm2160_vm14, %v5037_v1 }
0x2a92   :  { %8451 = vmatpush3.bf16.msra.mxu0 %v5157_v33  ;;  %8452 = vmatprep.mubr.msk.bf16.mxu0 %vm9431_vm11, %v9429_v27  ;;  %v5287_v58 = vpop.permute.xlu1 %5286 }
0x2a93   :  { %8462 = vmatprep.subr.bf16.mxu0 %v9429_v27 }
0x2a94   :  { %v8928_v26 = vpop.eup %8927 }
0x2a95   :  { %v5149_v53 = vmul.f32 %v8928_v26, %v8924_v23 }
0x2a97   :  { %v5150_v5 = vpack.c.bf16 %v5149_v53, %v5149_v53 }
0x2a99   :  { %8453 = vmatmul.mubr.msk.bf16.vlgmr.msra.gmra.mxu0 %vm2160_vm14, %v5150_v5 }
0x2a9a   :  { %8463 = vmatpush3.bf16.msra.mxu0 %v10345_v6  ;;  %8464 = vmatprep.mubr.msk.bf16.mxu0 %vm9431_vm11, %v9429_v27  ;;  %v5294_v6 = vsel %vm2160_vm14, %v5289_v63, 0 }
0x2a9b   :  { %8474 = vmatprep.subr.bf16.mxu0 %v9429_v27 }
0x2b51   :  { %v5080_v52 = vpop.f32.mrf.mxu0 }
0x2b52   :  { %v5086_v35 = vpack.c.bf16 %v5080_v52, %v5080_v52 }
0x2b53   :  { %v8442_v13 = vpop.f32.mrf.mxu0 }
0x2b54   :  { %8465 = vmatmul.mubr.msk.bf16.vlgmr.msra.gmra.mxu0 %vm2160_vm14, %v5086_v35 }
0x2b55   :  { %v5083_v9 = vpop.f32.mrf.mxu0  ;;  %8476 = vmatprep.mubr.msk.bf16.mxu0 %vm9431_vm11, %v9429_v27 }
0x2b57   :  { %v8443_v44 = vpop.f32.mrf.mxu0 }
0x2b59   :  { %v5193_v60 = vpop.f32.mrf.mxu0 }
0x2b5a   :  { %v5199_v4 = vpack.c.bf16 %v5193_v60, %v5193_v60 }
0x2b5b   :  { %v8454_v39 = vpop.f32.mrf.mxu0 }
0x2b5c   :  { %8459 = vmatmul.mubr.msk.bf16.vlgmr.msra.gmra.mxu1 %vm2160_vm14, %v5199_v4 }
0x2b5d   :  { %8469 = vmatpush3.bf16.xpose.msra.mxu1 %v5294_v6  ;;  %v5196_v41 = vpop.f32.mrf.mxu0  ;;  %8470 = vmatprep.mubr.msk.bf16.mxu1 %vm9431_vm11, %v9429_v27 }
0x2b5e   :  { %8480 = vmatprep.subr.bf16.mxu1 %v9429_v27 }
0x2b5f   :  { %v8455_v23 = vpop.f32.mrf.mxu0 }
0x2b64   :  { %8471 = vmatmul.mubr.msk.bf16.vlgmr.msra.gmra.mxu1 %vm2160_vm14, %v5287_v58 }
0x2b65   :  { %8481 = vmatpush3.bf16.msra.mxu1 %v10389_v31  ;;  %8482 = vmatprep.mubr.msk.bf16.mxu1 %vm9431_vm11, %v9429_v27 }
0x2b66   :  { %8492 = vmatprep.subr.bf16.mxu1 %v9429_v27 }
0x2c14   :  { %v5280_v10 = vpop.f32.mrf.mxu0 }
0x2c16   :  { %v8466_v34 = vpop.f32.mrf.mxu0 }
0x2c18   :  { %v5283_v36 = vpop.f32.mrf.mxu0 }
0x2c1a   :  { %v8467_v2 = vpop.f32.mrf.mxu0 }
0x2c1c   :  { %v5237_v51 = vpop.f32.mrf.mxu1 }
0x2c1d   :  { %v11097_v45 = vadd.f32 %v5280_v10, %v5237_v51 }
0x2c1e   :  { %v8460_v24 = vpop.f32.mrf.mxu1 }
0x2c20   :  { %v5240_v1 = vpop.f32.mrf.mxu1 }
0x2c22   :  { %v8461_v33 = vpop.f32.mrf.mxu1 }
0x2c24   :  { %v5330_v26 = vpop.f32.mrf.mxu1 }
0x2c25   :  { %v5336_v53 = vmul.f32 0.35355338, %v5330_v26 }
0x2c26   :  { %v8472_v5 = vpop.f32.mrf.mxu1 }
0x2c27   :  { %v5337_v31 = vadd.f32 %v5336_v53, %v11056_v48 }
0x2c28   :  { %v5333_v52 = vpop.f32.mrf.mxu1 }
0x2c29   :  { %v5338_v35 = vsel %vm2160_vm14, %v5337_v31, -inf }
0x2c2a   :  { %5339 = vmax.xlane.f32.xlu1 %v5338_v35  ;;  %v8473_v13 = vpop.f32.mrf.mxu1 }
0x2c3b   :  { %5445 = vrot.lane.b32.xlu1 %v11033_v25, %s9437_s4 }
0x2c3f   :  { %5443 = vrot.lane.b32.xlu1 %v11033_v25, %s9438_s10 }
0x2cb3   :  { %v5340_v9 = vpop.xlane.xlu1 %5339 }
0x2cb4   :  { %v5341_v44 = vsub.f32 %v5337_v31, %v5340_v9 }
0x2cb6   :  { %v5342_v63 = vmul.f32 1.442695, %v5341_v44 }
0x2cb7   :  { %v5446_v10 = vpop.permute.xlu1 %5445 }
0x2cb8   :  { %8929 = vpow2.f32 %v5342_v63  ;;  %v5451_v36 = vsel %vm2160_vm14, %v5446_v10, 0  ;;  %v5801_v10 = vld [vmem:[%s11593_s8 + $0x8] sm:$0xff] }
0x2cbb   :  { %v5444_v2 = vpop.permute.xlu1 %5443 }
0x2cc5   :  { %v8930_v60 = vpop.eup %8929 }
0x2cc6   :  { %v5344_v4 = vsel %vm2160_vm14, %v8930_v60, 0.0 }
0x2cc7   :  { %5345 = vadd.xlane.f32.xlu0 %v5344_v4 }
0x2cdd   :  { %5350 = vrot.lane.b32.xlu0 %v11033_v25, %s9439_s24 }
0x2d50   :  { %v5346_v39 = vpop.xlane.xlu0 %5345 }
0x2d51   :  { %8931 = vrcp.f32 %v5346_v39 }
0x2d54   :  { %v5351_v6 = vpop.permute.xlu0 %5350 }
0x2d55   :  { %v5356_v41 = vsel %vm2230_vm2, %v5351_v6, 0 }
0x2d56   :  { %8475 = vmatpush3.bf16.msra.mxu0 %v5356_v41 }
0x2d57   :  { %8486 = vmatprep.subr.bf16.mxu0 %v9429_v27 }
0x2d5e   :  { %v8932_v23 = vpop.eup %8931 }
0x2d5f   :  { %v5348_v58 = vmul.f32 %v8932_v23, %v8930_v60 }
0x2d61   :  { %v5349_v34 = vpack.c.bf16 %v5348_v58, %v5348_v58  ;;  %v5799_v58 = vld [vmem:[#allocation2 + $0x18] sm:$0xff] }
0x2d63   :  { %8477 = vmatmul.mubr.msk.bf16.vlgmr.msra.gmra.mxu0 %vm2160_vm14, %v5349_v34  ;;  %v11130_v34 = vadd.f32 %v5801_v10, %v5799_v58  ;;  %v5641_v10 = vld [vmem:[%s11591_s17 + $0x18] sm:$0xff] }
0x2d64   :  { %8487 = vmatpush3.bf16.xpose.msra.mxu0 %v5451_v36  ;;  %8488 = vmatprep.mubr.msk.bf16.mxu0 %vm9431_vm11, %v9429_v27 }
0x2d65   :  { %8498 = vmatprep.subr.bf16.mxu0 %v9429_v27  ;;  %v5809_v36 = vsel %vm2067_vm0, %v11130_v34, 0.0 }
0x2d6b   :  { %8489 = vmatmul.mubr.msk.bf16.vlgmr.msra.gmra.mxu0 %vm2160_vm14, %v5444_v2 }
0x2d6c   :  { %8499 = vmatpush3.bf16.msra.mxu0 %v10438_v19  ;;  %8500 = vmatprep.mubr.msk.bf16.mxu0 %vm9431_vm11, %v9429_v27 }
0x2d6d   :  { %8512 = vmatprep.subr.bf16.mxu0 %v9429_v27 }
0x2e23   :  { %v5392_v51 = vpop.f32.mrf.mxu0 }
0x2e24   :  { %v5398_v24 = vpack.c.bf16 %v5392_v51, %v5392_v51 }
0x2e25   :  { %v8478_v1 = vpop.f32.mrf.mxu0 }
0x2e26   :  { %8483 = vmatmul.mubr.msk.bf16.vlgmr.msra.gmra.mxu1 %vm2160_vm14, %v5398_v24 }
0x2e27   :  { %v5395_v33 = vpop.f32.mrf.mxu0  ;;  %8494 = vmatprep.mubr.msk.bf16.mxu1 %vm9431_vm11, %v9429_v27 }
0x2e29   :  { %v8479_v26 = vpop.f32.mrf.mxu0 }
0x2e2b   :  { %v5487_v53 = vpop.f32.mrf.mxu0 }
0x2e2c   :  { %v5493_v5 = vmul.f32 0.35355338, %v5487_v53 }
0x2e2d   :  { %v8490_v31 = vpop.f32.mrf.mxu0 }
0x2e2e   :  { %v5494_v19 = vadd.f32 %v5493_v5, %v11056_v48 }
0x2e2f   :  { %v5490_v52 = vpop.f32.mrf.mxu0 }
0x2e30   :  { %v5495_v35 = vsel %vm2160_vm14, %v5494_v19, -inf }
0x2e31   :  { %5496 = vmax.xlane.f32.xlu1 %v5495_v35  ;;  %v8491_v13 = vpop.f32.mrf.mxu0 }
0x2e32   :  { %v7796_v13 = vld [vmem:[#allocation12] ss:$0 sm:$0xff] }
0x2eba   :  { %v5497_v9 = vpop.xlane.xlu1 %5496 }
0x2ebb   :  { %v5498_v44 = vsub.f32 %v5494_v19, %v5497_v9 }
0x2ebd   :  { %v5499_v63 = vmul.f32 1.442695, %v5498_v44 }
0x2ebf   :  { %8933 = vpow2.f32 %v5499_v63 }
0x2ecc   :  { %v8934_v60 = vpop.eup %8933 }
0x2ecd   :  { %v5501_v4 = vsel %vm2160_vm14, %v8934_v60, 0.0 }
0x2ece   :  { %5502 = vadd.xlane.f32.xlu0 %v5501_v4 }
0x2ee4   :  { %5507 = vrot.lane.b32.xlu0 %v11033_v25, %s9440_s14 }
0x2ee6   :  { %v5436_v39 = vpop.f32.mrf.mxu1 }
0x2ee7   :  { %v5442_v48 = vadd.f32 %v5436_v39, %v11097_v45 }
0x2ee8   :  { %v8484_v6 = vpop.f32.mrf.mxu1 }
0x2eea   :  { %v5439_v41 = vpop.f32.mrf.mxu1 }
0x2eec   :  { %v8485_v23 = vpop.f32.mrf.mxu1 }
0x2f03   :  { %5810 = vadd.xlane.f32.xlu0 %v5809_v36  ;;  %v5638_v36 = vld [vmem:[%s11591_s17] sm:$0xff] }
0x2f57   :  { %v5503_v2 = vpop.xlane.xlu0 %5502 }
0x2f58   :  { %8935 = vrcp.f32 %v5503_v2 }
0x2f5b   :  { %v5508_v51 = vpop.permute.xlu0 %5507 }
0x2f5c   :  { %v5513_v24 = vsel %vm2230_vm2, %v5508_v51, 0  ;;  %v5639_v51 = vld [vmem:[%s11591_s17 + $0x8] sm:$0xff] }
0x2f5d   :  { %8493 = vmatpush3.bf16.msra.mxu1 %v5513_v24 }
0x2f5e   :  { %8504 = vmatprep.subr.bf16.mxu1 %v9429_v27 }
0x2f65   :  { %v8936_v25 = vpop.eup %8935 }
0x2f66   :  { %v5505_v45 = vmul.f32 %v8936_v25, %v8934_v60 }
0x2f68   :  { %v5506_v1 = vpack.c.bf16 %v5505_v45, %v5505_v45 }
0x2f6a   :  { %8495 = vmatmul.mubr.msk.bf16.vlgmr.msra.gmra.mxu1 %vm2160_vm14, %v5506_v1 }
0x2f6b   :  { %8508 = vmatprep.mubr.msk.bf16.mxu1 %vm9431_vm11, %v9429_v27 }
0x302a   :  { %v5549_v33 = vpop.f32.mrf.mxu1 }
0x302b   :  { %v5555_v26 = vpack.c.bf16 %v5549_v33, %v5549_v33  ;;  %v7797_v33 = vld [vmem:[#allocation14] ss:$0 sm:$0xff] }
0x302c   :  { %v8496_v53 = vpop.f32.mrf.mxu1 }
0x302d   :  { %8501 = vmatmul.mubr.msk.bf16.vlgmr.msra.gmra.mxu0 %vm2160_vm14, %v5555_v26  ;;  %v7798_v53 = vld [vmem:[#allocation15] ss:$0 sm:$0xff] }
0x302e   :  { %v5552_v5 = vpop.f32.mrf.mxu1  ;;  %8520 = vmatprep.mubr.msk.bf16.mxu0 %vm9431_vm11, %v9429_v27 }
0x3030   :  { %v8497_v31 = vpop.f32.mrf.mxu1 }
0x30ed   :  { %v5593_v19 = vpop.f32.mrf.mxu0 }
0x30ee   :  { %v5599_v52 = vadd.f32 %v5593_v19, %v5442_v48  ;;  %v5640_v48 = vld [vmem:[%s11591_s17 + $0x10] sm:$0xff] }
0x30ef   :  { %v8502_v35 = vpop.f32.mrf.mxu0  ;;  %v5644_v2 = vpack.c.bf16 %v5641_v10, %v5640_v48 }
0x30f0   :  { %v5600_v9 = vadd.f32 %v5599_v52, %v11025_v59  ;;  %v5643_v59 = vpack.c.bf16 %v5639_v51, %v5638_v36  ;;  %v5710_v52 = vld [vmem:[%s11592_s11 + $0x30] sm:$0xff]  ;;  %v5711_v35 = vld [vmem:[%s11592_s11 + $0x38] sm:$0xff] }
0x30f1   :  { %v5596_v44 = vpop.f32.mrf.mxu0  ;;  %8505 = vmatpush3.bf16.msra.mxu1 %v5644_v2 }
0x30f2   :  { %v5608_v63 = vadd.f32 %v7796_v13, %v5600_v9  ;;  %8506 = vmatprep.subr.bf16.mxu1 %v9429_v27  ;;  %v5708_v13 = vld [vmem:[%s11592_s11 + $0x20] sm:$0xff]  ;;  %v5716_v9 = vpack.c.bf16 %v5711_v35, %v5710_v52  ;;  %v5709_v44 = vld [vmem:[%s11592_s11 + $0x28] sm:$0xff]  ;;  %v7801_v52 = vld [vmem:[#allocation18] ss:$0 sm:$0xff] }
0x30f3   :  { %v8503_v60 = vpop.f32.mrf.mxu0 }
0x30f4   :  { %v5611_v4 = vsel %vm2067_vm0, %v5608_v63, 0.0  ;;  %8513 = vmatpush3.bf16.msra.mxu0 %v5716_v9  ;;  %v5706_v60 = vld [vmem:[%s11592_s11 + $0x10] sm:$0xff] }
0x30f5   :  { %5612 = vadd.xlane.f32.xlu1 %v5611_v4  ;;  %8507 = vmatpush3.bf16.msra.mxu1 %v5643_v59  ;;  %v5707_v4 = vld [vmem:[%s11592_s11 + $0x18] sm:$0xff] }
0x30f6   :  { %8514 = vmatprep.subr.bf16.mxu0 %v9429_v27 }
0x317e   :  { %v5613_v39 = vpop.xlane.xlu1 %5612 }
0x317f   :  { %v5614_v6 = vmul.f32 0.03125, %v5613_v39  ;;  %v5714_v39 = vpack.c.bf16 %v5707_v4, %v5706_v60 }
0x3181   :  { %v5615_v41 = vsub.f32 %v5608_v63, %v5614_v6  ;;  %v5715_v63 = vpack.c.bf16 %v5709_v44, %v5708_v13  ;;  %v5704_v6 = vld [vmem:[%s11592_s11] sm:$0xff] }
0x3183   :  { %v5616_v23 = vmul.f32 %v5615_v41, %v5615_v41  ;;  %8515 = vmatpush3.bf16.msra.mxu0 %v5715_v63 }
0x3184   :  { %8516 = vmatprep.subr.bf16.mxu0 %v9429_v27 }
0x3185   :  { %v5617_v58 = vsel %vm2067_vm0, %v5616_v23, 0.0 }
0x3186   :  { %5618 = vadd.xlane.f32.xlu1 %v5617_v58  ;;  %v7799_v58 = vld [vmem:[#allocation17] ss:$0 sm:$0xff] }
0x3187   :  { %8517 = vmatpush3.bf16.msra.mxu0 %v5714_v39 }
0x3188   :  { %8518 = vmatprep.subr.bf16.mxu0 %v9429_v27 }
0x320f   :  { %v5619_v24 = vpop.xlane.xlu1 %5618 }
0x3210   :  { %v5620_v25 = vmul.f32 0.03125, %v5619_v24 }
0x3212   :  { %v5621_v45 = vadd.f32 1e-12, %v5620_v25 }
0x3214   :  { %8937 = vrsqrt.f32 %v5621_v45 }
0x3221   :  { %v8938_v1 = vpop.eup %8937 }
0x3222   :  { %v5623_v26 = vmul.f32 %v8938_v1, %v5615_v41  ;;  %v5705_v41 = vld [vmem:[%s11592_s11 + $0x8] sm:$0xff] }
0x3223   :  { %v5713_v23 = vpack.c.bf16 %v5705_v41, %v5704_v6 }
0x3224   :  { %v5630_v5 = vmul.f32 %v7797_v33, %v5623_v26 }
0x3225   :  { %8519 = vmatpush3.bf16.msra.mxu0 %v5713_v23 }
0x3226   :  { %v5637_v31 = vadd.f32 %v7798_v53, %v5630_v5 }
0x3228   :  { %v5642_v19 = vpack.c.bf16 %v5637_v31, %v5637_v31 }
0x322a   :  { %8509 = vmatmul.mubr.msk.bf16.vlgmr.msra.gmra.mxu1 %vm2067_vm0, %v5642_v19 }
0x322b   :  { %5956 = vmatprep.mubr.bf16.mxu1 %v9425_v0 }
0x32ea   :  { %v5689_v48 = vpop.f32.mrf.mxu1 }
0x32eb   :  { %v5690_v10 = vadd.f32 %v7799_v58, %v5689_v48 }
0x32ec   :  { %v8510_v36 = vpop.f32.mrf.mxu1 }
0x32ed   :  { %v5695_v2 = vmul.f32 %v5690_v10, %v5690_v10 }
0x32ee   :  { %v5692_v51 = vpop.f32.mrf.mxu1 }
0x32ef   :  { %v5696_v59 = vmul.f32 %v5695_v2, %v5690_v10  ;;  %v7803_v51 = vld [vmem:[#allocation20] ss:$0 sm:$0xff] }
0x32f0   :  { %v8511_v24 = vpop.f32.mrf.mxu1 }
0x32f1   :  { %v5697_v25 = vmul.f32 0.044715, %v5696_v59  ;;  %v7804_v59 = vld [vmem:[#allocation21] ss:$0 sm:$0xff] }
0x32f3   :  { %v5698_v45 = vadd.f32 %v5697_v25, %v5690_v10 }
0x32f5   :  { %v5699_v1 = vmul.f32 0.7978846, %v5698_v45  ;;  %v5800_v45 = vld [vmem:[%s11593_s8] sm:$0xff] }
0x32f7   :  { %8939 = vtanh.f32 %v5699_v1 }
0x3304   :  { %v8940_v33 = vpop.eup %8939 }
0x3305   :  { %v5701_v26 = vadd.f32 1.0, %v8940_v33 }
0x3307   :  { %v5702_v53 = vmul.f32 0.5, %v5701_v26 }
0x3309   :  { %v5703_v5 = vmul.f32 %v5702_v53, %v5690_v10  ;;  %v5811_v53 = vpop.xlane.xlu0 %5810 }
0x330b   :  { %v5712_v19 = vpack.c.bf16 %v5703_v5, %v5703_v5  ;;  %v5813_v5 = vmul.f32 0.03125, %v5811_v53  ;;  %v5852_v53 = vld [vmem:[%s11594_s15 + $0x20] sm:$0xff] }
0x330d   :  { %8521 = vmatmul.mubr.msk.bf16.vlgmr.msra.gmra.mxu0 %vm2928_vm15, %v5712_v19 }
0x330e   :  { %6042 = vmatprep.mubr.bf16.mxu0 %v9425_v0 }
0x33cd   :  { %v5761_v35 = vpop.f32.mrf.mxu0 }
0x33ce   :  { %v5762_v13 = vadd.f32 %v7801_v52, %v5761_v35  ;;  %v5815_v35 = vsub.f32 %v11130_v34, %v5813_v5  ;;  %v5889_v34 = vld [vmem:[%s11594_s15 + $0x148] sm:$0xff] }
0x33cf   :  { %v8522_v9 = vpop.f32.mrf.mxu0 }
0x33d0   :  { %v5767_v44 = vadd.f32 %v5762_v13, %v5637_v31 }
0x33d1   :  { %v5764_v63 = vpop.f32.mrf.mxu0 }
0x33d2   :  { %v5770_v60 = vsel %vm2067_vm0, %v5767_v44, 0.0  ;;  %v5817_v63 = vmul.f32 %v5815_v35, %v5815_v35 }
0x33d3   :  { %5771 = vadd.xlane.f32.xlu1 %v5770_v60  ;;  %v8523_v4 = vpop.f32.mrf.mxu0 }
0x33d4   :  { %v5821_v60 = vsel %vm2067_vm0, %v5817_v63, 0.0  ;;  %v5873_v4 = vld [vmem:[%s11594_s15 + $0xc8] sm:$0xff] }
0x33d5   :  { %v5881_v63 = vld [vmem:[%s11594_s15 + $0x108] sm:$0xff] }
0x345c   :  { %v5772_v39 = vpop.xlane.xlu1 %5771 }
0x345d   :  { %v5773_v6 = vmul.f32 0.03125, %v5772_v39  ;;  %v5885_v39 = vld [vmem:[%s11594_s15 + $0x128] sm:$0xff] }
0x345f   :  { %v5774_v41 = vsub.f32 %v5767_v44, %v5773_v6  ;;  %v5877_v6 = vld [vmem:[%s11594_s15 + $0xe8] sm:$0xff] }
0x3461   :  { %v5775_v23 = vmul.f32 %v5774_v41, %v5774_v41 }
0x3463   :  { %v5776_v58 = vsel %vm2067_vm0, %v5775_v23, 0.0  ;;  %v5872_v23 = vld [vmem:[%s11594_s15 + $0xc0] sm:$0xff] }
0x3464   :  { %5777 = vadd.xlane.f32.xlu1 %v5776_v58  ;;  %v5884_v58 = vld [vmem:[%s11594_s15 + $0x120] sm:$0xff] }
0x34ed   :  { %v5778_v48 = vpop.xlane.xlu1 %5777 }
0x34ee   :  { %v5779_v10 = vmul.f32 0.03125, %v5778_v48  ;;  %v5914_v48 = vpack.c.bf16 %v5889_v34, %v5877_v6 }
0x34f0   :  { %v5780_v36 = vadd.f32 1e-12, %v5779_v10  ;;  %v5909_v10 = vpack.c.bf16 %v5884_v58, %v5872_v23  ;;  %6022 = vmatprep.subr.bf16.mxu0 %v5914_v48 }
0x34f2   :  { %8941 = vrsqrt.f32 %v5780_v36  ;;  %v5876_v36 = vld [vmem:[%s11594_s15 + $0xe0] sm:$0xff] }
0x34ff   :  { %v8942_v2 = vpop.eup %8941 }
0x3500   :  { %v5782_v31 = vmul.f32 %v8942_v2, %v5774_v41  ;;  %v5910_v41 = vpack.c.bf16 %v5885_v39, %v5873_v4  ;;  %v5888_v2 = vld [vmem:[%s11594_s15 + $0x140] sm:$0xff]  ;;  %v5893_v4 = vld [vmem:[%s11594_s15 + $0x168] sm:$0xff] }
0x3501   :  { %v5918_v39 = vpack.c.bf16 %v5893_v4, %v5881_v63  ;;  %v5850_v63 = vld [vmem:[%s11594_s15 + $0x10] sm:$0xff] }
0x3502   :  { %v5789_v24 = vmul.f32 %v7803_v51, %v5782_v31  ;;  %v5849_v51 = vld [vmem:[%s11594_s15 + $0x8] sm:$0xff]  ;;  %5936 = vmatprep.subr.bf16.mxu1 %v5910_v41  ;;  %v5913_v31 = vpack.c.bf16 %v5888_v2, %v5876_v36  ;;  %v7805_v2 = vld [vmem:[#allocation23] ss:$0 sm:$0xff] }
0x3503   :  { %5937 = vmatpush1.bf16.msra.mxu1 %v5909_v10 }
0x3504   :  { %v5796_v25 = vadd.f32 %v7804_v59, %v5789_v24  ;;  %v5861_v59 = vld [vmem:[%s11594_s15 + $0x68] sm:$0xff]  ;;  %6023 = vmatpush1.bf16.msra.mxu0 %v5913_v31 }
0x3505   :  { %v5853_v24 = vld [vmem:[%s11594_s15 + $0x28] sm:$0xff] }
0x3506   :  { %5797 = vst.msk [vmem:[#allocation2 + $0x10] sm:$0xff] %vm2067_vm0, %v5796_v25  ;;  %v5865_v25 = vld [vmem:[%s11594_s15 + $0x88] sm:$0xff] }
0x350d   :  { %v5798_v1 = vld [vmem:[#allocation2 + $0x10] sm:$0xff] }
0x350e   :  { %v5802_v33 = vadd.f32 %v5800_v45, %v5798_v1  ;;  %v5898_v45 = vpack.c.bf16 %v5861_v59, %v5849_v51  ;;  %v5902_v1 = vpack.c.bf16 %v5865_v25, %v5853_v24  ;;  %v7806_v24 = vld [vmem:[#allocation24] ss:$0 sm:$0xff]  ;;  %v5874_v25 = vld [vmem:[%s11594_s15 + $0xd0] sm:$0xff] }
0x3510   :  { %v5806_v26 = vsel %vm2067_vm0, %v5802_v33, 0.0  ;;  %5938 = vmatprep.subr.bf16.mxu1 %v5898_v45  ;;  %6024 = vmatprep.subr.bf16.mxu0 %v5902_v1  ;;  %v5886_v45 = vld [vmem:[%s11594_s15 + $0x130] sm:$0xff] }
0x3511   :  { %5807 = vadd.xlane.f32.xlu1 %v5806_v26  ;;  %v5860_v26 = vld [vmem:[%s11594_s15 + $0x60] sm:$0xff] }
0x359a   :  { %v5808_v19 = vpop.xlane.xlu1 %5807 }
0x359b   :  { %v5812_v52 = vmul.f32 0.03125, %v5808_v19  ;;  %v5864_v19 = vld [vmem:[%s11594_s15 + $0x80] sm:$0xff] }
0x359d   :  { %v5814_v13 = vsub.f32 %v5802_v33, %v5812_v52  ;;  %v5848_v33 = vld [vmem:[%s11594_s15] sm:$0xff]  ;;  %v5901_v52 = vpack.c.bf16 %v5864_v19, %v5852_v53  ;;  %v5851_v53 = vld [vmem:[%s11594_s15 + $0x18] sm:$0xff]  ;;  %v5857_v19 = vld [vmem:[%s11594_s15 + $0x48] sm:$0xff] }
0x359e   :  { %v5897_v5 = vpack.c.bf16 %v5860_v26, %v5848_v33  ;;  %v5880_v33 = vld [vmem:[%s11594_s15 + $0x100] sm:$0xff] }
0x359f   :  { %v5816_v9 = vmul.f32 %v5814_v13, %v5814_v13  ;;  %6025 = vmatpush1.bf16.msra.mxu0 %v5901_v52  ;;  %v5892_v26 = vld [vmem:[%s11594_s15 + $0x160] sm:$0xff] }
0x35a0   :  { %5939 = vmatpush1.bf16.msra.mxu1 %v5897_v5  ;;  %6108 = vmatprep.subr.bf16.mxu0 %v5918_v39  ;;  %v5863_v5 = vld [vmem:[%s11594_s15 + $0x78] sm:$0xff] }
0x35a1   :  { %v5818_v44 = vsel %vm2067_vm0, %v5816_v9, 0.0  ;;  %v5875_v9 = vld [vmem:[%s11594_s15 + $0xd8] sm:$0xff]  ;;  %v5900_v4 = vpack.c.bf16 %v5863_v5, %v5851_v53 }
0x35a2   :  { %5819 = vadd.xlane.f32.xlu1 %v5818_v44  ;;  %v5887_v44 = vld [vmem:[%s11594_s15 + $0x138] sm:$0xff] }
0x35a6   :  { %5822 = vadd.xlane.f32.xlu1 %v5821_v60  ;;  %v5912_v60 = vpack.c.bf16 %v5887_v44, %v5875_v9  ;;  %v5917_v44 = vpack.c.bf16 %v5892_v26, %v5880_v33  ;;  %v5883_v33 = vld [vmem:[%s11594_s15 + $0x118] sm:$0xff] }
0x35a7   :  { %v5895_v26 = vld [vmem:[%s11594_s15 + $0x178] sm:$0xff] }
0x35a8   :  { %5979 = vmatprep.subr.bf16.mxu1 %v5912_v60  ;;  %v5920_v5 = vpack.c.bf16 %v5895_v26, %v5883_v33 }
0x362b   :  { %v5820_v6 = vpop.xlane.xlu1 %5819 }
0x362c   :  { %v5824_v41 = vmul.f32 0.03125, %v5820_v6  ;;  %v5862_v6 = vld [vmem:[%s11594_s15 + $0x70] sm:$0xff] }
0x362e   :  { %v5826_v34 = vadd.f32 1e-06, %v5824_v41  ;;  %v5856_v41 = vld [vmem:[%s11594_s15 + $0x40] sm:$0xff] }
0x362f   :  { %v5823_v23 = vpop.xlane.xlu1 %5822 }
0x3630   :  { %8943 = vrsqrt.f32 %v5826_v34  ;;  %v5825_v58 = vmul.f32 0.03125, %v5823_v23  ;;  %v5868_v34 = vld [vmem:[%s11594_s15 + $0xa0] sm:$0xff]  ;;  %v5879_v23 = vld [vmem:[%s11594_s15 + $0xf8] sm:$0xff] }
0x3632   :  { %v5827_v48 = vadd.f32 1e-06, %v5825_v58  ;;  %v5891_v58 = vld [vmem:[%s11594_s15 + $0x158] sm:$0xff] }
0x3634   :  { %8945 = vrsqrt.f32 %v5827_v48  ;;  %v5899_v48 = vpack.c.bf16 %v5862_v6, %v5850_v63  ;;  %v5870_v6 = vld [vmem:[%s11594_s15 + $0xb0] sm:$0xff] }
0x363d   :  { %v8944_v10 = vpop.eup %8943 }
0x363e   :  { %v5830_v36 = vmul.f32 %v8944_v10, %v5814_v13  ;;  %v5869_v13 = vld [vmem:[%s11594_s15 + $0xa8] sm:$0xff]  ;;  %v5905_v10 = vpack.c.bf16 %v5868_v34, %v5856_v41 }
0x363f   :  { %v5906_v39 = vpack.c.bf16 %v5869_v13, %v5857_v19  ;;  %v5882_v19 = vld [vmem:[%s11594_s15 + $0x110] sm:$0xff] }
0x3640   :  { %v5838_v31 = vmul.f32 %v7805_v2, %v5830_v36  ;;  %v5916_v36 = vpack.c.bf16 %v5891_v58, %v5879_v23  ;;  %v5894_v13 = vld [vmem:[%s11594_s15 + $0x170] sm:$0xff] }
0x3641   :  { %v8946_v51 = vpop.eup %8945  ;;  %v5919_v63 = vpack.c.bf16 %v5894_v13, %v5882_v19 }
0x3642   :  { %v5831_v59 = vmul.f32 %v8946_v51, %v5815_v35  ;;  %v11201_v52 = vadd.f32 %v7806_v24, %v5838_v31  ;;  %v5911_v35 = vpack.c.bf16 %v5886_v45, %v5874_v25  ;;  %v5890_v51 = vld [vmem:[%s11594_s15 + $0x150] sm:$0xff]  ;;  %v5855_v31 = vld [vmem:[%s11594_s15 + $0x38] sm:$0xff] }
0x3643   :  { %v5854_v45 = vld [vmem:[%s11594_s15 + $0x30] sm:$0xff] }
0x3644   :  { %v5839_v1 = vmul.f32 %v7805_v2, %v5831_v59  ;;  %v5878_v2 = vld [vmem:[%s11594_s15 + $0xf0] sm:$0xff]  ;;  %v5867_v59 = vld [vmem:[%s11594_s15 + $0x98] sm:$0xff] }
0x3645   :  { %v5904_v25 = vpack.c.bf16 %v5867_v59, %v5855_v31 }
0x3646   :  { %v11203_v9 = vadd.f32 %v7806_v24, %v5839_v1  ;;  %v5915_v24 = vpack.c.bf16 %v5890_v51, %v5878_v2  ;;  %v5866_v1 = vld [vmem:[%s11594_s15 + $0x90] sm:$0xff] }
0x3647   :  { %v5903_v53 = vpack.c.bf16 %v5866_v1, %v5854_v45 }
0x3648   :  { %v5896_v60 = vpack.c.bf16 %v11203_v9, %v11201_v52 }
0x364a   :  { %7807 = vmatmul.mubr.msk.bf16.vlgmr.msra.gmra.mxu1 %vm2067_vm0, %v5896_v60  ;;  %7809 = vmatmul.mubr.msk.bf16.vlgmr.msra.gmra.mxu0 %vm2067_vm0, %v5896_v60 }
0x364b   :  { %5980 = vmatpush1.bf16.msra.mxu1 %v5911_v35  ;;  %6109 = vmatpush1.bf16.msra.mxu0 %v5917_v44  ;;  %v5859_v35 = vld [vmem:[%s11594_s15 + $0x58] sm:$0xff] }
0x364c   :  { %5981 = vmatprep.subr.bf16.mxu1 %v5900_v4  ;;  %6110 = vmatprep.subr.bf16.mxu0 %v5906_v39  ;;  %v5871_v44 = vld [vmem:[%s11594_s15 + $0xb8] sm:$0xff]  ;;  %v5858_v39 = vld [vmem:[%s11594_s15 + $0x50] sm:$0xff] }
0x364d   :  { %5999 = vmatprep.mubr.bf16.mxu1 %v9425_v0  ;;  %6128 = vmatprep.mubr.bf16.mxu0 %v9425_v0  ;;  %v5908_v4 = vpack.c.bf16 %v5871_v44, %v5859_v35  ;;  %v5907_v41 = vpack.c.bf16 %v5870_v6, %v5858_v39 }
0x364f   :  { %5982 = vmatpush1.bf16.msra.mxu1 %v5899_v48  ;;  %6111 = vmatpush1.bf16.msra.mxu0 %v5905_v10 }
0x3650   :  { %6065 = vmatprep.subr.bf16.mxu1 %v5916_v36  ;;  %8524 = vmatprep.subr.bf16.mxu0 %v9429_v27 }
0x3652   :  { %7808 = vmatmul.mubr.msk.bf16.vlgmr.msra.gmra.mxu1 %vm2067_vm0, %v5896_v60  ;;  %7811 = vmatmul.mubr.msk.bf16.vlgmr.msra.gmra.mxu0 %vm2067_vm0, %v5896_v60 }
0x3653   :  { %6066 = vmatpush1.bf16.msra.mxu1 %v5915_v24  ;;  %6085 = vmatprep.mubr.bf16.mxu1 %v9425_v0 }
0x3654   :  { %6067 = vmatprep.subr.bf16.mxu1 %v5904_v25  ;;  %8526 = vmatprep.mubr.msk.bf16.mxu0 %vm9431_vm11, %v9429_v27 }
0x3657   :  { %6068 = vmatpush1.bf16.msra.mxu1 %v5903_v53 }
0x3658   :  { %6151 = vmatprep.subr.bf16.mxu1 %v5920_v5 }
0x365a   :  { %7810 = vmatmul.mubr.msk.bf16.vlgmr.msra.gmra.mxu1 %vm2067_vm0, %v5896_v60 }
0x365b   :  { %6152 = vmatpush1.bf16.msra.mxu1 %v5919_v63  ;;  %6171 = vmatprep.mubr.bf16.mxu1 %v9425_v0 }
0x365c   :  { %6153 = vmatprep.subr.bf16.mxu1 %v5908_v4 }
0x365f   :  { %6154 = vmatpush1.bf16.msra.mxu1 %v5907_v41 }
0x3660   :  { %8530 = vmatprep.subr.bf16.mxu1 %v9429_v27 }
0x3662   :  { %7812 = vmatmul.mubr.msk.bf16.vlgmr.msra.gmra.mxu1 %vm2067_vm0, %v5896_v60 }
0x3663   :  { %8532 = vmatprep.mubr.msk.bf16.mxu1 %vm9431_vm11, %v9429_v27 }
0x370a   :  { %v5958_v34 = vpop.f32.mrf.mxu1  ;;  %v6044_v23 = vpop.f32.mrf.mxu0 }
0x370c   :  { %v5960_v58 = vpop.f32.mrf.mxu1  ;;  %v6046_v48 = vpop.f32.mrf.mxu0 }
0x370e   :  { %v5962_v10 = vpop.f32.mrf.mxu1  ;;  %v6048_v36 = vpop.f32.mrf.mxu0 }
0x370f   :  { %v6183_v2 = vpack.c.bf16 %v6048_v36, %v6044_v23  ;;  %v6182_v45 = vpack.c.bf16 %v5962_v10, %v5958_v34 }
0x3710   :  { %v5964_v51 = vpop.f32.mrf.mxu1  ;;  %v6050_v31 = vpop.f32.mrf.mxu0 }
0x3711   :  { %v6188_v0 = vsel %vm2928_vm15, %v6183_v2, 0  ;;  %v11244_v59 = vpack.c.bf16 %v5964_v51, %v5960_v58  ;;  %v11246_v24 = vpack.c.bf16 %v6050_v31, %v6046_v48  ;;  %6306 = vrot.lane.b32.xlu1 %v6183_v2, %s9426_s16 }
0x3712   :  { %v6001_v60 = vpop.f32.mrf.mxu1  ;;  %v6130_v25 = vpop.f32.mrf.mxu0  ;;  %8525 = vmatpush3.bf16.xpose.msra.mxu0 %v6188_v0 }
0x3713   :  { %8536 = vmatprep.subr.bf16.mxu0 %v9429_v27 }
0x3714   :  { %v6003_v1 = vpop.f32.mrf.mxu1  ;;  %v11250_v33 = vpop.f32.mrf.mxu0 }
0x3715   :  { %6303 = vrot.lane.b32.xlu1 %v6182_v45, %s9426_s16 }
0x3716   :  { %v6005_v26 = vpop.f32.mrf.mxu1  ;;  %v6134_v53 = vpop.f32.mrf.mxu0 }
0x3717   :  { %v11253_v5 = vpack.c.bf16 %v6005_v26, %v6001_v60  ;;  %v11255_v19 = vpack.c.bf16 %v6134_v53, %v6130_v25 }
0x3718   :  { %v6007_v13 = vpop.f32.mrf.mxu1  ;;  %v11285_v51 = vpop.f32.mrf.mxu0 }
0x3719   :  { %v11257_v35 = vpack.c.bf16 %v6007_v13, %v6003_v1  ;;  %8527 = vmatmul.mubr.msk.bf16.vlgmr.msra.gmra.mxu0 %vm2928_vm15, %v6182_v45  ;;  %8531 = vmatpush3.bf16.msra.mxu1 %v11255_v19 }
0x371a   :  { %v6087_v44 = vpop.f32.mrf.mxu1  ;;  %8538 = vmatprep.mubr.msk.bf16.mxu0 %vm9431_vm11, %v9429_v27  ;;  %8542 = vmatprep.subr.bf16.mxu1 %v9429_v27 }
0x371c   :  { %v6089_v63 = vpop.f32.mrf.mxu1 }
0x371e   :  { %v6091_v4 = vpop.f32.mrf.mxu1 }
0x371f   :  { %v11264_v39 = vpack.c.bf16 %v6091_v4, %v6087_v44 }
0x3720   :  { %v6093_v6 = vpop.f32.mrf.mxu1 }
0x3721   :  { %v11266_v41 = vpack.c.bf16 %v6093_v6, %v6089_v63 }
0x3722   :  { %v6173_v34 = vpop.f32.mrf.mxu1 }
0x3724   :  { %v11268_v23 = vpop.f32.mrf.mxu1 }
0x3726   :  { %v6177_v58 = vpop.f32.mrf.mxu1 }
0x3727   :  { %v11270_v48 = vpack.c.bf16 %v6177_v58, %v6173_v34 }
0x3783   :  { %v6307_v10 = vpop.permute.xlu1 %6306 }
0x3784   :  { %v6312_v36 = vsel %vm2928_vm15, %v6307_v10, 0 }
0x3785   :  { %8537 = vmatpush3.bf16.xpose.msra.mxu0 %v6312_v36 }
0x3786   :  { %8548 = vmatprep.subr.bf16.mxu0 %v9429_v27 }
0x3787   :  { %v6304_v2 = vpop.permute.xlu1 %6303 }
0x378c   :  { %8539 = vmatmul.mubr.msk.bf16.vlgmr.msra.gmra.mxu0 %vm2928_vm15, %v6304_v2 }
0x378d   :  { %8549 = vmatpush3.bf16.msra.mxu0 %v10632_v55  ;;  %8556 = vmatprep.mubr.msk.bf16.mxu0 %vm9431_vm11, %v9429_v27 }
0x378e   :  { %8550 = vmatprep.subr.bf16.mxu0 %v9429_v27 }
0x3791   :  { %8551 = vmatpush3.bf16.msra.mxu0 %v10636_v37 }
0x3792   :  { %8552 = vmatprep.subr.bf16.mxu0 %v9429_v27 }
0x3795   :  { %8553 = vmatpush3.bf16.msra.mxu0 %v10642_v12 }
0x3796   :  { %8554 = vmatprep.subr.bf16.mxu0 %v9429_v27 }
0x3799   :  { %8555 = vmatpush3.bf16.msra.mxu0 %v10677_v17 }
0x379a   :  { %8572 = vmatprep.subr.bf16.mxu0 %v9429_v27 }
0x37d9   :  { %v6224_v55 = vpop.f32.mrf.mxu0 }
0x37da   :  { %v6231_v31 = vmul.f32 0.125, %v6224_v55 }
0x37db   :  { %v8528_v0 = vpop.f32.mrf.mxu0 }
0x37dc   :  { %v6233_v60 = vsel %vm351_vm1, %v6231_v31, -inf }
0x37dd   :  { %6234 = vmax.xlane.f32.xlu0 %v6233_v60  ;;  %v6227_v25 = vpop.f32.mrf.mxu0 }
0x37de   :  { %v6232_v37 = vmul.f32 0.125, %v6227_v25 }
0x37df   :  { %v8529_v45 = vpop.f32.mrf.mxu0 }
0x37e0   :  { %v6236_v1 = vsel %vm351_vm1, %v6232_v37, -inf }
0x37e1   :  { %6237 = vmax.xlane.f32.xlu1 %v6236_v1 }
0x384c   :  { %v6348_v12 = vpop.f32.mrf.mxu0 }
0x384d   :  { %v6355_v26 = vmul.f32 0.125, %v6348_v12 }
0x384e   :  { %v8540_v53 = vpop.f32.mrf.mxu0 }
0x384f   :  { %v6357_v17 = vsel %vm351_vm1, %v6355_v26, -inf }
0x3850   :  { %6358 = vmax.xlane.f32.xlu0 %v6357_v17  ;;  %v6351_v13 = vpop.f32.mrf.mxu0 }
0x3851   :  { %v6356_v44 = vmul.f32 0.125, %v6351_v13 }
0x3852   :  { %v8541_v63 = vpop.f32.mrf.mxu0 }
0x3853   :  { %v6360_v4 = vsel %vm351_vm1, %v6356_v44, -inf }
0x3854   :  { %6361 = vmax.xlane.f32.xlu0 %v6360_v4 }
0x3866   :  { %v6235_v6 = vpop.xlane.xlu0 %6234 }
0x3867   :  { %v6239_v34 = vsub.f32 %v6231_v31, %v6235_v6 }
0x3869   :  { %v6241_v58 = vmul.f32 1.442695, %v6239_v34 }
0x386a   :  { %v6238_v10 = vpop.xlane.xlu1 %6237 }
0x386b   :  { %8947 = vpow2.f32 %v6241_v58  ;;  %v6240_v36 = vsub.f32 %v6232_v37, %v6238_v10 }
0x386d   :  { %v6243_v2 = vmul.f32 1.442695, %v6240_v36 }
0x386f   :  { %8949 = vpow2.f32 %v6243_v2 }
0x3878   :  { %v8948_v55 = vpop.eup %8947 }
0x3879   :  { %v6245_v0 = vsel %vm351_vm1, %v8948_v55, 0.0 }
0x387a   :  { %6246 = vadd.xlane.f32.xlu0 %v6245_v0 }
0x387c   :  { %v8950_v60 = vpop.eup %8949 }
0x387d   :  { %v6248_v25 = vsel %vm351_vm1, %v8950_v60, 0.0 }
0x387e   :  { %6249 = vadd.xlane.f32.xlu0 %v6248_v25 }
0x38d9   :  { %v6359_v45 = vpop.xlane.xlu0 %6358 }
0x38da   :  { %v6363_v1 = vsub.f32 %v6355_v26, %v6359_v45 }
0x38dc   :  { %v6365_v12 = vmul.f32 1.442695, %v6363_v1 }
0x38dd   :  { %v6362_v53 = vpop.xlane.xlu0 %6361 }
0x38de   :  { %8951 = vpow2.f32 %v6365_v12  ;;  %v6364_v31 = vsub.f32 %v6356_v44, %v6362_v53 }
0x38e0   :  { %v6367_v17 = vmul.f32 1.442695, %v6364_v31 }
0x38e2   :  { %8953 = vpow2.f32 %v6367_v17 }
0x38eb   :  { %v8952_v13 = vpop.eup %8951 }
0x38ec   :  { %v6369_v37 = vsel %vm351_vm1, %v8952_v13, 0.0 }
0x38ed   :  { %6370 = vadd.xlane.f32.xlu0 %v6369_v37 }
0x38ef   :  { %v8954_v63 = vpop.eup %8953 }
0x38f0   :  { %v6372_v4 = vsel %vm351_vm1, %v8954_v63, 0.0 }
0x38f1   :  { %6373 = vadd.xlane.f32.xlu0 %v6372_v4 }
0x3903   :  { %v6247_v6 = vpop.xlane.xlu0 %6246 }
0x3904   :  { %8955 = vrcp.f32 %v6247_v6  ;;  %v6523_v6 = vsel %vm2928_vm15, %v11246_v24, 0 }
0x3907   :  { %6381 = vrot.lane.b32.xlu0 %v11255_v19, %s9426_s16  ;;  %v6250_v26 = vpop.xlane.xlu0 %6249 }
0x3908   :  { %8957 = vrcp.f32 %v6250_v26 }
0x390b   :  { %6687 = vrot.lane.b32.xlu0 %v11246_v24, %s9426_s16 }
0x3911   :  { %v8956_v44 = vpop.eup %8955 }
0x3912   :  { %v6253_v58 = vmul.f32 %v8956_v44, %v8948_v55 }
0x3915   :  { %v8958_v34 = vpop.eup %8957 }
0x3916   :  { %v6254_v10 = vmul.f32 %v8958_v34, %v8950_v60  ;;  %v11314_v60 = vpop.f32.mrf.mxu1 }
0x3918   :  { %v6255_v36 = vpack.c.bf16 %v6254_v10, %v6253_v58 }
0x391a   :  { %8533 = vmatmul.mubr.msk.bf16.vlgmr.msra.gmra.mxu1 %vm351_vm1, %v6255_v36 }
0x391b   :  { %8544 = vmatprep.mubr.msk.bf16.mxu1 %vm9431_vm11, %v9429_v27 }
0x3976   :  { %v6371_v2 = vpop.xlane.xlu0 %6370 }
0x3977   :  { %8959 = vrcp.f32 %v6371_v2 }
0x397a   :  { %v6374_v0 = vpop.xlane.xlu0 %6373 }
0x397b   :  { %8961 = vrcp.f32 %v6374_v0 }
0x397e   :  { %v6382_v19 = vpop.permute.xlu0 %6381 }
0x397f   :  { %8543 = vmatpush3.bf16.msra.mxu1 %v6382_v19 }
0x3980   :  { %8560 = vmatprep.subr.bf16.mxu1 %v9429_v27 }
0x3984   :  { %v8960_v25 = vpop.eup %8959 }
0x3985   :  { %v6377_v1 = vmul.f32 %v8960_v25, %v8952_v13  ;;  %v11318_v13 = vpack.c.bf16 %v11285_v51, %v11250_v33 }
0x3988   :  { %v8962_v45 = vpop.eup %8961 }
0x3989   :  { %v6378_v12 = vmul.f32 %v8962_v45, %v8954_v63 }
0x398b   :  { %v6379_v55 = vpack.c.bf16 %v6378_v12, %v6377_v1 }
0x398d   :  { %8545 = vmatmul.mubr.msk.bf16.vlgmr.msra.gmra.mxu1 %vm351_vm1, %v6379_v55 }
0x398e   :  { %8561 = vmatpush3.bf16.msra.mxu1 %v10650_v14  ;;  %8568 = vmatprep.mubr.msk.bf16.mxu1 %vm9431_vm11, %v9429_v27 }
0x398f   :  { %8562 = vmatprep.subr.bf16.mxu1 %v9429_v27 }
0x3992   :  { %8563 = vmatpush3.bf16.msra.mxu1 %v10656_v57 }
0x3993   :  { %8564 = vmatprep.subr.bf16.mxu1 %v9429_v27 }
0x3996   :  { %8565 = vmatpush3.bf16.msra.mxu1 %v10664_v20 }
0x3997   :  { %8566 = vmatprep.subr.bf16.mxu1 %v9429_v27 }
0x399a   :  { %8567 = vmatpush3.bf16.msra.mxu1 %v10670_v50 }
0x399b   :  { %8578 = vmatprep.subr.bf16.mxu1 %v9429_v27 }
0x39da   :  { %v6294_v14 = vpop.f32.mrf.mxu1 }
0x39dc   :  { %v8534_v53 = vpop.f32.mrf.mxu1 }
0x39de   :  { %v6297_v31 = vpop.f32.mrf.mxu1 }
0x39df   :  { %v6301_v17 = vpack.c.bf16 %v6297_v31, %v6294_v14 }
0x39e0   :  { %v8535_v57 = vpop.f32.mrf.mxu1 }
0x39e1   :  { %8569 = vmatmul.mubr.msk.bf16.vlgmr.msra.gmra.mxu1 %vm2928_vm15, %v6301_v17 }
0x39e2   :  { %8579 = vmatpush3.bf16.msra.mxu1 %v11318_v13  ;;  %8580 = vmatprep.mubr.msk.bf16.mxu1 %vm9431_vm11, %v9429_v27 }
0x39e3   :  { %8596 = vmatprep.subr.bf16.mxu1 %v9429_v27 }
0x3a4d   :  { %v6421_v20 = vpop.f32.mrf.mxu1 }
0x3a4f   :  { %v8546_v50 = vpop.f32.mrf.mxu1 }
0x3a51   :  { %v6424_v37 = vpop.f32.mrf.mxu1 }
0x3a52   :  { %v6428_v63 = vpack.c.bf16 %v6424_v37, %v6421_v20 }
0x3a53   :  { %v8547_v4 = vpop.f32.mrf.mxu1 }
0x3a54   :  { %8557 = vmatmul.mubr.msk.bf16.vlgmr.msra.gmra.mxu0 %vm2928_vm15, %v6428_v63 }
0x3a55   :  { %8573 = vmatpush3.bf16.xpose.msra.mxu0 %v6523_v6  ;;  %8574 = vmatprep.mubr.msk.bf16.mxu0 %vm9431_vm11, %v9429_v27 }
0x3a56   :  { %8584 = vmatprep.subr.bf16.mxu0 %v9429_v27 }
0x3a5c   :  { %8575 = vmatmul.mubr.msk.bf16.vlgmr.msra.gmra.mxu0 %vm2928_vm15, %v11244_v59 }
0x3a5d   :  { %8585 = vmatpush3.bf16.msra.mxu0 %v10719_v32  ;;  %8592 = vmatprep.mubr.msk.bf16.mxu0 %vm9431_vm11, %v9429_v27 }
0x3a5e   :  { %8586 = vmatprep.subr.bf16.mxu0 %v9429_v27 }
0x3a61   :  { %8587 = vmatpush3.bf16.msra.mxu0 %v10723_v56 }
0x3a62   :  { %8588 = vmatprep.subr.bf16.mxu0 %v9429_v27 }
0x3a65   :  { %8589 = vmatpush3.bf16.msra.mxu0 %v10738_v29 }
0x3a66   :  { %8590 = vmatprep.subr.bf16.mxu0 %v9429_v27 }
0x3a69   :  { %8591 = vmatpush3.bf16.msra.mxu0 %v10744_v62 }
0x3a6a   :  { %8608 = vmatprep.subr.bf16.mxu0 %v9429_v27 }
0x3aa1   :  { %v11343_v24 = vpop.f32.mrf.mxu1 }
0x3aa3   :  { %v8570_v32 = vpop.f32.mrf.mxu1 }
0x3aa4   :  { %v6688_v32 = vpop.permute.xlu0 %6687 }
0x3aa5   :  { %v11345_v33 = vpop.f32.mrf.mxu1 }
0x3aa7   :  { %v8571_v51 = vpop.f32.mrf.mxu1 }
0x3b14   :  { %v11347_v26 = vpop.f32.mrf.mxu0 }
0x3b16   :  { %v8558_v44 = vpop.f32.mrf.mxu0 }
0x3b17   :  { %v6693_v44 = vsel %vm2928_vm15, %v6688_v32, 0 }
0x3b18   :  { %v11349_v56 = vpop.f32.mrf.mxu0 }
0x3b1a   :  { %v8559_v34 = vpop.f32.mrf.mxu0 }
0x3b1c   :  { %v6559_v58 = vpop.f32.mrf.mxu0 }
0x3b1d   :  { %v6566_v29 = vmul.f32 0.125, %v6559_v58 }
0x3b1e   :  { %v8576_v10 = vpop.f32.mrf.mxu0 }
0x3b1f   :  { %v6568_v36 = vsel %vm351_vm1, %v6566_v29, -inf }
0x3b20   :  { %6569 = vmax.xlane.f32.xlu1 %v6568_v36  ;;  %v6562_v62 = vpop.f32.mrf.mxu0 }
0x3b21   :  { %v6567_v2 = vmul.f32 0.125, %v6562_v62 }
0x3b22   :  { %v8577_v0 = vpop.f32.mrf.mxu0 }
0x3b23   :  { %v6571_v19 = vsel %vm351_vm1, %v6567_v2, -inf }
0x3b24   :  { %6572 = vmax.xlane.f32.xlu1 %v6571_v19 }
0x3ba9   :  { %v6570_v25 = vpop.xlane.xlu1 %6569 }
0x3baa   :  { %v6574_v45 = vsub.f32 %v6566_v29, %v6570_v25 }
0x3bac   :  { %v6576_v1 = vmul.f32 1.442695, %v6574_v45 }
0x3bad   :  { %v6573_v12 = vpop.xlane.xlu1 %6572 }
0x3bae   :  { %8963 = vpow2.f32 %v6576_v1  ;;  %v6575_v55 = vsub.f32 %v6567_v2, %v6573_v12 }
0x3bb0   :  { %v6578_v14 = vmul.f32 1.442695, %v6575_v55 }
0x3bb2   :  { %8965 = vpow2.f32 %v6578_v14 }
0x3bbb   :  { %v8964_v53 = vpop.eup %8963 }
0x3bbc   :  { %v6580_v31 = vsel %vm351_vm1, %v8964_v53, 0.0 }
0x3bbd   :  { %6581 = vadd.xlane.f32.xlu1 %v6580_v31 }
0x3bbf   :  { %v8966_v17 = vpop.eup %8965 }
0x3bc0   :  { %v6583_v57 = vsel %vm351_vm1, %v8966_v17, 0.0 }
0x3bc1   :  { %6584 = vadd.xlane.f32.xlu1 %v6583_v57 }
0x3bd2   :  { %6684 = vrot.lane.b32.xlu1 %v11244_v59, %s9426_s16 }
0x3c46   :  { %v6582_v20 = vpop.xlane.xlu1 %6581 }
0x3c47   :  { %8967 = vrcp.f32 %v6582_v20 }
0x3c4a   :  { %v6585_v50 = vpop.xlane.xlu1 %6584 }
0x3c4b   :  { %8969 = vrcp.f32 %v6585_v50 }
0x3c4e   :  { %v6685_v59 = vpop.permute.xlu1 %6684 }
0x3c54   :  { %v8968_v37 = vpop.eup %8967 }
0x3c55   :  { %v6588_v4 = vmul.f32 %v8968_v37, %v8964_v53 }
0x3c58   :  { %v8970_v63 = vpop.eup %8969 }
0x3c59   :  { %v6589_v6 = vmul.f32 %v8970_v63, %v8966_v17 }
0x3c5b   :  { %v6590_v51 = vpack.c.bf16 %v6589_v6, %v6588_v4  ;;  %v6514_v4 = vadd.f32 %v11345_v33, %v11349_v56  ;;  %v6862_v33 = vsel %vm2928_vm15, %v11264_v39, 0 }
0x3c5d   :  { %8581 = vmatmul.mubr.msk.bf16.vlgmr.msra.gmra.mxu1 %vm351_vm1, %v6590_v51 }
0x3c5e   :  { %8597 = vmatpush3.bf16.xpose.msra.mxu1 %v6693_v44  ;;  %8598 = vmatprep.mubr.msk.bf16.mxu1 %vm9431_vm11, %v9429_v27 }
0x3c5f   :  { %8602 = vmatprep.subr.bf16.mxu1 %v9429_v27 }
0x3c65   :  { %8599 = vmatmul.mubr.msk.bf16.vlgmr.msra.gmra.mxu1 %vm2928_vm15, %v6685_v59 }
0x3c66   :  { %8604 = vmatprep.mubr.msk.bf16.mxu1 %vm9431_vm11, %v9429_v27 }
0x3d1d   :  { %v6629_v34 = vpop.f32.mrf.mxu1 }
0x3d1f   :  { %v8582_v58 = vpop.f32.mrf.mxu1 }
0x3d21   :  { %v6632_v29 = vpop.f32.mrf.mxu1 }
0x3d22   :  { %v6636_v10 = vpack.c.bf16 %v6632_v29, %v6629_v34 }
0x3d23   :  { %v8583_v36 = vpop.f32.mrf.mxu1 }
0x3d24   :  { %8593 = vmatmul.mubr.msk.bf16.vlgmr.msra.gmra.mxu0 %vm2928_vm15, %v6636_v10 }
0x3d25   :  { %v6729_v62 = vpop.f32.mrf.mxu1  ;;  %8609 = vmatpush3.bf16.msra.mxu0 %v10770_v40  ;;  %8616 = vmatprep.mubr.msk.bf16.mxu0 %vm9431_vm11, %v9429_v27 }
0x3d26   :  { %v6736_v2 = vmul.f32 0.125, %v6729_v62  ;;  %8610 = vmatprep.subr.bf16.mxu0 %v9429_v27 }
0x3d27   :  { %v8600_v0 = vpop.f32.mrf.mxu1 }
0x3d28   :  { %v6738_v19 = vsel %vm351_vm1, %v6736_v2, -inf }
0x3d29   :  { %6739 = vmax.xlane.f32.xlu0 %v6738_v19  ;;  %v6732_v25 = vpop.f32.mrf.mxu1  ;;  %8611 = vmatpush3.bf16.msra.mxu0 %v10774_v30 }
0x3d2a   :  { %v6737_v45 = vmul.f32 0.125, %v6732_v25  ;;  %8612 = vmatprep.subr.bf16.mxu0 %v9429_v27 }
0x3d2b   :  { %v8601_v1 = vpop.f32.mrf.mxu1 }
0x3d2c   :  { %v6741_v12 = vsel %vm351_vm1, %v6737_v45, -inf }
0x3d2d   :  { %6742 = vmax.xlane.f32.xlu1 %v6741_v12  ;;  %8613 = vmatpush3.bf16.msra.mxu0 %v10794_v8 }
0x3d2e   :  { %8614 = vmatprep.subr.bf16.mxu0 %v9429_v27 }
0x3d31   :  { %8615 = vmatpush3.bf16.msra.mxu0 %v10800_v43  ;;  %v6511_v43 = vadd.f32 %v11343_v24, %v11347_v26 }
0x3d32   :  { %8632 = vmatprep.subr.bf16.mxu0 %v9429_v27 }
0x3db2   :  { %v6740_v40 = vpop.xlane.xlu0 %6739 }
0x3db3   :  { %v6744_v55 = vsub.f32 %v6736_v2, %v6740_v40 }
0x3db5   :  { %v6746_v14 = vmul.f32 1.442695, %v6744_v55 }
0x3db6   :  { %v6743_v53 = vpop.xlane.xlu1 %6742 }
0x3db7   :  { %8971 = vpow2.f32 %v6746_v14  ;;  %v6745_v30 = vsub.f32 %v6737_v45, %v6743_v53 }
0x3db9   :  { %v6748_v31 = vmul.f32 1.442695, %v6745_v30 }
0x3dbb   :  { %8973 = vpow2.f32 %v6748_v31 }
0x3dc4   :  { %v8972_v17 = vpop.eup %8971 }
0x3dc5   :  { %v6750_v57 = vsel %vm351_vm1, %v8972_v17, 0.0 }
0x3dc6   :  { %6751 = vadd.xlane.f32.xlu0 %v6750_v57 }
0x3dc8   :  { %v8974_v20 = vpop.eup %8973 }
0x3dc9   :  { %v6753_v8 = vsel %vm351_vm1, %v8974_v20, 0.0 }
0x3dca   :  { %6754 = vadd.xlane.f32.xlu0 %v6753_v8 }
0x3de0   :  { %6762 = vrot.lane.b32.xlu0 %v11318_v13, %s9426_s16 }
0x3de4   :  { %v6674_v50 = vpop.f32.mrf.mxu0 }
0x3de5   :  { %v11384_v37 = vadd.f32 %v6674_v50, %v6511_v43 }
0x3de6   :  { %v8594_v63 = vpop.f32.mrf.mxu0 }
0x3de8   :  { %v6677_v6 = vpop.f32.mrf.mxu0 }
0x3de9   :  { %v11388_v32 = vadd.f32 %v6677_v6, %v6514_v4 }
0x3dea   :  { %v8595_v51 = vpop.f32.mrf.mxu0 }
0x3e4f   :  { %v6752_v44 = vpop.xlane.xlu0 %6751 }
0x3e50   :  { %8975 = vrcp.f32 %v6752_v44 }
0x3e53   :  { %v6755_v59 = vpop.xlane.xlu0 %6754 }
0x3e54   :  { %8977 = vrcp.f32 %v6755_v59 }
0x3e57   :  { %v6763_v34 = vpop.permute.xlu0 %6762 }
0x3e58   :  { %8603 = vmatpush3.bf16.msra.mxu1 %v6763_v34 }
0x3e59   :  { %8620 = vmatprep.subr.bf16.mxu1 %v9429_v27 }
0x3e5d   :  { %v8976_v13 = vpop.eup %8975 }
0x3e5e   :  { %v6758_v26 = vmul.f32 %v8976_v13, %v8972_v17 }
0x3e61   :  { %v8978_v24 = vpop.eup %8977 }
0x3e62   :  { %v6759_v58 = vmul.f32 %v8978_v24, %v8974_v20 }
0x3e64   :  { %v6760_v29 = vpack.c.bf16 %v6759_v58, %v6758_v26 }
0x3e66   :  { %8605 = vmatmul.mubr.msk.bf16.vlgmr.msra.gmra.mxu1 %vm351_vm1, %v6760_v29 }
0x3e67   :  { %8621 = vmatpush3.bf16.xpose.msra.mxu1 %v6862_v33  ;;  %8622 = vmatprep.mubr.msk.bf16.mxu1 %vm9431_vm11, %v9429_v27 }
0x3e68   :  { %8626 = vmatprep.subr.bf16.mxu1 %v9429_v27 }
0x3e6e   :  { %8623 = vmatmul.mubr.msk.bf16.vlgmr.msra.gmra.mxu1 %vm2928_vm15, %v11253_v5 }
0x3e6f   :  { %8627 = vmatpush3.bf16.msra.mxu1 %v11270_v48  ;;  %8628 = vmatprep.mubr.msk.bf16.mxu1 %vm9431_vm11, %v9429_v27 }
0x3e70   :  { %8644 = vmatprep.subr.bf16.mxu1 %v9429_v27 }
0x3f26   :  { %v6802_v56 = vpop.f32.mrf.mxu1 }
0x3f28   :  { %v8606_v10 = vpop.f32.mrf.mxu1 }
0x3f2a   :  { %v6805_v36 = vpop.f32.mrf.mxu1 }
0x3f2b   :  { %v6809_v62 = vpack.c.bf16 %v6805_v36, %v6802_v56 }
0x3f2c   :  { %v8607_v2 = vpop.f32.mrf.mxu1 }
0x3f2d   :  { %8617 = vmatmul.mubr.msk.bf16.vlgmr.msra.gmra.mxu0 %vm2928_vm15, %v6809_v62 }
0x3f2e   :  { %v6898_v0 = vpop.f32.mrf.mxu1  ;;  %8633 = vmatpush3.bf16.msra.mxu0 %v10822_v47  ;;  %8640 = vmatprep.mubr.msk.bf16.mxu0 %vm9431_vm11, %v9429_v27 }
0x3f2f   :  { %v6905_v19 = vmul.f32 0.125, %v6898_v0  ;;  %8634 = vmatprep.subr.bf16.mxu0 %v9429_v27 }
0x3f30   :  { %v8624_v25 = vpop.f32.mrf.mxu1 }
0x3f31   :  { %v6907_v45 = vsel %vm351_vm1, %v6905_v19, -inf }
0x3f32   :  { %6908 = vmax.xlane.f32.xlu1 %v6907_v45  ;;  %v6901_v1 = vpop.f32.mrf.mxu1  ;;  %8635 = vmatpush3.bf16.msra.mxu0 %v10826_v42 }
0x3f33   :  { %v6906_v12 = vmul.f32 0.125, %v6901_v1  ;;  %8636 = vmatprep.subr.bf16.mxu0 %v9429_v27 }
0x3f34   :  { %v8625_v40 = vpop.f32.mrf.mxu1 }
0x3f35   :  { %v6910_v55 = vsel %vm351_vm1, %v6906_v12, -inf }
0x3f36   :  { %6911 = vmax.xlane.f32.xlu1 %v6910_v55  ;;  %8637 = vmatpush3.bf16.msra.mxu0 %v10841_v11 }
0x3f37   :  { %8638 = vmatprep.subr.bf16.mxu0 %v9429_v27 }
0x3f3a   :  { %8639 = vmatpush3.bf16.msra.mxu0 %v10847_v38 }
0x3f3b   :  { %8656 = vmatprep.subr.bf16.mxu0 %v9429_v27 }
0x3fbb   :  { %v6909_v47 = vpop.xlane.xlu1 %6908 }
0x3fbc   :  { %v6913_v14 = vsub.f32 %v6905_v19, %v6909_v47 }
0x3fbe   :  { %v6915_v53 = vmul.f32 1.442695, %v6913_v14 }
0x3fbf   :  { %v6912_v30 = vpop.xlane.xlu1 %6911 }
0x3fc0   :  { %8979 = vpow2.f32 %v6915_v53  ;;  %v6914_v42 = vsub.f32 %v6906_v12, %v6912_v30 }
0x3fc2   :  { %v6917_v31 = vmul.f32 1.442695, %v6914_v42 }
0x3fc4   :  { %8981 = vpow2.f32 %v6917_v31 }
0x3fcd   :  { %v8980_v17 = vpop.eup %8979 }
0x3fce   :  { %v6919_v57 = vsel %vm351_vm1, %v8980_v17, 0.0 }
0x3fcf   :  { %6920 = vadd.xlane.f32.xlu1 %v6919_v57 }
0x3fd1   :  { %v8982_v20 = vpop.eup %8981 }
0x3fd2   :  { %v6922_v11 = vsel %vm351_vm1, %v8982_v20, 0.0 }
0x3fd3   :  { %6923 = vadd.xlane.f32.xlu0 %v6922_v11 }
0x3fe0   :  { %7026 = vrot.lane.b32.xlu1 %v11264_v39, %s9426_s16 }
0x3fe4   :  { %7023 = vrot.lane.b32.xlu1 %v11253_v5, %s9426_s16 }
0x3fed   :  { %v6847_v38 = vpop.f32.mrf.mxu0 }
0x3fee   :  { %v11423_v8 = vadd.f32 %v6847_v38, %v11384_v37 }
0x3fef   :  { %v8618_v43 = vpop.f32.mrf.mxu0 }
0x3ff1   :  { %v6850_v50 = vpop.f32.mrf.mxu0 }
0x3ff2   :  { %v11426_v63 = vadd.f32 %v6850_v50, %v11388_v32 }
0x3ff3   :  { %v8619_v4 = vpop.f32.mrf.mxu0 }
0x3ff4   :  { %v7201_v4 = vsel %vm2928_vm15, %v11266_v41, 0 }
0x4058   :  { %v6921_v6 = vpop.xlane.xlu1 %6920 }
0x4059   :  { %8983 = vrcp.f32 %v6921_v6 }
0x405c   :  { %v6924_v51 = vpop.xlane.xlu0 %6923  ;;  %v7027_v13 = vpop.permute.xlu1 %7026 }
0x405d   :  { %8985 = vrcp.f32 %v6924_v51  ;;  %v7032_v24 = vsel %vm2928_vm15, %v7027_v13, 0 }
0x4060   :  { %v7024_v37 = vpop.permute.xlu1 %7023 }
0x4066   :  { %v8984_v44 = vpop.eup %8983 }
0x4067   :  { %v6927_v39 = vmul.f32 %v8984_v44, %v8980_v17 }
0x406a   :  { %v8986_v59 = vpop.eup %8985 }
0x406b   :  { %v6928_v34 = vmul.f32 %v8986_v59, %v8982_v20 }
0x406d   :  { %v6929_v5 = vpack.c.bf16 %v6928_v34, %v6927_v39 }
0x406f   :  { %8629 = vmatmul.mubr.msk.bf16.vlgmr.msra.gmra.mxu1 %vm351_vm1, %v6929_v5 }
0x4070   :  { %8645 = vmatpush3.bf16.xpose.msra.mxu1 %v7032_v24  ;;  %8646 = vmatprep.mubr.msk.bf16.mxu1 %vm9431_vm11, %v9429_v27 }
0x4071   :  { %8650 = vmatprep.subr.bf16.mxu1 %v9429_v27 }
0x4077   :  { %8647 = vmatmul.mubr.msk.bf16.vlgmr.msra.gmra.mxu1 %vm2928_vm15, %v7024_v37 }
0x4078   :  { %8652 = vmatprep.mubr.msk.bf16.mxu1 %vm9431_vm11, %v9429_v27 }
0x412f   :  { %v6968_v32 = vpop.f32.mrf.mxu1 }
0x4131   :  { %v8630_v26 = vpop.f32.mrf.mxu1 }
0x4133   :  { %v6971_v58 = vpop.f32.mrf.mxu1 }
0x4134   :  { %v6975_v29 = vpack.c.bf16 %v6971_v58, %v6968_v32 }
0x4135   :  { %v8631_v33 = vpop.f32.mrf.mxu1 }
0x4136   :  { %8641 = vmatmul.mubr.msk.bf16.vlgmr.msra.gmra.mxu0 %vm2928_vm15, %v6975_v29 }
0x4137   :  { %v7068_v56 = vpop.f32.mrf.mxu1  ;;  %8657 = vmatpush3.bf16.msra.mxu0 %v10872_v46  ;;  %8664 = vmatprep.mubr.msk.bf16.mxu0 %vm9431_vm11, %v9429_v27 }
0x4138   :  { %v7075_v10 = vmul.f32 0.125, %v7068_v56  ;;  %8658 = vmatprep.subr.bf16.mxu0 %v9429_v27 }
0x4139   :  { %v8648_v36 = vpop.f32.mrf.mxu1 }
0x413a   :  { %v7077_v62 = vsel %vm351_vm1, %v7075_v10, -inf }
0x413b   :  { %7078 = vmax.xlane.f32.xlu1 %v7077_v62  ;;  %v7071_v2 = vpop.f32.mrf.mxu1  ;;  %8659 = vmatpush3.bf16.msra.mxu0 %v10876_v7 }
0x413c   :  { %v7076_v0 = vmul.f32 0.125, %v7071_v2  ;;  %8660 = vmatprep.subr.bf16.mxu0 %v9429_v27 }
0x413d   :  { %v8649_v19 = vpop.f32.mrf.mxu1 }
0x413e   :  { %v7080_v25 = vsel %vm351_vm1, %v7076_v0, -inf }
0x413f   :  { %7081 = vmax.xlane.f32.xlu0 %v7080_v25  ;;  %8661 = vmatpush3.bf16.msra.mxu0 %v10900_v3 }
0x4140   :  { %8662 = vmatprep.subr.bf16.mxu0 %v9429_v27 }
0x4143   :  { %8663 = vmatpush3.bf16.msra.mxu0 %v10906_v54 }
0x4144   :  { %8680 = vmatprep.subr.bf16.mxu0 %v9429_v27 }
0x41c4   :  { %v7079_v46 = vpop.xlane.xlu1 %7078 }
0x41c5   :  { %v7083_v45 = vsub.f32 %v7075_v10, %v7079_v46 }
0x41c7   :  { %v7085_v1 = vmul.f32 1.442695, %v7083_v45 }
0x41c8   :  { %v7082_v12 = vpop.xlane.xlu0 %7081 }
0x41c9   :  { %8987 = vpow2.f32 %v7085_v1  ;;  %v7084_v7 = vsub.f32 %v7076_v0, %v7082_v12 }
0x41cb   :  { %v7087_v40 = vmul.f32 1.442695, %v7084_v7 }
0x41cd   :  { %8989 = vpow2.f32 %v7087_v40 }
0x41d6   :  { %v8988_v55 = vpop.eup %8987 }
0x41d7   :  { %v7089_v47 = vsel %vm351_vm1, %v8988_v55, 0.0 }
0x41d8   :  { %7090 = vadd.xlane.f32.xlu0 %v7089_v47 }
0x41da   :  { %v8990_v14 = vpop.eup %8989 }
0x41db   :  { %v7092_v3 = vsel %vm351_vm1, %v8990_v14, 0.0 }
0x41dc   :  { %7093 = vadd.xlane.f32.xlu0 %v7092_v3 }
0x41f2   :  { %7101 = vrot.lane.b32.xlu0 %v11270_v48, %s9426_s16 }
0x41f6   :  { %v7013_v54 = vpop.f32.mrf.mxu0 }
0x41f7   :  { %v11454_v53 = vadd.f32 %v7013_v54, %v11423_v8 }
0x41f8   :  { %v8642_v30 = vpop.f32.mrf.mxu0 }
0x41fa   :  { %v7016_v42 = vpop.f32.mrf.mxu0 }
0x41fb   :  { %v11457_v31 = vadd.f32 %v7016_v42, %v11426_v63  ;;  %v11468_v63 = vpack.c.bf16 %v11314_v60, %v11268_v23 }
0x41fc   :  { %v8643_v17 = vpop.f32.mrf.mxu0 }
0x4261   :  { %v7091_v57 = vpop.xlane.xlu0 %7090 }
0x4262   :  { %8991 = vrcp.f32 %v7091_v57 }
0x4265   :  { %v7094_v20 = vpop.xlane.xlu0 %7093 }
0x4266   :  { %8993 = vrcp.f32 %v7094_v20 }
0x4269   :  { %v7102_v11 = vpop.permute.xlu0 %7101 }
0x426a   :  { %8651 = vmatpush3.bf16.msra.mxu1 %v7102_v11 }
0x426b   :  { %8668 = vmatprep.subr.bf16.mxu1 %v9429_v27 }
0x426f   :  { %v8992_v38 = vpop.eup %8991 }
0x4270   :  { %v7097_v43 = vmul.f32 %v8992_v38, %v8988_v55 }
0x4273   :  { %v8994_v48 = vpop.eup %8993 }
0x4274   :  { %v7098_v50 = vmul.f32 %v8994_v48, %v8990_v14 }
0x4276   :  { %v7099_v8 = vpack.c.bf16 %v7098_v50, %v7097_v43 }
0x4278   :  { %8653 = vmatmul.mubr.msk.bf16.vlgmr.msra.gmra.mxu1 %vm351_vm1, %v7099_v8 }
0x4279   :  { %8669 = vmatpush3.bf16.xpose.msra.mxu1 %v7201_v4  ;;  %8670 = vmatprep.mubr.msk.bf16.mxu1 %vm9431_vm11, %v9429_v27 }
0x427a   :  { %8674 = vmatprep.subr.bf16.mxu1 %v9429_v27 }
0x4280   :  { %8671 = vmatmul.mubr.msk.bf16.vlgmr.msra.gmra.mxu1 %vm2928_vm15, %v11257_v35 }
0x4281   :  { %8675 = vmatpush3.bf16.msra.mxu1 %v11468_v63  ;;  %8676 = vmatprep.mubr.msk.bf16.mxu1 %vm9431_vm11, %v9429_v27 }
0x4282   :  { %8692 = vmatprep.subr.bf16.mxu1 %v9429_v27 }
0x4338   :  { %v7141_v6 = vpop.f32.mrf.mxu1 }
0x433a   :  { %v8654_v51 = vpop.f32.mrf.mxu1 }
0x433c   :  { %v7144_v44 = vpop.f32.mrf.mxu1 }
0x433d   :  { %v7148_v59 = vpack.c.bf16 %v7144_v44, %v7141_v6 }
0x433e   :  { %v8655_v39 = vpop.f32.mrf.mxu1 }
0x433f   :  { %8665 = vmatmul.mubr.msk.bf16.vlgmr.msra.gmra.mxu0 %vm2928_vm15, %v7148_v59 }
0x4340   :  { %v7237_v34 = vpop.f32.mrf.mxu1  ;;  %8681 = vmatpush3.bf16.msra.mxu0 %v10927_v49  ;;  %8688 = vmatprep.mubr.msk.bf16.mxu0 %vm9431_vm11, %v9429_v27 }
0x4341   :  { %v7244_v23 = vmul.f32 0.125, %v7237_v34  ;;  %8682 = vmatprep.subr.bf16.mxu0 %v9429_v27 }
0x4342   :  { %v8672_v60 = vpop.f32.mrf.mxu1 }
0x4343   :  { %v7246_v13 = vsel %vm351_vm1, %v7244_v23, -inf }
0x4344   :  { %7247 = vmax.xlane.f32.xlu1 %v7246_v13  ;;  %v7240_v5 = vpop.f32.mrf.mxu1  ;;  %8683 = vmatpush3.bf16.msra.mxu0 %v10931_v15 }
0x4345   :  { %v7245_v24 = vmul.f32 0.125, %v7240_v5  ;;  %8684 = vmatprep.subr.bf16.mxu0 %v9429_v27 }
0x4346   :  { %v8673_v37 = vpop.f32.mrf.mxu1 }
0x4347   :  { %v7249_v32 = vsel %vm351_vm1, %v7245_v24, -inf }
0x4348   :  { %7250 = vmax.xlane.f32.xlu1 %v7249_v32  ;;  %8685 = vmatpush3.bf16.msra.mxu0 %v10946_v18 }
0x4349   :  { %8686 = vmatprep.subr.bf16.mxu0 %v9429_v27 }
0x434c   :  { %8687 = vmatpush3.bf16.msra.mxu0 %v10952_v61 }
0x434d   :  { %8704 = vmatprep.subr.bf16.mxu0 %v9429_v27 }
0x43cd   :  { %v7248_v49 = vpop.xlane.xlu1 %7247 }
0x43ce   :  { %v7252_v26 = vsub.f32 %v7244_v23, %v7248_v49 }
0x43d0   :  { %v7254_v58 = vmul.f32 1.442695, %v7252_v26 }
0x43d1   :  { %v7251_v29 = vpop.xlane.xlu1 %7250 }
0x43d2   :  { %8995 = vpow2.f32 %v7254_v58  ;;  %v7253_v15 = vsub.f32 %v7245_v24, %v7251_v29 }
0x43d4   :  { %v7256_v33 = vmul.f32 1.442695, %v7253_v15 }
0x43d6   :  { %8997 = vpow2.f32 %v7256_v33 }
0x43df   :  { %v8996_v56 = vpop.eup %8995 }
0x43e0   :  { %v7258_v10 = vsel %vm351_vm1, %v8996_v56, 0.0 }
0x43e1   :  { %7259 = vadd.xlane.f32.xlu0 %v7258_v10 }
0x43e3   :  { %v8998_v36 = vpop.eup %8997 }
0x43e4   :  { %v7261_v18 = vsel %vm351_vm1, %v8998_v36, 0.0 }
0x43e5   :  { %7262 = vadd.xlane.f32.xlu1 %v7261_v18 }
0x43f6   :  { %7365 = vrot.lane.b32.xlu1 %v11266_v41, %s9426_s16 }
0x43fa   :  { %7362 = vrot.lane.b32.xlu1 %v11257_v35, %s9426_s16 }
0x43ff   :  { %v7186_v61 = vpop.f32.mrf.mxu0 }
0x4400   :  { %v11496_v62 = vadd.f32 %v7186_v61, %v11454_v53 }
0x4401   :  { %v8666_v2 = vpop.f32.mrf.mxu0 }
0x4403   :  { %v7189_v0 = vpop.f32.mrf.mxu0 }
0x4404   :  { %v11499_v19 = vadd.f32 %v7189_v0, %v11457_v31 }
0x4405   :  { %v8667_v25 = vpop.f32.mrf.mxu0 }
0x446a   :  { %v7260_v46 = vpop.xlane.xlu0 %7259 }
0x446b   :  { %8999 = vrcp.f32 %v7260_v46 }
0x446e   :  { %v7263_v45 = vpop.xlane.xlu1 %7262 }
0x446f   :  { %9001 = vrcp.f32 %v7263_v45 }
0x4472   :  { %v7366_v40 = vpop.permute.xlu1 %7365 }
0x4473   :  { %v7371_v55 = vsel %vm2928_vm15, %v7366_v40, 0 }
0x4476   :  { %v7363_v47 = vpop.permute.xlu1 %7362 }
0x4478   :  { %v9000_v1 = vpop.eup %8999 }
0x4479   :  { %v7266_v41 = vmul.f32 %v9000_v1, %v8996_v56 }
0x447c   :  { %v9002_v12 = vpop.eup %9001 }
0x447d   :  { %v7267_v7 = vmul.f32 %v9002_v12, %v8998_v36 }
0x447f   :  { %v7268_v35 = vpack.c.bf16 %v7267_v7, %v7266_v41 }
0x4481   :  { %8677 = vmatmul.mubr.msk.bf16.vlgmr.msra.gmra.mxu1 %vm351_vm1, %v7268_v35 }
0x4482   :  { %8693 = vmatpush3.bf16.xpose.msra.mxu1 %v7371_v55  ;;  %8694 = vmatprep.mubr.msk.bf16.mxu1 %vm9431_vm11, %v9429_v27 }
0x4483   :  { %8698 = vmatprep.subr.bf16.mxu1 %v9429_v27 }
0x4489   :  { %8695 = vmatmul.mubr.msk.bf16.vlgmr.msra.gmra.mxu1 %vm2928_vm15, %v7363_v47 }
0x448a   :  { %8700 = vmatprep.mubr.msk.bf16.mxu1 %vm9431_vm11, %v9429_v27 }
0x4541   :  { %v7307_v14 = vpop.f32.mrf.mxu1 }
0x4543   :  { %v8678_v3 = vpop.f32.mrf.mxu1 }
0x4544   :  { %v7590_v3 = vld [vmem:[%s9610_s29] sm:$0xff] }
0x4545   :  { %v7310_v54 = vpop.f32.mrf.mxu1 }
0x4546   :  { %v7314_v53 = vpack.c.bf16 %v7310_v54, %v7307_v14  ;;  %v7593_v14 = vld [vmem:[%s9610_s29 + $0x18] sm:$0xff] }
0x4547   :  { %v8679_v30 = vpop.f32.mrf.mxu1 }
0x4548   :  { %8689 = vmatmul.mubr.msk.bf16.vlgmr.msra.gmra.mxu0 %vm2928_vm15, %v7314_v53  ;;  %v7591_v53 = vld [vmem:[%s9610_s29 + $0x8] sm:$0xff] }
0x4549   :  { %v7407_v42 = vpop.f32.mrf.mxu1  ;;  %8705 = vmatpush3.bf16.msra.mxu0 %v10969_v28  ;;  %8712 = vmatprep.mubr.msk.bf16.mxu0 %vm9431_vm11, %v9429_v27  ;;  %v7595_v30 = vpack.c.bf16 %v7591_v53, %v7590_v3 }
0x454a   :  { %v7414_v31 = vmul.f32 0.125, %v7407_v42  ;;  %8706 = vmatprep.subr.bf16.mxu0 %v9429_v27 }
0x454b   :  { %v8696_v17 = vpop.f32.mrf.mxu1 }
0x454c   :  { %v7416_v57 = vsel %vm351_vm1, %v7414_v31, -inf }
0x454d   :  { %7417 = vmax.xlane.f32.xlu1 %v7416_v57  ;;  %v7410_v20 = vpop.f32.mrf.mxu1  ;;  %8707 = vmatpush3.bf16.msra.mxu0 %v10974_v22 }
0x454e   :  { %v7415_v11 = vmul.f32 0.125, %v7410_v20  ;;  %8708 = vmatprep.subr.bf16.mxu0 %v9429_v27 }
0x454f   :  { %v8697_v38 = vpop.f32.mrf.mxu1 }
0x4550   :  { %v7419_v48 = vsel %vm351_vm1, %v7415_v11, -inf }
0x4551   :  { %7420 = vmax.xlane.f32.xlu0 %v7419_v48  ;;  %8709 = vmatpush3.bf16.msra.mxu0 %v10985_v21  ;;  %v7837_v48 = vld [vmem:[%s11596_s30] ss:$0 sm:$0xff] }
0x4552   :  { %8710 = vmatprep.subr.bf16.mxu0 %v9429_v27 }
0x4555   :  { %8711 = vmatpush3.bf16.msra.mxu0 %v10991_v16 }
0x45d6   :  { %v7418_v28 = vpop.xlane.xlu1 %7417 }
0x45d7   :  { %v7422_v43 = vsub.f32 %v7414_v31, %v7418_v28 }
0x45d9   :  { %v7424_v50 = vmul.f32 1.442695, %v7422_v43 }
0x45da   :  { %v7421_v8 = vpop.xlane.xlu0 %7420 }
0x45db   :  { %9003 = vpow2.f32 %v7424_v50  ;;  %v7423_v4 = vsub.f32 %v7415_v11, %v7421_v8  ;;  %v7838_v8 = vld [vmem:[#allocation26] ss:$0 sm:$0xff] }
0x45dd   :  { %v7426_v22 = vmul.f32 1.442695, %v7423_v4 }
0x45df   :  { %9005 = vpow2.f32 %v7426_v22 }
0x45e8   :  { %v9004_v6 = vpop.eup %9003 }
0x45e9   :  { %v7428_v51 = vsel %vm351_vm1, %v9004_v6, 0.0 }
0x45ea   :  { %7429 = vadd.xlane.f32.xlu0 %v7428_v51 }
0x45ec   :  { %v9006_v44 = vpop.eup %9005 }
0x45ed   :  { %v7431_v59 = vsel %vm351_vm1, %v9006_v44, 0.0 }
0x45ee   :  { %7432 = vadd.xlane.f32.xlu0 %v7431_v59 }
0x4604   :  { %7440 = vrot.lane.b32.xlu0 %v11468_v63, %s9426_s16 }
0x4608   :  { %v7352_v21 = vpop.f32.mrf.mxu0 }
0x4609   :  { %v7359_v16 = vadd.f32 %v7352_v21, %v11496_v62 }
0x460a   :  { %v8690_v39 = vpop.f32.mrf.mxu0 }
0x460c   :  { %v7355_v34 = vpop.f32.mrf.mxu0 }
0x460d   :  { %v7360_v23 = vadd.f32 %v7355_v34, %v11499_v19 }
0x460e   :  { %v8691_v60 = vpop.f32.mrf.mxu0 }
0x4673   :  { %v7430_v13 = vpop.xlane.xlu0 %7429 }
0x4674   :  { %9007 = vrcp.f32 %v7430_v13 }
0x4677   :  { %v7433_v5 = vpop.xlane.xlu0 %7432 }
0x4678   :  { %9009 = vrcp.f32 %v7433_v5 }
0x467b   :  { %v7441_v24 = vpop.permute.xlu0 %7440 }
0x467c   :  { %8699 = vmatpush3.bf16.msra.mxu1 %v7441_v24  ;;  %v7597_v24 = vld [vmem:[#allocation27] sm:$0x1] }
0x467d   :  { %8716 = vmatprep.subr.bf16.mxu1 %v9429_v27 }
0x4681   :  { %v9008_v37 = vpop.eup %9007 }
0x4682   :  { %v7436_v49 = vmul.f32 %v9008_v37, %v9004_v6 }
0x4685   :  { %v9010_v32 = vpop.eup %9009 }
0x4686   :  { %v7437_v63 = vmul.f32 %v9010_v32, %v9006_v44 }
0x4688   :  { %v7438_v26 = vpack.c.bf16 %v7437_v63, %v7436_v49 }
0x468a   :  { %8701 = vmatmul.mubr.msk.bf16.vlgmr.msra.gmra.mxu1 %vm351_vm1, %v7438_v26 }
0x468b   :  { %8720 = vmatprep.mubr.msk.bf16.mxu1 %vm9431_vm11, %v9429_v27 }
0x474a   :  { %v7480_v58 = vpop.f32.mrf.mxu1 }
0x474c   :  { %v8702_v29 = vpop.f32.mrf.mxu1 }
0x474e   :  { %v7483_v15 = vpop.f32.mrf.mxu1 }
0x474f   :  { %v7487_v33 = vpack.c.bf16 %v7483_v15, %v7480_v58 }
0x4750   :  { %v8703_v56 = vpop.f32.mrf.mxu1 }
0x4751   :  { %8713 = vmatmul.mubr.msk.bf16.vlgmr.msra.gmra.mxu0 %vm2928_vm15, %v7487_v33 }
0x4811   :  { %v7525_v10 = vpop.f32.mrf.mxu0 }
0x4812   :  { %v7532_v36 = vadd.f32 %v7525_v10, %v7359_v16 }
0x4813   :  { %v8714_v18 = vpop.f32.mrf.mxu0 }
0x4814   :  { %v7534_v61 = vadd.f32 %v7532_v36, %v11201_v52 }
0x4815   :  { %v7528_v62 = vpop.f32.mrf.mxu0 }
0x4816   :  { %v7533_v2 = vadd.f32 %v7528_v62, %v7360_v23  ;;  %v7538_v0 = vsel %vm2067_vm0, %v7534_v61, 0.0 }
0x4817   :  { %7539 = vadd.xlane.f32.xlu1 %v7538_v0  ;;  %v8715_v19 = vpop.f32.mrf.mxu0 }
0x4818   :  { %v7535_v25 = vadd.f32 %v7533_v2, %v11203_v9  ;;  %v7592_v9 = vld [vmem:[%s9610_s29 + $0x10] sm:$0xff]  ;;  %s9441_s29 = smov [#allocation29]  }
0x4819   :  { %v7596_v54 = vpack.c.bf16 %v7593_v14, %v7592_v9  ;;  %s7648_s5 = sshll.u32 %s9441_s29, 4  ;;  %s7649_s5 = int_to_ptr.vmem [resolvable:$true] %s7648_s5 }
0x481a   :  { %v7541_v46 = vsel %vm2067_vm0, %v7535_v25, 0.0  ;;  %s9335_s25 = scalar_lea.vmem %s7649_s5, 32  ;;  %p9340_p11 = scmp.lt.s32.totalorder %s7649_s5, %s7649_s5 }
0x481b   :  { %7542 = vadd.xlane.f32.xlu0 %v7541_v46  ;;  %8717 = vmatpush3.bf16.msra.mxu1 %v7596_v54  ;;  %p9336_p10 = scmp.ne.s32.totalorder %s7649_s5, %s9335_s25  ;;  %p9341_p12 = scmp.lt.s32.totalorder %s9335_s25, %s9335_s25 }
0x481c   :  { %8718 = vmatprep.subr.bf16.mxu1 %v9429_v27 }
0x481d   :  { %p9342_p13 = por %p9341_p12, %p9340_p11 }
0x481f   :  { %8719 = vmatpush3.bf16.msra.mxu1 %v7595_v30  ;;  %p9343_p0 = pnand %p9342_p13, %p9336_p10 }
0x48a0   :  { %v7540_v45 = vpop.xlane.xlu1 %7539 }
0x48a1   :  { %v7544_v1 = vmul.f32 0.03125, %v7540_v45 }
0x48a3   :  { %v7546_v12 = vsub.f32 %v7534_v61, %v7544_v1 }
0x48a4   :  { %v7543_v41 = vpop.xlane.xlu0 %7542 }
0x48a5   :  { %v7545_v52 = vmul.f32 0.03125, %v7543_v41  ;;  %v7548_v7 = vmul.f32 %v7546_v12, %v7546_v12 }
0x48a7   :  { %v7547_v40 = vsub.f32 %v7535_v25, %v7545_v52  ;;  %v7550_v35 = vsel %vm2067_vm0, %v7548_v7, 0.0 }
0x48a8   :  { %7551 = vadd.xlane.f32.xlu1 %v7550_v35 }
0x48a9   :  { %v7549_v55 = vmul.f32 %v7547_v40, %v7547_v40 }
0x48ab   :  { %v7553_v47 = vsel %vm2067_vm0, %v7549_v55, 0.0 }
0x48ac   :  { %7554 = vadd.xlane.f32.xlu1 %v7553_v47 }
0x4931   :  { %v7552_v42 = vpop.xlane.xlu1 %7551 }
0x4932   :  { %v7556_v31 = vmul.f32 0.03125, %v7552_v42 }
0x4934   :  { %v7558_v17 = vadd.f32 1e-06, %v7556_v31 }
0x4935   :  { %v7555_v57 = vpop.xlane.xlu1 %7554 }
0x4936   :  { %9011 = vrsqrt.f32 %v7558_v17  ;;  %v7557_v20 = vmul.f32 0.03125, %v7555_v57 }
0x4938   :  { %v7559_v11 = vadd.f32 1e-06, %v7557_v20 }
0x493a   :  { %9013 = vrsqrt.f32 %v7559_v11 }
0x4943   :  { %v9012_v38 = vpop.eup %9011 }
0x4944   :  { %v7562_v28 = vmul.f32 %v9012_v38, %v7546_v12 }
0x4946   :  { %v7570_v43 = vmul.f32 %v7837_v48, %v7562_v28 }
0x4947   :  { %v9014_v50 = vpop.eup %9013 }
0x4948   :  { %v7563_v4 = vmul.f32 %v9014_v50, %v7547_v40  ;;  %v7578_v22 = vadd.f32 %v7838_v8, %v7570_v43 }
0x494a   :  { %v7571_v6 = vmul.f32 %v7837_v48, %v7563_v4  ;;  %v7580_v27 = vsel %vm2067_vm0, %v7578_v22, 0.0 }
0x494c   :  { %v7579_v51 = vadd.f32 %v7838_v8, %v7571_v6 }
0x494e   :  { %v7581_v44 = vsel %vm2067_vm0, %v7579_v51, 0.0 }
0x494f   :  { %v7582_v59 = vadd.f32 %v7581_v44, %v7580_v27 }
0x4951   :  { %v7583_v21 = vrot.slane %v7582_v59, 4 }
0x4953   :  { %v7584_v16 = vadd.f32 %v7583_v21, %v7582_v59 }
0x4955   :  { %v7585_v39 = vrot.slane %v7584_v16, 2 }
0x4957   :  { %v7586_v34 = vadd.f32 %v7585_v39, %v7584_v16 }
0x4959   :  { %v7587_v23 = vrot.slane %v7586_v34, 1 }
0x495b   :  { %v7588_v60 = vadd.f32 %v7587_v23, %v7586_v34 }
0x495d   :  { %v7589_v13 = vmax.f32 %v7588_v60, 0.0 }
0x495f   :  { %v7594_v5 = vpack.c.bf16 %v7589_v13, %v7589_v13 }
0x4961   :  { %8721 = vmatmul.mubr.msk.bf16.vlgmr.msra.gmra.mxu1 %vm2067_vm0, %v7594_v5 }
0x4a21   :  { %v7635_v37 = vpop.f32.mrf.mxu1 }
0x4a22   :  { %v7636_v32 = vadd.f32 %v7635_v37, %v7597_v24 }
0x4a23   :  { %v8722_v49 = vpop.f32.mrf.mxu1 }
0x4a24   :  { %7641 = vst [vmem:[#allocation29 + $0x1] sm:$0x1] %v7636_v32 }
0x4a25   :  { %v7638_v63 = vpop.f32.mrf.mxu1 }
0x4a26   :  { %9346 = shalt.err (!%p9343_p0)
}
0x4a27   :  { %7651 = dma.vmem_to_hbm [thread:$0]  %s7649_s5, 32, %s9620_s21, [#allocation5]   ;;  %v8723_v26 = vpop.f32.mrf.mxu1 }
0x4a28   :  { %9373 = dma.done.wait [#allocation5], 32  }
0x4a29   :  { %9374 = vsyncadd [#allocation5], 4294967264 }
0x4a2a   :  { %7655 = vsyncpa [#allocation4], 1 }
0x4a2b   :  { %7656 = vsyncpa [#allocation7], 1 }
0x4a2c   :  { %7657 = vsyncpa [#allocation10], 1 }
0x4a2d   :  { %7658 = vsyncpa [#allocation13], 1 }
0x4a2e   :  { %7659 = vsyncpa [#allocation16], 1 }
0x4a2f   :  { %7660 = vsyncpa [#allocation19], 1 }
0x4a30   :  { %7661 = vsyncpa [#allocation22], 1 }
0x4a31   :  { %7662 = vsyncpa [#allocation25], 1 }
0x4a32   :  { %7663 = vsyncpa [#allocation28], 1 }
0x4a33   :  { %7664 = vsyncpa [#allocation5], 1 }

</bundles_post_ra>
